<compile_context>
chip_gen: v5e
topology: v5e:2x2
jax: 0.10.0
libtpu: 0.0.40
codegen_flags: <defaults>
</compile_context>

<pallas_src>
import functools

import jax
import jax.numpy as jnp
from jax.experimental import pallas as pl
from jax.experimental.pallas import tpu as pltpu

LEAKY_SLOPE = 0.15


# -----------------------------------------------------------------------------
# Fused ResBlock kernel
# -----------------------------------------------------------------------------
def _resblock_kernel(x_ref, w_ref, b_ref, o_ref, patch_ref, *,
                     dilations, kernel_size, slope):
    """x_ref/o_ref: (bb, L, C) f32 blocks.  w_ref: (NL, K*C, C) bf16 (VMEM-resident).
    b_ref: (NL, 1, C) f32.  patch_ref: (bb*L, K*C) bf16 scratch (im2col patches)."""
    bb, L, C = x_ref.shape
    R = bb * L
    half = kernel_size // 2

    x0 = x_ref[...].reshape(R, C)                       # rows = sample-major positions
    # position of each row inside its own sample (for zero-padding / cross-sample masking)
    pos0 = jax.lax.broadcasted_iota(jnp.int32, (R, C), 0) % L

    h = x0
    for j, d in enumerate(dilations):                   # static, fully unrolled layer loop
        a = jnp.where(h >= 0, h, slope * h)             # LeakyReLU(0.15), f32

        # Live taps: |(k-half)*d| < L.  Taps outside always read the zero padding, so they
        # are dropped statically together with the matching weight rows.  Live taps are a
        # contiguous range around k=half, so the weight rows form one contiguous slice.
        live = [k for k in range(kernel_size) if abs((k - half) * d) < L]
        k_lo, n_live = live[0], len(live)

        for k in live:
            off = (k - half) * d
            if off == 0:
                col = a
            else:
                if off > 0:
                    shifted = jnp.concatenate(
                        [a[off:, :], jnp.zeros((off, C), jnp.float32)], axis=0)
                else:
                    shifted = jnp.concatenate(
                        [jnp.zeros((-off, C), jnp.float32), a[:off, :]], axis=0)
                p = pos0 + off
                valid = jnp.logical_and(p >= 0, p < L)   # stay inside own sample ('same' pad)
                col = jnp.where(valid, shifted, 0.0)
            c0 = (k - k_lo) * C                          # lane-aligned (multiple of C=128)
            patch_ref[:, c0:c0 + C] = col.astype(jnp.bfloat16)

        # One im2col matmul per layer: (R, n_live*C) @ (n_live*C, C), bf16 inputs, f32 acc.
        w_live = w_ref[j, k_lo * C:(k_lo + n_live) * C, :]
        h = jnp.dot(patch_ref[:, :n_live * C], w_live,
                    preferred_element_type=jnp.float32) + b_ref[j]

        # TODO(synk): Dropout(0.2) is identity here (eval mode).

    o_ref[...] = (x0 + h).reshape(bb, L, C)              # residual add, single full store


# -----------------------------------------------------------------------------
# Block-size / VMEM heuristics
# -----------------------------------------------------------------------------
def _choose_block_batch(B, L, C, kernel_size, n_layers,
                        vmem_budget_bytes=24 << 20, target_rows=512):
    """Pick block_batch so R = block_batch*L fills the MXU (~256-1024 rows) while the
    f32 in/out blocks (double-buffered), bf16 patch scratch, per-layer temporaries and the
    bf16 weight stack stay inside a conservative VMEM budget (fits v7x's 64 MiB too)."""
    per_row = 2 * (C * 4) * 2 + kernel_size * C * 2 + 6 * C * 4
    weight_bytes = n_layers * (kernel_size * C * C * 2 + C * 4)
    rows_cap = max(L, (vmem_budget_bytes - weight_bytes) // per_row)
    rows = min(max(target_rows, L), rows_cap)
    bb = max(1, min(B, rows // L))
    while B % bb:                                        # largest divisor of B <= bb
        bb -= 1
    return bb


def _vmem_bytes_estimate(bb, L, C, kernel_size, n_layers):
    R = bb * L
    io = 2 * (bb * L * C * 4) * 2                        # in + out blocks, double-buffered
    patches = R * kernel_size * C * 2                    # bf16 patch scratch
    weights = n_layers * (kernel_size * C * C * 2 + C * 4)
    temps = 6 * R * C * 4                                # live f32 temporaries per layer
    return io + patches + weights + temps


# -----------------------------------------------------------------------------
# Wrappers
# -----------------------------------------------------------------------------
def resblock_forward_nlc(x_nlc, w_stack, b_stack, *, dilations, kernel_size=7,
                         slope=LEAKY_SLOPE, block_batch=None):
    """Channel-last ResBlock forward.  x_nlc: (B, L, C) f32.  Returns (B, L, C) f32.

    Use this entry point for a *stack* of ResBlocks so the NCW<->NLC transposes are paid
    only once at the ends of the stack."""
    assert kernel_size % 2 == 1
    B, L, C = x_nlc.shape
    NL, KC, C2 = w_stack.shape
    assert C2 == C and KC == kernel_size * C and NL == len(dilations)

    if block_batch is None:
        block_batch = _choose_block_batch(B, L, C, kernel_size, NL)
    assert B % block_batch == 0
    grid = (B // block_batch,)

    vmem_limit = min(48 << 20,
                     max(32 << 20, 2 * _vmem_bytes_estimate(block_batch, L, C,
                                                            kernel_size, NL)))

    kern = functools.partial(_resblock_kernel, dilations=tuple(dilations),
                             kernel_size=kernel_size, slope=slope)

    return pl.pallas_call(
        kern,
        grid=grid,
        in_specs=[
            pl.BlockSpec((block_batch, L, C), lambda i: (i, 0, 0)),
            # Weights / bias: whole array resident in VMEM once (no double-buffering).
            pl.BlockSpec(memory_space=pltpu.MemorySpace.VMEM),
            pl.BlockSpec(memory_space=pltpu.MemorySpace.VMEM),
        ],
        out_specs=pl.BlockSpec((block_batch, L, C), lambda i: (i, 0, 0)),
        out_shape=jax.ShapeDtypeStruct((B, L, C), jnp.float32),
        scratch_shapes=[pltpu.VMEM((block_batch * L, kernel_size * C), jnp.bfloat16)],
        compiler_params=pltpu.CompilerParams(
            dimension_semantics=("parallel",),
            vmem_limit_bytes=int(vmem_limit)),
    )(x_nlc, w_stack, b_stack)


def resblock_forward(x_ncw, w_stack, b_stack, *, dilations, kernel_size=7,
                     slope=LEAKY_SLOPE, block_batch=None):
    """PyTorch-layout wrapper: x_ncw (B, C, L) -> (B, C, L)."""
    x = jnp.transpose(x_ncw, (0, 2, 1))                  # (B, L, C) channel-last
    y = resblock_forward_nlc(x, w_stack, b_stack, dilations=dilations,
                             kernel_size=kernel_size, slope=slope,
                             block_batch=block_batch)
    return jnp.transpose(y, (0, 2, 1))


# -----------------------------------------------------------------------------
# Pure-JAX reference (mirrors the PyTorch module) + parameter helpers
# -----------------------------------------------------------------------------
def resblock_reference(x_ncw, torch_params, dilations, *, kernel_size=7, slope=LEAKY_SLOPE):
    h = x_ncw
    for (wt, bt), d in zip(torch_params, dilations):
        pad = (d * (kernel_size - 1)) // 2               # padding_same(k, d)
        h = jnp.where(h >= 0, h, slope * h)
        h = jax.lax.conv_general_dilated(
            h, wt, window_strides=(1,), padding=[(pad, pad)],
            rhs_dilation=(d,), dimension_numbers=("NCH", "OIH", "NCH"),
            precision=jax.lax.Precision.HIGHEST)
        h = h + bt[None, :, None]
    return x_ncw + h


def init_torch_params(key, C, kernel_size, dilations):
    """Deterministic torch-layout params: list of (weight (Cout,Cin,K), bias (Cout,))."""
    bound = 1.0 / float(C * kernel_size) ** 0.5
    params = []
    for i in range(len(dilations)):
        k1, k2 = jax.random.split(jax.random.fold_in(key, i))
        wt = jax.random.uniform(k1, (C, C, kernel_size), jnp.float32, -bound, bound)
        bt = jax.random.uniform(k2, (C,), jnp.float32, -bound, bound)
        params.append((wt, bt))
    return params


def pack_params(torch_params, kernel_size):
    """torch (Cout,Cin,K) -> (NL, K*Cin, Cout) bf16 (MXU operand); bias (NL,1,C) f32."""
    C = torch_params[0][0].shape[0]
    w_stack = jnp.stack([jnp.transpose(wt, (2, 1, 0)).reshape(kernel_size * C, C)
                         for wt, _ in torch_params]).astype(jnp.bfloat16)
    b_stack = jnp.stack([bt.reshape(1, C) for _, bt in torch_params]).astype(jnp.float32)
    return w_stack, b_stack


# -----------------------------------------------------------------------------
if __name__ == "__main__":
    C = 128                       # num_windows_features (module default, lane-dense)
    K = 7                         # kernel_size
    dilations = (2, 4, 8, 16, 32)
    B, L = 2, 64                  # batch, sequence length (number of windows)

    key = jax.random.PRNGKey(0)
    kx, kp = jax.random.split(key)
    x = jax.random.normal(kx, (B, C, L), jnp.float32)    # PyTorch NCW layout

    torch_params = init_torch_params(kp, C, K, dilations)
    w_stack, b_stack = pack_params(torch_params, K)

    out = resblock_forward(x, w_stack, b_stack, dilations=dilations,
                           kernel_size=K, slope=LEAKY_SLOPE)
    out = jax.block_until_ready(out)

    assert out.shape == (B, C, L)
    assert bool(jnp.all(jnp.isfinite(out)))

    ref = resblock_reference(x, torch_params, dilations, kernel_size=K, slope=LEAKY_SLOPE)
    max_err = float(jnp.max(jnp.abs(out - ref)))
    assert max_err < 5e-2, f"mismatch vs reference: max_err={max_err}"

    print("KERNEL_OK")
</pallas_src>

<mosaic_0001>
module attributes {stable_mosaic.version = 11 : i64} {
  func.func @_resblock_kernel(%arg0: i32, %arg1: memref<2x64x128xf32, #tpu.memory_space<vmem>>, %arg2: memref<5x896x128xbf16, #tpu.memory_space<vmem>>, %arg3: memref<5x1x128xf32, #tpu.memory_space<vmem>>, %arg4: memref<2x64x128xf32, #tpu.memory_space<vmem>>, %arg5: memref<128x896xbf16, #tpu.memory_space<vmem>>) attributes {dimension_semantics = [#tpu.dimension_semantics<parallel>], iteration_bounds = array<i64: 1>, scalar_prefetch = 0 : i64, scratch_operands = 1 : i64, tpu.core_type = #tpu.core_type<tc>, window_params = [{transform_indices = @transform_0, window_bounds = array<i64: 2, 64, 128>}, {pipeline_mode = #tpu.pipeline_mode<synchronous>, transform_indices = @transform_1, window_bounds = array<i64: 5, 896, 128>}, {pipeline_mode = #tpu.pipeline_mode<synchronous>, transform_indices = @transform_2, window_bounds = array<i64: 5, 1, 128>}, {transform_indices = @transform_3, window_bounds = array<i64: 2, 64, 128>}]} {
    %c0 = arith.constant 0 : index
    %c0_0 = arith.constant 0 : index
    %c0_1 = arith.constant 0 : index
    %0 = vector.load %arg1[%c0, %c0_0, %c0_1] : memref<2x64x128xf32, #tpu.memory_space<vmem>>, vector<2x64x128xf32>
    %1 = vector.shape_cast %0 : vector<2x64x128xf32> to vector<128x128xf32>
    %2 = tpu.iota {dimensions = array<i32: 0>} : vector<128x128xi32>
    %c64_i32 = arith.constant 64 : i32
    %c0_i32 = arith.constant 0 : i32
    %3 = arith.cmpi eq, %c64_i32, %c0_i32 : i32
    %c1_i32 = arith.constant 1 : i32
    %4 = arith.select %3, %c1_i32, %c64_i32 : i32
    %5 = vector.broadcast %4 : i32 to vector<128x128xi32>
    %6 = arith.remsi %2, %5 : vector<128x128xi32>
    %c0_i32_2 = arith.constant 0 : i32
    %7 = vector.broadcast %c0_i32_2 : i32 to vector<128x128xi32>
    %8 = arith.cmpi ne, %6, %7 : vector<128x128xi32>
    %c0_i32_3 = arith.constant 0 : i32
    %9 = vector.broadcast %c0_i32_3 : i32 to vector<128x128xi32>
    %10 = arith.cmpi slt, %6, %9 : vector<128x128xi32>
    %c0_i32_4 = arith.constant 0 : i32
    %11 = arith.cmpi slt, %4, %c0_i32_4 : i32
    %12 = vector.broadcast %11 : i1 to vector<128x128xi1>
    %13 = vector.broadcast %12 : vector<128x128xi1> to vector<128x128xi1>
    %14 = arith.xori %10, %13 : vector<128x128xi1>
    %15 = arith.andi %14, %8 : vector<128x128xi1>
    %16 = vector.broadcast %4 : i32 to vector<128x128xi32>
    %17 = arith.addi %6, %16 : vector<128x128xi32>
    %18 = arith.select %15, %17, %6 : vector<128x128xi1>, vector<128x128xi32>
    %cst = arith.constant 0.000000e+00 : f32
    %19 = vector.broadcast %cst : f32 to vector<128x128xf32>
    %20 = arith.cmpf oge, %1, %19 : vector<128x128xf32>
    %cst_5 = arith.constant 1.500000e-01 : f32
    %21 = vector.broadcast %cst_5 : f32 to vector<128x128xf32>
    %22 = arith.mulf %21, %1 : vector<128x128xf32>
    %23 = arith.select %20, %1, %22 : vector<128x128xi1>, vector<128x128xf32>
    %cst_6 = arith.constant 0.000000e+00 : f32
    %24 = vector.broadcast %cst_6 : f32 to vector<6x128xf32>
    %25 = vector.extract_strided_slice %23 {offsets = [0, 0], sizes = [122, 128], strides = [1, 1]} : vector<128x128xf32> to vector<122x128xf32>
    %26 = tpu.concatenate %24, %25 in 0 : vector<6x128xf32>, vector<122x128xf32> -> vector<128x128xf32>
    %c-6_i32 = arith.constant -6 : i32
    %27 = vector.broadcast %c-6_i32 : i32 to vector<128x128xi32>
    %28 = arith.addi %18, %27 : vector<128x128xi32>
    %c0_i32_7 = arith.constant 0 : i32
    %29 = vector.broadcast %c0_i32_7 : i32 to vector<128x128xi32>
    %30 = arith.cmpi sge, %28, %29 : vector<128x128xi32>
    %c64_i32_8 = arith.constant 64 : i32
    %31 = vector.broadcast %c64_i32_8 : i32 to vector<128x128xi32>
    %32 = arith.cmpi slt, %28, %31 : vector<128x128xi32>
    %33 = arith.andi %30, %32 : vector<128x128xi1>
    %cst_9 = arith.constant 0.000000e+00 : f32
    %34 = vector.broadcast %cst_9 : f32 to vector<128x128xf32>
    %35 = arith.select %33, %26, %34 : vector<128x128xi1>, vector<128x128xf32>
    %36 = arith.truncf %35 : vector<128x128xf32> to vector<128x128xbf16>
    %c0_10 = arith.constant 0 : index
    %c0_11 = arith.constant 0 : index
    %37 = vector.load %arg5[%c0_10, %c0_11] : memref<128x896xbf16, #tpu.memory_space<vmem>>, vector<128x128xbf16>
    tpu.vector_store %arg5[%c0_10, %c0_11], %36 {strides = array<i32>} : memref<128x896xbf16, #tpu.memory_space<vmem>>, vector<128x128xbf16>,
    %cst_12 = arith.constant 0.000000e+00 : f32
    %38 = vector.broadcast %cst_12 : f32 to vector<4x128xf32>
    %39 = vector.extract_strided_slice %23 {offsets = [0, 0], sizes = [124, 128], strides = [1, 1]} : vector<128x128xf32> to vector<124x128xf32>
    %40 = tpu.concatenate %38, %39 in 0 : vector<4x128xf32>, vector<124x128xf32> -> vector<128x128xf32>
    %c-4_i32 = arith.constant -4 : i32
    %41 = vector.broadcast %c-4_i32 : i32 to vector<128x128xi32>
    %42 = arith.addi %18, %41 : vector<128x128xi32>
    %c0_i32_13 = arith.constant 0 : i32
    %43 = vector.broadcast %c0_i32_13 : i32 to vector<128x128xi32>
    %44 = arith.cmpi sge, %42, %43 : vector<128x128xi32>
    %c64_i32_14 = arith.constant 64 : i32
    %45 = vector.broadcast %c64_i32_14 : i32 to vector<128x128xi32>
    %46 = arith.cmpi slt, %42, %45 : vector<128x128xi32>
    %47 = arith.andi %44, %46 : vector<128x128xi1>
    %cst_15 = arith.constant 0.000000e+00 : f32
    %48 = vector.broadcast %cst_15 : f32 to vector<128x128xf32>
    %49 = arith.select %47, %40, %48 : vector<128x128xi1>, vector<128x128xf32>
    %50 = arith.truncf %49 : vector<128x128xf32> to vector<128x128xbf16>
    %c0_16 = arith.constant 0 : index
    %c128 = arith.constant 128 : index
    %51 = vector.load %arg5[%c0_16, %c128] : memref<128x896xbf16, #tpu.memory_space<vmem>>, vector<128x128xbf16>
    tpu.vector_store %arg5[%c0_16, %c128], %50 {strides = array<i32>} : memref<128x896xbf16, #tpu.memory_space<vmem>>, vector<128x128xbf16>,
    %cst_17 = arith.constant 0.000000e+00 : f32
    %52 = vector.broadcast %cst_17 : f32 to vector<2x128xf32>
    %53 = vector.extract_strided_slice %23 {offsets = [0, 0], sizes = [126, 128], strides = [1, 1]} : vector<128x128xf32> to vector<126x128xf32>
    %54 = tpu.concatenate %52, %53 in 0 : vector<2x128xf32>, vector<126x128xf32> -> vector<128x128xf32>
    %c-2_i32 = arith.constant -2 : i32
    %55 = vector.broadcast %c-2_i32 : i32 to vector<128x128xi32>
    %56 = arith.addi %18, %55 : vector<128x128xi32>
    %c0_i32_18 = arith.constant 0 : i32
    %57 = vector.broadcast %c0_i32_18 : i32 to vector<128x128xi32>
    %58 = arith.cmpi sge, %56, %57 : vector<128x128xi32>
    %c64_i32_19 = arith.constant 64 : i32
    %59 = vector.broadcast %c64_i32_19 : i32 to vector<128x128xi32>
    %60 = arith.cmpi slt, %56, %59 : vector<128x128xi32>
    %61 = arith.andi %58, %60 : vector<128x128xi1>
    %cst_20 = arith.constant 0.000000e+00 : f32
    %62 = vector.broadcast %cst_20 : f32 to vector<128x128xf32>
    %63 = arith.select %61, %54, %62 : vector<128x128xi1>, vector<128x128xf32>
    %64 = arith.truncf %63 : vector<128x128xf32> to vector<128x128xbf16>
    %c0_21 = arith.constant 0 : index
    %c256 = arith.constant 256 : index
    %65 = vector.load %arg5[%c0_21, %c256] : memref<128x896xbf16, #tpu.memory_space<vmem>>, vector<128x128xbf16>
    tpu.vector_store %arg5[%c0_21, %c256], %64 {strides = array<i32>} : memref<128x896xbf16, #tpu.memory_space<vmem>>, vector<128x128xbf16>,
    %66 = arith.truncf %23 : vector<128x128xf32> to vector<128x128xbf16>
    %c0_22 = arith.constant 0 : index
    %c384 = arith.constant 384 : index
    %67 = vector.load %arg5[%c0_22, %c384] : memref<128x896xbf16, #tpu.memory_space<vmem>>, vector<128x128xbf16>
    tpu.vector_store %arg5[%c0_22, %c384], %66 {strides = array<i32>} : memref<128x896xbf16, #tpu.memory_space<vmem>>, vector<128x128xbf16>,
    %68 = vector.extract_strided_slice %23 {offsets = [2, 0], sizes = [126, 128], strides = [1, 1]} : vector<128x128xf32> to vector<126x128xf32>
    %cst_23 = arith.constant 0.000000e+00 : f32
    %69 = vector.broadcast %cst_23 : f32 to vector<2x128xf32>
    %70 = tpu.concatenate %68, %69 in 0 : vector<126x128xf32>, vector<2x128xf32> -> vector<128x128xf32>
    %c2_i32 = arith.constant 2 : i32
    %71 = vector.broadcast %c2_i32 : i32 to vector<128x128xi32>
    %72 = arith.addi %18, %71 : vector<128x128xi32>
    %c0_i32_24 = arith.constant 0 : i32
    %73 = vector.broadcast %c0_i32_24 : i32 to vector<128x128xi32>
    %74 = arith.cmpi sge, %72, %73 : vector<128x128xi32>
    %c64_i32_25 = arith.constant 64 : i32
    %75 = vector.broadcast %c64_i32_25 : i32 to vector<128x128xi32>
    %76 = arith.cmpi slt, %72, %75 : vector<128x128xi32>
    %77 = arith.andi %74, %76 : vector<128x128xi1>
    %cst_26 = arith.constant 0.000000e+00 : f32
    %78 = vector.broadcast %cst_26 : f32 to vector<128x128xf32>
    %79 = arith.select %77, %70, %78 : vector<128x128xi1>, vector<128x128xf32>
    %80 = arith.truncf %79 : vector<128x128xf32> to vector<128x128xbf16>
    %c0_27 = arith.constant 0 : index
    %c512 = arith.constant 512 : index
    %81 = vector.load %arg5[%c0_27, %c512] : memref<128x896xbf16, #tpu.memory_space<vmem>>, vector<128x128xbf16>
    tpu.vector_store %arg5[%c0_27, %c512], %80 {strides = array<i32>} : memref<128x896xbf16, #tpu.memory_space<vmem>>, vector<128x128xbf16>,
    %82 = vector.extract_strided_slice %23 {offsets = [4, 0], sizes = [124, 128], strides = [1, 1]} : vector<128x128xf32> to vector<124x128xf32>
    %cst_28 = arith.constant 0.000000e+00 : f32
    %83 = vector.broadcast %cst_28 : f32 to vector<4x128xf32>
    %84 = tpu.concatenate %82, %83 in 0 : vector<124x128xf32>, vector<4x128xf32> -> vector<128x128xf32>
    %c4_i32 = arith.constant 4 : i32
    %85 = vector.broadcast %c4_i32 : i32 to vector<128x128xi32>
    %86 = arith.addi %18, %85 : vector<128x128xi32>
    %c0_i32_29 = arith.constant 0 : i32
    %87 = vector.broadcast %c0_i32_29 : i32 to vector<128x128xi32>
    %88 = arith.cmpi sge, %86, %87 : vector<128x128xi32>
    %c64_i32_30 = arith.constant 64 : i32
    %89 = vector.broadcast %c64_i32_30 : i32 to vector<128x128xi32>
    %90 = arith.cmpi slt, %86, %89 : vector<128x128xi32>
    %91 = arith.andi %88, %90 : vector<128x128xi1>
    %cst_31 = arith.constant 0.000000e+00 : f32
    %92 = vector.broadcast %cst_31 : f32 to vector<128x128xf32>
    %93 = arith.select %91, %84, %92 : vector<128x128xi1>, vector<128x128xf32>
    %94 = arith.truncf %93 : vector<128x128xf32> to vector<128x128xbf16>
    %c0_32 = arith.constant 0 : index
    %c640 = arith.constant 640 : index
    %95 = vector.load %arg5[%c0_32, %c640] : memref<128x896xbf16, #tpu.memory_space<vmem>>, vector<128x128xbf16>
    tpu.vector_store %arg5[%c0_32, %c640], %94 {strides = array<i32>} : memref<128x896xbf16, #tpu.memory_space<vmem>>, vector<128x128xbf16>,
    %96 = vector.extract_strided_slice %23 {offsets = [6, 0], sizes = [122, 128], strides = [1, 1]} : vector<128x128xf32> to vector<122x128xf32>
    %cst_33 = arith.constant 0.000000e+00 : f32
    %97 = vector.broadcast %cst_33 : f32 to vector<6x128xf32>
    %98 = tpu.concatenate %96, %97 in 0 : vector<122x128xf32>, vector<6x128xf32> -> vector<128x128xf32>
    %c6_i32 = arith.constant 6 : i32
    %99 = vector.broadcast %c6_i32 : i32 to vector<128x128xi32>
    %100 = arith.addi %18, %99 : vector<128x128xi32>
    %c0_i32_34 = arith.constant 0 : i32
    %101 = vector.broadcast %c0_i32_34 : i32 to vector<128x128xi32>
    %102 = arith.cmpi sge, %100, %101 : vector<128x128xi32>
    %c64_i32_35 = arith.constant 64 : i32
    %103 = vector.broadcast %c64_i32_35 : i32 to vector<128x128xi32>
    %104 = arith.cmpi slt, %100, %103 : vector<128x128xi32>
    %105 = arith.andi %102, %104 : vector<128x128xi1>
    %cst_36 = arith.constant 0.000000e+00 : f32
    %106 = vector.broadcast %cst_36 : f32 to vector<128x128xf32>
    %107 = arith.select %105, %98, %106 : vector<128x128xi1>, vector<128x128xf32>
    %108 = arith.truncf %107 : vector<128x128xf32> to vector<128x128xbf16>
    %c0_37 = arith.constant 0 : index
    %c768 = arith.constant 768 : index
    %109 = vector.load %arg5[%c0_37, %c768] : memref<128x896xbf16, #tpu.memory_space<vmem>>, vector<128x128xbf16>
    tpu.vector_store %arg5[%c0_37, %c768], %108 {strides = array<i32>} : memref<128x896xbf16, #tpu.memory_space<vmem>>, vector<128x128xbf16>,
    %c0_38 = arith.constant 0 : index
    %c0_39 = arith.constant 0 : index
    %c0_40 = arith.constant 0 : index
    %110 = vector.load %arg2[%c0_38, %c0_39, %c0_40] : memref<5x896x128xbf16, #tpu.memory_space<vmem>>, vector<1x896x128xbf16>
    %111 = vector.shape_cast %110 : vector<1x896x128xbf16> to vector<896x128xbf16>
    %c0_41 = arith.constant 0 : index
    %c0_42 = arith.constant 0 : index
    %112 = vector.load %arg5[%c0_41, %c0_42] : memref<128x896xbf16, #tpu.memory_space<vmem>>, vector<128x896xbf16>
    %cst_43 = arith.constant dense<0.000000e+00> : vector<128x128xf32>
    %113 = tpu.matmul %112, %111, %cst_43 {dimension_numbers = #tpu.dot_dimension_numbers<[1], [0], [0], [1], [0, 0, 1, 1], [], []>} : vector<128x896xbf16>, vector<896x128xbf16>, vector<128x128xf32> -> vector<128x128xf32>
    %c0_44 = arith.constant 0 : index
    %c0_45 = arith.constant 0 : index
    %c0_46 = arith.constant 0 : index
    %114 = vector.load %arg3[%c0_44, %c0_45, %c0_46] : memref<5x1x128xf32, #tpu.memory_space<vmem>>, vector<1x1x128xf32>
    %115 = vector.shape_cast %114 : vector<1x1x128xf32> to vector<1x128xf32>
    %116 = vector.broadcast %115 : vector<1x128xf32> to vector<128x128xf32>
    %117 = arith.addf %113, %116 : vector<128x128xf32>
    %cst_47 = arith.constant 0.000000e+00 : f32
    %118 = vector.broadcast %cst_47 : f32 to vector<128x128xf32>
    %119 = arith.cmpf oge, %117, %118 : vector<128x128xf32>
    %cst_48 = arith.constant 1.500000e-01 : f32
    %120 = vector.broadcast %cst_48 : f32 to vector<128x128xf32>
    %121 = arith.mulf %120, %117 : vector<128x128xf32>
    %122 = arith.select %119, %117, %121 : vector<128x128xi1>, vector<128x128xf32>
    %cst_49 = arith.constant 0.000000e+00 : f32
    %123 = vector.broadcast %cst_49 : f32 to vector<12x128xf32>
    %124 = vector.extract_strided_slice %122 {offsets = [0, 0], sizes = [116, 128], strides = [1, 1]} : vector<128x128xf32> to vector<116x128xf32>
    %125 = tpu.concatenate %123, %124 in 0 : vector<12x128xf32>, vector<116x128xf32> -> vector<128x128xf32>
    %c-12_i32 = arith.constant -12 : i32
    %126 = vector.broadcast %c-12_i32 : i32 to vector<128x128xi32>
    %127 = arith.addi %18, %126 : vector<128x128xi32>
    %c0_i32_50 = arith.constant 0 : i32
    %128 = vector.broadcast %c0_i32_50 : i32 to vector<128x128xi32>
    %129 = arith.cmpi sge, %127, %128 : vector<128x128xi32>
    %c64_i32_51 = arith.constant 64 : i32
    %130 = vector.broadcast %c64_i32_51 : i32 to vector<128x128xi32>
    %131 = arith.cmpi slt, %127, %130 : vector<128x128xi32>
    %132 = arith.andi %129, %131 : vector<128x128xi1>
    %cst_52 = arith.constant 0.000000e+00 : f32
    %133 = vector.broadcast %cst_52 : f32 to vector<128x128xf32>
    %134 = arith.select %132, %125, %133 : vector<128x128xi1>, vector<128x128xf32>
    %135 = arith.truncf %134 : vector<128x128xf32> to vector<128x128xbf16>
    %c0_53 = arith.constant 0 : index
    %c0_54 = arith.constant 0 : index
    %136 = vector.load %arg5[%c0_53, %c0_54] : memref<128x896xbf16, #tpu.memory_space<vmem>>, vector<128x128xbf16>
    tpu.vector_store %arg5[%c0_53, %c0_54], %135 {strides = array<i32>} : memref<128x896xbf16, #tpu.memory_space<vmem>>, vector<128x128xbf16>,
    %cst_55 = arith.constant 0.000000e+00 : f32
    %137 = vector.broadcast %cst_55 : f32 to vector<8x128xf32>
    %138 = vector.extract_strided_slice %122 {offsets = [0, 0], sizes = [120, 128], strides = [1, 1]} : vector<128x128xf32> to vector<120x128xf32>
    %139 = tpu.concatenate %137, %138 in 0 : vector<8x128xf32>, vector<120x128xf32> -> vector<128x128xf32>
    %c-8_i32 = arith.constant -8 : i32
    %140 = vector.broadcast %c-8_i32 : i32 to vector<128x128xi32>
    %141 = arith.addi %18, %140 : vector<128x128xi32>
    %c0_i32_56 = arith.constant 0 : i32
    %142 = vector.broadcast %c0_i32_56 : i32 to vector<128x128xi32>
    %143 = arith.cmpi sge, %141, %142 : vector<128x128xi32>
    %c64_i32_57 = arith.constant 64 : i32
    %144 = vector.broadcast %c64_i32_57 : i32 to vector<128x128xi32>
    %145 = arith.cmpi slt, %141, %144 : vector<128x128xi32>
    %146 = arith.andi %143, %145 : vector<128x128xi1>
    %cst_58 = arith.constant 0.000000e+00 : f32
    %147 = vector.broadcast %cst_58 : f32 to vector<128x128xf32>
    %148 = arith.select %146, %139, %147 : vector<128x128xi1>, vector<128x128xf32>
    %149 = arith.truncf %148 : vector<128x128xf32> to vector<128x128xbf16>
    %c0_59 = arith.constant 0 : index
    %c128_60 = arith.constant 128 : index
    %150 = vector.load %arg5[%c0_59, %c128_60] : memref<128x896xbf16, #tpu.memory_space<vmem>>, vector<128x128xbf16>
    tpu.vector_store %arg5[%c0_59, %c128_60], %149 {strides = array<i32>} : memref<128x896xbf16, #tpu.memory_space<vmem>>, vector<128x128xbf16>,
    %cst_61 = arith.constant 0.000000e+00 : f32
    %151 = vector.broadcast %cst_61 : f32 to vector<4x128xf32>
    %152 = vector.extract_strided_slice %122 {offsets = [0, 0], sizes = [124, 128], strides = [1, 1]} : vector<128x128xf32> to vector<124x128xf32>
    %153 = tpu.concatenate %151, %152 in 0 : vector<4x128xf32>, vector<124x128xf32> -> vector<128x128xf32>
    %c-4_i32_62 = arith.constant -4 : i32
    %154 = vector.broadcast %c-4_i32_62 : i32 to vector<128x128xi32>
    %155 = arith.addi %18, %154 : vector<128x128xi32>
    %c0_i32_63 = arith.constant 0 : i32
    %156 = vector.broadcast %c0_i32_63 : i32 to vector<128x128xi32>
    %157 = arith.cmpi sge, %155, %156 : vector<128x128xi32>
    %c64_i32_64 = arith.constant 64 : i32
    %158 = vector.broadcast %c64_i32_64 : i32 to vector<128x128xi32>
    %159 = arith.cmpi slt, %155, %158 : vector<128x128xi32>
    %160 = arith.andi %157, %159 : vector<128x128xi1>
    %cst_65 = arith.constant 0.000000e+00 : f32
    %161 = vector.broadcast %cst_65 : f32 to vector<128x128xf32>
    %162 = arith.select %160, %153, %161 : vector<128x128xi1>, vector<128x128xf32>
    %163 = arith.truncf %162 : vector<128x128xf32> to vector<128x128xbf16>
    %c0_66 = arith.constant 0 : index
    %c256_67 = arith.constant 256 : index
    %164 = vector.load %arg5[%c0_66, %c256_67] : memref<128x896xbf16, #tpu.memory_space<vmem>>, vector<128x128xbf16>
    tpu.vector_store %arg5[%c0_66, %c256_67], %163 {strides = array<i32>} : memref<128x896xbf16, #tpu.memory_space<vmem>>, vector<128x128xbf16>,
    %165 = arith.truncf %122 : vector<128x128xf32> to vector<128x128xbf16>
    %c0_68 = arith.constant 0 : index
    %c384_69 = arith.constant 384 : index
    %166 = vector.load %arg5[%c0_68, %c384_69] : memref<128x896xbf16, #tpu.memory_space<vmem>>, vector<128x128xbf16>
    tpu.vector_store %arg5[%c0_68, %c384_69], %165 {strides = array<i32>} : memref<128x896xbf16, #tpu.memory_space<vmem>>, vector<128x128xbf16>,
    %167 = vector.extract_strided_slice %122 {offsets = [4, 0], sizes = [124, 128], strides = [1, 1]} : vector<128x128xf32> to vector<124x128xf32>
    %cst_70 = arith.constant 0.000000e+00 : f32
    %168 = vector.broadcast %cst_70 : f32 to vector<4x128xf32>
    %169 = tpu.concatenate %167, %168 in 0 : vector<124x128xf32>, vector<4x128xf32> -> vector<128x128xf32>
    %c4_i32_71 = arith.constant 4 : i32
    %170 = vector.broadcast %c4_i32_71 : i32 to vector<128x128xi32>
    %171 = arith.addi %18, %170 : vector<128x128xi32>
    %c0_i32_72 = arith.constant 0 : i32
    %172 = vector.broadcast %c0_i32_72 : i32 to vector<128x128xi32>
    %173 = arith.cmpi sge, %171, %172 : vector<128x128xi32>
    %c64_i32_73 = arith.constant 64 : i32
    %174 = vector.broadcast %c64_i32_73 : i32 to vector<128x128xi32>
    %175 = arith.cmpi slt, %171, %174 : vector<128x128xi32>
    %176 = arith.andi %173, %175 : vector<128x128xi1>
    %cst_74 = arith.constant 0.000000e+00 : f32
    %177 = vector.broadcast %cst_74 : f32 to vector<128x128xf32>
    %178 = arith.select %176, %169, %177 : vector<128x128xi1>, vector<128x128xf32>
    %179 = arith.truncf %178 : vector<128x128xf32> to vector<128x128xbf16>
    %c0_75 = arith.constant 0 : index
    %c512_76 = arith.constant 512 : index
    %180 = vector.load %arg5[%c0_75, %c512_76] : memref<128x896xbf16, #tpu.memory_space<vmem>>, vector<128x128xbf16>
    tpu.vector_store %arg5[%c0_75, %c512_76], %179 {strides = array<i32>} : memref<128x896xbf16, #tpu.memory_space<vmem>>, vector<128x128xbf16>,
    %181 = vector.extract_strided_slice %122 {offsets = [8, 0], sizes = [120, 128], strides = [1, 1]} : vector<128x128xf32> to vector<120x128xf32>
    %cst_77 = arith.constant 0.000000e+00 : f32
    %182 = vector.broadcast %cst_77 : f32 to vector<8x128xf32>
    %183 = tpu.concatenate %181, %182 in 0 : vector<120x128xf32>, vector<8x128xf32> -> vector<128x128xf32>
    %c8_i32 = arith.constant 8 : i32
    %184 = vector.broadcast %c8_i32 : i32 to vector<128x128xi32>
    %185 = arith.addi %18, %184 : vector<128x128xi32>
    %c0_i32_78 = arith.constant 0 : i32
    %186 = vector.broadcast %c0_i32_78 : i32 to vector<128x128xi32>
    %187 = arith.cmpi sge, %185, %186 : vector<128x128xi32>
    %c64_i32_79 = arith.constant 64 : i32
    %188 = vector.broadcast %c64_i32_79 : i32 to vector<128x128xi32>
    %189 = arith.cmpi slt, %185, %188 : vector<128x128xi32>
    %190 = arith.andi %187, %189 : vector<128x128xi1>
    %cst_80 = arith.constant 0.000000e+00 : f32
    %191 = vector.broadcast %cst_80 : f32 to vector<128x128xf32>
    %192 = arith.select %190, %183, %191 : vector<128x128xi1>, vector<128x128xf32>
    %193 = arith.truncf %192 : vector<128x128xf32> to vector<128x128xbf16>
    %c0_81 = arith.constant 0 : index
    %c640_82 = arith.constant 640 : index
    %194 = vector.load %arg5[%c0_81, %c640_82] : memref<128x896xbf16, #tpu.memory_space<vmem>>, vector<128x128xbf16>
    tpu.vector_store %arg5[%c0_81, %c640_82], %193 {strides = array<i32>} : memref<128x896xbf16, #tpu.memory_space<vmem>>, vector<128x128xbf16>,
    %195 = vector.extract_strided_slice %122 {offsets = [12, 0], sizes = [116, 128], strides = [1, 1]} : vector<128x128xf32> to vector<116x128xf32>
    %cst_83 = arith.constant 0.000000e+00 : f32
    %196 = vector.broadcast %cst_83 : f32 to vector<12x128xf32>
    %197 = tpu.concatenate %195, %196 in 0 : vector<116x128xf32>, vector<12x128xf32> -> vector<128x128xf32>
    %c12_i32 = arith.constant 12 : i32
    %198 = vector.broadcast %c12_i32 : i32 to vector<128x128xi32>
    %199 = arith.addi %18, %198 : vector<128x128xi32>
    %c0_i32_84 = arith.constant 0 : i32
    %200 = vector.broadcast %c0_i32_84 : i32 to vector<128x128xi32>
    %201 = arith.cmpi sge, %199, %200 : vector<128x128xi32>
    %c64_i32_85 = arith.constant 64 : i32
    %202 = vector.broadcast %c64_i32_85 : i32 to vector<128x128xi32>
    %203 = arith.cmpi slt, %199, %202 : vector<128x128xi32>
    %204 = arith.andi %201, %203 : vector<128x128xi1>
    %cst_86 = arith.constant 0.000000e+00 : f32
    %205 = vector.broadcast %cst_86 : f32 to vector<128x128xf32>
    %206 = arith.select %204, %197, %205 : vector<128x128xi1>, vector<128x128xf32>
    %207 = arith.truncf %206 : vector<128x128xf32> to vector<128x128xbf16>
    %c0_87 = arith.constant 0 : index
    %c768_88 = arith.constant 768 : index
    %208 = vector.load %arg5[%c0_87, %c768_88] : memref<128x896xbf16, #tpu.memory_space<vmem>>, vector<128x128xbf16>
    tpu.vector_store %arg5[%c0_87, %c768_88], %207 {strides = array<i32>} : memref<128x896xbf16, #tpu.memory_space<vmem>>, vector<128x128xbf16>,
    %c1 = arith.constant 1 : index
    %c0_89 = arith.constant 0 : index
    %c0_90 = arith.constant 0 : index
    %209 = vector.load %arg2[%c1, %c0_89, %c0_90] : memref<5x896x128xbf16, #tpu.memory_space<vmem>>, vector<1x896x128xbf16>
    %210 = vector.shape_cast %209 : vector<1x896x128xbf16> to vector<896x128xbf16>
    %c0_91 = arith.constant 0 : index
    %c0_92 = arith.constant 0 : index
    %211 = vector.load %arg5[%c0_91, %c0_92] : memref<128x896xbf16, #tpu.memory_space<vmem>>, vector<128x896xbf16>
    %cst_93 = arith.constant dense<0.000000e+00> : vector<128x128xf32>
    %212 = tpu.matmul %211, %210, %cst_93 {dimension_numbers = #tpu.dot_dimension_numbers<[1], [0], [0], [1], [0, 0, 1, 1], [], []>} : vector<128x896xbf16>, vector<896x128xbf16>, vector<128x128xf32> -> vector<128x128xf32>
    %c1_94 = arith.constant 1 : index
    %c0_95 = arith.constant 0 : index
    %c0_96 = arith.constant 0 : index
    %213 = vector.load %arg3[%c1_94, %c0_95, %c0_96] : memref<5x1x128xf32, #tpu.memory_space<vmem>>, vector<1x1x128xf32>
    %214 = vector.shape_cast %213 : vector<1x1x128xf32> to vector<1x128xf32>
    %215 = vector.broadcast %214 : vector<1x128xf32> to vector<128x128xf32>
    %216 = arith.addf %212, %215 : vector<128x128xf32>
    %cst_97 = arith.constant 0.000000e+00 : f32
    %217 = vector.broadcast %cst_97 : f32 to vector<128x128xf32>
    %218 = arith.cmpf oge, %216, %217 : vector<128x128xf32>
    %cst_98 = arith.constant 1.500000e-01 : f32
    %219 = vector.broadcast %cst_98 : f32 to vector<128x128xf32>
    %220 = arith.mulf %219, %216 : vector<128x128xf32>
    %221 = arith.select %218, %216, %220 : vector<128x128xi1>, vector<128x128xf32>
    %cst_99 = arith.constant 0.000000e+00 : f32
    %222 = vector.broadcast %cst_99 : f32 to vector<24x128xf32>
    %223 = vector.extract_strided_slice %221 {offsets = [0, 0], sizes = [104, 128], strides = [1, 1]} : vector<128x128xf32> to vector<104x128xf32>
    %224 = tpu.concatenate %222, %223 in 0 : vector<24x128xf32>, vector<104x128xf32> -> vector<128x128xf32>
    %c-24_i32 = arith.constant -24 : i32
    %225 = vector.broadcast %c-24_i32 : i32 to vector<128x128xi32>
    %226 = arith.addi %18, %225 : vector<128x128xi32>
    %c0_i32_100 = arith.constant 0 : i32
    %227 = vector.broadcast %c0_i32_100 : i32 to vector<128x128xi32>
    %228 = arith.cmpi sge, %226, %227 : vector<128x128xi32>
    %c64_i32_101 = arith.constant 64 : i32
    %229 = vector.broadcast %c64_i32_101 : i32 to vector<128x128xi32>
    %230 = arith.cmpi slt, %226, %229 : vector<128x128xi32>
    %231 = arith.andi %228, %230 : vector<128x128xi1>
    %cst_102 = arith.constant 0.000000e+00 : f32
    %232 = vector.broadcast %cst_102 : f32 to vector<128x128xf32>
    %233 = arith.select %231, %224, %232 : vector<128x128xi1>, vector<128x128xf32>
    %234 = arith.truncf %233 : vector<128x128xf32> to vector<128x128xbf16>
    %c0_103 = arith.constant 0 : index
    %c0_104 = arith.constant 0 : index
    %235 = vector.load %arg5[%c0_103, %c0_104] : memref<128x896xbf16, #tpu.memory_space<vmem>>, vector<128x128xbf16>
    tpu.vector_store %arg5[%c0_103, %c0_104], %234 {strides = array<i32>} : memref<128x896xbf16, #tpu.memory_space<vmem>>, vector<128x128xbf16>,
    %cst_105 = arith.constant 0.000000e+00 : f32
    %236 = vector.broadcast %cst_105 : f32 to vector<16x128xf32>
    %237 = vector.extract_strided_slice %221 {offsets = [0, 0], sizes = [112, 128], strides = [1, 1]} : vector<128x128xf32> to vector<112x128xf32>
    %238 = tpu.concatenate %236, %237 in 0 : vector<16x128xf32>, vector<112x128xf32> -> vector<128x128xf32>
    %c-16_i32 = arith.constant -16 : i32
    %239 = vector.broadcast %c-16_i32 : i32 to vector<128x128xi32>
    %240 = arith.addi %18, %239 : vector<128x128xi32>
    %c0_i32_106 = arith.constant 0 : i32
    %241 = vector.broadcast %c0_i32_106 : i32 to vector<128x128xi32>
    %242 = arith.cmpi sge, %240, %241 : vector<128x128xi32>
    %c64_i32_107 = arith.constant 64 : i32
    %243 = vector.broadcast %c64_i32_107 : i32 to vector<128x128xi32>
    %244 = arith.cmpi slt, %240, %243 : vector<128x128xi32>
    %245 = arith.andi %242, %244 : vector<128x128xi1>
    %cst_108 = arith.constant 0.000000e+00 : f32
    %246 = vector.broadcast %cst_108 : f32 to vector<128x128xf32>
    %247 = arith.select %245, %238, %246 : vector<128x128xi1>, vector<128x128xf32>
    %248 = arith.truncf %247 : vector<128x128xf32> to vector<128x128xbf16>
    %c0_109 = arith.constant 0 : index
    %c128_110 = arith.constant 128 : index
    %249 = vector.load %arg5[%c0_109, %c128_110] : memref<128x896xbf16, #tpu.memory_space<vmem>>, vector<128x128xbf16>
    tpu.vector_store %arg5[%c0_109, %c128_110], %248 {strides = array<i32>} : memref<128x896xbf16, #tpu.memory_space<vmem>>, vector<128x128xbf16>,
    %cst_111 = arith.constant 0.000000e+00 : f32
    %250 = vector.broadcast %cst_111 : f32 to vector<8x128xf32>
    %251 = vector.extract_strided_slice %221 {offsets = [0, 0], sizes = [120, 128], strides = [1, 1]} : vector<128x128xf32> to vector<120x128xf32>
    %252 = tpu.concatenate %250, %251 in 0 : vector<8x128xf32>, vector<120x128xf32> -> vector<128x128xf32>
    %c-8_i32_112 = arith.constant -8 : i32
    %253 = vector.broadcast %c-8_i32_112 : i32 to vector<128x128xi32>
    %254 = arith.addi %18, %253 : vector<128x128xi32>
    %c0_i32_113 = arith.constant 0 : i32
    %255 = vector.broadcast %c0_i32_113 : i32 to vector<128x128xi32>
    %256 = arith.cmpi sge, %254, %255 : vector<128x128xi32>
    %c64_i32_114 = arith.constant 64 : i32
    %257 = vector.broadcast %c64_i32_114 : i32 to vector<128x128xi32>
    %258 = arith.cmpi slt, %254, %257 : vector<128x128xi32>
    %259 = arith.andi %256, %258 : vector<128x128xi1>
    %cst_115 = arith.constant 0.000000e+00 : f32
    %260 = vector.broadcast %cst_115 : f32 to vector<128x128xf32>
    %261 = arith.select %259, %252, %260 : vector<128x128xi1>, vector<128x128xf32>
    %262 = arith.truncf %261 : vector<128x128xf32> to vector<128x128xbf16>
    %c0_116 = arith.constant 0 : index
    %c256_117 = arith.constant 256 : index
    %263 = vector.load %arg5[%c0_116, %c256_117] : memref<128x896xbf16, #tpu.memory_space<vmem>>, vector<128x128xbf16>
    tpu.vector_store %arg5[%c0_116, %c256_117], %262 {strides = array<i32>} : memref<128x896xbf16, #tpu.memory_space<vmem>>, vector<128x128xbf16>,
    %264 = arith.truncf %221 : vector<128x128xf32> to vector<128x128xbf16>
    %c0_118 = arith.constant 0 : index
    %c384_119 = arith.constant 384 : index
    %265 = vector.load %arg5[%c0_118, %c384_119] : memref<128x896xbf16, #tpu.memory_space<vmem>>, vector<128x128xbf16>
    tpu.vector_store %arg5[%c0_118, %c384_119], %264 {strides = array<i32>} : memref<128x896xbf16, #tpu.memory_space<vmem>>, vector<128x128xbf16>,
    %266 = vector.extract_strided_slice %221 {offsets = [8, 0], sizes = [120, 128], strides = [1, 1]} : vector<128x128xf32> to vector<120x128xf32>
    %cst_120 = arith.constant 0.000000e+00 : f32
    %267 = vector.broadcast %cst_120 : f32 to vector<8x128xf32>
    %268 = tpu.concatenate %266, %267 in 0 : vector<120x128xf32>, vector<8x128xf32> -> vector<128x128xf32>
    %c8_i32_121 = arith.constant 8 : i32
    %269 = vector.broadcast %c8_i32_121 : i32 to vector<128x128xi32>
    %270 = arith.addi %18, %269 : vector<128x128xi32>
    %c0_i32_122 = arith.constant 0 : i32
    %271 = vector.broadcast %c0_i32_122 : i32 to vector<128x128xi32>
    %272 = arith.cmpi sge, %270, %271 : vector<128x128xi32>
    %c64_i32_123 = arith.constant 64 : i32
    %273 = vector.broadcast %c64_i32_123 : i32 to vector<128x128xi32>
    %274 = arith.cmpi slt, %270, %273 : vector<128x128xi32>
    %275 = arith.andi %272, %274 : vector<128x128xi1>
    %cst_124 = arith.constant 0.000000e+00 : f32
    %276 = vector.broadcast %cst_124 : f32 to vector<128x128xf32>
    %277 = arith.select %275, %268, %276 : vector<128x128xi1>, vector<128x128xf32>
    %278 = arith.truncf %277 : vector<128x128xf32> to vector<128x128xbf16>
    %c0_125 = arith.constant 0 : index
    %c512_126 = arith.constant 512 : index
    %279 = vector.load %arg5[%c0_125, %c512_126] : memref<128x896xbf16, #tpu.memory_space<vmem>>, vector<128x128xbf16>
    tpu.vector_store %arg5[%c0_125, %c512_126], %278 {strides = array<i32>} : memref<128x896xbf16, #tpu.memory_space<vmem>>, vector<128x128xbf16>,
    %280 = vector.extract_strided_slice %221 {offsets = [16, 0], sizes = [112, 128], strides = [1, 1]} : vector<128x128xf32> to vector<112x128xf32>
    %cst_127 = arith.constant 0.000000e+00 : f32
    %281 = vector.broadcast %cst_127 : f32 to vector<16x128xf32>
    %282 = tpu.concatenate %280, %281 in 0 : vector<112x128xf32>, vector<16x128xf32> -> vector<128x128xf32>
    %c16_i32 = arith.constant 16 : i32
    %283 = vector.broadcast %c16_i32 : i32 to vector<128x128xi32>
    %284 = arith.addi %18, %283 : vector<128x128xi32>
    %c0_i32_128 = arith.constant 0 : i32
    %285 = vector.broadcast %c0_i32_128 : i32 to vector<128x128xi32>
    %286 = arith.cmpi sge, %284, %285 : vector<128x128xi32>
    %c64_i32_129 = arith.constant 64 : i32
    %287 = vector.broadcast %c64_i32_129 : i32 to vector<128x128xi32>
    %288 = arith.cmpi slt, %284, %287 : vector<128x128xi32>
    %289 = arith.andi %286, %288 : vector<128x128xi1>
    %cst_130 = arith.constant 0.000000e+00 : f32
    %290 = vector.broadcast %cst_130 : f32 to vector<128x128xf32>
    %291 = arith.select %289, %282, %290 : vector<128x128xi1>, vector<128x128xf32>
    %292 = arith.truncf %291 : vector<128x128xf32> to vector<128x128xbf16>
    %c0_131 = arith.constant 0 : index
    %c640_132 = arith.constant 640 : index
    %293 = vector.load %arg5[%c0_131, %c640_132] : memref<128x896xbf16, #tpu.memory_space<vmem>>, vector<128x128xbf16>
    tpu.vector_store %arg5[%c0_131, %c640_132], %292 {strides = array<i32>} : memref<128x896xbf16, #tpu.memory_space<vmem>>, vector<128x128xbf16>,
    %294 = vector.extract_strided_slice %221 {offsets = [24, 0], sizes = [104, 128], strides = [1, 1]} : vector<128x128xf32> to vector<104x128xf32>
    %cst_133 = arith.constant 0.000000e+00 : f32
    %295 = vector.broadcast %cst_133 : f32 to vector<24x128xf32>
    %296 = tpu.concatenate %294, %295 in 0 : vector<104x128xf32>, vector<24x128xf32> -> vector<128x128xf32>
    %c24_i32 = arith.constant 24 : i32
    %297 = vector.broadcast %c24_i32 : i32 to vector<128x128xi32>
    %298 = arith.addi %18, %297 : vector<128x128xi32>
    %c0_i32_134 = arith.constant 0 : i32
    %299 = vector.broadcast %c0_i32_134 : i32 to vector<128x128xi32>
    %300 = arith.cmpi sge, %298, %299 : vector<128x128xi32>
    %c64_i32_135 = arith.constant 64 : i32
    %301 = vector.broadcast %c64_i32_135 : i32 to vector<128x128xi32>
    %302 = arith.cmpi slt, %298, %301 : vector<128x128xi32>
    %303 = arith.andi %300, %302 : vector<128x128xi1>
    %cst_136 = arith.constant 0.000000e+00 : f32
    %304 = vector.broadcast %cst_136 : f32 to vector<128x128xf32>
    %305 = arith.select %303, %296, %304 : vector<128x128xi1>, vector<128x128xf32>
    %306 = arith.truncf %305 : vector<128x128xf32> to vector<128x128xbf16>
    %c0_137 = arith.constant 0 : index
    %c768_138 = arith.constant 768 : index
    %307 = vector.load %arg5[%c0_137, %c768_138] : memref<128x896xbf16, #tpu.memory_space<vmem>>, vector<128x128xbf16>
    tpu.vector_store %arg5[%c0_137, %c768_138], %306 {strides = array<i32>} : memref<128x896xbf16, #tpu.memory_space<vmem>>, vector<128x128xbf16>,
    %c2 = arith.constant 2 : index
    %c0_139 = arith.constant 0 : index
    %c0_140 = arith.constant 0 : index
    %308 = vector.load %arg2[%c2, %c0_139, %c0_140] : memref<5x896x128xbf16, #tpu.memory_space<vmem>>, vector<1x896x128xbf16>
    %309 = vector.shape_cast %308 : vector<1x896x128xbf16> to vector<896x128xbf16>
    %c0_141 = arith.constant 0 : index
    %c0_142 = arith.constant 0 : index
    %310 = vector.load %arg5[%c0_141, %c0_142] : memref<128x896xbf16, #tpu.memory_space<vmem>>, vector<128x896xbf16>
    %cst_143 = arith.constant dense<0.000000e+00> : vector<128x128xf32>
    %311 = tpu.matmul %310, %309, %cst_143 {dimension_numbers = #tpu.dot_dimension_numbers<[1], [0], [0], [1], [0, 0, 1, 1], [], []>} : vector<128x896xbf16>, vector<896x128xbf16>, vector<128x128xf32> -> vector<128x128xf32>
    %c2_144 = arith.constant 2 : index
    %c0_145 = arith.constant 0 : index
    %c0_146 = arith.constant 0 : index
    %312 = vector.load %arg3[%c2_144, %c0_145, %c0_146] : memref<5x1x128xf32, #tpu.memory_space<vmem>>, vector<1x1x128xf32>
    %313 = vector.shape_cast %312 : vector<1x1x128xf32> to vector<1x128xf32>
    %314 = vector.broadcast %313 : vector<1x128xf32> to vector<128x128xf32>
    %315 = arith.addf %311, %314 : vector<128x128xf32>
    %cst_147 = arith.constant 0.000000e+00 : f32
    %316 = vector.broadcast %cst_147 : f32 to vector<128x128xf32>
    %317 = arith.cmpf oge, %315, %316 : vector<128x128xf32>
    %cst_148 = arith.constant 1.500000e-01 : f32
    %318 = vector.broadcast %cst_148 : f32 to vector<128x128xf32>
    %319 = arith.mulf %318, %315 : vector<128x128xf32>
    %320 = arith.select %317, %315, %319 : vector<128x128xi1>, vector<128x128xf32>
    %cst_149 = arith.constant 0.000000e+00 : f32
    %321 = vector.broadcast %cst_149 : f32 to vector<48x128xf32>
    %322 = vector.extract_strided_slice %320 {offsets = [0, 0], sizes = [80, 128], strides = [1, 1]} : vector<128x128xf32> to vector<80x128xf32>
    %323 = tpu.concatenate %321, %322 in 0 : vector<48x128xf32>, vector<80x128xf32> -> vector<128x128xf32>
    %c-48_i32 = arith.constant -48 : i32
    %324 = vector.broadcast %c-48_i32 : i32 to vector<128x128xi32>
    %325 = arith.addi %18, %324 : vector<128x128xi32>
    %c0_i32_150 = arith.constant 0 : i32
    %326 = vector.broadcast %c0_i32_150 : i32 to vector<128x128xi32>
    %327 = arith.cmpi sge, %325, %326 : vector<128x128xi32>
    %c64_i32_151 = arith.constant 64 : i32
    %328 = vector.broadcast %c64_i32_151 : i32 to vector<128x128xi32>
    %329 = arith.cmpi slt, %325, %328 : vector<128x128xi32>
    %330 = arith.andi %327, %329 : vector<128x128xi1>
    %cst_152 = arith.constant 0.000000e+00 : f32
    %331 = vector.broadcast %cst_152 : f32 to vector<128x128xf32>
    %332 = arith.select %330, %323, %331 : vector<128x128xi1>, vector<128x128xf32>
    %333 = arith.truncf %332 : vector<128x128xf32> to vector<128x128xbf16>
    %c0_153 = arith.constant 0 : index
    %c0_154 = arith.constant 0 : index
    %334 = vector.load %arg5[%c0_153, %c0_154] : memref<128x896xbf16, #tpu.memory_space<vmem>>, vector<128x128xbf16>
    tpu.vector_store %arg5[%c0_153, %c0_154], %333 {strides = array<i32>} : memref<128x896xbf16, #tpu.memory_space<vmem>>, vector<128x128xbf16>,
    %cst_155 = arith.constant 0.000000e+00 : f32
    %335 = vector.broadcast %cst_155 : f32 to vector<32x128xf32>
    %336 = vector.extract_strided_slice %320 {offsets = [0, 0], sizes = [96, 128], strides = [1, 1]} : vector<128x128xf32> to vector<96x128xf32>
    %337 = tpu.concatenate %335, %336 in 0 : vector<32x128xf32>, vector<96x128xf32> -> vector<128x128xf32>
    %c-32_i32 = arith.constant -32 : i32
    %338 = vector.broadcast %c-32_i32 : i32 to vector<128x128xi32>
    %339 = arith.addi %18, %338 : vector<128x128xi32>
    %c0_i32_156 = arith.constant 0 : i32
    %340 = vector.broadcast %c0_i32_156 : i32 to vector<128x128xi32>
    %341 = arith.cmpi sge, %339, %340 : vector<128x128xi32>
    %c64_i32_157 = arith.constant 64 : i32
    %342 = vector.broadcast %c64_i32_157 : i32 to vector<128x128xi32>
    %343 = arith.cmpi slt, %339, %342 : vector<128x128xi32>
    %344 = arith.andi %341, %343 : vector<128x128xi1>
    %cst_158 = arith.constant 0.000000e+00 : f32
    %345 = vector.broadcast %cst_158 : f32 to vector<128x128xf32>
    %346 = arith.select %344, %337, %345 : vector<128x128xi1>, vector<128x128xf32>
    %347 = arith.truncf %346 : vector<128x128xf32> to vector<128x128xbf16>
    %c0_159 = arith.constant 0 : index
    %c128_160 = arith.constant 128 : index
    %348 = vector.load %arg5[%c0_159, %c128_160] : memref<128x896xbf16, #tpu.memory_space<vmem>>, vector<128x128xbf16>
    tpu.vector_store %arg5[%c0_159, %c128_160], %347 {strides = array<i32>} : memref<128x896xbf16, #tpu.memory_space<vmem>>, vector<128x128xbf16>,
    %cst_161 = arith.constant 0.000000e+00 : f32
    %349 = vector.broadcast %cst_161 : f32 to vector<16x128xf32>
    %350 = vector.extract_strided_slice %320 {offsets = [0, 0], sizes = [112, 128], strides = [1, 1]} : vector<128x128xf32> to vector<112x128xf32>
    %351 = tpu.concatenate %349, %350 in 0 : vector<16x128xf32>, vector<112x128xf32> -> vector<128x128xf32>
    %c-16_i32_162 = arith.constant -16 : i32
    %352 = vector.broadcast %c-16_i32_162 : i32 to vector<128x128xi32>
    %353 = arith.addi %18, %352 : vector<128x128xi32>
    %c0_i32_163 = arith.constant 0 : i32
    %354 = vector.broadcast %c0_i32_163 : i32 to vector<128x128xi32>
    %355 = arith.cmpi sge, %353, %354 : vector<128x128xi32>
    %c64_i32_164 = arith.constant 64 : i32
    %356 = vector.broadcast %c64_i32_164 : i32 to vector<128x128xi32>
    %357 = arith.cmpi slt, %353, %356 : vector<128x128xi32>
    %358 = arith.andi %355, %357 : vector<128x128xi1>
    %cst_165 = arith.constant 0.000000e+00 : f32
    %359 = vector.broadcast %cst_165 : f32 to vector<128x128xf32>
    %360 = arith.select %358, %351, %359 : vector<128x128xi1>, vector<128x128xf32>
    %361 = arith.truncf %360 : vector<128x128xf32> to vector<128x128xbf16>
    %c0_166 = arith.constant 0 : index
    %c256_167 = arith.constant 256 : index
    %362 = vector.load %arg5[%c0_166, %c256_167] : memref<128x896xbf16, #tpu.memory_space<vmem>>, vector<128x128xbf16>
    tpu.vector_store %arg5[%c0_166, %c256_167], %361 {strides = array<i32>} : memref<128x896xbf16, #tpu.memory_space<vmem>>, vector<128x128xbf16>,
    %363 = arith.truncf %320 : vector<128x128xf32> to vector<128x128xbf16>
    %c0_168 = arith.constant 0 : index
    %c384_169 = arith.constant 384 : index
    %364 = vector.load %arg5[%c0_168, %c384_169] : memref<128x896xbf16, #tpu.memory_space<vmem>>, vector<128x128xbf16>
    tpu.vector_store %arg5[%c0_168, %c384_169], %363 {strides = array<i32>} : memref<128x896xbf16, #tpu.memory_space<vmem>>, vector<128x128xbf16>,
    %365 = vector.extract_strided_slice %320 {offsets = [16, 0], sizes = [112, 128], strides = [1, 1]} : vector<128x128xf32> to vector<112x128xf32>
    %cst_170 = arith.constant 0.000000e+00 : f32
    %366 = vector.broadcast %cst_170 : f32 to vector<16x128xf32>
    %367 = tpu.concatenate %365, %366 in 0 : vector<112x128xf32>, vector<16x128xf32> -> vector<128x128xf32>
    %c16_i32_171 = arith.constant 16 : i32
    %368 = vector.broadcast %c16_i32_171 : i32 to vector<128x128xi32>
    %369 = arith.addi %18, %368 : vector<128x128xi32>
    %c0_i32_172 = arith.constant 0 : i32
    %370 = vector.broadcast %c0_i32_172 : i32 to vector<128x128xi32>
    %371 = arith.cmpi sge, %369, %370 : vector<128x128xi32>
    %c64_i32_173 = arith.constant 64 : i32
    %372 = vector.broadcast %c64_i32_173 : i32 to vector<128x128xi32>
    %373 = arith.cmpi slt, %369, %372 : vector<128x128xi32>
    %374 = arith.andi %371, %373 : vector<128x128xi1>
    %cst_174 = arith.constant 0.000000e+00 : f32
    %375 = vector.broadcast %cst_174 : f32 to vector<128x128xf32>
    %376 = arith.select %374, %367, %375 : vector<128x128xi1>, vector<128x128xf32>
    %377 = arith.truncf %376 : vector<128x128xf32> to vector<128x128xbf16>
    %c0_175 = arith.constant 0 : index
    %c512_176 = arith.constant 512 : index
    %378 = vector.load %arg5[%c0_175, %c512_176] : memref<128x896xbf16, #tpu.memory_space<vmem>>, vector<128x128xbf16>
    tpu.vector_store %arg5[%c0_175, %c512_176], %377 {strides = array<i32>} : memref<128x896xbf16, #tpu.memory_space<vmem>>, vector<128x128xbf16>,
    %379 = vector.extract_strided_slice %320 {offsets = [32, 0], sizes = [96, 128], strides = [1, 1]} : vector<128x128xf32> to vector<96x128xf32>
    %cst_177 = arith.constant 0.000000e+00 : f32
    %380 = vector.broadcast %cst_177 : f32 to vector<32x128xf32>
    %381 = tpu.concatenate %379, %380 in 0 : vector<96x128xf32>, vector<32x128xf32> -> vector<128x128xf32>
    %c32_i32 = arith.constant 32 : i32
    %382 = vector.broadcast %c32_i32 : i32 to vector<128x128xi32>
    %383 = arith.addi %18, %382 : vector<128x128xi32>
    %c0_i32_178 = arith.constant 0 : i32
    %384 = vector.broadcast %c0_i32_178 : i32 to vector<128x128xi32>
    %385 = arith.cmpi sge, %383, %384 : vector<128x128xi32>
    %c64_i32_179 = arith.constant 64 : i32
    %386 = vector.broadcast %c64_i32_179 : i32 to vector<128x128xi32>
    %387 = arith.cmpi slt, %383, %386 : vector<128x128xi32>
    %388 = arith.andi %385, %387 : vector<128x128xi1>
    %cst_180 = arith.constant 0.000000e+00 : f32
    %389 = vector.broadcast %cst_180 : f32 to vector<128x128xf32>
    %390 = arith.select %388, %381, %389 : vector<128x128xi1>, vector<128x128xf32>
    %391 = arith.truncf %390 : vector<128x128xf32> to vector<128x128xbf16>
    %c0_181 = arith.constant 0 : index
    %c640_182 = arith.constant 640 : index
    %392 = vector.load %arg5[%c0_181, %c640_182] : memref<128x896xbf16, #tpu.memory_space<vmem>>, vector<128x128xbf16>
    tpu.vector_store %arg5[%c0_181, %c640_182], %391 {strides = array<i32>} : memref<128x896xbf16, #tpu.memory_space<vmem>>, vector<128x128xbf16>,
    %393 = vector.extract_strided_slice %320 {offsets = [48, 0], sizes = [80, 128], strides = [1, 1]} : vector<128x128xf32> to vector<80x128xf32>
    %cst_183 = arith.constant 0.000000e+00 : f32
    %394 = vector.broadcast %cst_183 : f32 to vector<48x128xf32>
    %395 = tpu.concatenate %393, %394 in 0 : vector<80x128xf32>, vector<48x128xf32> -> vector<128x128xf32>
    %c48_i32 = arith.constant 48 : i32
    %396 = vector.broadcast %c48_i32 : i32 to vector<128x128xi32>
    %397 = arith.addi %18, %396 : vector<128x128xi32>
    %c0_i32_184 = arith.constant 0 : i32
    %398 = vector.broadcast %c0_i32_184 : i32 to vector<128x128xi32>
    %399 = arith.cmpi sge, %397, %398 : vector<128x128xi32>
    %c64_i32_185 = arith.constant 64 : i32
    %400 = vector.broadcast %c64_i32_185 : i32 to vector<128x128xi32>
    %401 = arith.cmpi slt, %397, %400 : vector<128x128xi32>
    %402 = arith.andi %399, %401 : vector<128x128xi1>
    %cst_186 = arith.constant 0.000000e+00 : f32
    %403 = vector.broadcast %cst_186 : f32 to vector<128x128xf32>
    %404 = arith.select %402, %395, %403 : vector<128x128xi1>, vector<128x128xf32>
    %405 = arith.truncf %404 : vector<128x128xf32> to vector<128x128xbf16>
    %c0_187 = arith.constant 0 : index
    %c768_188 = arith.constant 768 : index
    %406 = vector.load %arg5[%c0_187, %c768_188] : memref<128x896xbf16, #tpu.memory_space<vmem>>, vector<128x128xbf16>
    tpu.vector_store %arg5[%c0_187, %c768_188], %405 {strides = array<i32>} : memref<128x896xbf16, #tpu.memory_space<vmem>>, vector<128x128xbf16>,
    %c3 = arith.constant 3 : index
    %c0_189 = arith.constant 0 : index
    %c0_190 = arith.constant 0 : index
    %407 = vector.load %arg2[%c3, %c0_189, %c0_190] : memref<5x896x128xbf16, #tpu.memory_space<vmem>>, vector<1x896x128xbf16>
    %408 = vector.shape_cast %407 : vector<1x896x128xbf16> to vector<896x128xbf16>
    %c0_191 = arith.constant 0 : index
    %c0_192 = arith.constant 0 : index
    %409 = vector.load %arg5[%c0_191, %c0_192] : memref<128x896xbf16, #tpu.memory_space<vmem>>, vector<128x896xbf16>
    %cst_193 = arith.constant dense<0.000000e+00> : vector<128x128xf32>
    %410 = tpu.matmul %409, %408, %cst_193 {dimension_numbers = #tpu.dot_dimension_numbers<[1], [0], [0], [1], [0, 0, 1, 1], [], []>} : vector<128x896xbf16>, vector<896x128xbf16>, vector<128x128xf32> -> vector<128x128xf32>
    %c3_194 = arith.constant 3 : index
    %c0_195 = arith.constant 0 : index
    %c0_196 = arith.constant 0 : index
    %411 = vector.load %arg3[%c3_194, %c0_195, %c0_196] : memref<5x1x128xf32, #tpu.memory_space<vmem>>, vector<1x1x128xf32>
    %412 = vector.shape_cast %411 : vector<1x1x128xf32> to vector<1x128xf32>
    %413 = vector.broadcast %412 : vector<1x128xf32> to vector<128x128xf32>
    %414 = arith.addf %410, %413 : vector<128x128xf32>
    %cst_197 = arith.constant 0.000000e+00 : f32
    %415 = vector.broadcast %cst_197 : f32 to vector<128x128xf32>
    %416 = arith.cmpf oge, %414, %415 : vector<128x128xf32>
    %cst_198 = arith.constant 1.500000e-01 : f32
    %417 = vector.broadcast %cst_198 : f32 to vector<128x128xf32>
    %418 = arith.mulf %417, %414 : vector<128x128xf32>
    %419 = arith.select %416, %414, %418 : vector<128x128xi1>, vector<128x128xf32>
    %cst_199 = arith.constant 0.000000e+00 : f32
    %420 = vector.broadcast %cst_199 : f32 to vector<32x128xf32>
    %421 = vector.extract_strided_slice %419 {offsets = [0, 0], sizes = [96, 128], strides = [1, 1]} : vector<128x128xf32> to vector<96x128xf32>
    %422 = tpu.concatenate %420, %421 in 0 : vector<32x128xf32>, vector<96x128xf32> -> vector<128x128xf32>
    %c-32_i32_200 = arith.constant -32 : i32
    %423 = vector.broadcast %c-32_i32_200 : i32 to vector<128x128xi32>
    %424 = arith.addi %18, %423 : vector<128x128xi32>
    %c0_i32_201 = arith.constant 0 : i32
    %425 = vector.broadcast %c0_i32_201 : i32 to vector<128x128xi32>
    %426 = arith.cmpi sge, %424, %425 : vector<128x128xi32>
    %c64_i32_202 = arith.constant 64 : i32
    %427 = vector.broadcast %c64_i32_202 : i32 to vector<128x128xi32>
    %428 = arith.cmpi slt, %424, %427 : vector<128x128xi32>
    %429 = arith.andi %426, %428 : vector<128x128xi1>
    %cst_203 = arith.constant 0.000000e+00 : f32
    %430 = vector.broadcast %cst_203 : f32 to vector<128x128xf32>
    %431 = arith.select %429, %422, %430 : vector<128x128xi1>, vector<128x128xf32>
    %432 = arith.truncf %431 : vector<128x128xf32> to vector<128x128xbf16>
    %c0_204 = arith.constant 0 : index
    %c0_205 = arith.constant 0 : index
    %433 = vector.load %arg5[%c0_204, %c0_205] : memref<128x896xbf16, #tpu.memory_space<vmem>>, vector<128x128xbf16>
    tpu.vector_store %arg5[%c0_204, %c0_205], %432 {strides = array<i32>} : memref<128x896xbf16, #tpu.memory_space<vmem>>, vector<128x128xbf16>,
    %434 = arith.truncf %419 : vector<128x128xf32> to vector<128x128xbf16>
    %c0_206 = arith.constant 0 : index
    %c128_207 = arith.constant 128 : index
    %435 = vector.load %arg5[%c0_206, %c128_207] : memref<128x896xbf16, #tpu.memory_space<vmem>>, vector<128x128xbf16>
    tpu.vector_store %arg5[%c0_206, %c128_207], %434 {strides = array<i32>} : memref<128x896xbf16, #tpu.memory_space<vmem>>, vector<128x128xbf16>,
    %436 = vector.extract_strided_slice %419 {offsets = [32, 0], sizes = [96, 128], strides = [1, 1]} : vector<128x128xf32> to vector<96x128xf32>
    %cst_208 = arith.constant 0.000000e+00 : f32
    %437 = vector.broadcast %cst_208 : f32 to vector<32x128xf32>
    %438 = tpu.concatenate %436, %437 in 0 : vector<96x128xf32>, vector<32x128xf32> -> vector<128x128xf32>
    %c32_i32_209 = arith.constant 32 : i32
    %439 = vector.broadcast %c32_i32_209 : i32 to vector<128x128xi32>
    %440 = arith.addi %18, %439 : vector<128x128xi32>
    %c0_i32_210 = arith.constant 0 : i32
    %441 = vector.broadcast %c0_i32_210 : i32 to vector<128x128xi32>
    %442 = arith.cmpi sge, %440, %441 : vector<128x128xi32>
    %c64_i32_211 = arith.constant 64 : i32
    %443 = vector.broadcast %c64_i32_211 : i32 to vector<128x128xi32>
    %444 = arith.cmpi slt, %440, %443 : vector<128x128xi32>
    %445 = arith.andi %442, %444 : vector<128x128xi1>
    %cst_212 = arith.constant 0.000000e+00 : f32
    %446 = vector.broadcast %cst_212 : f32 to vector<128x128xf32>
    %447 = arith.select %445, %438, %446 : vector<128x128xi1>, vector<128x128xf32>
    %448 = arith.truncf %447 : vector<128x128xf32> to vector<128x128xbf16>
    %c0_213 = arith.constant 0 : index
    %c256_214 = arith.constant 256 : index
    %449 = vector.load %arg5[%c0_213, %c256_214] : memref<128x896xbf16, #tpu.memory_space<vmem>>, vector<128x128xbf16>
    tpu.vector_store %arg5[%c0_213, %c256_214], %448 {strides = array<i32>} : memref<128x896xbf16, #tpu.memory_space<vmem>>, vector<128x128xbf16>,
    %c4 = arith.constant 4 : index
    %c256_215 = arith.constant 256 : index
    %c0_216 = arith.constant 0 : index
    %450 = vector.load %arg2[%c4, %c256_215, %c0_216] : memref<5x896x128xbf16, #tpu.memory_space<vmem>>, vector<1x384x128xbf16>
    %451 = vector.shape_cast %450 : vector<1x384x128xbf16> to vector<384x128xbf16>
    %c0_217 = arith.constant 0 : index
    %c0_218 = arith.constant 0 : index
    %452 = vector.load %arg5[%c0_217, %c0_218] : memref<128x896xbf16, #tpu.memory_space<vmem>>, vector<128x384xbf16>
    %cst_219 = arith.constant dense<0.000000e+00> : vector<128x128xf32>
    %453 = tpu.matmul %452, %451, %cst_219 {dimension_numbers = #tpu.dot_dimension_numbers<[1], [0], [0], [1], [0, 0, 1, 1], [], []>} : vector<128x384xbf16>, vector<384x128xbf16>, vector<128x128xf32> -> vector<128x128xf32>
    %c4_220 = arith.constant 4 : index
    %c0_221 = arith.constant 0 : index
    %c0_222 = arith.constant 0 : index
    %454 = vector.load %arg3[%c4_220, %c0_221, %c0_222] : memref<5x1x128xf32, #tpu.memory_space<vmem>>, vector<1x1x128xf32>
    %455 = vector.shape_cast %454 : vector<1x1x128xf32> to vector<1x128xf32>
    %456 = vector.broadcast %455 : vector<1x128xf32> to vector<128x128xf32>
    %457 = arith.addf %453, %456 : vector<128x128xf32>
    %458 = arith.addf %1, %457 : vector<128x128xf32>
    %459 = vector.shape_cast %458 : vector<128x128xf32> to vector<2x64x128xf32>
    %c0_223 = arith.constant 0 : index
    %c0_224 = arith.constant 0 : index
    %c0_225 = arith.constant 0 : index
    %460 = vector.load %arg4[%c0_223, %c0_224, %c0_225] : memref<2x64x128xf32, #tpu.memory_space<vmem>>, vector<2x64x128xf32>
    tpu.vector_store %arg4[%c0_223, %c0_224, %c0_225], %459 {strides = array<i32>} : memref<2x64x128xf32, #tpu.memory_space<vmem>>, vector<2x64x128xf32>,
    return
  }
  func.func @transform_0(%arg0: i32) -> (i32, i32, i32) {
    %c0_i32 = arith.constant 0 : i32
    %c0_i32_0 = arith.constant 0 : i32
    %c0_i32_1 = arith.constant 0 : i32
    return %arg0, %c0_i32, %c0_i32_0 : i32, i32, i32
  }
  func.func @transform_1(%arg0: i32) -> (i32, i32, i32) {
    %c0_i32 = arith.constant 0 : i32
    %c0_i32_0 = arith.constant 0 : i32
    %c0_i32_1 = arith.constant 0 : i32
    %c0_i32_2 = arith.constant 0 : i32
    return %c0_i32, %c0_i32_0, %c0_i32_1 : i32, i32, i32
  }
  func.func @transform_2(%arg0: i32) -> (i32, i32, i32) {
    %c0_i32 = arith.constant 0 : i32
    %c0_i32_0 = arith.constant 0 : i32
    %c0_i32_1 = arith.constant 0 : i32
    %c0_i32_2 = arith.constant 0 : i32
    return %c0_i32, %c0_i32_0, %c0_i32_1 : i32, i32, i32
  }
  func.func @transform_3(%arg0: i32) -> (i32, i32, i32) {
    %c0_i32 = arith.constant 0 : i32
    %c0_i32_0 = arith.constant 0 : i32
    %c0_i32_1 = arith.constant 0 : i32
    return %arg0, %c0_i32, %c0_i32_0 : i32, i32, i32
  }
}

</mosaic_0001>

<bundles_post_ra>
// kernel: tpu_custom_call.1
= control target key start
LH: loop header
LB: loop body
LE: loop exit
PB: predicated region body
PF: predicated region fallthrough
CT: control target
= control target key end

     0   :  { %8 = vsyncpa [#allocation4], 0  ;;  %s12111_s0 = inlined_call_operand.hbm [shape: f32[2,64,128], index: 0, kind: input, shape index: {}]   ;;  %s12112_s1 = inlined_call_operand.hbm [shape: bf16[5,896,128], index: 1, kind: input, shape index: {}]   ;;  %s12113_s2 = inlined_call_operand.hbm [shape: f32[5,1,128], index: 2, kind: input, shape index: {}]   ;;  %s12114_s3 = inlined_call_operand.hbm [shape: f32[2,64,128], index: 3, kind: output, shape index: {}]  }
   0x1   :  { %9 = vsyncpa [#allocation7], 0  ;;  %s28_s14 = sshll.u32 %s12112_s1, 4  ;;  %s29_s14 = int_to_ptr.hbm [resolvable:$true] %s28_s14 }
   0x2   :  { %10 = vsyncpa [#allocation5], 0  ;;  %s10884_s15 = smov [#allocation6]   ;;  %s15_s19 = sshll.u32 %s12111_s0, 4  ;;  %s16_s19 = int_to_ptr.hbm [resolvable:$true] %s15_s19 }
   0x3   :  { %s30_s16 = sshll.u32 %s10884_s15, 4  ;;  %s10885_s20 = smov 64   ;;  %s31_s16 = int_to_ptr.vmem [resolvable:$true] %s30_s16 }
   0x4   :  { %s10886_s21 = smov 4   ;;  %s10887_s22 = smov [#allocation3]  }
   0x5   :  { %36 = dma.hbm_to_vmem [thread:$0]  %s29_s14, 35840, %s31_s16, [#allocation7], %s10885_s20, %s10885_s20, %s10886_s21  }
   0x6   :  { %s17_s23 = sshll.u32 %s10887_s22, 4  ;;  %s10888_s24 = smov 128   ;;  %s18_s23 = int_to_ptr.vmem [resolvable:$true] %s17_s23 }
   0x7   :  { %s10889_s25 = smov 8   ;;  %s41_s27 = sshll.u32 %s12113_s2, 4  ;;  %s42_s27 = int_to_ptr.hbm [resolvable:$true] %s41_s27 }
   0x8   :  { %23 = dma.hbm_to_vmem [thread:$0]  %s16_s19, 2048, %s18_s23, [#allocation4], %s10888_s24, %s10888_s24, %s10889_s25  }
   0x9   :  { %s10890_s28 = smov [#allocation8]   ;;  %s10891_s29 = smov 16  }
   0xa   :  { %s43_s0 = sshll.u32 %s10890_s28, 4  ;;  %s10892_s30 = smov 1   ;;  %s44_s0 = int_to_ptr.vmem [resolvable:$true] %s43_s0 }
   0xb   :  { %49 = dma.hbm_to_vmem [thread:$0]  %s42_s27, 80, %s44_s0, [#allocation7], %s10891_s29, %s10891_s29, %s10892_s30  }
   0xc   :  { %10878 = dma.done.wait [#allocation4], 2048  }
   0xd   :  { %10879 = vsyncadd [#allocation4], 4294965248 }
   0xe   :  { %10880 = dma.done.wait [#allocation7], 35920  }
   0xf   :  { %10881 = vsyncadd [#allocation7], 4294931376  ;;  %v78_v0 = vlaneseq  ;;  %v10233_v2 = vld [vmem:[#allocation6 + $0x38] sm:$0xff]  ;;  %v10232_v6 = vld [vmem:[#allocation6 + $0x30] sm:$0xff]  ;;  %vm351_vm0 = vcmask 1045504   ;;  %vm673_vm2 = vcmask 1041408  }
  0x10   :  { %v10929_v3 = vld [vmem:[#allocation6 + $0xb8] sm:$0xff]  ;;  %2012 = vmatpush.bf16.msra.mxu0 %v10233_v2  ;;  %10722 = vmatpush.bf16.msra.mxu3 %v10233_v2  ;;  %v10938_v7 = vld [vmem:[#allocation6 + $0xb0] sm:$0xff]  ;;  %v10231_v11 = vld [vmem:[#allocation6 + $0x28] sm:$0xff]  ;;  %vm512_vm10 = vcmask 1043456   ;;  %s10894_s2 = smov [#allocation9]   ;;  %s8228_s7 = sshll.u32 %s12114_s3, 4  ;;  %s8229_s7 = int_to_ptr.hbm [resolvable:$true] %s8228_s7 }
  0x11   :  { %v10927_v1 = vshrl.u32 %v78_v0, 7  ;;  %v10931_v4 = vld [vmem:[#allocation6 + $0x78] sm:$0xff]  ;;  %10738 = vmatpush.bf16.msra.mxu2 %v10929_v3  ;;  %v10940_v8 = vld [vmem:[#allocation6 + $0x70] sm:$0xff]  ;;  %v10946_v12 = vld [vmem:[#allocation6 + $0xa8] sm:$0xff]  ;;  %s8226_s4 = sshll.u32 %s10894_s2, 4  ;;  %s8227_s4 = int_to_ptr.vmem [resolvable:$true] %s8226_s4 }
  0x12   :  { %10730 = vmatpush.bf16.msra.mxu1 %v10931_v4  ;;  %v10948_v13 = vld [vmem:[#allocation6 + $0x68] sm:$0xff]  ;;  %v10230_v14 = vld [vmem:[#allocation6 + $0x20] sm:$0xff]  ;;  %v64_v17 = vld [vmem:[#allocation3 + $0x10] sm:$0xff] }
  0x13   :  { %v10934_v5 = vand.u32 63, %v10927_v1  ;;  %v62_v15 = vld [vmem:[#allocation3] sm:$0xff]  ;;  %v63_v16 = vld [vmem:[#allocation3 + $0x8] sm:$0xff]  ;;  %vm289_vm6 = vcmp.ge.f32.partialorder %v64_v17, 0.0  ;;  %v65_v19 = vld [vmem:[#allocation3 + $0x18] sm:$0xff] }
  0x14   :  { %2013 = vmatpush.bf16.msra.mxu0 %v10232_v6  ;;  %10723 = vmatpush.bf16.msra.mxu3 %v10232_v6  ;;  %vm287_vm4 = vcmp.ge.f32.partialorder %v62_v15, 0.0  ;;  %vm288_vm5 = vcmp.ge.f32.partialorder %v63_v16, 0.0  ;;  %v303_v18 = vmul.f32 0.15, %v62_v15  ;;  %v304_v20 = vmul.f32 0.15, %v63_v16 }
  0x15   :  { %v400_v9 = vadd.s32 4294967290, %v10934_v5  ;;  %v722_v10 = vadd.s32 4294967294, %v10934_v5  ;;  %10739 = vmatpush.bf16.msra.mxu2 %v10938_v7  ;;  %v305_v21 = vmul.f32 0.15, %v64_v17  ;;  %v66_v22 = vld [vmem:[#allocation3 + $0x20] sm:$0xff]  ;;  %v67_v23 = vld [vmem:[#allocation3 + $0x28] sm:$0xff] }
  0x16   :  { %10731 = vmatpush.bf16.msra.mxu1 %v10940_v8  ;;  %v10952_v24 = vld [vmem:[#allocation6 + $0xa0] sm:$0xff]  ;;  %v10956_v26 = vsel %vm287_vm4, %v62_v15, %v303_v18  ;;  %vm290_vm7 = vcmp.ge.f32.partialorder %v65_v19, 0.0  ;;  %vm291_vm8 = vcmp.ge.f32.partialorder %v66_v22, 0.0  ;;  %vm292_vm9 = vcmp.ge.f32.partialorder %v67_v23, 0.0  ;;  %v10229_v31 = vld [vmem:[#allocation6 + $0x18] sm:$0xff]  ;;  %v10228_v53 = vld [vmem:[#allocation6 + $0x10] sm:$0xff] }
  0x17   :  { %vm416_vm1 = vcmp.ge.s32.totalorder %v400_v9, 0  ;;  %vm738_vm3 = vcmp.ge.s32.totalorder %v722_v10, 0  ;;  %v10954_v25 = vld [vmem:[#allocation6 + $0x60] sm:$0xff]  ;;  %v10959_v27 = vsel %vm288_vm5, %v63_v16, %v304_v20  ;;  %v10962_v28 = vsel %vm289_vm6, %v64_v17, %v305_v21  ;;  %v10977_v40 = vld [vmem:[#allocation6 + $0x98] sm:$0xff]  ;;  %v10995_v56 = vld [vmem:[#allocation6 + $0x90] sm:$0xff] }
  0x18   :  { %2014 = vmatpush.bf16.msra.mxu0 %v10231_v11  ;;  %10724 = vmatpush.bf16.msra.mxu3 %v10231_v11  ;;  %v352_v29 = vrot.slane %v10956_v26, 2  ;;  %v674_v30 = vrot.slane %v10956_v26, 6  ;;  %v353_v32 = vrot.slane %v10959_v27, 2  ;;  %v355_v33 = vrot.slane %v10962_v28, 2  ;;  %v10979_v41 = vld [vmem:[#allocation6 + $0x58] sm:$0xff]  ;;  %v10997_v57 = vld [vmem:[#allocation6 + $0x50] sm:$0xff] }
  0x19   :  { %10740 = vmatpush.bf16.msra.mxu2 %v10946_v12  ;;  %v675_v34 = vrot.slane %v10959_v27, 6  ;;  %v834_v35 = vpack.c.bf16 %v10956_v26, %v10956_v26  ;;  %v835_v38 = vpack.c.bf16 %v10959_v27, %v10959_v27  ;;  %v306_v39 = vmul.f32 0.15, %v65_v19  ;;  %v68_v61 = vld [vmem:[#allocation3 + $0x30] sm:$0xff]  ;;  %v10227_v9 = vld [vmem:[#allocation6 + $0x8] sm:$0xff]  ;;  %v69_v15 = vld [vmem:[#allocation3 + $0x38] sm:$0xff] }
  0x1a   :  { %10732 = vmatpush.bf16.msra.mxu1 %v10948_v13  ;;  %v399_v36 = vsel %vm351_vm0, 0.0, %v352_v29  ;;  %v721_v37 = vsel %vm673_vm2, 0.0, %v674_v30  ;;  %v354_v42 = vsel %vm351_vm0, %v352_v29, %v353_v32  ;;  %v356_v43 = vsel %vm351_vm0, %v353_v32, %v355_v33  ;;  %v11011_v10 = vld [vmem:[#allocation6 + $0x88] sm:$0xff] }
  0x1b   :  { %v464_v44 = vsel %vm416_vm1, %v399_v36, 0.0  ;;  %v676_v45 = vsel %vm673_vm2, %v674_v30, %v675_v34  ;;  %v481_v47 = vpack.c.bf16 %v354_v42, %v354_v42  ;;  %v482_v48 = vpack.c.bf16 %v356_v43, %v356_v43  ;;  %850 = vst [vmem:[#allocation2 + $0xc] sm:$0xf] %v834_v35  ;;  %v11021_v16 = vld [vmem:[#allocation6 + $0x48] sm:$0xff]  ;;  %v10257_v43 = vld [vmem:[#allocation6 + $0xf8] sm:$0xff] }
  0x1c   :  { %2015 = vmatpush.bf16.msra.mxu0 %v10230_v14  ;;  %10725 = vmatpush.bf16.msra.mxu3 %v10230_v14  ;;  %v480_v46 = vpack.c.bf16 %v464_v44, %v464_v44  ;;  %v786_v49 = vsel %vm738_vm3, %v721_v37, 0.0  ;;  %851 = vst [vmem:[#allocation2 + $0x28] sm:$0xf] %v835_v38  ;;  %v307_v51 = vmul.f32 0.15, %v66_v22  ;;  %v803_v54 = vpack.c.bf16 %v676_v45, %v676_v45  ;;  %v11035_v37 = vld [vmem:[#allocation6 + $0x80] sm:$0xff] }
  0x1d   :  { %10741 = vmatpush.bf16.msra.mxu2 %v10952_v24  ;;  %v802_v50 = vpack.c.bf16 %v786_v49, %v786_v49  ;;  %v308_v52 = vmul.f32 0.15, %v67_v23  ;;  %v10991_v55 = vsel %vm290_vm7, %v65_v19, %v306_v39  ;;  %497 = vst [vmem:[#allocation2 + $0x1c] sm:$0xf] %v481_v47  ;;  %vm293_vm11 = vcmp.ge.f32.partialorder %v68_v61, 0.0  ;;  %v10226_v19 = vld [vmem:[#allocation6] sm:$0xff] }
  0x1e   :  { %10733 = vmatpush.bf16.msra.mxu1 %v10954_v25  ;;  %496 = vst [vmem:[#allocation2] sm:$0xf] %v480_v46  ;;  %v11000_v58 = vsel %vm291_vm8, %v66_v22, %v307_v51  ;;  %v357_v60 = vrot.slane %v10991_v55, 2  ;;  %v679_v0 = vrot.slane %v10991_v55, 6  ;;  %v309_v18 = vmul.f32 0.15, %v68_v61 }
  0x1f   :  { %v11003_v59 = vsel %vm292_vm9, %v67_v23, %v308_v52  ;;  %498 = vst [vmem:[#allocation2 + $0x38] sm:$0xf] %v482_v48  ;;  %v359_v62 = vrot.slane %v11000_v58, 2  ;;  %v681_v2 = vrot.slane %v11000_v58, 6  ;;  %v518_v22 = vrot.slane %v10991_v55, 4  ;;  %v11037_v38 = vld [vmem:[#allocation6 + $0x40] sm:$0xff] }
  0x20   :  { %2016 = vmatpush.bf16.msra.mxu0 %v10229_v31  ;;  %10726 = vmatpush.bf16.msra.mxu3 %v10229_v31  ;;  %v361_v63 = vrot.slane %v11003_v59, 2  ;;  %818 = vst [vmem:[#allocation2 + $0x8] sm:$0xf] %v802_v50  ;;  %v683_v6 = vrot.slane %v11003_v59, 6  ;;  %v520_v23 = vrot.slane %v11000_v58, 4  ;;  %v10893_v35 = vmov 0.0|0.0  }
  0x21   :  { %10742 = vmatpush.bf16.msra.mxu2 %v10977_v40  ;;  %819 = vst [vmem:[#allocation2 + $0x24] sm:$0xf] %v803_v54  ;;  %v360_v11 = vsel %vm351_vm0, %v357_v60, %v359_v62  ;;  %v682_v21 = vsel %vm673_vm2, %v679_v0, %v681_v2  ;;  %v310_v31 = vmul.f32 0.15, %v69_v15  ;;  %v522_v36 = vrot.slane %v11003_v59, 4  ;;  %v70_v49 = vld [vmem:[#allocation3 + $0x40] sm:$0xff] }
  0x22   :  { %10734 = vmatpush.bf16.msra.mxu1 %v10979_v41  ;;  %v362_v14 = vsel %vm351_vm0, %v359_v62, %v361_v63  ;;  %964 = vst [vmem:[#allocation2 + $0x10] sm:$0xf] %v481_v47  ;;  %v484_v17 = vpack.c.bf16 %v360_v11, %v360_v11  ;;  %v684_v30 = vsel %vm673_vm2, %v681_v2, %v683_v6  ;;  %vm294_vm12 = vcmp.ge.f32.partialorder %v69_v15, 0.0  ;;  %v10281_v47 = vld [vmem:[#allocation6 + $0x1b8] sm:$0xff]  ;;  %v71_v2 = vld [vmem:[#allocation3 + $0x48] sm:$0xff] }
  0x23   :  { %965 = vst [vmem:[#allocation2 + $0x2c] sm:$0xf] %v482_v48  ;;  %v485_v20 = vpack.c.bf16 %v362_v14, %v362_v14  ;;  %v806_v39 = vpack.c.bf16 %v682_v21, %v682_v21  ;;  %v807_v42 = vpack.c.bf16 %v684_v30, %v684_v30  ;;  %v521_v44 = vsel %vm512_vm10, %v518_v22, %v520_v23  ;;  %v10273_v51 = vld [vmem:[#allocation6 + $0x178] sm:$0xff] }
  0x24   :  { %2017 = vmatpush.bf16.msra.mxu0 %v10228_v53  ;;  %10727 = vmatpush.bf16.msra.mxu3 %v10228_v53  ;;  %1192 = vst [vmem:[#allocation2 + $0x18] sm:$0xf] %v803_v54  ;;  %v10285_v32 = vld [vmem:[#allocation2 + $0x18] sm:$0xf0]  ;;  %v11043_v45 = vsel %vm293_vm11, %v68_v61, %v309_v18  ;;  %v11045_v48 = vsel %vm294_vm12, %v69_v15, %v310_v31  ;;  %v87_v52 = vadd.s32 64, %v10927_v1  ;;  %v10256_v54 = vld [vmem:[#allocation6 + $0xf0] sm:$0xff] }
  0x25   :  { %10743 = vmatpush.bf16.msra.mxu2 %v10995_v56  ;;  %v8244_v29 = vld [vmem:[#allocation2] sm:$0xf]  ;;  %500 = vst [vmem:[#allocation2 + $0x70] sm:$0xf] %v484_v17  ;;  %v523_v50 = vsel %vm512_vm10, %v520_v23, %v522_v36  ;;  %v645_v53 = vpack.c.bf16 %v521_v44, %v521_v44  ;;  %v358_v61 = vsel %vm351_vm0, %v355_v33, %v357_v60  ;;  %v363_v62 = vrot.slane %v11043_v45, 2  ;;  %v10280_v33 = vld [vmem:[#allocation6 + $0x1b0] sm:$0xff] }
  0x26   :  { %10735 = vmatpush.bf16.msra.mxu1 %v10997_v57  ;;  %2554 = vst [vmem:[#allocation2] sm:$0xf] %v10893_v35  ;;  %v8245_v46 = vor.u32 %v10285_v32, %v8244_v29  ;;  %v685_v11 = vrot.slane %v11043_v45, 6  ;;  %v687_v14 = vrot.slane %v11045_v48, 6  ;;  %vm295_vm13 = vcmp.ge.f32.partialorder %v70_v49, 0.0  ;;  %v10272_v60 = vld [vmem:[#allocation6 + $0x170] sm:$0xff] }
  0x27   :  { %501 = vst [vmem:[#allocation2 + $0x8c] sm:$0xf] %v485_v20  ;;  %v483_v21 = vpack.c.bf16 %v358_v61, %v358_v61  ;;  %v364_v23 = vsel %vm351_vm0, %v361_v63, %v363_v62  ;;  %v311_v29 = vmul.f32 0.15, %v70_v49  ;;  %v10255_v32 = vld [vmem:[#allocation6 + $0xe8] sm:$0xff]  ;;  %vm296_vm14 = vcmp.ge.f32.partialorder %v71_v2, 0.0 }
  0x28   :  { %2018 = vmatpush.bf16.msra.mxu0 %v10227_v9  ;;  %10728 = vmatpush.bf16.msra.mxu3 %v10227_v9  ;;  %967 = vst [vmem:[#allocation2 + $0x64] sm:$0xf] %v484_v17  ;;  %v365_v9 = vrot.slane %v11045_v48, 2  ;;  %v646_v17 = vpack.c.bf16 %v523_v50, %v523_v50  ;;  %v526_v50 = vrot.slane %v11045_v48, 4 }
  0x29   :  { %10744 = vmatpush.bf16.msra.mxu2 %v11011_v10  ;;  %968 = vst [vmem:[#allocation2 + $0x80] sm:$0xf] %v485_v20  ;;  %v11077_v44 = vsel %vm295_vm13, %v70_v49, %v311_v29  ;;  %v688_v49 = vsel %vm673_vm2, %v685_v11, %v687_v14 }
  0x2a   :  { %10736 = vmatpush.bf16.msra.mxu1 %v11021_v16  ;;  %822 = vst [vmem:[#allocation2 + $0x78] sm:$0xf] %v806_v39  ;;  %v366_v31 = vsel %vm351_vm0, %v363_v62, %v365_v9 }
  0x2b   :  { %823 = vst [vmem:[#allocation2 + $0x94] sm:$0xf] %v807_v42 }
  0x2c   :  { %2019 = vmatpush.bf16.msra.mxu0 %v10226_v19  ;;  %10729 = vmatpush.bf16.msra.mxu3 %v10226_v19  ;;  %1195 = vst [vmem:[#allocation2 + $0x6c] sm:$0xf] %v806_v39  ;;  %v8300_v18 = vld [vmem:[#allocation2 + $0x70] sm:$0xf]  ;;  %v11067_v19 = vand.u32 63, %v87_v52  ;;  %v487_v52 = vpack.c.bf16 %v366_v31, %v366_v31 }
  0x2d   :  { %10745 = vmatpush.bf16.msra.mxu2 %v11035_v37  ;;  %v11063_v15 = vld [vmem:[#allocation2] sm:$0xf]  ;;  %1196 = vst [vmem:[#allocation2 + $0x88] sm:$0xf] %v807_v42  ;;  %v312_v39 = vmul.f32 0.15, %v71_v2 }
  0x2e   :  { %10737 = vmatpush.bf16.msra.mxu1 %v11037_v38  ;;  %4297 = vst [vmem:[#allocation2] sm:$0xf] %v10893_v35  ;;  %v10299_v20 = vld [vmem:[#allocation2 + $0x88] sm:$0xf0]  ;;  %v8272_v31 = vld [vmem:[#allocation2 + $0x38] sm:$0xf] }
  0x2f   :  { %2020 = vmatmul.bf16.vlgmr.msra.gmra.mxu0 %v8245_v46  ;;  %v8301_v30 = vor.u32 %v10299_v20, %v8300_v18  ;;  %661 = vst [vmem:[#allocation2 + $0x74] sm:$0xf] %v645_v53  ;;  %v10279_v42 = vld [vmem:[#allocation6 + $0x1a8] sm:$0xff]  ;;  %v486_v46 = vpack.c.bf16 %v364_v23, %v364_v23  ;;  %v11092_v62 = vsel %vm296_vm14, %v71_v2, %v312_v39 }
  0x30   :  { %2159 = vmatpush.bf16.msrb.mxu3 %v10257_v43  ;;  %2061 = vmatpush.bf16.msrb.mxu0 %v10931_v4  ;;  %v86_v4 = vadd.s32 56, %v10927_v1  ;;  %662 = vst [vmem:[#allocation2 + $0x90] sm:$0xf] %v646_v17  ;;  %v72_v43 = vld [vmem:[#allocation3 + $0x50] sm:$0xff]  ;;  %v369_v20 = vrot.slane %v11092_v62, 2 }
  0x31   :  { %2306 = vmatpush.bf16.msrb.mxu2 %v10281_v47  ;;  %2030 = vmatmul.bf16.vlgmr.msra.gmra.mxu3 %v8301_v30  ;;  %v8308_v63 = vld [vmem:[#allocation2 + $0x78] sm:$0xf]  ;;  %1081 = vst [vmem:[#allocation2 + $0x68] sm:$0xf] %v645_v53  ;;  %v524_v47 = vrot.slane %v11043_v45, 4  ;;  %v408_v53 = vadd.s32 4294967290, %v11067_v19 }
  0x32   :  { %2257 = vmatpush.bf16.msrb.mxu1 %v10273_v51  ;;  %v10300_v51 = vld [vmem:[#allocation2 + $0x90] sm:$0xf0]  ;;  %1082 = vst [vmem:[#allocation2 + $0x84] sm:$0xf] %v646_v17  ;;  %v367_v17 = vrot.slane %v11077_v44, 2  ;;  %vm297_vm15 = vcmp.ge.f32.partialorder %v72_v43, 0.0 }
  0x33   :  { %v8309_v61 = vor.u32 %v10300_v51, %v8308_v63  ;;  %499 = vst [vmem:[#allocation2 + $0x54] sm:$0xf] %v483_v21  ;;  %v525_v2 = vsel %vm512_vm10, %v522_v36, %v524_v47  ;;  %vm424_vm1 = vcmp.ge.s32.totalorder %v408_v53, 0  ;;  %v513_v51 = vrot.slane %v10956_v26, 4 }
  0x34   :  { %2062 = vmatpush.bf16.msrb.mxu0 %v10940_v8  ;;  %2160 = vmatpush.bf16.msrb.mxu3 %v10256_v54  ;;  %v686_v8 = vsel %vm673_vm2, %v683_v6, %v685_v11  ;;  %v11087_v54 = vand.u32 63, %v86_v4  ;;  %v313_v6 = vmul.f32 0.15, %v72_v43  ;;  %966 = vst [vmem:[#allocation2 + $0x48] sm:$0xf] %v483_v21  ;;  %v689_v11 = vrot.slane %v11077_v44, 6 }
  0x35   :  { %2307 = vmatpush.bf16.msrb.mxu2 %v10280_v33  ;;  %v730_v33 = vadd.s32 4294967294, %v11067_v19  ;;  %502 = vst [vmem:[#allocation2 + $0xa8] sm:$0xf] %v486_v46  ;;  %v527_v4 = vsel %vm512_vm10, %v524_v47, %v526_v50  ;;  %v368_v29 = vsel %vm351_vm0, %v365_v9, %v367_v17 }
  0x36   :  { %2258 = vmatpush.bf16.msrb.mxu1 %v10272_v60  ;;  %2128 = vmatmul.bf16.vlgmr.msra.gmra.mxu2 %v8309_v61  ;;  %v808_v60 = vpack.c.bf16 %v686_v8, %v686_v8  ;;  %v10296_v18 = vld [vmem:[#allocation2 + $0x74] sm:$0xf]  ;;  %503 = vst [vmem:[#allocation2 + $0xc4] sm:$0xf] %v487_v52  ;;  %v11105_v23 = vsel %vm297_vm15, %v72_v43, %v313_v6  ;;  %v875_v30 = vadd.s32 2, %v11087_v54  ;;  %v472_v63 = vsel %vm424_vm1, %v368_v29, 0.0 }
  0x37   :  { %v8302_v21 = vld [vmem:[#allocation2 + $0x8c] sm:$0xf0]  ;;  %969 = vst [vmem:[#allocation2 + $0x9c] sm:$0xf] %v486_v46  ;;  %vm746_vm3 = vcmp.ge.s32.totalorder %v730_v33, 0  ;;  %v648_v9 = vpack.c.bf16 %v527_v4, %v527_v4  ;;  %v371_v43 = vrot.slane %v11105_v23, 2  ;;  %v488_v53 = vpack.c.bf16 %v472_v63, %v472_v63 }
  0x38   :  { %2063 = vmatpush.bf16.msrb.mxu0 %v10948_v13  ;;  %2161 = vmatpush.bf16.msrb.mxu3 %v10255_v32  ;;  %v809_v13 = vpack.c.bf16 %v688_v49, %v688_v49  ;;  %v8305_v36 = vor.u32 %v10296_v18, %v8302_v21  ;;  %970 = vst [vmem:[#allocation2 + $0xb8] sm:$0xf] %v487_v52  ;;  %v691_v8 = vrot.slane %v11092_v62, 6  ;;  %vm907_vm4 = vcmp.lt.s32.totalorder %v875_v30, 64  ;;  %v10271_v52 = vld [vmem:[#allocation6 + $0x168] sm:$0xff]  ;;  %v10254_v6 = vld [vmem:[#allocation6 + $0xe0] sm:$0xff] }
  0x39   :  { %2308 = vmatpush.bf16.msrb.mxu2 %v10279_v42  ;;  %v11116_v32 = vsel %vm673_vm2, %v687_v14, %v689_v11  ;;  %824 = vst [vmem:[#allocation2 + $0xb0] sm:$0xf] %v808_v60  ;;  %v370_v42 = vsel %vm351_vm0, %v367_v17, %v369_v20  ;;  %v11125_v61 = vadd.s32 4294967292, %v10934_v5  ;;  %v939_v33 = vsel %vm907_vm4, %v368_v29, 0.0  ;;  %v10270_v18 = vld [vmem:[#allocation6 + $0x160] sm:$0xff] }
  0x3a   :  { %2079 = vmatmul.bf16.vlgmr.msra.gmra.mxu1 %v8305_v36  ;;  %v10292_v39 = vld [vmem:[#allocation2 + $0x50] sm:$0xf0]  ;;  %825 = vst [vmem:[#allocation2 + $0xcc] sm:$0xf] %v809_v13  ;;  %v794_v14 = vsel %vm746_vm3, %v11116_v32, 0.0  ;;  %v372_v5 = vsel %vm351_vm0, %v369_v20, %v371_v43  ;;  %v955_v21 = vpack.c.bf16 %v939_v33, %v939_v33  ;;  %v560_v29 = vsel %vm512_vm10, 0.0, %v513_v51 }
  0x3b   :  { %v8273_v46 = vor.u32 %v10292_v39, %v8272_v31  ;;  %1197 = vst [vmem:[#allocation2 + $0xa4] sm:$0xf] %v808_v60  ;;  %2259 = vmatpush.bf16.msrb.mxu1 %v10271_v52  ;;  %v10278_v60 = vld [vmem:[#allocation6 + $0x1a0] sm:$0xff]  ;;  %v810_v26 = vpack.c.bf16 %v794_v14, %v794_v14  ;;  %vm577_vm5 = vcmp.ge.s32.totalorder %v11125_v61, 0  ;;  %v514_v20 = vrot.slane %v10959_v27, 4  ;;  %v73_v36 = vld [vmem:[#allocation3 + $0x58] sm:$0xff] }
  0x3c   :  { %2064 = vmatpush.bf16.msrb.mxu0 %v10954_v25  ;;  %v647_v25 = vpack.c.bf16 %v525_v2, %v525_v2  ;;  %v8328_v47 = vld [vmem:[#allocation2 + $0xa8] sm:$0xf]  ;;  %1198 = vst [vmem:[#allocation2 + $0xc0] sm:$0xf] %v809_v13  ;;  %2162 = vmatpush.bf16.msrb.mxu3 %v10254_v6  ;;  %v842_v2 = vpack.c.bf16 %v11077_v44, %v11077_v44  ;;  %v11144_v39 = vadd.s32 4294967292, %v11067_v19  ;;  %v625_v63 = vsel %vm577_vm5, %v560_v29, 0.0 }
  0x3d   :  { %v10306_v49 = vld [vmem:[#allocation2 + $0xc0] sm:$0xf0]  ;;  %664 = vst [vmem:[#allocation2 + $0xc8] sm:$0xf] %v648_v9  ;;  %2309 = vmatpush.bf16.msrb.mxu2 %v10278_v60  ;;  %v490_v31 = vpack.c.bf16 %v372_v5, %v372_v5  ;;  %v314_v14 = vmul.f32 0.15, %v73_v36 }
  0x3e   :  { %663 = vst [vmem:[#allocation2 + $0xac] sm:$0xf] %v647_v25  ;;  %v8329_v17 = vor.u32 %v10306_v49, %v8328_v47  ;;  %v515_v47 = vsel %vm512_vm10, %v513_v51, %v514_v20  ;;  %vm298_vm6 = vcmp.ge.f32.partialorder %v73_v36, 0.0  ;;  %vm585_vm7 = vcmp.ge.s32.totalorder %v11144_v39, 0  ;;  %v10253_v52 = vld [vmem:[#allocation6 + $0xd8] sm:$0xff] }
  0x3f   :  { %2025 = vmatmul.bf16.gmra.mxu0 %v8273_v46  ;;  %1083 = vst [vmem:[#allocation2 + $0xa0] sm:$0xf] %v647_v25  ;;  %2260 = vmatpush.bf16.msrb.mxu1 %v10270_v18  ;;  %v528_v25 = vrot.slane %v11077_v44, 4  ;;  %v530_v44 = vrot.slane %v11092_v62, 4  ;;  %v11164_v6 = vsel %vm298_vm6, %v73_v36, %v314_v14  ;;  %v10277_v18 = vld [vmem:[#allocation6 + $0x198] sm:$0xff] }
  0x40   :  { %2065 = vmatpush.bf16.msrb.mxu0 %v10979_v41  ;;  %v489_v41 = vpack.c.bf16 %v370_v42, %v370_v42  ;;  %v8336_v13 = vld [vmem:[#allocation2 + $0xb0] sm:$0xf]  ;;  %1084 = vst [vmem:[#allocation2 + $0xbc] sm:$0xf] %v648_v9  ;;  %v516_v42 = vrot.slane %v10962_v28, 4  ;;  %2163 = vmatpush.bf16.msrb.mxu3 %v10253_v52  ;;  %v534_v52 = vrot.slane %v11164_v6, 4 }
  0x41   :  { %2035 = vmatmul.bf16.gmra.mxu3 %v8329_v17  ;;  %v10307_v4 = vld [vmem:[#allocation2 + $0xc8] sm:$0xf0]  ;;  %504 = vst [vmem:[#allocation2 + $0xe0] sm:$0xf] %v488_v53  ;;  %v11154_v19 = vsel %vm512_vm10, %v526_v50, %v528_v25  ;;  %v641_v53 = vpack.c.bf16 %v625_v63, %v625_v63  ;;  %v532_v50 = vrot.slane %v11105_v23, 4  ;;  %v531_v60 = vsel %vm512_vm10, %v528_v25, %v530_v44 }
  0x42   :  { %v8337_v30 = vor.u32 %v10307_v4, %v8336_v13  ;;  %505 = vst [vmem:[#allocation2 + $0xfc] sm:$0xf] %v489_v41  ;;  %v517_v51 = vsel %vm512_vm10, %v514_v20, %v516_v42  ;;  %v10252_v13 = vld [vmem:[#allocation6 + $0xd0] sm:$0xff]  ;;  %v650_v29 = vpack.c.bf16 %v531_v60, %v531_v60  ;;  %2310 = vmatpush.bf16.msrb.mxu2 %v10277_v18  ;;  %v695_v63 = vrot.slane %v11164_v6, 6  ;;  %v8252_v27 = vld [vmem:[#allocation2 + $0x8] sm:$0xf] }
  0x43   :  { %826 = vst [vmem:[#allocation2 + $0xe8] sm:$0xf] %v810_v26  ;;  %v643_v33 = vpack.c.bf16 %v517_v51, %v517_v51  ;;  %v10269_v26 = vld [vmem:[#allocation6 + $0x158] sm:$0xff] }
  0x44   :  { %2066 = vmatpush.bf16.msrb.mxu0 %v10997_v57  ;;  %v692_v57 = vsel %vm673_vm2, %v689_v11, %v691_v8  ;;  %858 = vst [vmem:[#allocation2 + $0xec] sm:$0xf] %v842_v2  ;;  %v8330_v46 = vld [vmem:[#allocation2 + $0xc4] sm:$0xf0]  ;;  %v533_v2 = vsel %vm512_vm10, %v530_v44, %v532_v50  ;;  %2261 = vmatpush.bf16.msrb.mxu1 %v10269_v26  ;;  %v77_v26 = vld [vmem:[#allocation3 + $0x78] sm:$0xff] }
  0x45   :  { %v10303_v11 = vld [vmem:[#allocation2 + $0xac] sm:$0xf]  ;;  %v811_v9 = vpack.c.bf16 %v692_v57, %v692_v57  ;;  %971 = vst [vmem:[#allocation2 + $0xd4] sm:$0xf] %v955_v21  ;;  %v74_v57 = vld [vmem:[#allocation3 + $0x60] sm:$0xff]  ;;  %2164 = vmatpush.bf16.msrb.mxu3 %v10252_v13  ;;  %v651_v20 = vpack.c.bf16 %v533_v2, %v533_v2  ;;  %vm302_vm12 = vcmp.ge.f32.partialorder %v77_v26, 0.0 }
  0x46   :  { %2133 = vmatmul.bf16.gmra.mxu2 %v8337_v30  ;;  %972 = vst [vmem:[#allocation2 + $0xf0] sm:$0xf] %v489_v41  ;;  %v633_v41 = vsel %vm585_vm7, %v11154_v19, 0.0  ;;  %v75_v30 = vld [vmem:[#allocation3 + $0x68] sm:$0xff]  ;;  %vm299_vm8 = vcmp.ge.f32.partialorder %v74_v57, 0.0 }
  0x47   :  { %506 = vst [vmem:[#allocation2 + $0x118] sm:$0xf] %v490_v31  ;;  %v649_v4 = vpack.c.bf16 %v633_v41, %v633_v41  ;;  %vm300_vm9 = vcmp.ge.f32.partialorder %v75_v30, 0.0  ;;  %v535_v41 = vsel %vm512_vm10, %v532_v50, %v534_v52 }
  0x48   :  { %2067 = vmatpush.bf16.msrb.mxu0 %v11021_v16  ;;  %v8333_v16 = vor.u32 %v10303_v11, %v8330_v46  ;;  %v8356_v49 = vld [vmem:[#allocation2 + $0xe0] sm:$0xf]  ;;  %827 = vst [vmem:[#allocation2 + $0x104] sm:$0xf] %v811_v9  ;;  %v693_v11 = vrot.slane %v11105_v23, 6  ;;  %v652_v2 = vpack.c.bf16 %v535_v41, %v535_v41 }
  0x49   :  { %2562 = vst [vmem:[#allocation2 + $0xe0] sm:$0xf] %v10893_v35  ;;  %v10313_v17 = vld [vmem:[#allocation2 + $0xf8] sm:$0xf0] }
  0x4a   :  { %2084 = vmatmul.bf16.gmra.mxu1 %v8333_v16  ;;  %973 = vst [vmem:[#allocation2 + $0x10c] sm:$0xf] %v490_v31  ;;  %v8357_v5 = vor.u32 %v10313_v17, %v8356_v49  ;;  %v8364_v21 = vld [vmem:[#allocation2 + $0xe8] sm:$0xf]  ;;  %v315_v31 = vmul.f32 0.15, %v74_v57  ;;  %v694_v44 = vsel %vm673_vm2, %v691_v8, %v693_v11 }
  0x4b   :  { %1200 = vst [vmem:[#allocation2 + $0xf8] sm:$0xf] %v811_v9  ;;  %v316_v9 = vmul.f32 0.15, %v75_v30 }
  0x4c   :  { %2068 = vmatpush.bf16.msrb.mxu0 %v11037_v38  ;;  %v642_v38 = vpack.c.bf16 %v515_v47, %v515_v47  ;;  %657 = vst [vmem:[#allocation2 + $0x4] sm:$0xf] %v641_v53  ;;  %v11190_v16 = vsel %vm299_vm8, %v74_v57, %v315_v31  ;;  %v812_v53 = vpack.c.bf16 %v694_v44, %v694_v44 }
  0x4d   :  { %659 = vst [vmem:[#allocation2 + $0x3c] sm:$0xf] %v643_v33  ;;  %v11196_v49 = vsel %vm300_vm9, %v75_v30, %v316_v9  ;;  %v697_v18 = vrot.slane %v11190_v16, 6  ;;  %v318_v30 = vmul.f32 0.15, %v77_v26 }
  0x4e   :  { %658 = vst [vmem:[#allocation2 + $0x20] sm:$0xf] %v642_v38  ;;  %v8384_v13 = vld [vmem:[#allocation2 + $0x118] sm:$0xf] }
  0x4f   :  { %1078 = vst [vmem:[#allocation2 + $0x14] sm:$0xf] %v642_v38  ;;  %v377_v38 = vrot.slane %v11196_v49, 2 }
  0x50   :  { %2110 = vmatpush.bf16.msra.mxu0 %v10929_v3  ;;  %v373_v3 = vrot.slane %v11164_v6, 2  ;;  %1079 = vst [vmem:[#allocation2 + $0x30] sm:$0xf] %v643_v33  ;;  %v76_v33 = vld [vmem:[#allocation3 + $0x70] sm:$0xff] }
  0x51   :  { %2040 = vmatmul.bf16.gmra.mxu3 %v8357_v5  ;;  %665 = vst [vmem:[#allocation2 + $0xe4] sm:$0xf] %v649_v4  ;;  %v699_v5 = vrot.slane %v11196_v49, 6  ;;  %v10276_v4 = vld [vmem:[#allocation6 + $0x190] sm:$0xff]  ;;  %vm301_vm11 = vcmp.ge.f32.partialorder %v76_v33, 0.0 }
  0x52   :  { %v374_v36 = vsel %vm351_vm0, %v371_v43, %v373_v3  ;;  %666 = vst [vmem:[#allocation2 + $0x100] sm:$0xf] %v650_v29  ;;  %v519_v43 = vsel %vm512_vm10, %v516_v42, %v518_v22  ;;  %v696_v42 = vsel %vm673_vm2, %v693_v11, %v695_v63  ;;  %v317_v57 = vmul.f32 0.15, %v76_v33  ;;  %2311 = vmatpush.bf16.msrb.mxu2 %v10276_v4 }
  0x53   :  { %v10282_v46 = vld [vmem:[#allocation2 + $0x4] sm:$0xf]  ;;  %1086 = vst [vmem:[#allocation2 + $0xf4] sm:$0xf] %v650_v29  ;;  %v644_v22 = vpack.c.bf16 %v519_v43, %v519_v43  ;;  %v813_v17 = vpack.c.bf16 %v696_v42, %v696_v42  ;;  %v10251_v29 = vld [vmem:[#allocation6 + $0xc8] sm:$0xff]  ;;  %v700_v9 = vsel %vm673_vm2, %v697_v18, %v699_v5  ;;  %v10265_v43 = vld [vmem:[#allocation6 + $0x138] sm:$0xff] }
  0x54   :  { %2111 = vmatpush.bf16.msra.mxu0 %v10938_v7  ;;  %v10314_v7 = vld [vmem:[#allocation2 + $0x100] sm:$0xf0]  ;;  %2660 = vst [vmem:[#allocation2 + $0x4] sm:$0xf] %v10893_v35  ;;  %2165 = vmatpush.bf16.msrb.mxu3 %v10251_v29  ;;  %v10289_v11 = vld [vmem:[#allocation2 + $0x3c] sm:$0xf] }
  0x55   :  { %v8365_v25 = vor.u32 %v10314_v7, %v8364_v21  ;;  %v8246_v14 = vld [vmem:[#allocation2 + $0x1c] sm:$0xf0]  ;;  %667 = vst [vmem:[#allocation2 + $0x11c] sm:$0xf] %v651_v20  ;;  %v10268_v21 = vld [vmem:[#allocation6 + $0x150] sm:$0xff] }
  0x56   :  { %v8249_v47 = vor.u32 %v10282_v46, %v8246_v14  ;;  %1087 = vst [vmem:[#allocation2 + $0x110] sm:$0xf] %v651_v20  ;;  %v698_v20 = vsel %vm673_vm2, %v695_v63, %v697_v18  ;;  %2262 = vmatpush.bf16.msrb.mxu1 %v10268_v21  ;;  %v538_v63 = vrot.slane %v11196_v49, 4  ;;  %v11225_v46 = vsel %vm301_vm11, %v76_v33, %v317_v57  ;;  %v10264_v33 = vld [vmem:[#allocation6 + $0x130] sm:$0xff] }
  0x57   :  { %2138 = vmatmul.bf16.gmra.mxu2 %v8365_v25  ;;  %660 = vst [vmem:[#allocation2 + $0x58] sm:$0xf] %v644_v22  ;;  %v536_v25 = vrot.slane %v11190_v16, 4  ;;  %v11228_v14 = vsel %vm302_vm12, %v77_v26, %v318_v30  ;;  %v677_v26 = vrot.slane %v10962_v28, 6  ;;  %v701_v29 = vrot.slane %v11225_v46, 6 }
  0x58   :  { %2112 = vmatpush.bf16.msra.mxu0 %v10946_v12  ;;  %v491_v12 = vpack.c.bf16 %v374_v36, %v374_v36  ;;  %v10310_v51 = vld [vmem:[#allocation2 + $0xe4] sm:$0xf]  ;;  %1080 = vst [vmem:[#allocation2 + $0x4c] sm:$0xf] %v644_v22  ;;  %v10275_v36 = vld [vmem:[#allocation6 + $0x188] sm:$0xff]  ;;  %v815_v22 = vpack.c.bf16 %v700_v9, %v700_v9 }
  0x59   :  { %2069 = vmatmul.bf16.vlgmr.msrb.gmra.mxu0 %v8249_v47  ;;  %v8358_v8 = vld [vmem:[#allocation2 + $0xfc] sm:$0xf0]  ;;  %2668 = vst [vmem:[#allocation2 + $0xe4] sm:$0xf] %v10893_v35  ;;  %v814_v47 = vpack.c.bf16 %v698_v20, %v698_v20  ;;  %2312 = vmatpush.bf16.msrb.mxu2 %v10275_v36  ;;  %v537_v42 = vsel %vm512_vm10, %v534_v52, %v536_v25 }
  0x5a   :  { %507 = vst [vmem:[#allocation2 + $0x134] sm:$0xf] %v491_v12  ;;  %v8361_v60 = vor.u32 %v10310_v51, %v8358_v8  ;;  %v381_v8 = vrot.slane %v11228_v14, 2  ;;  %v680_v30 = vsel %vm673_vm2, %v677_v26, %v679_v0  ;;  %v10250_v20 = vld [vmem:[#allocation6 + $0xc0] sm:$0xff]  ;;  %v702_v0 = vsel %vm673_vm2, %v699_v5, %v701_v29 }
  0x5b   :  { %974 = vst [vmem:[#allocation2 + $0x128] sm:$0xf] %v491_v12  ;;  %2166 = vmatpush.bf16.msrb.mxu3 %v10250_v20  ;;  %v805_v9 = vpack.c.bf16 %v680_v30, %v680_v30 }
  0x5c   :  { %2113 = vmatpush.bf16.msra.mxu0 %v10952_v24  ;;  %v375_v24 = vrot.slane %v11190_v16, 2  ;;  %2089 = vmatmul.bf16.gmra.mxu1 %v8361_v60  ;;  %828 = vst [vmem:[#allocation2 + $0x120] sm:$0xf] %v812_v53  ;;  %v10317_v41 = vld [vmem:[#allocation2 + $0x11c] sm:$0xf]  ;;  %v653_v60 = vpack.c.bf16 %v537_v42, %v537_v42  ;;  %v816_v42 = vpack.c.bf16 %v702_v0, %v702_v0 }
  0x5d   :  { %829 = vst [vmem:[#allocation2 + $0x13c] sm:$0xf] %v813_v17 }
  0x5e   :  { %v378_v50 = vsel %vm351_vm0, %v375_v24, %v377_v38  ;;  %1201 = vst [vmem:[#allocation2 + $0x114] sm:$0xf] %v812_v53  ;;  %v8274_v12 = vld [vmem:[#allocation2 + $0x54] sm:$0xf0]  ;;  %v539_v53 = vsel %vm512_vm10, %v536_v25, %v538_v63  ;;  %v10266_v25 = vld [vmem:[#allocation6 + $0x140] sm:$0xff] }
  0x5f   :  { %1202 = vst [vmem:[#allocation2 + $0x130] sm:$0xf] %v813_v17  ;;  %v493_v31 = vpack.c.bf16 %v378_v50, %v378_v50  ;;  %v654_v18 = vpack.c.bf16 %v539_v53, %v539_v53 }
  0x60   :  { %2114 = vmatpush.bf16.msra.mxu0 %v10977_v40  ;;  %v376_v40 = vsel %vm351_vm0, %v373_v3, %v375_v24  ;;  %668 = vst [vmem:[#allocation2 + $0x138] sm:$0xf] %v652_v2  ;;  %v379_v24 = vrot.slane %v11225_v46, 2 }
  0x61   :  { %v10320_v7 = vld [vmem:[#allocation2 + $0x130] sm:$0xf0]  ;;  %v492_v3 = vpack.c.bf16 %v376_v40, %v376_v40  ;;  %1088 = vst [vmem:[#allocation2 + $0x12c] sm:$0xf] %v652_v2  ;;  %v10263_v2 = vld [vmem:[#allocation6 + $0x128] sm:$0xff] }
  0x62   :  { %509 = vst [vmem:[#allocation2 + $0x16c] sm:$0xf] %v493_v31  ;;  %v382_v40 = vsel %vm351_vm0, %v379_v24, %v381_v8 }
  0x63   :  { %508 = vst [vmem:[#allocation2 + $0x150] sm:$0xf] %v492_v3  ;;  %v8392_v44 = vld [vmem:[#allocation2 + $0x120] sm:$0xf]  ;;  %v495_v21 = vpack.c.bf16 %v382_v40, %v382_v40  ;;  %v836_v40 = vpack.c.bf16 %v10962_v28, %v10962_v28 }
  0x64   :  { %2115 = vmatpush.bf16.msra.mxu0 %v10995_v56  ;;  %v8385_v56 = vor.u32 %v10320_v7, %v8384_v13  ;;  %v10321_v51 = vld [vmem:[#allocation2 + $0x138] sm:$0xf0]  ;;  %975 = vst [vmem:[#allocation2 + $0x144] sm:$0xf] %v492_v3  ;;  %v703_v7 = vrot.slane %v11228_v14, 6  ;;  %v10267_v3 = vld [vmem:[#allocation6 + $0x148] sm:$0xff] }
  0x65   :  { %v8393_v17 = vor.u32 %v10321_v51, %v8392_v44  ;;  %976 = vst [vmem:[#allocation2 + $0x160] sm:$0xf] %v493_v31  ;;  %v10274_v31 = vld [vmem:[#allocation6 + $0x180] sm:$0xff]  ;;  %2263 = vmatpush.bf16.msrb.mxu1 %v10267_v3 }
  0x66   :  { %2045 = vmatmul.bf16.gmra.mxu3 %v8385_v56  ;;  %830 = vst [vmem:[#allocation2 + $0x158] sm:$0xf] %v814_v47  ;;  %v10262_v56 = vld [vmem:[#allocation6 + $0x120] sm:$0xff]  ;;  %2313 = vmatpush.bf16.msrb.mxu2 %v10274_v31  ;;  %v704_v44 = vsel %vm673_vm2, %v701_v29, %v703_v7 }
  0x67   :  { %2143 = vmatmul.bf16.gmra.mxu2 %v8393_v17  ;;  %v8386_v52 = vld [vmem:[#allocation2 + $0x134] sm:$0xf0]  ;;  %831 = vst [vmem:[#allocation2 + $0x174] sm:$0xf] %v815_v22  ;;  %v817_v51 = vpack.c.bf16 %v704_v44, %v704_v44  ;;  %v8262_v44 = vld [vmem:[#allocation2 + $0x2c] sm:$0xf0] }
  0x68   :  { %2116 = vmatpush.bf16.msra.mxu0 %v11011_v10  ;;  %v8277_v10 = vor.u32 %v10289_v11, %v8274_v12  ;;  %v8389_v13 = vor.u32 %v10317_v41, %v8386_v52  ;;  %1203 = vst [vmem:[#allocation2 + $0x14c] sm:$0xf] %v814_v47  ;;  %v10286_v11 = vld [vmem:[#allocation2 + $0x20] sm:$0xf0]  ;;  %v540_v12 = vrot.slane %v11225_v46, 4  ;;  %v10260_v41 = vld [vmem:[#allocation6 + $0x110] sm:$0xff] }
  0x69   :  { %1204 = vst [vmem:[#allocation2 + $0x168] sm:$0xf] %v815_v22  ;;  %v10327_v4 = vld [vmem:[#allocation2 + $0x168] sm:$0xf0]  ;;  %v10261_v22 = vld [vmem:[#allocation6 + $0x118] sm:$0xff]  ;;  %2264 = vmatpush.bf16.msrb.mxu1 %v10266_v25  ;;  %v8253_v5 = vor.u32 %v10286_v11, %v8252_v27  ;;  %v838_v27 = vpack.c.bf16 %v11000_v58, %v11000_v58 }
  0x6a   :  { %2074 = vmatmul.bf16.gmra.mxu0 %v8277_v10  ;;  %v8412_v50 = vld [vmem:[#allocation2 + $0x150] sm:$0xf]  ;;  %669 = vst [vmem:[#allocation2 + $0x154] sm:$0xf] %v653_v60  ;;  %v541_v53 = vsel %vm512_vm10, %v538_v63, %v540_v12  ;;  %v10259_v63 = vld [vmem:[#allocation6 + $0x108] sm:$0xff] }
  0x6b   :  { %670 = vst [vmem:[#allocation2 + $0x170] sm:$0xf] %v654_v18  ;;  %v8413_v36 = vor.u32 %v10327_v4, %v8412_v50  ;;  %v655_v52 = vpack.c.bf16 %v541_v53, %v541_v53  ;;  %v10258_v4 = vld [vmem:[#allocation6 + $0x100] sm:$0xff]  ;;  %v8260_v25 = vld [vmem:[#allocation2 + $0x10] sm:$0xf] }
  0x6c   :  { %2117 = vmatpush.bf16.msra.mxu0 %v11035_v37  ;;  %v380_v37 = vsel %vm351_vm0, %v377_v38, %v379_v24  ;;  %v678_v38 = vsel %vm673_vm2, %v675_v34, %v677_v26  ;;  %2094 = vmatmul.bf16.gmra.mxu1 %v8389_v13  ;;  %1089 = vst [vmem:[#allocation2 + $0x148] sm:$0xf] %v653_v60  ;;  %v10287_v11 = vld [vmem:[#allocation2 + $0x28] sm:$0xf0] }
  0x6d   :  { %v494_v57 = vpack.c.bf16 %v380_v37, %v380_v37  ;;  %1090 = vst [vmem:[#allocation2 + $0x164] sm:$0xf] %v654_v18  ;;  %v804_v34 = vpack.c.bf16 %v678_v38, %v678_v38  ;;  %v8420_v47 = vld [vmem:[#allocation2 + $0x158] sm:$0xf] }
  0x6e   :  { %511 = vst [vmem:[#allocation2 + $0x1a4] sm:$0xf] %v495_v21  ;;  %v10328_v10 = vld [vmem:[#allocation2 + $0x170] sm:$0xf0] }
  0x6f   :  { %510 = vst [vmem:[#allocation2 + $0x188] sm:$0xf] %v494_v57  ;;  %v8421_v24 = vor.u32 %v10328_v10, %v8420_v47  ;;  %v10284_v10 = vld [vmem:[#allocation2 + $0x14] sm:$0xf] }
  0x70   :  { %2208 = vmatpush.bf16.msrb.mxu0 %v10265_v43  ;;  %v542_v43 = vrot.slane %v11228_v14, 4  ;;  %977 = vst [vmem:[#allocation2 + $0x17c] sm:$0xf] %v494_v57 }
  0x71   :  { %978 = vst [vmem:[#allocation2 + $0x198] sm:$0xf] %v495_v21 }
  0x72   :  { %820 = vst [vmem:[#allocation2 + $0x40] sm:$0xf] %v804_v34  ;;  %v543_v17 = vsel %vm512_vm10, %v540_v12, %v542_v43  ;;  %v8414_v60 = vld [vmem:[#allocation2 + $0x16c] sm:$0xf0]  ;;  %v8261_v12 = vor.u32 %v10287_v11, %v8260_v25  ;;  %v10298_v11 = vld [vmem:[#allocation2 + $0x84] sm:$0xf] }
  0x73   :  { %821 = vst [vmem:[#allocation2 + $0x5c] sm:$0xf] %v805_v9  ;;  %v656_v18 = vpack.c.bf16 %v543_v17, %v543_v17  ;;  %v8288_v17 = vld [vmem:[#allocation2 + $0x48] sm:$0xf] }
  0x74   :  { %2209 = vmatpush.bf16.msrb.mxu0 %v10264_v33  ;;  %1193 = vst [vmem:[#allocation2 + $0x34] sm:$0xf] %v804_v34  ;;  %v10324_v33 = vld [vmem:[#allocation2 + $0x154] sm:$0xf]  ;;  %v839_v34 = vpack.c.bf16 %v11003_v59, %v11003_v59  ;;  %v1103_v59 = vadd.s32 6, %v11087_v54 }
  0x75   :  { %1194 = vst [vmem:[#allocation2 + $0x50] sm:$0xf] %v805_v9  ;;  %v8417_v37 = vor.u32 %v10324_v33, %v8414_v60  ;;  %v10334_v13 = vld [vmem:[#allocation2 + $0x1a0] sm:$0xf0]  ;;  %v8268_v9 = vld [vmem:[#allocation2 + $0x18] sm:$0xf]  ;;  %v841_v33 = vpack.c.bf16 %v11045_v48, %v11045_v48 }
  0x76   :  { %2050 = vmatmul.bf16.gmra.mxu3 %v8413_v36  ;;  %832 = vst [vmem:[#allocation2 + $0x190] sm:$0xf] %v816_v42  ;;  %v8440_v26 = vld [vmem:[#allocation2 + $0x188] sm:$0xf]  ;;  %vm1135_vm13 = vcmp.lt.s32.totalorder %v1103_v59, 64 }
  0x77   :  { %2148 = vmatmul.bf16.gmra.mxu2 %v8421_v24  ;;  %833 = vst [vmem:[#allocation2 + $0x1ac] sm:$0xf] %v817_v51  ;;  %v8441_v50 = vor.u32 %v10334_v13, %v8440_v26  ;;  %v11278_v24 = vadd.s32 4, %v11087_v54  ;;  %v1167_v53 = vsel %vm1135_vm13, %v11116_v32, 0.0  ;;  %v10295_v26 = vld [vmem:[#allocation2 + $0x68] sm:$0xf0] }
  0x78   :  { %2210 = vmatpush.bf16.msrb.mxu0 %v10263_v2  ;;  %1205 = vst [vmem:[#allocation2 + $0x184] sm:$0xf] %v816_v42  ;;  %v837_v2 = vpack.c.bf16 %v10991_v55, %v10991_v55  ;;  %v10283_v55 = vld [vmem:[#allocation2 + $0xc] sm:$0xf]  ;;  %v8265_v42 = vor.u32 %v10284_v10, %v8262_v44  ;;  %v1183_v60 = vpack.c.bf16 %v1167_v53, %v1167_v53 }
  0x79   :  { %1206 = vst [vmem:[#allocation2 + $0x1a0] sm:$0xf] %v817_v51  ;;  %v8280_v57 = vld [vmem:[#allocation2 + $0x40] sm:$0xf]  ;;  %vm1021_vm14 = vcmp.lt.s32.totalorder %v11278_v24, 64 }
  0x7a   :  { %2118 = vmatmul.bf16.vlgmr.msra.gmra.mxu0 %v8253_v5  ;;  %671 = vst [vmem:[#allocation2 + $0x18c] sm:$0xf] %v655_v52  ;;  %v10293_v21 = vld [vmem:[#allocation2 + $0x58] sm:$0xf0]  ;;  %v1053_v54 = vsel %vm1021_vm14, %v11154_v19, 0.0 }
  0x7b   :  { %672 = vst [vmem:[#allocation2 + $0x1a8] sm:$0xf] %v656_v18  ;;  %v8281_v30 = vor.u32 %v10293_v21, %v8280_v57  ;;  %v10288_v0 = vld [vmem:[#allocation2 + $0x30] sm:$0xf0]  ;;  %v1069_v32 = vpack.c.bf16 %v1053_v54, %v1053_v54  ;;  %v10291_v13 = vld [vmem:[#allocation2 + $0x4c] sm:$0xf] }
  0x7c   :  { %2211 = vmatpush.bf16.msrb.mxu0 %v10262_v56  ;;  %2099 = vmatmul.bf16.gmra.mxu1 %v8417_v37  ;;  %1091 = vst [vmem:[#allocation2 + $0x180] sm:$0xf] %v655_v52  ;;  %v8254_v56 = vld [vmem:[#allocation2 + $0x24] sm:$0xf0]  ;;  %v8269_v47 = vor.u32 %v10288_v0, %v8268_v9  ;;  %v10294_v52 = vld [vmem:[#allocation2 + $0x60] sm:$0xf0] }
  0x7d   :  { %1092 = vst [vmem:[#allocation2 + $0x19c] sm:$0xf] %v656_v18  ;;  %v8448_v38 = vld [vmem:[#allocation2 + $0x190] sm:$0xf]  ;;  %v8257_v31 = vor.u32 %v10283_v55, %v8254_v56  ;;  %v10353_v18 = vld [vmem:[#allocation6 + $0x238] sm:$0xff] }
  0x7e   :  { %852 = vst [vmem:[#allocation2 + $0x44] sm:$0xf] %v836_v40  ;;  %v10335_v29 = vld [vmem:[#allocation2 + $0x1a8] sm:$0xf0]  ;;  %v10361_v37 = vld [vmem:[#allocation6 + $0x278] sm:$0xff] }
  0x7f   :  { %853 = vst [vmem:[#allocation2 + $0x60] sm:$0xf] %v837_v2  ;;  %v8449_v3 = vor.u32 %v10335_v29, %v8448_v38  ;;  %3926 = vmatpush.bf16.msra.mxu1 %v10361_v37  ;;  %v8290_v40 = vld [vmem:[#allocation2 + $0x64] sm:$0xf0]  ;;  %v10344_v2 = vld [vmem:[#allocation6 + $0x1f0] sm:$0xff] }
  0x80   :  { %2212 = vmatpush.bf16.msrb.mxu0 %v10261_v22  ;;  %854 = vst [vmem:[#allocation2 + $0x7c] sm:$0xf] %v838_v27  ;;  %v10345_v22 = vld [vmem:[#allocation6 + $0x1f8] sm:$0xff]  ;;  %v8324_v55 = vld [vmem:[#allocation2 + $0x88] sm:$0xf] }
  0x81   :  { %v10331_v20 = vld [vmem:[#allocation2 + $0x18c] sm:$0xf]  ;;  %855 = vst [vmem:[#allocation2 + $0x98] sm:$0xf] %v839_v34  ;;  %3828 = vmatpush.bf16.msra.mxu3 %v10345_v22  ;;  %v10302_v56 = vld [vmem:[#allocation2 + $0xa0] sm:$0xf0] }
  0x82   :  { %v8442_v36 = vld [vmem:[#allocation2 + $0x1a4] sm:$0xf0]  ;;  %857 = vst [vmem:[#allocation2 + $0xd0] sm:$0xf] %v841_v33  ;;  %v8325_v34 = vor.u32 %v10302_v56, %v8324_v55  ;;  %v8318_v9 = vld [vmem:[#allocation2 + $0x9c] sm:$0xf0]  ;;  %v846_v56 = vpack.c.bf16 %v11190_v16, %v11190_v16 }
  0x83   :  { %v8445_v28 = vor.u32 %v10331_v20, %v8442_v36  ;;  %1199 = vst [vmem:[#allocation2 + $0xdc] sm:$0xf] %v1183_v60  ;;  %v10301_v20 = vld [vmem:[#allocation2 + $0x98] sm:$0xf0]  ;;  %v10352_v36 = vld [vmem:[#allocation6 + $0x230] sm:$0xff]  ;;  %v10343_v22 = vld [vmem:[#allocation6 + $0x1e8] sm:$0xff] }
  0x84   :  { %2213 = vmatpush.bf16.msrb.mxu0 %v10260_v41  ;;  %v840_v41 = vpack.c.bf16 %v11043_v45, %v11043_v45  ;;  %v8289_v45 = vor.u32 %v10294_v52, %v8288_v17  ;;  %1085 = vst [vmem:[#allocation2 + $0xd8] sm:$0xf] %v1069_v32  ;;  %v844_v17 = vpack.c.bf16 %v11105_v23, %v11105_v23  ;;  %v8344_v60 = vld [vmem:[#allocation2 + $0xb8] sm:$0xf]  ;;  %v10308_v54 = vld [vmem:[#allocation2 + $0xd0] sm:$0xf0] }
  0x85   :  { %v10290_v58 = vld [vmem:[#allocation2 + $0x44] sm:$0xf]  ;;  %3829 = vmatpush.bf16.msra.mxu3 %v10344_v2  ;;  %v10359_v32 = vld [vmem:[#allocation6 + $0x268] sm:$0xff]  ;;  %862 = vst [vmem:[#allocation2 + $0x15c] sm:$0xf] %v846_v56 }
  0x86   :  { %2055 = vmatmul.bf16.gmra.mxu3 %v8441_v50  ;;  %v8282_v5 = vld [vmem:[#allocation2 + $0x5c] sm:$0xf0]  ;;  %856 = vst [vmem:[#allocation2 + $0xb4] sm:$0xf] %v840_v41  ;;  %v8293_v50 = vor.u32 %v10291_v13, %v8290_v40  ;;  %v845_v41 = vpack.c.bf16 %v11164_v6, %v11164_v6  ;;  %v10305_v13 = vld [vmem:[#allocation2 + $0xbc] sm:$0xf] }
  0x87   :  { %2153 = vmatmul.bf16.gmra.mxu2 %v8449_v3  ;;  %v8285_v51 = vor.u32 %v10290_v58, %v8282_v5  ;;  %v843_v3 = vpack.c.bf16 %v11092_v62, %v11092_v62  ;;  %860 = vst [vmem:[#allocation2 + $0x124] sm:$0xf] %v844_v17  ;;  %v10322_v56 = vld [vmem:[#allocation2 + $0x140] sm:$0xf0] }
  0x88   :  { %2214 = vmatpush.bf16.msrb.mxu0 %v10259_v63  ;;  %v8296_v63 = vld [vmem:[#allocation2 + $0x50] sm:$0xf]  ;;  %v8310_v57 = vld [vmem:[#allocation2 + $0x94] sm:$0xf0]  ;;  %861 = vst [vmem:[#allocation2 + $0x140] sm:$0xf] %v845_v41 }
  0x89   :  { %v8297_v48 = vor.u32 %v10295_v26, %v8296_v63  ;;  %859 = vst [vmem:[#allocation2 + $0x108] sm:$0xf] %v843_v3  ;;  %v8338_v5 = vld [vmem:[#allocation2 + $0xcc] sm:$0xf0]  ;;  %3830 = vmatpush.bf16.msra.mxu3 %v10343_v22  ;;  %v8352_v63 = vld [vmem:[#allocation2 + $0xc0] sm:$0xf] }
  0x8a   :  { %2123 = vmatmul.bf16.gmra.mxu0 %v8281_v30  ;;  %v11289_v19 = vld [vmem:[#allocation2 + $0xd8] sm:$0xf0]  ;;  %v8316_v30 = vld [vmem:[#allocation2 + $0x80] sm:$0xf]  ;;  %v10351_v26 = vld [vmem:[#allocation6 + $0x228] sm:$0xff] }
  0x8b   :  { %3013 = vst [vmem:[#allocation2 + $0xdc] sm:$0xf] %v10893_v35  ;;  %v11292_v21 = vld [vmem:[#allocation2 + $0xd4] sm:$0xf0]  ;;  %v8317_v27 = vor.u32 %v10301_v20, %v8316_v30  ;;  %v8353_v23 = vor.u32 %v11289_v19, %v8352_v63  ;;  %v10311_v20 = vld [vmem:[#allocation2 + $0xec] sm:$0xf] }
  0x8c   :  { %2215 = vmatpush.bf16.msrb.mxu0 %v10258_v4  ;;  %2104 = vmatmul.bf16.gmra.mxu1 %v8445_v28  ;;  %v10297_v4 = vld [vmem:[#allocation2 + $0x7c] sm:$0xf]  ;;  %2907 = vst [vmem:[#allocation2 + $0xd8] sm:$0xf] %v10893_v35  ;;  %v10360_v28 = vld [vmem:[#allocation6 + $0x270] sm:$0xff] }
  0x8d   :  { %v8313_v29 = vor.u32 %v10297_v4, %v8310_v57  ;;  %3927 = vmatpush.bf16.msra.mxu1 %v10360_v28  ;;  %v10304_v58 = vld [vmem:[#allocation2 + $0xb4] sm:$0xf] }
  0x8e   :  { %v8341_v53 = vor.u32 %v10304_v58, %v8338_v5  ;;  %v10312_v5 = vld [vmem:[#allocation2 + $0xf4] sm:$0xf] }
  0x8f   :  { %v8394_v63 = vld [vmem:[#allocation2 + $0x13c] sm:$0xf0] }
  0x90   :  { %3877 = vmatpush.bf16.msra.mxu0 %v10353_v18  ;;  %v8366_v19 = vld [vmem:[#allocation2 + $0x104] sm:$0xf0] }
  0x91   :  { %3928 = vmatpush.bf16.msra.mxu1 %v10359_v32  ;;  %v8369_v55 = vor.u32 %v10311_v20, %v8366_v19  ;;  %v10323_v20 = vld [vmem:[#allocation2 + $0x148] sm:$0xf0] }
  0x94   :  { %3878 = vmatpush.bf16.msra.mxu0 %v10352_v36 }
  0x96   :  { %2167 = vmatmul.bf16.vlgmr.msrb.gmra.mxu3 %v8257_v31  ;;  %v11299_v31 = vld [vmem:[#allocation8] ss:$0 sm:$0xff] }
  0x97   :  { %2314 = vmatmul.bf16.vlgmr.msrb.gmra.mxu2 %v8269_v47  ;;  %v8321_v47 = vor.u32 %v10298_v11, %v8318_v9 }
  0x98   :  { %3879 = vmatpush.bf16.msra.mxu0 %v10351_v26 }
  0x9a   :  { %2216 = vmatmul.bf16.vlgmr.msrb.gmra.mxu0 %v8261_v12 }
  0x9c   :  { %2265 = vmatmul.bf16.vlgmr.msrb.gmra.mxu1 %v8265_v42 }
  0xa6   :  { %2172 = vmatmul.bf16.gmra.mxu3 %v8285_v51 }
  0xa7   :  { %2319 = vmatmul.bf16.gmra.mxu2 %v8297_v48  ;;  %v8345_v48 = vor.u32 %v10308_v54, %v8344_v60  ;;  %v10341_v60 = vld [vmem:[#allocation6 + $0x1d8] sm:$0xff]  ;;  %v10318_v54 = vld [vmem:[#allocation2 + $0x124] sm:$0xf] }
  0xaa   :  { %2221 = vmatmul.bf16.gmra.mxu0 %v8289_v45 }
  0xac   :  { %2270 = vmatmul.bf16.gmra.mxu1 %v8293_v50  ;;  %v11295_v38 = vpop.f32.mrf.mxu0  ;;  %v8349_v50 = vor.u32 %v10305_v13, %v11292_v21  ;;  %v847_v21 = vpack.c.bf16 %v11196_v49, %v11196_v49  ;;  %v1095_v13 = vsel %vm673_vm2, %v703_v7, 0.0  ;;  %v981_v7 = vsel %vm512_vm10, %v542_v43, 0.0 }
  0xae   :  { %863 = vst [vmem:[#allocation2 + $0x178] sm:$0xf] %v847_v21 }
  0xb4   :  { %v2031_v25 = vpop.f32.mrf.mxu3  ;;  %v11302_v12 = vpop.f32.mrf.mxu0 }
  0xb5   :  { %v2032_v0 = vadd.f32 %v11299_v31, %v2031_v25  ;;  %v10315_v25 = vld [vmem:[#allocation2 + $0x108] sm:$0xf0] }
  0xb6   :  { %2177 = vmatmul.bf16.gmra.mxu3 %v8313_v29  ;;  %v10342_v29 = vld [vmem:[#allocation6 + $0x1e0] sm:$0xff] }
  0xb7   :  { %v2080_v62 = vpop.f32.mrf.mxu1  ;;  %2324 = vmatmul.bf16.gmra.mxu2 %v8325_v34  ;;  %3831 = vmatpush.bf16.msra.mxu3 %v10342_v29  ;;  %v8372_v34 = vld [vmem:[#allocation2 + $0xf0] sm:$0xf] }
  0xb8   :  { %v2081_v10 = vadd.f32 %v2080_v62, %v2032_v0  ;;  %v8380_v0 = vld [vmem:[#allocation2 + $0xf8] sm:$0xf]  ;;  %v10316_v62 = vld [vmem:[#allocation2 + $0x110] sm:$0xf0]  ;;  %v8373_v22 = vor.u32 %v10315_v25, %v8372_v34 }
  0xb9   :  { %v2129_v44 = vpop.f32.mrf.mxu2  ;;  %v8381_v58 = vor.u32 %v10316_v62, %v8380_v0  ;;  %v10357_v34 = vld [vmem:[#allocation6 + $0x258] sm:$0xff]  ;;  %v10319_v62 = vld [vmem:[#allocation2 + $0x12c] sm:$0xf] }
  0xba   :  { %2226 = vmatmul.bf16.gmra.mxu0 %v8317_v27  ;;  %v11304_v42 = vadd.f32 %v2129_v44, %v2081_v10  ;;  %v10358_v10 = vld [vmem:[#allocation6 + $0x260] sm:$0xff] }
  0xbb   :  { %3929 = vmatpush.bf16.msra.mxu1 %v10358_v10  ;;  %3832 = vmatpush.bf16.msra.mxu3 %v10341_v60 }
  0xbc   :  { %2275 = vmatmul.bf16.gmra.mxu1 %v8321_v47  ;;  %v2033_v59 = vpop.f32.mrf.mxu3  ;;  %v11311_v37 = vpop.f32.mrf.mxu0  ;;  %v10350_v47 = vld [vmem:[#allocation6 + $0x220] sm:$0xff] }
  0xbd   :  { %v2034_v51 = vadd.f32 %v11299_v31, %v2033_v59  ;;  %3880 = vmatpush.bf16.msra.mxu0 %v10350_v47  ;;  %v8374_v59 = vld [vmem:[#allocation2 + $0x10c] sm:$0xf0]  ;;  %v8402_v47 = vld [vmem:[#allocation2 + $0x144] sm:$0xf0] }
  0xbe   :  { %v8377_v17 = vor.u32 %v10312_v5, %v8374_v59 }
  0xbf   :  { %v2082_v33 = vpop.f32.mrf.mxu1  ;;  %3930 = vmatpush.bf16.msra.mxu1 %v10357_v34 }
  0xc0   :  { %v2083_v52 = vadd.f32 %v2082_v33, %v2034_v51 }
  0xc1   :  { %v2131_v18 = vpop.f32.mrf.mxu2 }
  0xc2   :  { %v11313_v45 = vadd.f32 %v2131_v18, %v2083_v52 }
  0xc4   :  { %v2036_v6 = vpop.f32.mrf.mxu3  ;;  %v11320_v3 = vpop.f32.mrf.mxu0 }
  0xc5   :  { %v2037_v40 = vadd.f32 %v11299_v31, %v2036_v6 }
  0xc6   :  { %2182 = vmatmul.bf16.gmra.mxu3 %v8341_v53  ;;  %v94_v53 = vadd.s32 120, %v10927_v1 }
  0xc7   :  { %v2085_v2 = vpop.f32.mrf.mxu1  ;;  %2329 = vmatmul.bf16.gmra.mxu2 %v8353_v23 }
  0xc8   :  { %v2086_v4 = vadd.f32 %v2085_v2, %v2037_v40  ;;  %v204_v52 = vand.u32 63, %v94_v53  ;;  %v8397_v40 = vor.u32 %v10318_v54, %v8394_v63  ;;  %v867_v2 = vsel %vm351_vm0, %v381_v8, 0.0  ;;  %v8422_v53 = vld [vmem:[#allocation2 + $0x174] sm:$0xf0]  ;;  %v8436_v54 = vld [vmem:[#allocation2 + $0x168] sm:$0xf] }
  0xc9   :  { %v2134_v57 = vpop.f32.mrf.mxu2  ;;  %v10330_v63 = vld [vmem:[#allocation2 + $0x180] sm:$0xf0] }
  0xca   :  { %2231 = vmatmul.bf16.gmra.mxu0 %v8345_v48  ;;  %v11318_v30 = vadd.f32 %v2134_v57, %v2086_v4  ;;  %v883_v26 = vadd.s32 2, %v204_v52  ;;  %v1111_v32 = vadd.s32 6, %v204_v52  ;;  %v848_v4 = vpack.c.bf16 %v11225_v46, %v11225_v46 }
  0xcb   :  { %v849_v57 = vpack.c.bf16 %v11228_v14, %v11228_v14 }
  0xcc   :  { %2280 = vmatmul.bf16.gmra.mxu1 %v8349_v50  ;;  %v2038_v36 = vpop.f32.mrf.mxu3  ;;  %vm915_vm15 = vcmp.lt.s32.totalorder %v883_v26, 64  ;;  %v8408_v50 = vld [vmem:[#allocation2 + $0x130] sm:$0xf]  ;;  %vm1143_vm1 = vcmp.lt.s32.totalorder %v1111_v32, 64  ;;  %864 = vst [vmem:[#allocation2 + $0x194] sm:$0xf] %v848_v4  ;;  %v8437_v4 = vor.u32 %v10330_v63, %v8436_v54 }
  0xcd   :  { %v2039_v28 = vadd.f32 %v11299_v31, %v2038_v36  ;;  %v947_v29 = vsel %vm915_vm15, %v867_v2, 0.0  ;;  %v1175_v36 = vsel %vm1143_vm1, %v1095_v13, 0.0  ;;  %865 = vst [vmem:[#allocation2 + $0x1b0] sm:$0xf] %v849_v57  ;;  %v8409_v43 = vor.u32 %v10323_v20, %v8408_v50  ;;  %v8428_v26 = vld [vmem:[#allocation2 + $0x160] sm:$0xf] }
  0xce   :  { %v963_v19 = vpack.c.bf16 %v947_v29, %v947_v29  ;;  %v1191_v46 = vpack.c.bf16 %v1175_v36, %v1175_v36  ;;  %v10329_v32 = vld [vmem:[#allocation2 + $0x178] sm:$0xf0]  ;;  %v10356_v2 = vld [vmem:[#allocation6 + $0x250] sm:$0xff]  ;;  %v8430_v36 = vld [vmem:[#allocation2 + $0x17c] sm:$0xf0] }
  0xcf   :  { %v2087_v27 = vpop.f32.mrf.mxu1  ;;  %v8429_v57 = vor.u32 %v10329_v32, %v8428_v26  ;;  %3931 = vmatpush.bf16.msra.mxu1 %v10356_v2  ;;  %v10367_v63 = vld [vmem:[#allocation6 + $0x2a8] sm:$0xff]  ;;  %v10333_v26 = vld [vmem:[#allocation2 + $0x19c] sm:$0xf] }
  0xd0   :  { %v2088_v11 = vadd.f32 %v2087_v27, %v2039_v28  ;;  %v11352_v28 = vadd.s32 4, %v204_v52  ;;  %v10349_v27 = vld [vmem:[#allocation6 + $0x218] sm:$0xff]  ;;  %979 = vst [vmem:[#allocation2 + $0x1b4] sm:$0xf] %v963_v19  ;;  %v10326_v19 = vld [vmem:[#allocation2 + $0x164] sm:$0xf] }
  0xd1   :  { %v2136_v9 = vpop.f32.mrf.mxu2  ;;  %3881 = vmatpush.bf16.msra.mxu0 %v10349_v27  ;;  %1207 = vst [vmem:[#allocation2 + $0x1bc] sm:$0xf] %v1191_v46  ;;  %v10339_v46 = vld [vmem:[#allocation6 + $0x1c8] sm:$0xff] }
  0xd2   :  { %v11327_v44 = vadd.f32 %v2136_v9, %v2088_v11  ;;  %vm1029_vm0 = vcmp.lt.s32.totalorder %v11352_v28, 64  ;;  %v10347_v2 = vld [vmem:[#allocation6 + $0x208] sm:$0xff] }
  0xd3   :  { %v1061_v14 = vsel %vm1029_vm0, %v981_v7, 0.0 }
  0xd4   :  { %v2041_v49 = vpop.f32.mrf.mxu3  ;;  %v1077_v11 = vpack.c.bf16 %v1061_v14, %v1061_v14  ;;  %v10332_v14 = vld [vmem:[#allocation2 + $0x194] sm:$0xf] }
  0xd5   :  { %v2042_v51 = vadd.f32 %v11299_v31, %v2041_v49  ;;  %v10340_v49 = vld [vmem:[#allocation6 + $0x1d0] sm:$0xff] }
  0xd6   :  { %2187 = vmatmul.bf16.gmra.mxu3 %v8369_v55  ;;  %v11329_v16 = vpop.f32.mrf.mxu0  ;;  %v8400_v55 = vld [vmem:[#allocation2 + $0x128] sm:$0xf]  ;;  %1093 = vst [vmem:[#allocation2 + $0x1b8] sm:$0xf] %v1077_v11 }
  0xd7   :  { %2334 = vmatmul.bf16.gmra.mxu2 %v8381_v58  ;;  %v8401_v25 = vor.u32 %v10322_v56, %v8400_v55  ;;  %3833 = vmatpush.bf16.msra.mxu3 %v10340_v49  ;;  %v8433_v55 = vor.u32 %v10326_v19, %v8430_v36  ;;  %v10368_v49 = vld [vmem:[#allocation6 + $0x2b0] sm:$0xff] }
  0xd9   :  { %v2090_v33 = vpop.f32.mrf.mxu1 }
  0xda   :  { %2236 = vmatmul.bf16.gmra.mxu0 %v8373_v22  ;;  %v2139_v41 = vpop.f32.mrf.mxu2  ;;  %v2091_v18 = vadd.f32 %v2090_v33, %v2042_v51  ;;  %v8405_v22 = vor.u32 %v10319_v62, %v8402_v47  ;;  %v10325_v51 = vld [vmem:[#allocation2 + $0x15c] sm:$0xf] }
  0xdb   :  { %3834 = vmatpush.bf16.msra.mxu3 %v10339_v46  ;;  %v10369_v62 = vld [vmem:[#allocation6 + $0x2b8] sm:$0xff]  ;;  %v10338_v46 = vld [vmem:[#allocation6 + $0x1c0] sm:$0xff] }
  0xdc   :  { %2285 = vmatmul.bf16.gmra.mxu1 %v8377_v17  ;;  %v11333_v48 = vadd.f32 %v2139_v41, %v2091_v18  ;;  %v11337_v6 = vpop.f32.mrf.mxu3  ;;  %v10337_v17 = vld [vmem:[#allocation2 + $0x1b8] sm:$0xf0]  ;;  %v8425_v18 = vor.u32 %v10325_v51, %v8422_v53  ;;  %3975 = vmatpush.bf16.msra.mxu2 %v10369_v62 }
  0xdd   :  { %3021 = vst [vmem:[#allocation2 + $0x1bc] sm:$0xf] %v10893_v35  ;;  %v11371_v52 = vld [vmem:[#allocation2 + $0x1b4] sm:$0xf0] }
  0xde   :  { %v11335_v23 = vpop.f32.mrf.mxu0  ;;  %2915 = vst [vmem:[#allocation2 + $0x1b8] sm:$0xf] %v10893_v35 }
  0xdf   :  { %3835 = vmatpush.bf16.msra.mxu3 %v10338_v46 }
  0xe0   :  { %3976 = vmatpush.bf16.msra.mxu2 %v10368_v49 }
  0xe1   :  { %v11356_v21 = vpop.f32.mrf.mxu1 }
  0xe2   :  { %v11354_v8 = vpop.f32.mrf.mxu2 }
  0xe4   :  { %3977 = vmatpush.bf16.msra.mxu2 %v10367_v63 }
  0xe6   :  { %2192 = vmatmul.bf16.gmra.mxu3 %v8397_v40  ;;  %v10348_v40 = vld [vmem:[#allocation6 + $0x210] sm:$0xff] }
  0xe7   :  { %v11361_v9 = vpop.f32.mrf.mxu0  ;;  %2339 = vmatmul.bf16.gmra.mxu2 %v8409_v43  ;;  %3882 = vmatpush.bf16.msra.mxu0 %v10348_v40  ;;  %v8450_v43 = vld [vmem:[#allocation2 + $0x1ac] sm:$0xf0]  ;;  %v8461_v40 = vor.u32 %v10333_v26, %v11371_v52  ;;  %v2022_v52 = vadd.f32 %v11299_v31, %v11295_v38 }
  0xe8   :  { %v8453_v47 = vor.u32 %v10332_v14, %v8450_v43 }
  0xe9   :  { %v2046_v0 = vpop.f32.mrf.mxu3  ;;  %v2095_v58 = vpop.f32.mrf.mxu1  ;;  %v2071_v14 = vadd.f32 %v11329_v16, %v2022_v52  ;;  %v2024_v16 = vadd.f32 %v11299_v31, %v11302_v12  ;;  %v2027_v52 = vadd.f32 %v11299_v31, %v11311_v37 }
  0xea   :  { %v2047_v10 = vadd.f32 %v11299_v31, %v2046_v0  ;;  %2241 = vmatmul.bf16.gmra.mxu0 %v8401_v25  ;;  %v2144_v59 = vpop.f32.mrf.mxu2 }
  0xeb   :  { %3883 = vmatpush.bf16.msra.mxu0 %v10347_v2  ;;  %v2073_v63 = vadd.f32 %v11335_v23, %v2024_v16 }
  0xec   :  { %v2096_v5 = vadd.f32 %v2095_v58, %v2047_v10  ;;  %2290 = vmatmul.bf16.gmra.mxu1 %v8405_v22  ;;  %v8464_v10 = vld [vmem:[#allocation2 + $0x1a0] sm:$0xf]  ;;  %v8456_v22 = vld [vmem:[#allocation2 + $0x198] sm:$0xf]  ;;  %v10336_v58 = vld [vmem:[#allocation2 + $0x1b0] sm:$0xf0] }
  0xed   :  { %v8465_v51 = vor.u32 %v10337_v17, %v8464_v10  ;;  %v8457_v53 = vor.u32 %v10336_v58, %v8456_v22  ;;  %v10363_v58 = vld [vmem:[#allocation6 + $0x288] sm:$0xff] }
  0xee   :  { %v11365_v41 = vadd.f32 %v2144_v59, %v2096_v5 }
  0xef   :  { %v11367_v33 = vpop.f32.mrf.mxu0 }
  0xf1   :  { %v11369_v60 = vpop.f32.mrf.mxu3  ;;  %v11374_v13 = vpop.f32.mrf.mxu1 }
  0xf2   :  { %v11376_v50 = vpop.f32.mrf.mxu2 }
  0xf6   :  { %2197 = vmatmul.bf16.gmra.mxu3 %v8425_v18 }
  0xf7   :  { %v11378_v29 = vpop.f32.mrf.mxu0  ;;  %2344 = vmatmul.bf16.gmra.mxu2 %v8437_v4  ;;  %v10355_v4 = vld [vmem:[#allocation6 + $0x248] sm:$0xff] }
  0xf8   :  { %3932 = vmatpush.bf16.msra.mxu1 %v10355_v4  ;;  %v2120_v10 = vadd.f32 %v11378_v29, %v2071_v14  ;;  %v10354_v29 = vld [vmem:[#allocation6 + $0x240] sm:$0xff] }
  0xf9   :  { %v2051_v20 = vpop.f32.mrf.mxu3  ;;  %v2100_v56 = vpop.f32.mrf.mxu1 }
  0xfa   :  { %v2052_v7 = vadd.f32 %v11299_v31, %v2051_v20  ;;  %2246 = vmatmul.bf16.gmra.mxu0 %v8429_v57  ;;  %v2149_v34 = vpop.f32.mrf.mxu2  ;;  %v10366_v57 = vld [vmem:[#allocation6 + $0x2a0] sm:$0xff] }
  0xfb   :  { %3978 = vmatpush.bf16.msra.mxu2 %v10366_v57 }
  0xfc   :  { %v2101_v27 = vadd.f32 %v2100_v56, %v2052_v7  ;;  %2295 = vmatmul.bf16.gmra.mxu1 %v8433_v55  ;;  %v10365_v56 = vld [vmem:[#allocation6 + $0x298] sm:$0xff] }
  0xfd   :  { %3933 = vmatpush.bf16.msra.mxu1 %v10354_v29 }
  0xfe   :  { %v11381_v25 = vadd.f32 %v2149_v34, %v2101_v27  ;;  %v10346_v27 = vld [vmem:[#allocation6 + $0x200] sm:$0xff]  ;;  %v10364_v34 = vld [vmem:[#allocation6 + $0x290] sm:$0xff] }
  0xff   :  { %v11383_v11 = vpop.f32.mrf.mxu0  ;;  %3979 = vmatpush.bf16.msra.mxu2 %v10365_v56  ;;  %3884 = vmatpush.bf16.msra.mxu0 %v10346_v27  ;;  %v2076_v27 = vadd.f32 %v11361_v9, %v2027_v52 }
 0x100   :  { %v2122_v4 = vadd.f32 %v11383_v11, %v2073_v63 }
 0x101   :  { %v11385_v0 = vpop.f32.mrf.mxu3  ;;  %v11387_v5 = vpop.f32.mrf.mxu1 }
 0x102   :  { %v11389_v59 = vpop.f32.mrf.mxu2 }
 0x103   :  { %3980 = vmatpush.bf16.msra.mxu2 %v10364_v34 }
 0x106   :  { %2202 = vmatmul.bf16.gmra.mxu3 %v8453_v47  ;;  %v11408_v47 = vld [vmem:[#allocation2 + $0x4] sm:$0xf] }
 0x107   :  { %v11391_v18 = vpop.f32.mrf.mxu0  ;;  %2349 = vmatmul.bf16.gmra.mxu2 %v8465_v51  ;;  %4397 = vst [vmem:[#allocation2 + $0x4] sm:$0xf] %v10893_v35  ;;  %v80_v51 = vadd.s32 8, %v10927_v1 }
 0x108   :  { %3981 = vmatpush.bf16.msra.mxu2 %v10363_v58  ;;  %v2125_v58 = vadd.f32 %v11391_v18, %v2076_v27  ;;  %v2029_v18 = vadd.f32 %v11299_v31, %v11320_v3 }
 0x109   :  { %v2056_v54 = vpop.f32.mrf.mxu3  ;;  %v2105_v20 = vpop.f32.mrf.mxu1 }
 0x10a   :  { %v2057_v32 = vadd.f32 %v11299_v31, %v2056_v54  ;;  %2251 = vmatmul.bf16.gmra.mxu0 %v8457_v53  ;;  %v2154_v36 = vpop.f32.mrf.mxu2  ;;  %v10362_v54 = vld [vmem:[#allocation6 + $0x280] sm:$0xff] }
 0x10c   :  { %v2106_v19 = vadd.f32 %v2105_v20, %v2057_v32  ;;  %2300 = vmatmul.bf16.gmra.mxu1 %v8461_v40  ;;  %v106_v32 = vand.u32 63, %v80_v51  ;;  %3982 = vmatpush.bf16.msra.mxu2 %v10362_v54 }
 0x10e   :  { %v11395_v17 = vadd.f32 %v2154_v36, %v2106_v19  ;;  %v2463_v36 = vadd.s32 4294967284, %v106_v32 }
 0x10f   :  { %v11397_v7 = vpop.f32.mrf.mxu0 }
 0x110   :  { %vm2478_vm3 = vcmp.ge.s32.totalorder %v2463_v36, 0 }
 0x111   :  { %v11399_v55 = vpop.f32.mrf.mxu3  ;;  %v11404_v43 = vpop.f32.mrf.mxu1 }
 0x112   :  { %v11406_v62 = vpop.f32.mrf.mxu2 }
 0x117   :  { %v2217_v38 = vpop.f32.mrf.mxu0 }
 0x119   :  { %v2168_v22 = vpop.f32.mrf.mxu3  ;;  %v2266_v26 = vpop.f32.mrf.mxu1 }
 0x11a   :  { %v2169_v49 = vadd.f32 %v2168_v22, %v2120_v10  ;;  %v2315_v2 = vpop.f32.mrf.mxu2  ;;  %v10377_v10 = vld [vmem:[#allocation6 + $0x2f8] sm:$0xff] }
 0x11b   :  { %4024 = vmatpush.bf16.msrb.mxu3 %v10377_v10 }
 0x11c   :  { %v2218_v53 = vadd.f32 %v2217_v38, %v2169_v49 }
 0x11e   :  { %v2267_v40 = vadd.f32 %v2266_v26, %v2218_v53 }
 0x11f   :  { %v2219_v20 = vpop.f32.mrf.mxu0 }
 0x120   :  { %v2316_v57 = vadd.f32 %v2315_v2, %v2267_v40  ;;  %v2078_v2 = vadd.f32 %v11367_v33, %v2029_v18 }
 0x121   :  { %v2170_v19 = vpop.f32.mrf.mxu3  ;;  %v2268_v11 = vpop.f32.mrf.mxu1 }
 0x122   :  { %v2171_v56 = vadd.f32 %v2170_v19, %v2122_v4  ;;  %vm2355_vm2 = vcmp.ge.f32.partialorder %v2316_v57, 0.0  ;;  %v2371_v12 = vmul.f32 0.15, %v2316_v57  ;;  %v2317_v22 = vpop.f32.mrf.mxu2  ;;  %v10393_v19 = vld [vmem:[#allocation6 + $0x378] sm:$0xff]  ;;  %v2127_v52 = vadd.f32 %v11397_v7, %v2078_v2 }
 0x123   :  { %4122 = vmatpush.bf16.msrb.mxu1 %v10393_v19 }
 0x124   :  { %v2220_v23 = vadd.f32 %v2219_v20, %v2171_v56  ;;  %v2387_v46 = vsel %vm2355_vm2, %v2316_v57, %v2371_v12  ;;  %v10385_v20 = vld [vmem:[#allocation6 + $0x338] sm:$0xff] }
 0x125   :  { %v2418_v34 = vrot.slane %v2387_v46, 4  ;;  %v2645_v14 = vpack.c.bf16 %v2387_v46, %v2387_v46  ;;  %4073 = vmatpush.bf16.msrb.mxu0 %v10385_v20 }
 0x126   :  { %v2269_v38 = vadd.f32 %v2268_v11, %v2220_v23 }
 0x127   :  { %v2462_v49 = vsel %vm512_vm10, 0.0, %v2418_v34  ;;  %2661 = vst [vmem:[#allocation2 + $0x20] sm:$0xf] %v2645_v14  ;;  %v2222_v9 = vpop.f32.mrf.mxu0 }
 0x128   :  { %v2523_v51 = vsel %vm2478_vm3, %v2462_v49, 0.0  ;;  %v2680_v37 = vsel %vm577_vm5, %v2462_v49, 0.0  ;;  %2744 = vst [vmem:[#allocation2 + $0xc] sm:$0xf] %v2645_v14  ;;  %v2318_v16 = vadd.f32 %v2317_v22, %v2269_v38 }
 0x129   :  { %v2173_v53 = vpop.f32.mrf.mxu3  ;;  %v2539_v54 = vpack.c.bf16 %v2523_v51, %v2523_v51  ;;  %v2696_v63 = vpack.c.bf16 %v2680_v37, %v2680_v37  ;;  %v2271_v57 = vpop.f32.mrf.mxu1  ;;  %v10376_v51 = vld [vmem:[#allocation6 + $0x2f0] sm:$0xff] }
 0x12a   :  { %v2174_v26 = vadd.f32 %v2173_v53, %v2125_v58  ;;  %vm2356_vm4 = vcmp.ge.f32.partialorder %v2318_v16, 0.0  ;;  %v2372_v32 = vmul.f32 0.15, %v2318_v16  ;;  %v2320_v56 = vpop.f32.mrf.mxu2  ;;  %4025 = vmatpush.bf16.msrb.mxu3 %v10376_v51 }
 0x12b   :  { %2555 = vst [vmem:[#allocation2 + $0x1c] sm:$0xf] %v2539_v54 }
 0x12c   :  { %v2223_v29 = vadd.f32 %v2222_v9, %v2174_v26  ;;  %2712 = vst [vmem:[#allocation2 + $0x8] sm:$0xf] %v2696_v63  ;;  %v2388_v40 = vsel %vm2356_vm4, %v2318_v16, %v2372_v32 }
 0x12d   :  { %v2419_v61 = vrot.slane %v2388_v40, 4  ;;  %v2646_v4 = vpack.c.bf16 %v2388_v40, %v2388_v40 }
 0x12e   :  { %v2272_v36 = vadd.f32 %v2271_v57, %v2223_v29  ;;  %v8694_v12 = vld [vmem:[#allocation2 + $0x1c] sm:$0xf0] }
 0x12f   :  { %v2420_v23 = vsel %vm512_vm10, %v2418_v34, %v2419_v61  ;;  %2662 = vst [vmem:[#allocation2 + $0x3c] sm:$0xf] %v2646_v4  ;;  %v8697_v3 = vor.u32 %v11408_v47, %v8694_v12  ;;  %v2224_v27 = vpop.f32.mrf.mxu0  ;;  %v10395_v53 = vld [vmem:[#allocation2 + $0xc] sm:$0xf]  ;;  %v10384_v12 = vld [vmem:[#allocation6 + $0x330] sm:$0xff] }
 0x130   :  { %v2540_v46 = vpack.c.bf16 %v2420_v23, %v2420_v23  ;;  %2745 = vst [vmem:[#allocation2 + $0x28] sm:$0xf] %v2646_v4  ;;  %v2321_v33 = vadd.f32 %v2320_v56, %v2272_v36  ;;  %4074 = vmatpush.bf16.msrb.mxu0 %v10384_v12 }
 0x131   :  { %v2175_v14 = vpop.f32.mrf.mxu3  ;;  %2900 = vst [vmem:[#allocation2 + $0x14] sm:$0xf] %v2646_v4  ;;  %3885 = vmatmul.bf16.vlgmr.msra.gmra.mxu0 %v8697_v3  ;;  %v2273_v49 = vpop.f32.mrf.mxu1 }
 0x132   :  { %v2176_v11 = vadd.f32 %v2175_v14, %v2127_v52  ;;  %2556 = vst [vmem:[#allocation2 + $0x38] sm:$0xf] %v2540_v46  ;;  %vm2357_vm5 = vcmp.ge.f32.partialorder %v2321_v33, 0.0  ;;  %v2373_v10 = vmul.f32 0.15, %v2321_v33  ;;  %v2322_v16 = vpop.f32.mrf.mxu2  ;;  %v10392_v52 = vld [vmem:[#allocation6 + $0x370] sm:$0xff] }
 0x133   :  { %2713 = vst [vmem:[#allocation2 + $0x24] sm:$0xf] %v2540_v46  ;;  %v10397_v38 = vld [vmem:[#allocation2 + $0x18] sm:$0xf0]  ;;  %4123 = vmatpush.bf16.msrb.mxu1 %v10392_v52 }
 0x134   :  { %v2225_v7 = vadd.f32 %v2224_v27, %v2176_v11  ;;  %2794 = vst [vmem:[#allocation2 + $0x10] sm:$0xf] %v2540_v46  ;;  %v2389_v34 = vsel %vm2357_vm5, %v2321_v33, %v2373_v10  ;;  %v8693_v47 = vor.u32 %v10397_v38, %v11063_v15 }
 0x135   :  { %v2421_v22 = vrot.slane %v2389_v34, 4  ;;  %v2647_v58 = vpack.c.bf16 %v2389_v34, %v2389_v34  ;;  %4398 = vst [vmem:[#allocation2 + $0x20] sm:$0xf] %v10893_v35 }
 0x136   :  { %v2274_v37 = vadd.f32 %v2273_v49, %v2225_v7  ;;  %3836 = vmatmul.bf16.vlgmr.msra.gmra.mxu3 %v8693_v47  ;;  %4298 = vst [vmem:[#allocation2 + $0x1c] sm:$0xf] %v10893_v35 }
 0x137   :  { %v2422_v9 = vsel %vm512_vm10, %v2419_v61, %v2421_v22  ;;  %2663 = vst [vmem:[#allocation2 + $0x58] sm:$0xf] %v2647_v58  ;;  %v8702_v54 = vld [vmem:[#allocation2 + $0x24] sm:$0xf0]  ;;  %v2227_v26 = vpop.f32.mrf.mxu0 }
 0x138   :  { %v2541_v63 = vpack.c.bf16 %v2422_v9, %v2422_v9  ;;  %2746 = vst [vmem:[#allocation2 + $0x44] sm:$0xf] %v2647_v58  ;;  %v2323_v15 = vadd.f32 %v2322_v16, %v2274_v37  ;;  %v8705_v18 = vor.u32 %v10395_v53, %v8702_v54  ;;  %v8700_v61 = vld [vmem:[#allocation2 + $0x8] sm:$0xf] }
 0x139   :  { %v2178_v32 = vpop.f32.mrf.mxu3  ;;  %2901 = vst [vmem:[#allocation2 + $0x30] sm:$0xf] %v2647_v58  ;;  %v2276_v56 = vpop.f32.mrf.mxu1  ;;  %v8720_v34 = vld [vmem:[#allocation2 + $0x38] sm:$0xf]  ;;  %v10375_v37 = vld [vmem:[#allocation6 + $0x2e8] sm:$0xff] }
 0x13a   :  { %v2179_v29 = vadd.f32 %v2178_v32, %v11304_v42  ;;  %2557 = vst [vmem:[#allocation2 + $0x54] sm:$0xf] %v2541_v63  ;;  %vm2358_vm6 = vcmp.ge.f32.partialorder %v2323_v15, 0.0  ;;  %v2374_v40 = vmul.f32 0.15, %v2323_v15  ;;  %3983 = vmatmul.bf16.vlgmr.msra.gmra.mxu2 %v8705_v18  ;;  %v2325_v3 = vpop.f32.mrf.mxu2  ;;  %4026 = vmatpush.bf16.msrb.mxu3 %v10375_v37 }
 0x13b   :  { %2714 = vst [vmem:[#allocation2 + $0x40] sm:$0xf] %v2541_v63  ;;  %v10398_v4 = vld [vmem:[#allocation2 + $0x20] sm:$0xf0]  ;;  %v10401_v42 = vld [vmem:[#allocation2 + $0x3c] sm:$0xf] }
 0x13c   :  { %v2228_v2 = vadd.f32 %v2227_v26, %v2179_v29  ;;  %2795 = vst [vmem:[#allocation2 + $0x2c] sm:$0xf] %v2541_v63  ;;  %v2390_v57 = vsel %vm2358_vm6, %v2323_v15, %v2374_v40  ;;  %v8701_v20 = vor.u32 %v10398_v4, %v8700_v61 }
 0x13d   :  { %3006 = vst [vmem:[#allocation2 + $0x18] sm:$0xf] %v2541_v63  ;;  %v2423_v19 = vrot.slane %v2390_v57, 4  ;;  %v2648_v36 = vpack.c.bf16 %v2390_v57, %v2390_v57 }
 0x13e   :  { %v2277_v23 = vadd.f32 %v2276_v56, %v2228_v2  ;;  %3934 = vmatmul.bf16.vlgmr.msra.gmra.mxu1 %v8701_v20  ;;  %4443 = vst [vmem:[#allocation2 + $0x8] sm:$0xf] %v10893_v35  ;;  %v8722_v46 = vld [vmem:[#allocation2 + $0x54] sm:$0xf0] }
 0x13f   :  { %v2424_v33 = vsel %vm512_vm10, %v2421_v22, %v2423_v19  ;;  %2664 = vst [vmem:[#allocation2 + $0x74] sm:$0xf] %v2648_v36  ;;  %v8725_v27 = vor.u32 %v10401_v42, %v8722_v46  ;;  %v2229_v10 = vpop.f32.mrf.mxu0  ;;  %v10402_v15 = vld [vmem:[#allocation2 + $0x44] sm:$0xf] }
 0x140   :  { %v2542_v14 = vpack.c.bf16 %v2424_v33, %v2424_v33  ;;  %2747 = vst [vmem:[#allocation2 + $0x60] sm:$0xf] %v2648_v36  ;;  %v2326_v11 = vadd.f32 %v2325_v3, %v2277_v23  ;;  %v10383_v33 = vld [vmem:[#allocation6 + $0x328] sm:$0xff] }
 0x141   :  { %v2180_v7 = vpop.f32.mrf.mxu3  ;;  %2902 = vst [vmem:[#allocation2 + $0x4c] sm:$0xf] %v2648_v36  ;;  %3890 = vmatmul.bf16.gmra.mxu0 %v8725_v27  ;;  %v10404_v47 = vld [vmem:[#allocation2 + $0x50] sm:$0xf0]  ;;  %v2278_v53 = vpop.f32.mrf.mxu1  ;;  %v10391_v27 = vld [vmem:[#allocation6 + $0x368] sm:$0xff] }
 0x142   :  { %v2181_v38 = vadd.f32 %v2180_v7, %v11313_v45  ;;  %2558 = vst [vmem:[#allocation2 + $0x70] sm:$0xf] %v2542_v14  ;;  %vm2359_vm8 = vcmp.ge.f32.partialorder %v2326_v11, 0.0  ;;  %v2375_v58 = vmul.f32 0.15, %v2326_v11  ;;  %v8721_v49 = vor.u32 %v10404_v47, %v8720_v34  ;;  %v2327_v63 = vpop.f32.mrf.mxu2  ;;  %4075 = vmatpush.bf16.msrb.mxu0 %v10383_v33  ;;  %4124 = vmatpush.bf16.msrb.mxu1 %v10391_v27  ;;  %v10390_v27 = vld [vmem:[#allocation6 + $0x360] sm:$0xff] }
 0x143   :  { %2715 = vst [vmem:[#allocation2 + $0x5c] sm:$0xf] %v2542_v14  ;;  %v8728_v20 = vld [vmem:[#allocation2 + $0x40] sm:$0xf] }
 0x144   :  { %v2230_v22 = vadd.f32 %v2229_v10, %v2181_v38  ;;  %2796 = vst [vmem:[#allocation2 + $0x48] sm:$0xf] %v2542_v14  ;;  %v2391_v51 = vsel %vm2359_vm8, %v2326_v11, %v2375_v58 }
 0x145   :  { %3007 = vst [vmem:[#allocation2 + $0x34] sm:$0xf] %v2542_v14  ;;  %v2425_v16 = vrot.slane %v2391_v51, 4  ;;  %v2649_v9 = vpack.c.bf16 %v2391_v51, %v2391_v51 }
 0x146   :  { %v2279_v54 = vadd.f32 %v2278_v53, %v2230_v22  ;;  %3841 = vmatmul.bf16.gmra.mxu3 %v8721_v49  ;;  %4299 = vst [vmem:[#allocation2 + $0x38] sm:$0xf] %v10893_v35  ;;  %v10408_v3 = vld [vmem:[#allocation2 + $0x74] sm:$0xf]  ;;  %4125 = vmatpush.bf16.msrb.mxu1 %v10390_v27 }
 0x147   :  { %v2426_v45 = vsel %vm512_vm10, %v2423_v19, %v2425_v16  ;;  %2665 = vst [vmem:[#allocation2 + $0x90] sm:$0xf] %v2649_v9  ;;  %v8730_v26 = vld [vmem:[#allocation2 + $0x5c] sm:$0xf0]  ;;  %v2232_v29 = vpop.f32.mrf.mxu0 }
 0x148   :  { %v2543_v32 = vpack.c.bf16 %v2426_v45, %v2426_v45  ;;  %2748 = vst [vmem:[#allocation2 + $0x7c] sm:$0xf] %v2649_v9  ;;  %v2328_v18 = vadd.f32 %v2327_v63, %v2279_v54  ;;  %v8733_v2 = vor.u32 %v10402_v15, %v8730_v26  ;;  %v10374_v15 = vld [vmem:[#allocation6 + $0x2e0] sm:$0xff]  ;;  %v2044_v26 = vadd.f32 %v11299_v31, %v11337_v6 }
 0x149   :  { %v2183_v40 = vpop.f32.mrf.mxu3  ;;  %2903 = vst [vmem:[#allocation2 + $0x68] sm:$0xf] %v2649_v9  ;;  %v2281_v23 = vpop.f32.mrf.mxu1  ;;  %v8748_v58 = vld [vmem:[#allocation2 + $0x70] sm:$0xf]  ;;  %4027 = vmatpush.bf16.msrb.mxu3 %v10374_v15 }
 0x14a   :  { %v2184_v61 = vadd.f32 %v2183_v40, %v11318_v30  ;;  %2559 = vst [vmem:[#allocation2 + $0x8c] sm:$0xf] %v2543_v32  ;;  %vm2360_vm9 = vcmp.ge.f32.partialorder %v2328_v18, 0.0  ;;  %v2376_v4 = vmul.f32 0.15, %v2328_v18  ;;  %3988 = vmatmul.bf16.gmra.mxu2 %v8733_v2  ;;  %v2330_v46 = vpop.f32.mrf.mxu2  ;;  %v2093_v6 = vadd.f32 %v11356_v21, %v2044_v26  ;;  %v10382_v21 = vld [vmem:[#allocation6 + $0x320] sm:$0xff] }
 0x14b   :  { %2716 = vst [vmem:[#allocation2 + $0x78] sm:$0xf] %v2543_v32  ;;  %v10405_v19 = vld [vmem:[#allocation2 + $0x58] sm:$0xf0]  ;;  %4076 = vmatpush.bf16.msrb.mxu0 %v10382_v21  ;;  %v11465_v26 = vld [vmem:[#allocation2 + $0xd4] sm:$0xf0] }
 0x14c   :  { %v2233_v57 = vadd.f32 %v2232_v29, %v2184_v61  ;;  %2797 = vst [vmem:[#allocation2 + $0x64] sm:$0xf] %v2543_v32  ;;  %v2392_v36 = vsel %vm2360_vm9, %v2328_v18, %v2376_v4  ;;  %v8729_v56 = vor.u32 %v10405_v19, %v8728_v20 }
 0x14d   :  { %3008 = vst [vmem:[#allocation2 + $0x50] sm:$0xf] %v2543_v32  ;;  %v2427_v12 = vrot.slane %v2392_v36, 4  ;;  %v2650_v52 = vpack.c.bf16 %v2392_v36, %v2392_v36 }
 0x14e   :  { %v2282_v42 = vadd.f32 %v2281_v23, %v2233_v57  ;;  %3939 = vmatmul.bf16.gmra.mxu1 %v8729_v56  ;;  %v8750_v30 = vld [vmem:[#allocation2 + $0x8c] sm:$0xf0]  ;;  %v88_v57 = vadd.s32 72, %v10927_v1  ;;  %4628 = vst [vmem:[#allocation2 + $0xd8] sm:$0xf] %v10893_v35 }
 0x14f   :  { %v2428_v14 = vsel %vm512_vm10, %v2425_v16, %v2427_v12  ;;  %2666 = vst [vmem:[#allocation2 + $0xac] sm:$0xf] %v2650_v52  ;;  %v8753_v11 = vor.u32 %v10408_v3, %v8750_v30  ;;  %v2234_v38 = vpop.f32.mrf.mxu0  ;;  %v10409_v18 = vld [vmem:[#allocation2 + $0x7c] sm:$0xf] }
 0x150   :  { %v2544_v10 = vpack.c.bf16 %v2428_v14, %v2428_v14  ;;  %2749 = vst [vmem:[#allocation2 + $0x98] sm:$0xf] %v2650_v52  ;;  %v2331_v7 = vadd.f32 %v2330_v46, %v2282_v42  ;;  %v162_v3 = vand.u32 63, %v88_v57  ;;  %v11452_v46 = vld [vmem:[#allocation2 + $0xe4] sm:$0xf] }
 0x151   :  { %v2185_v34 = vpop.f32.mrf.mxu3  ;;  %2904 = vst [vmem:[#allocation2 + $0x84] sm:$0xf] %v2650_v52  ;;  %3895 = vmatmul.bf16.gmra.mxu0 %v8753_v11  ;;  %v10411_v49 = vld [vmem:[#allocation2 + $0x88] sm:$0xf0]  ;;  %v2283_v54 = vpop.f32.mrf.mxu1 }
 0x152   :  { %v2186_v47 = vadd.f32 %v2185_v34, %v11327_v44  ;;  %2560 = vst [vmem:[#allocation2 + $0xa8] sm:$0xf] %v2544_v10  ;;  %vm2361_vm11 = vcmp.ge.f32.partialorder %v2331_v7, 0.0  ;;  %v2377_v22 = vmul.f32 0.15, %v2331_v7  ;;  %v8749_v51 = vor.u32 %v10411_v49, %v8748_v58  ;;  %v2332_v45 = vpop.f32.mrf.mxu2 }
 0x153   :  { %2717 = vst [vmem:[#allocation2 + $0x94] sm:$0xf] %v2544_v10  ;;  %v85_v44 = vadd.s32 48, %v10927_v1  ;;  %v8756_v56 = vld [vmem:[#allocation2 + $0x78] sm:$0xf] }
 0x154   :  { %v2235_v37 = vadd.f32 %v2234_v38, %v2186_v47  ;;  %2798 = vst [vmem:[#allocation2 + $0x80] sm:$0xf] %v2544_v10  ;;  %v2393_v16 = vsel %vm2361_vm11, %v2331_v7, %v2377_v22  ;;  %v2142_v38 = vadd.f32 %v11354_v8, %v2093_v6  ;;  %v2471_v22 = vadd.s32 4294967284, %v162_v3 }
 0x155   :  { %3009 = vst [vmem:[#allocation2 + $0x6c] sm:$0xf] %v2544_v10  ;;  %v2429_v9 = vrot.slane %v2393_v16, 4  ;;  %v2651_v53 = vpack.c.bf16 %v2393_v16, %v2393_v16  ;;  %v141_v23 = vand.u32 63, %v85_v44 }
 0x156   :  { %v2284_v63 = vadd.f32 %v2283_v54, %v2235_v37  ;;  %3846 = vmatmul.bf16.gmra.mxu3 %v8749_v51  ;;  %v10415_v10 = vld [vmem:[#allocation2 + $0xac] sm:$0xf]  ;;  %4405 = vst [vmem:[#allocation2 + $0xe4] sm:$0xf] %v10893_v35  ;;  %vm2486_vm15 = vcmp.ge.s32.totalorder %v2471_v22, 0 }
 0x157   :  { %v2430_v32 = vsel %vm512_vm10, %v2427_v12, %v2429_v9  ;;  %2667 = vst [vmem:[#allocation2 + $0xc8] sm:$0xf] %v2651_v53  ;;  %v8758_v29 = vld [vmem:[#allocation2 + $0x94] sm:$0xf0]  ;;  %v2237_v61 = vpop.f32.mrf.mxu0  ;;  %v2922_v51 = vadd.s32 12, %v141_v23 }
 0x158   :  { %v2545_v40 = vpack.c.bf16 %v2430_v32, %v2430_v32  ;;  %2750 = vst [vmem:[#allocation2 + $0xb4] sm:$0xf] %v2651_v53  ;;  %v2333_v2 = vadd.f32 %v2332_v45, %v2284_v63  ;;  %v8761_v20 = vor.u32 %v10409_v18, %v8758_v29  ;;  %v11467_v32 = vld [vmem:[#allocation8] ss:$0 sm:$0xff] }
 0x159   :  { %v2188_v4 = vpop.f32.mrf.mxu3  ;;  %2905 = vst [vmem:[#allocation2 + $0xa0] sm:$0xf] %v2651_v53  ;;  %v2286_v33 = vpop.f32.mrf.mxu1  ;;  %v11460_v53 = vld [vmem:[#allocation2 + $0xe0] sm:$0xf]  ;;  %v8776_v63 = vld [vmem:[#allocation2 + $0xa8] sm:$0xf]  ;;  %v2049_v18 = vadd.f32 %v11467_v32, %v11369_v60 }
 0x15a   :  { %v2189_v19 = vadd.f32 %v2188_v4, %v11333_v48  ;;  %2561 = vst [vmem:[#allocation2 + $0xc4] sm:$0xf] %v2545_v40  ;;  %vm2362_vm12 = vcmp.ge.f32.partialorder %v2333_v2, 0.0  ;;  %v2378_v31 = vmul.f32 0.15, %v2333_v2  ;;  %3993 = vmatmul.bf16.gmra.mxu2 %v8761_v20  ;;  %v2335_v11 = vpop.f32.mrf.mxu2  ;;  %vm2952_vm1 = vcmp.lt.s32.totalorder %v2922_v51, 64 }
 0x15b   :  { %2718 = vst [vmem:[#allocation2 + $0xb0] sm:$0xf] %v2545_v40  ;;  %v10412_v12 = vld [vmem:[#allocation2 + $0x90] sm:$0xf0]  ;;  %v11475_v4 = vld [vmem:[#allocation2 + $0xd8] sm:$0xf0] }
 0x15c   :  { %v2238_v36 = vadd.f32 %v2237_v61, %v2189_v19  ;;  %2799 = vst [vmem:[#allocation2 + $0x9c] sm:$0xf] %v2545_v40  ;;  %v11450_v52 = vsel %vm2362_vm12, %v2333_v2, %v2378_v31  ;;  %v8757_v42 = vor.u32 %v10412_v12, %v8756_v56  ;;  %v10373_v61 = vld [vmem:[#allocation6 + $0x2d8] sm:$0xff] }
 0x15d   :  { %3010 = vst [vmem:[#allocation2 + $0x88] sm:$0xf] %v2545_v40  ;;  %v2431_v48 = vrot.slane %v11450_v52, 4  ;;  %v2735_v30 = vpack.c.bf16 %v11450_v52, %v11450_v52  ;;  %4028 = vmatpush.bf16.msrb.mxu3 %v10373_v61 }
 0x15e   :  { %v2287_v14 = vadd.f32 %v2286_v33, %v2238_v36  ;;  %3944 = vmatmul.bf16.gmra.mxu1 %v8757_v42  ;;  %v8778_v7 = vld [vmem:[#allocation2 + $0xc4] sm:$0xf0]  ;;  %4305 = vst [vmem:[#allocation2 + $0xe0] sm:$0xf] %v10893_v35 }
 0x15f   :  { %v2432_v34 = vsel %vm512_vm10, %v2429_v9, %v2431_v48  ;;  %2751 = vst [vmem:[#allocation2 + $0xd0] sm:$0xf] %v2735_v30  ;;  %v8781_v47 = vor.u32 %v10415_v10, %v8778_v7  ;;  %v2239_v37 = vpop.f32.mrf.mxu0  ;;  %v10416_v19 = vld [vmem:[#allocation2 + $0xb4] sm:$0xf] }
 0x160   :  { %v2703_v58 = vpack.c.bf16 %v2432_v34, %v2432_v34  ;;  %2906 = vst [vmem:[#allocation2 + $0xbc] sm:$0xf] %v2735_v30  ;;  %v2336_v49 = vadd.f32 %v2335_v11, %v2287_v14  ;;  %v10381_v34 = vld [vmem:[#allocation6 + $0x318] sm:$0xff] }
 0x161   :  { %v2190_v16 = vpop.f32.mrf.mxu3  ;;  %3900 = vmatmul.bf16.gmra.mxu0 %v8781_v47  ;;  %v10418_v45 = vld [vmem:[#allocation2 + $0xc0] sm:$0xf0]  ;;  %v2288_v2 = vpop.f32.mrf.mxu1  ;;  %4722 = vst [vmem:[#allocation2 + $0xdc] sm:$0xf] %v10893_v35  ;;  %v10389_v47 = vld [vmem:[#allocation6 + $0x358] sm:$0xff] }
 0x162   :  { %v2191_v54 = vadd.f32 %v2190_v16, %v2142_v38  ;;  %2719 = vst [vmem:[#allocation2 + $0xcc] sm:$0xf] %v2703_v58  ;;  %vm2363_vm13 = vcmp.ge.f32.partialorder %v2336_v49, 0.0  ;;  %v2379_v8 = vmul.f32 0.15, %v2336_v49  ;;  %v8777_v9 = vor.u32 %v10418_v45, %v8776_v63  ;;  %v2337_v20 = vpop.f32.mrf.mxu2  ;;  %4077 = vmatpush.bf16.msrb.mxu0 %v10381_v34  ;;  %4126 = vmatpush.bf16.msrb.mxu1 %v10389_v47 }
 0x163   :  { %2800 = vst [vmem:[#allocation2 + $0xb8] sm:$0xf] %v2703_v58  ;;  %v8784_v27 = vld [vmem:[#allocation2 + $0xb0] sm:$0xf] }
 0x164   :  { %v2240_v44 = vadd.f32 %v2239_v37, %v2191_v54  ;;  %3011 = vst [vmem:[#allocation2 + $0xa4] sm:$0xf] %v2703_v58  ;;  %v11463_v15 = vsel %vm2363_vm13, %v2336_v49, %v2379_v8 }
 0x165   :  { %v2433_v29 = vrot.slane %v11463_v15, 4  ;;  %v2653_v40 = vpack.c.bf16 %v11463_v15, %v11463_v15 }
 0x166   :  { %v2289_v57 = vadd.f32 %v2288_v2, %v2240_v44  ;;  %3851 = vmatmul.bf16.gmra.mxu3 %v8777_v9  ;;  %v8786_v31 = vld [vmem:[#allocation2 + $0xcc] sm:$0xf0] }
 0x167   :  { %v2434_v60 = vsel %vm512_vm10, %v2431_v48, %v2433_v29  ;;  %2669 = vst [vmem:[#allocation2 + $0x100] sm:$0xf] %v2653_v40  ;;  %v8789_v6 = vor.u32 %v10416_v19, %v8786_v31  ;;  %v11481_v36 = vld [vmem:[#allocation2 + $0xbc] sm:$0xf]  ;;  %v2242_v3 = vpop.f32.mrf.mxu0  ;;  %v2098_v48 = vadd.f32 %v11374_v13, %v2049_v18  ;;  %v10372_v31 = vld [vmem:[#allocation6 + $0x2d0] sm:$0xff] }
 0x168   :  { %v2531_v56 = vsel %vm2486_vm15, %v2434_v60, 0.0  ;;  %v2688_v12 = vsel %vm585_vm7, %v2434_v60, 0.0  ;;  %2752 = vst [vmem:[#allocation2 + $0xec] sm:$0xf] %v2653_v40  ;;  %v2769_v52 = vsel %vm1021_vm14, %v2434_v60, 0.0  ;;  %v2982_v23 = vsel %vm2952_vm1, %v2434_v60, 0.0  ;;  %4029 = vmatpush.bf16.msrb.mxu3 %v10372_v31 }
 0x169   :  { %v2193_v42 = vpop.f32.mrf.mxu3  ;;  %v2547_v30 = vpack.c.bf16 %v2531_v56, %v2531_v56  ;;  %v2704_v33 = vpack.c.bf16 %v2688_v12, %v2688_v12  ;;  %v2785_v21 = vpack.c.bf16 %v2769_v52, %v2769_v52  ;;  %v10419_v14 = vld [vmem:[#allocation2 + $0xc8] sm:$0xf0]  ;;  %4627 = vst [vmem:[#allocation2 + $0xbc] sm:$0xf] %v10893_v35  ;;  %v2997_v11 = vpack.c.bf16 %v2982_v23, %v2982_v23  ;;  %v2291_v13 = vpop.f32.mrf.mxu1 }
 0x16a   :  { %v2338_v39 = vadd.f32 %v2337_v20, %v2289_v57  ;;  %v2194_v10 = vadd.f32 %v2193_v42, %v11365_v41  ;;  %3998 = vmatmul.bf16.gmra.mxu2 %v8789_v6  ;;  %v8785_v24 = vor.u32 %v10419_v14, %v8784_v27  ;;  %v2147_v58 = vadd.f32 %v11376_v50, %v2098_v48  ;;  %v2340_v51 = vpop.f32.mrf.mxu2 }
 0x16b   :  { %2563 = vst [vmem:[#allocation2 + $0xfc] sm:$0xf] %v2547_v30  ;;  %v11495_v63 = vld [vmem:[#allocation2 + $0xa0] sm:$0xf0]  ;;  %v2054_v6 = vadd.f32 %v11467_v32, %v11385_v0 }
 0x16c   :  { %2720 = vst [vmem:[#allocation2 + $0xe8] sm:$0xf] %v2704_v33  ;;  %vm2364_vm7 = vcmp.ge.f32.partialorder %v2338_v39, 0.0  ;;  %v2380_v7 = vmul.f32 0.15, %v2338_v39  ;;  %v2243_v38 = vadd.f32 %v2242_v3, %v2194_v10 }
 0x16d   :  { %2801 = vst [vmem:[#allocation2 + $0xd4] sm:$0xf] %v2785_v21  ;;  %v2103_v0 = vadd.f32 %v11387_v5, %v2054_v6 }
 0x16e   :  { %3012 = vst [vmem:[#allocation2 + $0xc0] sm:$0xf] %v2997_v11  ;;  %v2396_v49 = vsel %vm2364_vm7, %v2338_v39, %v2380_v7  ;;  %v2292_v22 = vadd.f32 %v2291_v13, %v2243_v38  ;;  %3949 = vmatmul.bf16.gmra.mxu1 %v8785_v24  ;;  %v8806_v37 = vld [vmem:[#allocation2 + $0xfc] sm:$0xf0]  ;;  %v10380_v7 = vld [vmem:[#allocation6 + $0x310] sm:$0xff] }
 0x16f   :  { %v2435_v41 = vrot.slane %v2396_v49, 4  ;;  %v2654_v16 = vpack.c.bf16 %v2396_v49, %v2396_v49  ;;  %v8809_v54 = vor.u32 %v11452_v46, %v8806_v37  ;;  %4406 = vst [vmem:[#allocation2 + $0x100] sm:$0xf] %v10893_v35  ;;  %v2244_v8 = vpop.f32.mrf.mxu0  ;;  %v10423_v42 = vld [vmem:[#allocation2 + $0xec] sm:$0xf]  ;;  %v10388_v38 = vld [vmem:[#allocation6 + $0x350] sm:$0xff]  ;;  %4078 = vmatpush.bf16.msrb.mxu0 %v10380_v7 }
 0x170   :  { %v2341_v45 = vadd.f32 %v2340_v51, %v2292_v22  ;;  %4720 = vst [vmem:[#allocation2 + $0xa4] sm:$0xf] %v10893_v35  ;;  %4127 = vmatpush.bf16.msrb.mxu1 %v10388_v38  ;;  %v10378_v7 = vld [vmem:[#allocation6 + $0x300] sm:$0xff] }
 0x171   :  { %v2195_v9 = vpop.f32.mrf.mxu3  ;;  %v2436_v50 = vsel %vm512_vm10, %v2433_v29, %v2435_v41  ;;  %2670 = vst [vmem:[#allocation2 + $0x11c] sm:$0xf] %v2654_v16  ;;  %3905 = vmatmul.bf16.gmra.mxu0 %v8809_v54  ;;  %v2293_v15 = vpop.f32.mrf.mxu1  ;;  %v10386_v38 = vld [vmem:[#allocation6 + $0x340] sm:$0xff] }
 0x172   :  { %v2196_v44 = vadd.f32 %v2195_v9, %v2147_v58  ;;  %v2548_v18 = vpack.c.bf16 %v2436_v50, %v2436_v50  ;;  %2753 = vst [vmem:[#allocation2 + $0x108] sm:$0xf] %v2654_v16  ;;  %vm2365_vm14 = vcmp.ge.f32.partialorder %v2341_v45, 0.0  ;;  %v2381_v46 = vmul.f32 0.15, %v2341_v45  ;;  %v2342_v60 = vpop.f32.mrf.mxu2 }
 0x173   :  { %2908 = vst [vmem:[#allocation2 + $0xf4] sm:$0xf] %v2654_v16  ;;  %v10425_v2 = vld [vmem:[#allocation2 + $0xf8] sm:$0xf0]  ;;  %v8812_v14 = vld [vmem:[#allocation2 + $0xe8] sm:$0xf]  ;;  %v2152_v58 = vadd.f32 %v11389_v59, %v2103_v0 }
 0x174   :  { %v2245_v40 = vadd.f32 %v2244_v8, %v2196_v44  ;;  %2564 = vst [vmem:[#allocation2 + $0x118] sm:$0xf] %v2548_v18  ;;  %v2397_v61 = vsel %vm2365_vm14, %v2341_v45, %v2381_v46  ;;  %v8805_v57 = vor.u32 %v10425_v2, %v11460_v53 }
 0x175   :  { %2721 = vst [vmem:[#allocation2 + $0x104] sm:$0xf] %v2548_v18  ;;  %v2437_v20 = vrot.slane %v2397_v61, 4  ;;  %v2655_v19 = vpack.c.bf16 %v2397_v61, %v2397_v61 }
 0x176   :  { %2802 = vst [vmem:[#allocation2 + $0xf0] sm:$0xf] %v2548_v18  ;;  %v2294_v29 = vadd.f32 %v2293_v15, %v2245_v40  ;;  %3856 = vmatmul.bf16.gmra.mxu3 %v8805_v57 }
 0x177   :  { %v2438_v56 = vsel %vm512_vm10, %v2435_v41, %v2437_v20  ;;  %2671 = vst [vmem:[#allocation2 + $0x138] sm:$0xf] %v2655_v19  ;;  %v2247_v53 = vpop.f32.mrf.mxu0 }
 0x178   :  { %v2549_v12 = vpack.c.bf16 %v2438_v56, %v2438_v56  ;;  %2754 = vst [vmem:[#allocation2 + $0x124] sm:$0xf] %v2655_v19  ;;  %v2343_v52 = vadd.f32 %v2342_v60, %v2294_v29  ;;  %v10429_v47 = vld [vmem:[#allocation2 + $0x11c] sm:$0xf]  ;;  %v10379_v29 = vld [vmem:[#allocation6 + $0x308] sm:$0xff] }
 0x179   :  { %v2198_v23 = vpop.f32.mrf.mxu3  ;;  %2909 = vst [vmem:[#allocation2 + $0x110] sm:$0xf] %v2655_v19  ;;  %v8814_v48 = vld [vmem:[#allocation2 + $0x104] sm:$0xf0]  ;;  %v2296_v24 = vpop.f32.mrf.mxu1  ;;  %v2059_v19 = vadd.f32 %v11467_v32, %v11399_v55  ;;  %4079 = vmatpush.bf16.msrb.mxu0 %v10379_v29 }
 0x17a   :  { %v2199_v3 = vadd.f32 %v2198_v23, %v11381_v25  ;;  %2565 = vst [vmem:[#allocation2 + $0x134] sm:$0xf] %v2549_v12  ;;  %vm2366_vm2 = vcmp.ge.f32.partialorder %v2343_v52, 0.0  ;;  %v2382_v30 = vmul.f32 0.15, %v2343_v52  ;;  %v8817_v33 = vor.u32 %v10423_v42, %v8814_v48  ;;  %v2345_v34 = vpop.f32.mrf.mxu2  ;;  %v10387_v60 = vld [vmem:[#allocation6 + $0x348] sm:$0xff] }
 0x17b   :  { %2722 = vst [vmem:[#allocation2 + $0x120] sm:$0xf] %v2549_v12  ;;  %v8832_v45 = vld [vmem:[#allocation2 + $0x118] sm:$0xf]  ;;  %v10370_v23 = vld [vmem:[#allocation6 + $0x2c0] sm:$0xff]  ;;  %4128 = vmatpush.bf16.msrb.mxu1 %v10387_v60  ;;  %v2108_v32 = vadd.f32 %v11404_v43, %v2059_v19 }
 0x17c   :  { %v2248_v21 = vadd.f32 %v2247_v53, %v2199_v3  ;;  %2803 = vst [vmem:[#allocation2 + $0x10c] sm:$0xf] %v2549_v12  ;;  %v2398_v27 = vsel %vm2366_vm2, %v2343_v52, %v2382_v30  ;;  %4003 = vmatmul.bf16.gmra.mxu2 %v8817_v33  ;;  %v10426_v11 = vld [vmem:[#allocation2 + $0x100] sm:$0xf0] }
 0x17d   :  { %3014 = vst [vmem:[#allocation2 + $0xf8] sm:$0xf] %v2549_v12  ;;  %v2439_v39 = vrot.slane %v2398_v27, 4  ;;  %v2656_v10 = vpack.c.bf16 %v2398_v27, %v2398_v27  ;;  %v8813_v25 = vor.u32 %v10426_v11, %v8812_v14  ;;  %v2157_v43 = vadd.f32 %v11406_v62, %v2108_v32  ;;  %4080 = vmatpush.bf16.msrb.mxu0 %v10378_v7 }
 0x17e   :  { %4306 = vst [vmem:[#allocation2 + $0xfc] sm:$0xf] %v10893_v35  ;;  %v2297_v13 = vadd.f32 %v2296_v24, %v2248_v21  ;;  %v8834_v5 = vld [vmem:[#allocation2 + $0x134] sm:$0xf0] }
 0x17f   :  { %v2440_v49 = vsel %vm512_vm10, %v2437_v20, %v2439_v39  ;;  %2672 = vst [vmem:[#allocation2 + $0x154] sm:$0xf] %v2656_v10  ;;  %3954 = vmatmul.bf16.gmra.mxu1 %v8813_v25  ;;  %v8837_v22 = vor.u32 %v10429_v47, %v8834_v5  ;;  %v2249_v41 = vpop.f32.mrf.mxu0  ;;  %v10430_v57 = vld [vmem:[#allocation2 + $0x124] sm:$0xf]  ;;  %v10371_v20 = vld [vmem:[#allocation6 + $0x2c8] sm:$0xff]  ;;  %v93_v5 = vadd.s32 112, %v10927_v1 }
 0x180   :  { %v2550_v51 = vpack.c.bf16 %v2440_v49, %v2440_v49  ;;  %2755 = vst [vmem:[#allocation2 + $0x140] sm:$0xf] %v2656_v10  ;;  %v2346_v37 = vadd.f32 %v2345_v34, %v2297_v13  ;;  %4030 = vmatpush.bf16.msrb.mxu3 %v10371_v20  ;;  %4129 = vmatpush.bf16.msrb.mxu1 %v10386_v38 }
 0x181   :  { %v2200_v16 = vpop.f32.mrf.mxu3  ;;  %2910 = vst [vmem:[#allocation2 + $0x12c] sm:$0xf] %v2656_v10  ;;  %3910 = vmatmul.bf16.gmra.mxu0 %v8837_v22  ;;  %v10432_v8 = vld [vmem:[#allocation2 + $0x130] sm:$0xf0]  ;;  %v2298_v40 = vpop.f32.mrf.mxu1 }
 0x182   :  { %v2201_v54 = vadd.f32 %v2200_v16, %v2152_v58  ;;  %2566 = vst [vmem:[#allocation2 + $0x150] sm:$0xf] %v2550_v51  ;;  %vm2367_vm3 = vcmp.ge.f32.partialorder %v2346_v37, 0.0  ;;  %v2383_v59 = vmul.f32 0.15, %v2346_v37  ;;  %v8833_v9 = vor.u32 %v10432_v8, %v8832_v45  ;;  %v2347_v61 = vpop.f32.mrf.mxu2 }
 0x183   :  { %2723 = vst [vmem:[#allocation2 + $0x13c] sm:$0xf] %v2550_v51  ;;  %v8840_v48 = vld [vmem:[#allocation2 + $0x120] sm:$0xf]  ;;  %v197_v8 = vand.u32 63, %v93_v5 }
 0x184   :  { %v2250_v50 = vadd.f32 %v2249_v41, %v2201_v54  ;;  %2804 = vst [vmem:[#allocation2 + $0x128] sm:$0xf] %v2550_v51  ;;  %v2399_v44 = vsel %vm2367_vm3, %v2346_v37, %v2383_v59  ;;  %4031 = vmatpush.bf16.msrb.mxu3 %v10370_v23  ;;  %v11520_v59 = vld [vmem:[#allocation2 + $0xd0] sm:$0xf0] }
 0x185   :  { %3015 = vst [vmem:[#allocation2 + $0x114] sm:$0xf] %v2550_v51  ;;  %v2441_v18 = vrot.slane %v2399_v44, 4  ;;  %v2657_v46 = vpack.c.bf16 %v2399_v44, %v2399_v44 }
 0x186   :  { %4451 = vst [vmem:[#allocation2 + $0xe8] sm:$0xf] %v10893_v35  ;;  %v2299_v2 = vadd.f32 %v2298_v40, %v2250_v50  ;;  %3861 = vmatmul.bf16.gmra.mxu3 %v8833_v9 }
 0x187   :  { %v2442_v15 = vsel %vm512_vm10, %v2439_v39, %v2441_v18  ;;  %2673 = vst [vmem:[#allocation2 + $0x170] sm:$0xf] %v2657_v46  ;;  %v8842_v31 = vld [vmem:[#allocation2 + $0x13c] sm:$0xf0]  ;;  %v2252_v12 = vpop.f32.mrf.mxu0  ;;  %v10436_v39 = vld [vmem:[#allocation2 + $0x154] sm:$0xf] }
 0x188   :  { %v2551_v6 = vpack.c.bf16 %v2442_v15, %v2442_v15  ;;  %2756 = vst [vmem:[#allocation2 + $0x15c] sm:$0xf] %v2657_v46  ;;  %v2348_v56 = vadd.f32 %v2347_v61, %v2299_v2  ;;  %v8845_v53 = vor.u32 %v10430_v57, %v8842_v31  ;;  %v2930_v57 = vadd.s32 12, %v197_v8 }
 0x189   :  { %v2203_v52 = vpop.f32.mrf.mxu3  ;;  %2911 = vst [vmem:[#allocation2 + $0x148] sm:$0xf] %v2657_v46  ;;  %v8860_v49 = vld [vmem:[#allocation2 + $0x150] sm:$0xf] }
 0x18a   :  { %v2204_v3 = vadd.f32 %v2203_v52, %v11395_v17  ;;  %2567 = vst [vmem:[#allocation2 + $0x16c] sm:$0xf] %v2551_v6  ;;  %vm2368_vm4 = vcmp.ge.f32.partialorder %v2348_v56, 0.0  ;;  %v2384_v55 = vmul.f32 0.15, %v2348_v56  ;;  %v2301_v17 = vpop.f32.mrf.mxu1  ;;  %v2350_v11 = vpop.f32.mrf.mxu2  ;;  %vm2960_vm8 = vcmp.lt.s32.totalorder %v2930_v57, 64 }
 0x18b   :  { %2724 = vst [vmem:[#allocation2 + $0x158] sm:$0xf] %v2551_v6  ;;  %v10433_v30 = vld [vmem:[#allocation2 + $0x138] sm:$0xf0]  ;;  %v10403_v57 = vld [vmem:[#allocation2 + $0x4c] sm:$0xf] }
 0x18c   :  { %v2253_v42 = vadd.f32 %v2252_v12, %v2204_v3  ;;  %2805 = vst [vmem:[#allocation2 + $0x144] sm:$0xf] %v2551_v6  ;;  %v2400_v33 = vsel %vm2368_vm4, %v2348_v56, %v2384_v55  ;;  %4008 = vmatmul.bf16.gmra.mxu2 %v8845_v53  ;;  %v8841_v0 = vor.u32 %v10433_v30, %v8840_v48  ;;  %v11524_v56 = vld [vmem:[#allocation2 + $0xc0] sm:$0xf]  ;;  %v11531_v48 = vld [vmem:[#allocation2 + $0x1b4] sm:$0xf0] }
 0x18d   :  { %3016 = vst [vmem:[#allocation2 + $0x130] sm:$0xf] %v2551_v6  ;;  %v2443_v21 = vrot.slane %v2400_v33, 4  ;;  %v2658_v27 = vpack.c.bf16 %v2400_v33, %v2400_v33 }
 0x18e   :  { %4307 = vst [vmem:[#allocation2 + $0x118] sm:$0xf] %v10893_v35  ;;  %v2302_v14 = vadd.f32 %v2301_v17, %v2253_v42  ;;  %v8862_v10 = vld [vmem:[#allocation2 + $0x16c] sm:$0xf0]  ;;  %v11534_v17 = vld [vmem:[#allocation2 + $0x1b8] sm:$0xf0] }
 0x18f   :  { %v2444_v24 = vsel %vm512_vm10, %v2441_v18, %v2443_v21  ;;  %2674 = vst [vmem:[#allocation2 + $0x18c] sm:$0xf] %v2658_v27  ;;  %3959 = vmatmul.bf16.gmra.mxu1 %v8841_v0  ;;  %v8865_v25 = vor.u32 %v10436_v39, %v8862_v10  ;;  %v2254_v51 = vpop.f32.mrf.mxu0  ;;  %v10437_v18 = vld [vmem:[#allocation2 + $0x15c] sm:$0xf] }
 0x190   :  { %v2552_v13 = vpack.c.bf16 %v2444_v24, %v2444_v24  ;;  %2757 = vst [vmem:[#allocation2 + $0x178] sm:$0xf] %v2658_v27  ;;  %v2351_v34 = vadd.f32 %v2350_v11, %v2302_v14  ;;  %v10457_v10 = vld [vmem:[#allocation6 + $0x3b8] sm:$0xff] }
 0x191   :  { %v2205_v47 = vpop.f32.mrf.mxu3  ;;  %2912 = vst [vmem:[#allocation2 + $0x164] sm:$0xf] %v2658_v27  ;;  %3915 = vmatmul.bf16.gmra.mxu0 %v8865_v25  ;;  %v10439_v22 = vld [vmem:[#allocation2 + $0x168] sm:$0xf0]  ;;  %5537 = vmatpush.bf16.msrb.mxu2 %v10457_v10  ;;  %v10410_v10 = vld [vmem:[#allocation2 + $0x84] sm:$0xf] }
 0x192   :  { %v2206_v58 = vadd.f32 %v2205_v47, %v2157_v43  ;;  %2568 = vst [vmem:[#allocation2 + $0x188] sm:$0xf] %v2552_v13  ;;  %vm2369_vm5 = vcmp.ge.f32.partialorder %v2351_v34, 0.0  ;;  %v2385_v62 = vmul.f32 0.15, %v2351_v34  ;;  %v8861_v37 = vor.u32 %v10439_v22, %v8860_v49  ;;  %v2303_v1 = vpop.f32.mrf.mxu1  ;;  %v2352_v44 = vpop.f32.mrf.mxu2  ;;  %v10465_v43 = vld [vmem:[#allocation6 + $0x3f8] sm:$0xff] }
 0x193   :  { %2725 = vst [vmem:[#allocation2 + $0x174] sm:$0xf] %v2552_v13  ;;  %v8868_v19 = vld [vmem:[#allocation2 + $0x158] sm:$0xf]  ;;  %5586 = vmatpush.bf16.msra.mxu3 %v10465_v43 }
 0x194   :  { %v2255_v41 = vadd.f32 %v2254_v51, %v2206_v58  ;;  %2806 = vst [vmem:[#allocation2 + $0x160] sm:$0xf] %v2552_v13  ;;  %v2401_v16 = vsel %vm2369_vm5, %v2351_v34, %v2385_v62  ;;  %v10396_v58 = vld [vmem:[#allocation2 + $0x14] sm:$0xf]  ;;  %v10473_v22 = vld [vmem:[#allocation6 + $0x438] sm:$0xff] }
 0x195   :  { %3017 = vst [vmem:[#allocation2 + $0x14c] sm:$0xf] %v2552_v13  ;;  %v2445_v54 = vrot.slane %v2401_v16, 4  ;;  %v2659_v45 = vpack.c.bf16 %v2401_v16, %v2401_v16  ;;  %v8710_v13 = vld [vmem:[#allocation2 + $0x2c] sm:$0xf0]  ;;  %5635 = vmatpush.bf16.msra.mxu0 %v10473_v22 }
 0x196   :  { %v2304_v9 = vadd.f32 %v2303_v1, %v2255_v41  ;;  %3866 = vmatmul.bf16.gmra.mxu3 %v8861_v37  ;;  %4528 = vst [vmem:[#allocation2 + $0xd4] sm:$0xf] %v10893_v35  ;;  %v10443_v12 = vld [vmem:[#allocation2 + $0x18c] sm:$0xf]  ;;  %v8713_v49 = vor.u32 %v10396_v58, %v8710_v13  ;;  %v8708_v51 = vld [vmem:[#allocation2 + $0x10] sm:$0xf] }
 0x197   :  { %v2446_v50 = vsel %vm512_vm10, %v2443_v21, %v2445_v54  ;;  %2675 = vst [vmem:[#allocation2 + $0x1a8] sm:$0xf] %v2659_v45  ;;  %v8870_v46 = vld [vmem:[#allocation2 + $0x174] sm:$0xf0]  ;;  %v10399_v62 = vld [vmem:[#allocation2 + $0x28] sm:$0xf0] }
 0x198   :  { %v2553_v40 = vpack.c.bf16 %v2446_v50, %v2446_v50  ;;  %2758 = vst [vmem:[#allocation2 + $0x194] sm:$0xf] %v2659_v45  ;;  %v2353_v2 = vadd.f32 %v2352_v44, %v2304_v9  ;;  %v8873_v61 = vor.u32 %v10437_v18, %v8870_v46  ;;  %v8709_v37 = vor.u32 %v10399_v62, %v8708_v51  ;;  %v11549_v16 = vld [vmem:[#allocation8 + $0x1] ss:$0 sm:$0xff]  ;;  %v10400_v9 = vld [vmem:[#allocation2 + $0x30] sm:$0xf0] }
 0x199   :  { %2913 = vst [vmem:[#allocation2 + $0x180] sm:$0xf] %v2659_v45  ;;  %v8888_v0 = vld [vmem:[#allocation2 + $0x188] sm:$0xf]  ;;  %v10464_v45 = vld [vmem:[#allocation6 + $0x3f0] sm:$0xff] }
 0x19a   :  { %2569 = vst [vmem:[#allocation2 + $0x1a4] sm:$0xf] %v2553_v40  ;;  %vm2370_vm6 = vcmp.ge.f32.partialorder %v2353_v2, 0.0  ;;  %v2386_v20 = vmul.f32 0.15, %v2353_v2  ;;  %5587 = vmatpush.bf16.msra.mxu3 %v10464_v45 }
 0x19b   :  { %2726 = vst [vmem:[#allocation2 + $0x190] sm:$0xf] %v2553_v40  ;;  %v10440_v15 = vld [vmem:[#allocation2 + $0x170] sm:$0xf0]  ;;  %v8716_v18 = vld [vmem:[#allocation2 + $0x18] sm:$0xf] }
 0x19c   :  { %2807 = vst [vmem:[#allocation2 + $0x17c] sm:$0xf] %v2553_v40  ;;  %v2402_v31 = vsel %vm2370_vm6, %v2353_v2, %v2386_v20  ;;  %4013 = vmatmul.bf16.gmra.mxu2 %v8873_v61  ;;  %v8869_v29 = vor.u32 %v10440_v15, %v8868_v19  ;;  %v8738_v46 = vld [vmem:[#allocation2 + $0x64] sm:$0xf0]  ;;  %v10472_v19 = vld [vmem:[#allocation6 + $0x430] sm:$0xff] }
 0x19d   :  { %3018 = vst [vmem:[#allocation2 + $0x168] sm:$0xf] %v2553_v40  ;;  %v2677_v60 = vrot.slane %v2402_v31, 4  ;;  %v2743_v6 = vpack.c.bf16 %v2402_v31, %v2402_v31  ;;  %v8717_v40 = vor.u32 %v10400_v9, %v8716_v18  ;;  %v8741_v20 = vor.u32 %v10403_v57, %v8738_v46  ;;  %v10406_v31 = vld [vmem:[#allocation2 + $0x60] sm:$0xf0]  ;;  %5636 = vmatpush.bf16.msra.mxu0 %v10472_v19 }
 0x19e   :  { %v8890_v52 = vld [vmem:[#allocation2 + $0x1a4] sm:$0xf0]  ;;  %4721 = vst [vmem:[#allocation2 + $0xc0] sm:$0xf] %v10893_v35  ;;  %v8764_v58 = vld [vmem:[#allocation2 + $0x80] sm:$0xf]  ;;  %v8797_v46 = vor.u32 %v11481_v36, %v11465_v26 }
 0x19f   :  { %v2678_v53 = vsel %vm512_vm10, %v2445_v54, %v2677_v60  ;;  %2759 = vst [vmem:[#allocation2 + $0x1b0] sm:$0xf] %v2743_v6  ;;  %v2761_v23 = vsel %vm512_vm10, %v2677_v60, 0.0  ;;  %3964 = vmatmul.bf16.gmra.mxu1 %v8869_v29  ;;  %v8893_v3 = vor.u32 %v10443_v12, %v8890_v52  ;;  %v10444_v14 = vld [vmem:[#allocation2 + $0x194] sm:$0xf] }
 0x1a0   :  { %v2711_v55 = vpack.c.bf16 %v2678_v53, %v2678_v53  ;;  %v2777_v32 = vsel %vm1029_vm0, %v2761_v23, 0.0  ;;  %2914 = vst [vmem:[#allocation2 + $0x19c] sm:$0xf] %v2743_v6  ;;  %v2990_v42 = vsel %vm2960_vm8, %v2761_v23, 0.0  ;;  %v10456_v54 = vld [vmem:[#allocation6 + $0x3b0] sm:$0xff] }
 0x1a1   :  { %v2793_v30 = vpack.c.bf16 %v2777_v32, %v2777_v32  ;;  %v3005_v33 = vpack.c.bf16 %v2990_v42, %v2990_v42  ;;  %3920 = vmatmul.bf16.gmra.mxu0 %v8893_v3  ;;  %v10446_v21 = vld [vmem:[#allocation2 + $0x1a0] sm:$0xf0]  ;;  %4636 = vst [vmem:[#allocation2 + $0x1b8] sm:$0xf] %v10893_v35  ;;  %5538 = vmatpush.bf16.msrb.mxu2 %v10456_v54  ;;  %v8736_v6 = vld [vmem:[#allocation2 + $0x48] sm:$0xf] }
 0x1a2   :  { %2727 = vst [vmem:[#allocation2 + $0x1ac] sm:$0xf] %v2711_v55  ;;  %v8889_v27 = vor.u32 %v10446_v21, %v8888_v0  ;;  %v8896_v25 = vld [vmem:[#allocation2 + $0x190] sm:$0xf]  ;;  %v8737_v52 = vor.u32 %v10406_v31, %v8736_v6  ;;  %v10455_v3 = vld [vmem:[#allocation6 + $0x3a8] sm:$0xff]  ;;  %v10461_v6 = vld [vmem:[#allocation6 + $0x3d8] sm:$0xff] }
 0x1a3   :  { %2808 = vst [vmem:[#allocation2 + $0x198] sm:$0xf] %v2711_v55  ;;  %v8744_v21 = vld [vmem:[#allocation2 + $0x50] sm:$0xf]  ;;  %v8772_v9 = vld [vmem:[#allocation2 + $0x88] sm:$0xf] }
 0x1a4   :  { %2809 = vst [vmem:[#allocation2 + $0x1b4] sm:$0xf] %v2793_v30  ;;  %v10407_v30 = vld [vmem:[#allocation2 + $0x68] sm:$0xf0]  ;;  %v8792_v19 = vld [vmem:[#allocation2 + $0xb8] sm:$0xf] }
 0x1a5   :  { %3020 = vst [vmem:[#allocation2 + $0x1a0] sm:$0xf] %v3005_v33  ;;  %5539 = vmatpush.bf16.msrb.mxu2 %v10455_v3  ;;  %v8793_v31 = vor.u32 %v11520_v59, %v8792_v19  ;;  %v8801_v3 = vor.u32 %v11475_v4, %v11524_v56  ;;  %v10452_v56 = vld [vmem:[#allocation6 + $0x390] sm:$0xff] }
 0x1a6   :  { %3019 = vst [vmem:[#allocation2 + $0x184] sm:$0xf] %v2711_v55  ;;  %3871 = vmatmul.bf16.gmra.mxu3 %v8889_v27  ;;  %v8898_v28 = vld [vmem:[#allocation2 + $0x1ac] sm:$0xf0]  ;;  %v10463_v55 = vld [vmem:[#allocation6 + $0x3e8] sm:$0xff] }
 0x1a7   :  { %v11536_v11 = vld [vmem:[#allocation2 + $0x19c] sm:$0xf]  ;;  %4730 = vst [vmem:[#allocation2 + $0x1bc] sm:$0xf] %v10893_v35  ;;  %v8901_v39 = vor.u32 %v10444_v14, %v8898_v28  ;;  %5588 = vmatpush.bf16.msra.mxu3 %v10463_v55  ;;  %v8766_v27 = vld [vmem:[#allocation2 + $0x9c] sm:$0xf0]  ;;  %v8745_v28 = vor.u32 %v10407_v30, %v8744_v21 }
 0x1a8   :  { %4635 = vst [vmem:[#allocation2 + $0x19c] sm:$0xf] %v10893_v35  ;;  %v8769_v43 = vor.u32 %v10410_v10, %v8766_v27  ;;  %v10469_v30 = vld [vmem:[#allocation6 + $0x418] sm:$0xff] }
 0x1a9   :  { %v10447_v24 = vld [vmem:[#allocation2 + $0x1a8] sm:$0xf0] }
 0x1aa   :  { %v8897_v7 = vor.u32 %v10447_v24, %v8896_v25  ;;  %v10471_v24 = vld [vmem:[#allocation6 + $0x428] sm:$0xff] }
 0x1ab   :  { %v11540_v38 = vld [vmem:[#allocation2 + $0x1b0] sm:$0xf0]  ;;  %5637 = vmatpush.bf16.msra.mxu0 %v10471_v24 }
 0x1ac   :  { %4018 = vmatmul.bf16.gmra.mxu2 %v8901_v39  ;;  %4536 = vst [vmem:[#allocation2 + $0x1b4] sm:$0xf] %v10893_v35  ;;  %v11543_v34 = vld [vmem:[#allocation2 + $0x1a0] sm:$0xf]  ;;  %v10460_v24 = vld [vmem:[#allocation6 + $0x3d0] sm:$0xff] }
 0x1ad   :  { %v11545_v47 = vld [vmem:[#allocation2 + $0x180] sm:$0xf0]  ;;  %4729 = vst [vmem:[#allocation2 + $0x1a0] sm:$0xf] %v10893_v35 }
 0x1ae   :  { %v3886_v5 = vpop.f32.mrf.mxu0  ;;  %4728 = vst [vmem:[#allocation2 + $0x184] sm:$0xf] %v10893_v35 }
 0x1af   :  { %3969 = vmatmul.bf16.gmra.mxu1 %v8897_v7  ;;  %v10413_v7 = vld [vmem:[#allocation2 + $0x98] sm:$0xf0] }
 0x1b0   :  { %v8765_v22 = vor.u32 %v10413_v7, %v8764_v58 }
 0x1b1   :  { %4081 = vmatmul.bf16.vlgmr.msrb.gmra.mxu0 %v8713_v49 }
 0x1b6   :  { %4032 = vmatmul.bf16.vlgmr.msrb.gmra.mxu3 %v8709_v37  ;;  %v3888_v41 = vpop.f32.mrf.mxu0  ;;  %v10454_v37 = vld [vmem:[#allocation6 + $0x3a0] sm:$0xff] }
 0x1b7   :  { %5540 = vmatpush.bf16.msrb.mxu2 %v10454_v37 }
 0x1b9   :  { %v3837_v1 = vpop.f32.mrf.mxu3 }
 0x1ba   :  { %v3838_v8 = vadd.f32 %v11549_v16, %v3837_v1 }
 0x1bb   :  { %v3935_v50 = vpop.f32.mrf.mxu1 }
 0x1bc   :  { %v3887_v44 = vadd.f32 %v3886_v5, %v3838_v8 }
 0x1be   :  { %v11552_v2 = vadd.f32 %v3935_v50, %v3887_v44  ;;  %v3891_v61 = vpop.f32.mrf.mxu0  ;;  %v8773_v50 = vor.u32 %v11495_v63, %v8772_v9  ;;  %v10434_v9 = vld [vmem:[#allocation2 + $0x140] sm:$0xf0] }
 0x1bf   :  { %4130 = vmatmul.bf16.vlgmr.msrb.gmra.mxu1 %v8717_v40  ;;  %v10470_v40 = vld [vmem:[#allocation6 + $0x420] sm:$0xff] }
 0x1c0   :  { %5638 = vmatpush.bf16.msra.mxu0 %v10470_v40 }
 0x1c1   :  { %v3839_v15 = vpop.f32.mrf.mxu3  ;;  %4086 = vmatmul.bf16.gmra.mxu0 %v8741_v20 }
 0x1c2   :  { %v3840_v29 = vadd.f32 %v11549_v16, %v3839_v15 }
 0x1c3   :  { %v3937_v60 = vpop.f32.mrf.mxu1 }
 0x1c4   :  { %v3889_v12 = vadd.f32 %v3888_v41, %v3840_v29  ;;  %v10462_v41 = vld [vmem:[#allocation6 + $0x3e0] sm:$0xff]  ;;  %5639 = vmatpush.bf16.msra.mxu0 %v10469_v30 }
 0x1c5   :  { %5589 = vmatpush.bf16.msra.mxu3 %v10462_v41 }
 0x1c6   :  { %v11555_v53 = vadd.f32 %v3937_v60, %v3889_v12  ;;  %4037 = vmatmul.bf16.gmra.mxu3 %v8737_v52  ;;  %v3893_v23 = vpop.f32.mrf.mxu0  ;;  %v10453_v60 = vld [vmem:[#allocation6 + $0x398] sm:$0xff] }
 0x1c7   :  { %5541 = vmatpush.bf16.msrb.mxu2 %v10453_v60  ;;  %v8856_v60 = vld [vmem:[#allocation2 + $0x130] sm:$0xf] }
 0x1c9   :  { %v3842_v32 = vpop.f32.mrf.mxu3  ;;  %5590 = vmatpush.bf16.msra.mxu3 %v10461_v6  ;;  %v8878_v6 = vld [vmem:[#allocation2 + $0x17c] sm:$0xf0] }
 0x1ca   :  { %v3843_v42 = vadd.f32 %v11549_v16, %v3842_v32  ;;  %v10424_v32 = vld [vmem:[#allocation2 + $0xf4] sm:$0xf] }
 0x1cb   :  { %v3940_v33 = vpop.f32.mrf.mxu1  ;;  %5542 = vmatpush.bf16.msrb.mxu2 %v10452_v56 }
 0x1cc   :  { %v3892_v0 = vadd.f32 %v3891_v61, %v3843_v42 }
 0x1cd   :  { %5591 = vmatpush.bf16.msra.mxu3 %v10460_v24 }
 0x1ce   :  { %v11558_v14 = vadd.f32 %v3940_v33, %v3892_v0  ;;  %v3896_v39 = vpop.f32.mrf.mxu0  ;;  %v10427_v0 = vld [vmem:[#allocation2 + $0x108] sm:$0xf0] }
 0x1cf   :  { %4135 = vmatmul.bf16.gmra.mxu1 %v8745_v28  ;;  %v8820_v28 = vld [vmem:[#allocation2 + $0xf0] sm:$0xf] }
 0x1d0   :  { %v8821_v10 = vor.u32 %v10427_v0, %v8820_v28  ;;  %v10458_v28 = vld [vmem:[#allocation6 + $0x3c0] sm:$0xff] }
 0x1d1   :  { %v3844_v25 = vpop.f32.mrf.mxu3  ;;  %4091 = vmatmul.bf16.gmra.mxu0 %v8769_v43 }
 0x1d2   :  { %v3845_v13 = vadd.f32 %v11549_v16, %v3844_v25 }
 0x1d3   :  { %v3942_v5 = vpop.f32.mrf.mxu1 }
 0x1d4   :  { %v3894_v49 = vadd.f32 %v3893_v23, %v3845_v13  ;;  %v8822_v23 = vld [vmem:[#allocation2 + $0x10c] sm:$0xf0]  ;;  %v10428_v13 = vld [vmem:[#allocation2 + $0x110] sm:$0xf0] }
 0x1d5   :  { %v8825_v42 = vor.u32 %v10424_v32, %v8822_v23  ;;  %v10441_v32 = vld [vmem:[#allocation2 + $0x178] sm:$0xf0] }
 0x1d6   :  { %v11561_v62 = vadd.f32 %v3942_v5, %v3894_v49  ;;  %4042 = vmatmul.bf16.gmra.mxu3 %v8765_v22  ;;  %v3898_v51 = vpop.f32.mrf.mxu0  ;;  %v8828_v49 = vld [vmem:[#allocation2 + $0xf8] sm:$0xf]  ;;  %v8850_v22 = vld [vmem:[#allocation2 + $0x144] sm:$0xf0] }
 0x1d9   :  { %v3847_v54 = vpop.f32.mrf.mxu3 }
 0x1da   :  { %v3848_v45 = vadd.f32 %v11549_v16, %v3847_v54  ;;  %v10431_v54 = vld [vmem:[#allocation2 + $0x12c] sm:$0xf] }
 0x1db   :  { %v3945_v1 = vpop.f32.mrf.mxu1 }
 0x1dc   :  { %v3897_v8 = vadd.f32 %v3896_v39, %v3848_v45  ;;  %v8853_v45 = vor.u32 %v10431_v54, %v8850_v22  ;;  %v8904_v22 = vld [vmem:[#allocation2 + $0x198] sm:$0xf]  ;;  %v10480_v54 = vld [vmem:[#allocation6 + $0x470] sm:$0xff] }
 0x1de   :  { %v11565_v44 = vadd.f32 %v3945_v1, %v3897_v8  ;;  %v3901_v18 = vpop.f32.mrf.mxu0  ;;  %v10468_v1 = vld [vmem:[#allocation6 + $0x410] sm:$0xff] }
 0x1df   :  { %4140 = vmatmul.bf16.gmra.mxu1 %v8773_v50  ;;  %5640 = vmatpush.bf16.msra.mxu0 %v10468_v1  ;;  %v8848_v50 = vld [vmem:[#allocation2 + $0x128] sm:$0xf]  ;;  %v10509_v1 = vld [vmem:[#allocation2 + $0x18] sm:$0xf0] }
 0x1e0   :  { %5989 = vst [vmem:[#allocation2 + $0x1c] sm:$0xf] %v10893_v35 }
 0x1e1   :  { %v3849_v61 = vpop.f32.mrf.mxu3  ;;  %4096 = vmatmul.bf16.gmra.mxu0 %v8797_v46  ;;  %v8849_v46 = vor.u32 %v10434_v9, %v8848_v50 }
 0x1e2   :  { %v3850_v57 = vadd.f32 %v11549_v16, %v3849_v61  ;;  %v10451_v61 = vld [vmem:[#allocation6 + $0x388] sm:$0xff] }
 0x1e3   :  { %v3947_v20 = vpop.f32.mrf.mxu1  ;;  %5543 = vmatpush.bf16.msrb.mxu2 %v10451_v61 }
 0x1e4   :  { %v3899_v15 = vadd.f32 %v3898_v51, %v3850_v57  ;;  %v8829_v51 = vor.u32 %v10428_v13, %v8828_v49  ;;  %v10459_v57 = vld [vmem:[#allocation6 + $0x3c8] sm:$0xff]  ;;  %v8909_v49 = vor.u32 %v11536_v11, %v11531_v48  ;;  %v8905_v48 = vor.u32 %v11540_v38, %v8904_v22  ;;  %v9142_v11 = vld [vmem:[#allocation2 + $0x1c] sm:$0xf0] }
 0x1e5   :  { %5592 = vmatpush.bf16.msra.mxu3 %v10459_v57  ;;  %6077 = vst [vmem:[#allocation2 + $0x20] sm:$0xf] %v10893_v35  ;;  %v10466_v57 = vld [vmem:[#allocation6 + $0x400] sm:$0xff] }
 0x1e6   :  { %v11571_v29 = vadd.f32 %v3947_v20, %v3899_v15  ;;  %4047 = vmatmul.bf16.gmra.mxu3 %v8793_v31  ;;  %v3903_v63 = vpop.f32.mrf.mxu0  ;;  %v10435_v15 = vld [vmem:[#allocation2 + $0x148] sm:$0xf0] }
 0x1e9   :  { %v3852_v12 = vpop.f32.mrf.mxu3  ;;  %5593 = vmatpush.bf16.msra.mxu3 %v10458_v28  ;;  %v10475_v28 = vld [vmem:[#allocation6 + $0x448] sm:$0xff] }
 0x1ea   :  { %v3853_v26 = vadd.f32 %v11549_v16, %v3852_v12  ;;  %v8857_v12 = vor.u32 %v10435_v15, %v8856_v60  ;;  %v8913_v60 = vor.u32 %v11534_v17, %v11543_v34  ;;  %v11632_v17 = vld [vmem:[#allocation2 + $0x8] sm:$0xf] }
 0x1eb   :  { %v3950_v36 = vpop.f32.mrf.mxu1  ;;  %6120 = vst [vmem:[#allocation2 + $0x8] sm:$0xf] %v10893_v35 }
 0x1ec   :  { %v3902_v52 = vadd.f32 %v3901_v18, %v3853_v26 }
 0x1ee   :  { %v11576_v55 = vadd.f32 %v3950_v36, %v3902_v52  ;;  %v3906_v59 = vpop.f32.mrf.mxu0  ;;  %v10438_v52 = vld [vmem:[#allocation2 + $0x164] sm:$0xf] }
 0x1ef   :  { %4145 = vmatmul.bf16.gmra.mxu1 %v8801_v3  ;;  %v8881_v23 = vor.u32 %v10438_v52, %v8878_v6  ;;  %v10467_v3 = vld [vmem:[#allocation6 + $0x408] sm:$0xff]  ;;  %v10477_v6 = vld [vmem:[#allocation6 + $0x458] sm:$0xff] }
 0x1f0   :  { %5641 = vmatpush.bf16.msra.mxu0 %v10467_v3  ;;  %v10497_v3 = vld [vmem:[#allocation6 + $0x4f8] sm:$0xff] }
 0x1f1   :  { %v3854_v33 = vpop.f32.mrf.mxu3  ;;  %4101 = vmatmul.bf16.gmra.mxu0 %v8825_v42  ;;  %v8876_v42 = vld [vmem:[#allocation2 + $0x160] sm:$0xf]  ;;  %5782 = vmatpush.bf16.msrb.mxu3 %v10497_v3 }
 0x1f2   :  { %v3855_v21 = vadd.f32 %v11549_v16, %v3854_v33  ;;  %v8877_v33 = vor.u32 %v10441_v32, %v8876_v42  ;;  %v10476_v32 = vld [vmem:[#allocation6 + $0x450] sm:$0xff] }
 0x1f3   :  { %v3952_v27 = vpop.f32.mrf.mxu1 }
 0x1f4   :  { %v3904_v39 = vadd.f32 %v3903_v63, %v3855_v21  ;;  %v11601_v21 = vpop.f32.mrf.mxu2  ;;  %5642 = vmatpush.bf16.msra.mxu0 %v10466_v57 }
 0x1f6   :  { %v11579_v43 = vadd.f32 %v3952_v27, %v3904_v39  ;;  %4052 = vmatmul.bf16.gmra.mxu3 %v8821_v10  ;;  %v11581_v4 = vpop.f32.mrf.mxu0  ;;  %v10450_v27 = vld [vmem:[#allocation6 + $0x380] sm:$0xff]  ;;  %v10481_v39 = vld [vmem:[#allocation6 + $0x478] sm:$0xff] }
 0x1f7   :  { %5544 = vmatpush.bf16.msrb.mxu2 %v10450_v27  ;;  %5684 = vmatpush.bf16.msra.mxu1 %v10481_v39 }
 0x1f9   :  { %v3857_v25 = vpop.f32.mrf.mxu3 }
 0x1fa   :  { %v3858_v7 = vadd.f32 %v11549_v16, %v3857_v25 }
 0x1fb   :  { %5685 = vmatpush.bf16.msra.mxu1 %v10480_v54 }
 0x1fc   :  { %v3907_v5 = vadd.f32 %v3906_v59, %v3858_v7  ;;  %v3955_v58 = vpop.f32.mrf.mxu1  ;;  %v8884_v7 = vld [vmem:[#allocation2 + $0x168] sm:$0xf] }
 0x1fd   :  { %v8885_v13 = vor.u32 %v11545_v47, %v8884_v7  ;;  %v10506_v47 = vld [vmem:[#allocation2 + $0x4] sm:$0xf]  ;;  %v10505_v7 = vld [vmem:[#allocation6 + $0x538] sm:$0xff] }
 0x1fe   :  { %v11584_v37 = vadd.f32 %v3955_v58, %v3907_v5  ;;  %v3911_v41 = vpop.f32.mrf.mxu0  ;;  %6076 = vst [vmem:[#allocation2 + $0x4] sm:$0xf] %v10893_v35  ;;  %v9145_v42 = vor.u32 %v10506_v47, %v9142_v11  ;;  %5831 = vmatpush.bf16.msrb.mxu0 %v10505_v7  ;;  %v10496_v11 = vld [vmem:[#allocation6 + $0x4f0] sm:$0xff]  ;;  %v10487_v7 = vld [vmem:[#allocation6 + $0x4a8] sm:$0xff] }
 0x1ff   :  { %4150 = vmatmul.bf16.gmra.mxu1 %v8829_v51  ;;  %v11609_v51 = vpop.f32.mrf.mxu2  ;;  %5783 = vmatpush.bf16.msrb.mxu3 %v10496_v11 }
 0x201   :  { %v11586_v8 = vpop.f32.mrf.mxu3  ;;  %4106 = vmatmul.bf16.gmra.mxu0 %v8853_v45  ;;  %v9140_v45 = vld [vmem:[#allocation2] sm:$0xf] }
 0x202   :  { %v9141_v9 = vor.u32 %v10509_v1, %v9140_v45  ;;  %5988 = vst [vmem:[#allocation2] sm:$0xf] %v10893_v35  ;;  %v3987_v45 = vadd.f32 %v11609_v51, %v11555_v53 }
 0x204   :  { %v11588_v18 = vpop.f32.mrf.mxu1  ;;  %5545 = vmatmul.bf16.vlgmr.msrb.gmra.mxu2 %v9141_v9 }
 0x206   :  { %4057 = vmatmul.bf16.gmra.mxu3 %v8849_v46  ;;  %v11590_v40 = vpop.f32.mrf.mxu0  ;;  %v10479_v46 = vld [vmem:[#allocation6 + $0x468] sm:$0xff] }
 0x207   :  { %5686 = vmatpush.bf16.msra.mxu1 %v10479_v46 }
 0x209   :  { %v3862_v20 = vpop.f32.mrf.mxu3 }
 0x20a   :  { %v3863_v19 = vadd.f32 %v11549_v16, %v3862_v20 }
 0x20c   :  { %v3912_v31 = vadd.f32 %v3911_v41, %v3863_v19  ;;  %v3960_v63 = vpop.f32.mrf.mxu1  ;;  %v10478_v19 = vld [vmem:[#allocation6 + $0x460] sm:$0xff] }
 0x20d   :  { %5687 = vmatpush.bf16.msra.mxu1 %v10478_v19 }
 0x20e   :  { %v11593_v26 = vadd.f32 %v3960_v63, %v3912_v31  ;;  %v3916_v36 = vpop.f32.mrf.mxu0  ;;  %v3989_v31 = vpop.f32.mrf.mxu2 }
 0x20f   :  { %4155 = vmatmul.bf16.gmra.mxu1 %v8857_v12 }
 0x211   :  { %v11595_v59 = vpop.f32.mrf.mxu3  ;;  %4111 = vmatmul.bf16.gmra.mxu0 %v8881_v23  ;;  %5688 = vmatpush.bf16.msra.mxu1 %v10477_v6  ;;  %v10489_v23 = vld [vmem:[#allocation6 + $0x4b8] sm:$0xff] }
 0x212   :  { %5733 = vmatpush.bf16.msra.mxu2 %v10489_v23 }
 0x214   :  { %v11597_v30 = vpop.f32.mrf.mxu1 }
 0x215   :  { %5689 = vmatpush.bf16.msra.mxu1 %v10476_v32 }
 0x216   :  { %4062 = vmatmul.bf16.gmra.mxu3 %v8877_v33  ;;  %v11599_v0 = vpop.f32.mrf.mxu0  ;;  %v9168_v33 = vld [vmem:[#allocation2 + $0x38] sm:$0xf]  ;;  %v3991_v34 = vpop.f32.mrf.mxu2 }
 0x217   :  { %5990 = vst [vmem:[#allocation2 + $0x38] sm:$0xf] %v10893_v35 }
 0x219   :  { %v3867_v10 = vpop.f32.mrf.mxu3  ;;  %5690 = vmatpush.bf16.msra.mxu1 %v10475_v28 }
 0x21a   :  { %v3868_v56 = vadd.f32 %v11549_v16, %v3867_v10  ;;  %v3985_v10 = vadd.f32 %v11601_v21, %v11552_v2 }
 0x21c   :  { %v3917_v24 = vadd.f32 %v3916_v36, %v3868_v56  ;;  %v3965_v25 = vpop.f32.mrf.mxu1 }
 0x21e   :  { %v11605_v5 = vadd.f32 %v3965_v25, %v3917_v24  ;;  %v3921_v58 = vpop.f32.mrf.mxu0  ;;  %v10474_v24 = vld [vmem:[#allocation6 + $0x440] sm:$0xff]  ;;  %v11637_v54 = vpop.f32.mrf.mxu2 }
 0x21f   :  { %4160 = vmatmul.bf16.gmra.mxu1 %v8885_v13 }
 0x220   :  { %5691 = vmatpush.bf16.msra.mxu1 %v10474_v24 }
 0x221   :  { %v11611_v41 = vpop.f32.mrf.mxu3  ;;  %4116 = vmatmul.bf16.gmra.mxu0 %v8909_v49 }
 0x224   :  { %v11615_v50 = vpop.f32.mrf.mxu1 }
 0x226   :  { %4067 = vmatmul.bf16.gmra.mxu3 %v8905_v48  ;;  %v11620_v61 = vpop.f32.mrf.mxu0  ;;  %v10488_v48 = vld [vmem:[#allocation6 + $0x4b0] sm:$0xff]  ;;  %v11642_v51 = vpop.f32.mrf.mxu2 }
 0x227   :  { %5734 = vmatpush.bf16.msra.mxu2 %v10488_v48 }
 0x229   :  { %v3872_v20 = vpop.f32.mrf.mxu3 }
 0x22a   :  { %v3873_v15 = vadd.f32 %v11549_v16, %v3872_v20 }
 0x22b   :  { %5735 = vmatpush.bf16.msra.mxu2 %v10487_v7 }
 0x22c   :  { %v3922_v38 = vadd.f32 %v3921_v58, %v3873_v15  ;;  %v3970_v63 = vpop.f32.mrf.mxu1  ;;  %v3990_v15 = vadd.f32 %v3989_v31, %v11558_v14 }
 0x22e   :  { %v11625_v12 = vadd.f32 %v3970_v63, %v3922_v38  ;;  %v4082_v36 = vpop.f32.mrf.mxu0 }
 0x22f   :  { %4165 = vmatmul.bf16.gmra.mxu1 %v8913_v60 }
 0x231   :  { %v11627_v52 = vpop.f32.mrf.mxu3 }
 0x234   :  { %v11629_v27 = vpop.f32.mrf.mxu1 }
 0x236   :  { %v4084_v39 = vpop.f32.mrf.mxu0  ;;  %5594 = vmatmul.bf16.vlgmr.msra.gmra.mxu3 %v9145_v42 }
 0x239   :  { %v4033_v56 = vpop.f32.mrf.mxu3 }
 0x23a   :  { %v4034_v25 = vadd.f32 %v4033_v56, %v3985_v10  ;;  %v3992_v10 = vadd.f32 %v3991_v34, %v11561_v62 }
 0x23c   :  { %v4083_v13 = vadd.f32 %v4082_v36, %v4034_v25  ;;  %v4131_v58 = vpop.f32.mrf.mxu1  ;;  %v10504_v36 = vld [vmem:[#allocation6 + $0x530] sm:$0xff] }
 0x23d   :  { %5832 = vmatpush.bf16.msrb.mxu0 %v10504_v36 }
 0x23e   :  { %v4132_v49 = vadd.f32 %v4131_v58, %v4083_v13  ;;  %v4087_v22 = vpop.f32.mrf.mxu0  ;;  %v10495_v13 = vld [vmem:[#allocation6 + $0x4e8] sm:$0xff]  ;;  %v11647_v58 = vpop.f32.mrf.mxu2 }
 0x23f   :  { %5784 = vmatpush.bf16.msrb.mxu3 %v10495_v13 }
 0x240   :  { %vm4171_vm10 = vcmp.ge.f32.partialorder %v4132_v49, 0.0  ;;  %v4187_v1 = vmul.f32 0.15, %v4132_v49 }
 0x241   :  { %v4035_v9 = vpop.f32.mrf.mxu3 }
 0x242   :  { %v4203_v2 = vsel %vm4171_vm10, %v4132_v49, %v4187_v1  ;;  %v4036_v21 = vadd.f32 %v4035_v9, %v3987_v45 }
 0x243   :  { %v4284_v47 = vpack.c.bf16 %v4203_v2, %v4203_v2 }
 0x244   :  { %v4085_v46 = vadd.f32 %v4084_v39, %v4036_v21  ;;  %v4133_v57 = vpop.f32.mrf.mxu1 }
 0x245   :  { %4300 = vst [vmem:[#allocation2 + $0x54] sm:$0xf] %v4284_v47 }
 0x246   :  { %4399 = vst [vmem:[#allocation2 + $0x3c] sm:$0xf] %v4284_v47  ;;  %v4134_v20 = vadd.f32 %v4133_v57, %v4085_v46  ;;  %v4089_v19 = vpop.f32.mrf.mxu0  ;;  %v10503_v57 = vld [vmem:[#allocation6 + $0x528] sm:$0xff] }
 0x247   :  { %4444 = vst [vmem:[#allocation2 + $0x24] sm:$0xf] %v4284_v47  ;;  %5833 = vmatpush.bf16.msrb.mxu0 %v10503_v57 }
 0x248   :  { %4475 = vst [vmem:[#allocation2 + $0xc] sm:$0xf] %v4284_v47  ;;  %vm4172_vm0 = vcmp.ge.f32.partialorder %v4134_v20, 0.0  ;;  %v4188_v53 = vmul.f32 0.15, %v4134_v20  ;;  %v3995_v47 = vadd.f32 %v11637_v54, %v11565_v44  ;;  %v11655_v54 = vpop.f32.mrf.mxu2 }
 0x249   :  { %v4038_v38 = vpop.f32.mrf.mxu3 }
 0x24a   :  { %v4204_v63 = vsel %vm4172_vm0, %v4134_v20, %v4188_v53  ;;  %v4039_v60 = vadd.f32 %v4038_v38, %v3990_v15 }
 0x24b   :  { %v4285_v6 = vpack.c.bf16 %v4204_v63, %v4204_v63 }
 0x24c   :  { %v4088_v23 = vadd.f32 %v4087_v22, %v4039_v60  ;;  %v4136_v3 = vpop.f32.mrf.mxu1  ;;  %v10516_v32 = vld [vmem:[#allocation2 + $0x50] sm:$0xf0] }
 0x24d   :  { %4301 = vst [vmem:[#allocation2 + $0x70] sm:$0xf] %v4285_v6  ;;  %v9169_v42 = vor.u32 %v10516_v32, %v9168_v33 }
 0x24e   :  { %4400 = vst [vmem:[#allocation2 + $0x58] sm:$0xf] %v4285_v6  ;;  %v4137_v28 = vadd.f32 %v4136_v3, %v4088_v23  ;;  %v4092_v39 = vpop.f32.mrf.mxu0  ;;  %v10510_v14 = vld [vmem:[#allocation2 + $0x20] sm:$0xf0] }
 0x24f   :  { %4445 = vst [vmem:[#allocation2 + $0x40] sm:$0xf] %v4285_v6  ;;  %5550 = vmatmul.bf16.gmra.mxu2 %v9169_v42  ;;  %v9149_v31 = vor.u32 %v10510_v14, %v11632_v17  ;;  %v10513_v17 = vld [vmem:[#allocation2 + $0x3c] sm:$0xf]  ;;  %v10507_v2 = vld [vmem:[#allocation2 + $0xc] sm:$0xf]  ;;  %v3997_v42 = vadd.f32 %v11642_v51, %v11571_v29 }
 0x250   :  { %4476 = vst [vmem:[#allocation2 + $0x28] sm:$0xf] %v4285_v6  ;;  %vm4173_vm9 = vcmp.ge.f32.partialorder %v4137_v28, 0.0  ;;  %v4189_v56 = vmul.f32 0.15, %v4137_v28 }
 0x251   :  { %4521 = vst [vmem:[#allocation2 + $0x10] sm:$0xf] %v4285_v6  ;;  %5643 = vmatmul.bf16.vlgmr.msra.gmra.mxu0 %v9149_v31  ;;  %v4040_v24 = vpop.f32.mrf.mxu3  ;;  %v10494_v31 = vld [vmem:[#allocation6 + $0x4e0] sm:$0xff] }
 0x252   :  { %v4205_v25 = vsel %vm4173_vm9, %v4137_v28, %v4189_v56  ;;  %5991 = vst [vmem:[#allocation2 + $0x54] sm:$0xf] %v10893_v35  ;;  %v4041_v33 = vadd.f32 %v4040_v24, %v3992_v10  ;;  %5785 = vmatpush.bf16.msrb.mxu3 %v10494_v31 }
 0x253   :  { %v4286_v49 = vpack.c.bf16 %v4205_v25, %v4205_v25  ;;  %6121 = vst [vmem:[#allocation2 + $0x24] sm:$0xf] %v10893_v35 }
 0x254   :  { %v4090_v22 = vadd.f32 %v4089_v19, %v4041_v33  ;;  %v4138_v62 = vpop.f32.mrf.mxu1  ;;  %6078 = vst [vmem:[#allocation2 + $0x3c] sm:$0xf] %v10893_v35  ;;  %v9196_v53 = vld [vmem:[#allocation2 + $0x70] sm:$0xf] }
 0x255   :  { %4302 = vst [vmem:[#allocation2 + $0x8c] sm:$0xf] %v4286_v49  ;;  %v9170_v34 = vld [vmem:[#allocation2 + $0x54] sm:$0xf0] }
 0x256   :  { %4401 = vst [vmem:[#allocation2 + $0x74] sm:$0xf] %v4286_v49  ;;  %v4139_v45 = vadd.f32 %v4138_v62, %v4090_v22  ;;  %v4094_v1 = vpop.f32.mrf.mxu0  ;;  %v9173_v9 = vor.u32 %v10513_v17, %v9170_v34  ;;  %v9176_v23 = vld [vmem:[#allocation2 + $0x40] sm:$0xf]  ;;  %v11660_v17 = vpop.f32.mrf.mxu2  ;;  %v4000_v34 = vadd.f32 %v11647_v58, %v11576_v55 }
 0x257   :  { %4446 = vst [vmem:[#allocation2 + $0x5c] sm:$0xf] %v4286_v49  ;;  %v9150_v21 = vld [vmem:[#allocation2 + $0x24] sm:$0xf0] }
 0x258   :  { %4477 = vst [vmem:[#allocation2 + $0x44] sm:$0xf] %v4286_v49  ;;  %vm4174_vm11 = vcmp.ge.f32.partialorder %v4139_v45, 0.0  ;;  %v4190_v48 = vmul.f32 0.15, %v4139_v45  ;;  %5599 = vmatmul.bf16.gmra.mxu3 %v9173_v9  ;;  %v9153_v11 = vor.u32 %v10507_v2, %v9150_v21  ;;  %v10502_v9 = vld [vmem:[#allocation6 + $0x520] sm:$0xff] }
 0x259   :  { %4522 = vst [vmem:[#allocation2 + $0x2c] sm:$0xf] %v4286_v49  ;;  %v4043_v46 = vpop.f32.mrf.mxu3  ;;  %5834 = vmatpush.bf16.msrb.mxu0 %v10502_v9  ;;  %v10501_v9 = vld [vmem:[#allocation6 + $0x518] sm:$0xff] }
 0x25a   :  { %4621 = vst [vmem:[#allocation2 + $0x14] sm:$0xf] %v4286_v49  ;;  %v4206_v20 = vsel %vm4174_vm11, %v4139_v45, %v4190_v48  ;;  %5692 = vmatmul.bf16.vlgmr.msra.gmra.mxu1 %v9153_v11  ;;  %v4044_v19 = vadd.f32 %v4043_v46, %v3995_v47  ;;  %v11664_v11 = vld [vmem:[#allocation2 + $0xe0] sm:$0xf] }
 0x25b   :  { %v4287_v15 = vpack.c.bf16 %v4206_v20, %v4206_v20  ;;  %6079 = vst [vmem:[#allocation2 + $0x58] sm:$0xf] %v10893_v35 }
 0x25c   :  { %v4093_v38 = vadd.f32 %v4092_v39, %v4044_v19  ;;  %v4141_v63 = vpop.f32.mrf.mxu1  ;;  %v10523_v44 = vld [vmem:[#allocation2 + $0x88] sm:$0xf0]  ;;  %5992 = vst [vmem:[#allocation2 + $0x70] sm:$0xf] %v10893_v35  ;;  %v10486_v39 = vld [vmem:[#allocation6 + $0x4a0] sm:$0xff] }
 0x25d   :  { %4303 = vst [vmem:[#allocation2 + $0xa8] sm:$0xf] %v4287_v15  ;;  %v9197_v60 = vor.u32 %v10523_v44, %v9196_v53  ;;  %5736 = vmatpush.bf16.msra.mxu2 %v10486_v39  ;;  %v10520_v29 = vld [vmem:[#allocation2 + $0x74] sm:$0xf]  ;;  %v4002_v44 = vadd.f32 %v11655_v54, %v11579_v43  ;;  %v3860_v43 = vadd.f32 %v11549_v16, %v11586_v8 }
 0x25e   :  { %4402 = vst [vmem:[#allocation2 + $0x90] sm:$0xf] %v4287_v15  ;;  %v4142_v6 = vadd.f32 %v4141_v63, %v4093_v38  ;;  %v4097_v36 = vpop.f32.mrf.mxu0  ;;  %v10517_v3 = vld [vmem:[#allocation2 + $0x58] sm:$0xf0]  ;;  %5835 = vmatpush.bf16.msrb.mxu0 %v10501_v9 }
 0x25f   :  { %4447 = vst [vmem:[#allocation2 + $0x78] sm:$0xf] %v4287_v15  ;;  %5555 = vmatmul.bf16.gmra.mxu2 %v9197_v60  ;;  %v9177_v32 = vor.u32 %v10517_v3, %v9176_v23  ;;  %v10514_v22 = vld [vmem:[#allocation2 + $0x44] sm:$0xf]  ;;  %v10485_v23 = vld [vmem:[#allocation6 + $0x498] sm:$0xff]  ;;  %v3909_v8 = vadd.f32 %v11581_v4, %v3860_v43 }
 0x260   :  { %4478 = vst [vmem:[#allocation2 + $0x60] sm:$0xf] %v4287_v15  ;;  %vm4175_vm12 = vcmp.ge.f32.partialorder %v4142_v6, 0.0  ;;  %v4191_v28 = vmul.f32 0.15, %v4142_v6  ;;  %v10493_v3 = vld [vmem:[#allocation6 + $0x4d8] sm:$0xff] }
 0x261   :  { %4523 = vst [vmem:[#allocation2 + $0x48] sm:$0xf] %v4287_v15  ;;  %5648 = vmatmul.bf16.gmra.mxu0 %v9177_v32  ;;  %v4045_v14 = vpop.f32.mrf.mxu3  ;;  %5737 = vmatpush.bf16.msra.mxu2 %v10485_v23  ;;  %v10492_v23 = vld [vmem:[#allocation6 + $0x4d0] sm:$0xff] }
 0x262   :  { %4622 = vst [vmem:[#allocation2 + $0x30] sm:$0xf] %v4287_v15  ;;  %v4207_v10 = vsel %vm4175_vm12, %v4142_v6, %v4191_v28  ;;  %v4046_v56 = vadd.f32 %v4045_v14, %v3997_v42  ;;  %v11669_v6 = vpop.f32.mrf.mxu2  ;;  %v10537_v28 = vld [vmem:[#allocation2 + $0xf8] sm:$0xf0]  ;;  %v11672_v14 = vld [vmem:[#allocation2 + $0xe4] sm:$0xf]  ;;  %5786 = vmatpush.bf16.msrb.mxu3 %v10493_v3 }
 0x263   :  { %4715 = vst [vmem:[#allocation2 + $0x18] sm:$0xf] %v4287_v15  ;;  %v4288_v24 = vpack.c.bf16 %v4207_v10, %v4207_v10  ;;  %v9253_v4 = vor.u32 %v10537_v28, %v11664_v11  ;;  %v11703_v3 = vld [vmem:[#allocation2 + $0xd0] sm:$0xf0] }
 0x264   :  { %5993 = vst [vmem:[#allocation2 + $0x8c] sm:$0xf] %v10893_v35  ;;  %v4095_v25 = vadd.f32 %v4094_v1, %v4046_v56  ;;  %v4143_v33 = vpop.f32.mrf.mxu1  ;;  %v9224_v55 = vld [vmem:[#allocation2 + $0xa8] sm:$0xf] }
 0x265   :  { %4304 = vst [vmem:[#allocation2 + $0xc4] sm:$0xf] %v4288_v24  ;;  %v9198_v51 = vld [vmem:[#allocation2 + $0x8c] sm:$0xf0] }
 0x266   :  { %4403 = vst [vmem:[#allocation2 + $0xac] sm:$0xf] %v4288_v24  ;;  %v4144_v7 = vadd.f32 %v4143_v33, %v4095_v25  ;;  %v4099_v13 = vpop.f32.mrf.mxu0  ;;  %v9201_v49 = vor.u32 %v10520_v29, %v9198_v51  ;;  %v9204_v53 = vld [vmem:[#allocation2 + $0x78] sm:$0xf]  ;;  %5787 = vmatpush.bf16.msrb.mxu3 %v10492_v23 }
 0x267   :  { %4448 = vst [vmem:[#allocation2 + $0x94] sm:$0xf] %v4288_v24  ;;  %v9178_v62 = vld [vmem:[#allocation2 + $0x5c] sm:$0xf0] }
 0x268   :  { %4479 = vst [vmem:[#allocation2 + $0x7c] sm:$0xf] %v4288_v24  ;;  %vm4176_vm13 = vcmp.ge.f32.partialorder %v4144_v7, 0.0  ;;  %v4192_v45 = vmul.f32 0.15, %v4144_v7  ;;  %5604 = vmatmul.bf16.gmra.mxu3 %v9201_v49  ;;  %v9181_v1 = vor.u32 %v10514_v22, %v9178_v62  ;;  %v4005_v49 = vadd.f32 %v11660_v17, %v11584_v37 }
 0x269   :  { %4524 = vst [vmem:[#allocation2 + $0x64] sm:$0xf] %v4288_v24  ;;  %v4048_v2 = vpop.f32.mrf.mxu3  ;;  %v11680_v62 = vld [vmem:[#allocation2 + $0xfc] sm:$0xf0]  ;;  %v11687_v17 = vld [vmem:[#allocation2 + $0xe8] sm:$0xf] }
 0x26a   :  { %4623 = vst [vmem:[#allocation2 + $0x4c] sm:$0xf] %v4288_v24  ;;  %v4208_v21 = vsel %vm4176_vm13, %v4144_v7, %v4192_v45  ;;  %5697 = vmatmul.bf16.gmra.mxu1 %v9181_v1  ;;  %v4049_v47 = vadd.f32 %v4048_v2, %v4000_v34  ;;  %v11683_v1 = vld [vmem:[#allocation2 + $0x118] sm:$0xf]  ;;  %v4009_v2 = vpop.f32.mrf.mxu2 }
 0x26b   :  { %4716 = vst [vmem:[#allocation2 + $0x34] sm:$0xf] %v4288_v24  ;;  %v4388_v48 = vpack.c.bf16 %v4208_v21, %v4208_v21  ;;  %v3958_v21 = vadd.f32 %v11588_v18, %v3909_v8 }
 0x26c   :  { %v4098_v46 = vadd.f32 %v4097_v36, %v4049_v47  ;;  %v4146_v57 = vpop.f32.mrf.mxu1  ;;  %v10530_v58 = vld [vmem:[#allocation2 + $0xc0] sm:$0xf0]  ;;  %5996 = vst [vmem:[#allocation2 + $0xe0] sm:$0xf] %v10893_v35 }
 0x26d   :  { %4404 = vst [vmem:[#allocation2 + $0xc8] sm:$0xf] %v4388_v48  ;;  %v9225_v20 = vor.u32 %v10530_v58, %v9224_v55  ;;  %v10527_v10 = vld [vmem:[#allocation2 + $0xac] sm:$0xf] }
 0x26e   :  { %4449 = vst [vmem:[#allocation2 + $0xb0] sm:$0xf] %v4388_v48  ;;  %v4147_v19 = vadd.f32 %v4146_v57, %v4098_v46  ;;  %v4102_v15 = vpop.f32.mrf.mxu0  ;;  %v10524_v38 = vld [vmem:[#allocation2 + $0x90] sm:$0xf0] }
 0x26f   :  { %4480 = vst [vmem:[#allocation2 + $0x98] sm:$0xf] %v4388_v48  ;;  %5560 = vmatmul.bf16.gmra.mxu2 %v9225_v20  ;;  %v9205_v63 = vor.u32 %v10524_v38, %v9204_v53  ;;  %v10521_v33 = vld [vmem:[#allocation2 + $0x7c] sm:$0xf]  ;;  %v4007_v20 = vadd.f32 %v11669_v6, %v3958_v21 }
 0x270   :  { %4525 = vst [vmem:[#allocation2 + $0x80] sm:$0xf] %v4388_v48  ;;  %vm4177_vm15 = vcmp.ge.f32.partialorder %v4147_v19, 0.0  ;;  %v4193_v60 = vmul.f32 0.15, %v4147_v19 }
 0x271   :  { %4624 = vst [vmem:[#allocation2 + $0x68] sm:$0xf] %v4388_v48  ;;  %5653 = vmatmul.bf16.gmra.mxu0 %v9205_v63  ;;  %v4050_v36 = vpop.f32.mrf.mxu3 }
 0x272   :  { %4717 = vst [vmem:[#allocation2 + $0x50] sm:$0xf] %v4388_v48  ;;  %v4209_v32 = vsel %vm4177_vm15, %v4147_v19, %v4193_v60  ;;  %v4051_v42 = vadd.f32 %v4050_v36, %v4002_v44  ;;  %v10484_v36 = vld [vmem:[#allocation6 + $0x490] sm:$0xff] }
 0x273   :  { %v4434_v39 = vpack.c.bf16 %v4209_v32, %v4209_v32  ;;  %5997 = vst [vmem:[#allocation2 + $0xfc] sm:$0xf] %v10893_v35  ;;  %v3865_v32 = vadd.f32 %v11549_v16, %v11595_v59  ;;  %5738 = vmatpush.bf16.msra.mxu2 %v10484_v36 }
 0x274   :  { %v4100_v54 = vadd.f32 %v4099_v13, %v4051_v42  ;;  %v4148_v31 = vpop.f32.mrf.mxu1  ;;  %v9226_v56 = vld [vmem:[#allocation2 + $0xc4] sm:$0xf0]  ;;  %6084 = vst [vmem:[#allocation2 + $0xe4] sm:$0xf] %v10893_v35 }
 0x275   :  { %4450 = vst [vmem:[#allocation2 + $0xcc] sm:$0xf] %v4434_v39  ;;  %v9229_v24 = vor.u32 %v10527_v10, %v9226_v56  ;;  %v9232_v46 = vld [vmem:[#allocation2 + $0xb0] sm:$0xf] }
 0x276   :  { %4481 = vst [vmem:[#allocation2 + $0xb4] sm:$0xf] %v4434_v39  ;;  %v4149_v25 = vadd.f32 %v4148_v31, %v4100_v54  ;;  %v9206_v29 = vld [vmem:[#allocation2 + $0x94] sm:$0xf0]  ;;  %v4104_v51 = vpop.f32.mrf.mxu0  ;;  %v11710_v54 = vld [vmem:[#allocation2 + $0xa0] sm:$0xf0]  ;;  %v4011_v31 = vpop.f32.mrf.mxu2 }
 0x277   :  { %4526 = vst [vmem:[#allocation2 + $0x9c] sm:$0xf] %v4434_v39  ;;  %v9209_v7 = vor.u32 %v10521_v33, %v9206_v29 }
 0x278   :  { %4625 = vst [vmem:[#allocation2 + $0x84] sm:$0xf] %v4434_v39  ;;  %vm4178_vm1 = vcmp.ge.f32.partialorder %v4149_v25, 0.0  ;;  %v4194_v13 = vmul.f32 0.15, %v4149_v25  ;;  %5609 = vmatmul.bf16.gmra.mxu3 %v9229_v24 }
 0x279   :  { %4718 = vst [vmem:[#allocation2 + $0x6c] sm:$0xf] %v4434_v39  ;;  %v4053_v22 = vpop.f32.mrf.mxu3  ;;  %v11691_v11 = vld [vmem:[#allocation2 + $0x50] sm:$0xf]  ;;  %v9257_v39 = vor.u32 %v11672_v14, %v11680_v62 }
 0x27a   :  { %v4210_v34 = vsel %vm4178_vm1, %v4149_v25, %v4194_v13  ;;  %5702 = vmatmul.bf16.gmra.mxu1 %v9209_v7  ;;  %v4054_v45 = vadd.f32 %v4053_v22, %v4005_v49  ;;  %6085 = vst [vmem:[#allocation2 + $0x100] sm:$0xf] %v10893_v35  ;;  %v4010_v25 = vadd.f32 %v4009_v2, %v11593_v26 }
 0x27b   :  { %v4466_v37 = vpack.c.bf16 %v4210_v34, %v4210_v34  ;;  %5998 = vst [vmem:[#allocation2 + $0x118] sm:$0xf] %v10893_v35  ;;  %v10500_v34 = vld [vmem:[#allocation6 + $0x510] sm:$0xff] }
 0x27c   :  { %v4103_v47 = vadd.f32 %v4102_v15, %v4054_v45  ;;  %v4151_v48 = vpop.f32.mrf.mxu1  ;;  %v10531_v57 = vld [vmem:[#allocation2 + $0xc8] sm:$0xf0]  ;;  %6128 = vst [vmem:[#allocation2 + $0xe8] sm:$0xf] %v10893_v35  ;;  %5836 = vmatpush.bf16.msrb.mxu0 %v10500_v34 }
 0x27d   :  { %4482 = vst [vmem:[#allocation2 + $0xd0] sm:$0xf] %v4466_v37  ;;  %v9233_v55 = vor.u32 %v10531_v57, %v9232_v46  ;;  %v10528_v10 = vld [vmem:[#allocation2 + $0xb4] sm:$0xf] }
 0x27e   :  { %4527 = vst [vmem:[#allocation2 + $0xb8] sm:$0xf] %v4466_v37  ;;  %v4152_v58 = vadd.f32 %v4151_v48, %v4103_v47  ;;  %v4107_v19 = vpop.f32.mrf.mxu0  ;;  %v4014_v47 = vpop.f32.mrf.mxu2 }
 0x27f   :  { %4626 = vst [vmem:[#allocation2 + $0xa0] sm:$0xf] %v4466_v37  ;;  %5565 = vmatmul.bf16.gmra.mxu2 %v9253_v4  ;;  %v11700_v60 = vld [vmem:[#allocation2 + $0x84] sm:$0xf] }
 0x280   :  { %4719 = vst [vmem:[#allocation2 + $0x88] sm:$0xf] %v4466_v37  ;;  %vm4179_vm7 = vcmp.ge.f32.partialorder %v4152_v58, 0.0  ;;  %v4195_v18 = vmul.f32 0.15, %v4152_v58 }
 0x281   :  { %5658 = vmatmul.bf16.gmra.mxu0 %v9233_v55  ;;  %v4055_v15 = vpop.f32.mrf.mxu3  ;;  %v11694_v53 = vld [vmem:[#allocation2 + $0x68] sm:$0xf0]  ;;  %6362 = vst [vmem:[#allocation2 + $0x50] sm:$0xf] %v10893_v35 }
 0x282   :  { %v4211_v38 = vsel %vm4179_vm7, %v4152_v58, %v4195_v18  ;;  %v4056_v63 = vadd.f32 %v4055_v15, %v4007_v20  ;;  %v9193_v44 = vor.u32 %v11694_v53, %v11691_v11  ;;  %6363 = vst [vmem:[#allocation2 + $0x6c] sm:$0xf] %v10893_v35  ;;  %v10483_v58 = vld [vmem:[#allocation6 + $0x488] sm:$0xff]  ;;  %v11735_v15 = vld [vmem:[#allocation8 + $0x1] ss:$0 sm:$0xff] }
 0x283   :  { %v4292_v6 = vpack.c.bf16 %v4211_v38, %v4211_v38  ;;  %6288 = vst [vmem:[#allocation2 + $0x84] sm:$0xf] %v10893_v35  ;;  %v10491_v20 = vld [vmem:[#allocation6 + $0x4c8] sm:$0xff]  ;;  %5739 = vmatpush.bf16.msra.mxu2 %v10483_v58  ;;  %v10582_v11 = vld [vmem:[#allocation6 + $0x5e0] sm:$0xff] }
 0x284   :  { %v4105_v42 = vadd.f32 %v4104_v51, %v4056_v63  ;;  %v4153_v28 = vpop.f32.mrf.mxu1  ;;  %v9234_v43 = vld [vmem:[#allocation2 + $0xcc] sm:$0xf0]  ;;  %6203 = vst [vmem:[#allocation2 + $0xd4] sm:$0xf] %v10893_v35  ;;  %v3914_v51 = vadd.f32 %v11590_v40, %v3865_v32  ;;  %5788 = vmatpush.bf16.msrb.mxu3 %v10491_v20  ;;  %v10566_v53 = vld [vmem:[#allocation6 + $0x560] sm:$0xff] }
 0x285   :  { %4308 = vst [vmem:[#allocation2 + $0x134] sm:$0xf] %v4292_v6  ;;  %v11712_v56 = vld [vmem:[#allocation2 + $0xb8] sm:$0xf]  ;;  %v9237_v16 = vor.u32 %v10528_v10, %v9234_v43 }
 0x286   :  { %4407 = vst [vmem:[#allocation2 + $0x11c] sm:$0xf] %v4292_v6  ;;  %v4154_v24 = vadd.f32 %v4153_v28, %v4105_v42  ;;  %v11714_v59 = vld [vmem:[#allocation2 + $0x9c] sm:$0xf0]  ;;  %v9241_v14 = vor.u32 %v11703_v3, %v11712_v56  ;;  %v4109_v62 = vpop.f32.mrf.mxu0  ;;  %v3963_v40 = vadd.f32 %v11597_v30, %v3914_v51  ;;  %v4015_v42 = vadd.f32 %v4014_v47, %v11605_v5  ;;  %v4016_v10 = vpop.f32.mrf.mxu2 }
 0x287   :  { %4452 = vst [vmem:[#allocation2 + $0x104] sm:$0xf] %v4292_v6  ;;  %v9217_v33 = vor.u32 %v11700_v60, %v11714_v59  ;;  %v11721_v29 = vld [vmem:[#allocation2 + $0x88] sm:$0xf]  ;;  %v10498_v47 = vld [vmem:[#allocation6 + $0x500] sm:$0xff] }
 0x288   :  { %4483 = vst [vmem:[#allocation2 + $0xec] sm:$0xf] %v4292_v6  ;;  %vm4180_vm14 = vcmp.ge.f32.partialorder %v4154_v24, 0.0  ;;  %v4196_v7 = vmul.f32 0.15, %v4154_v24  ;;  %5614 = vmatmul.bf16.gmra.mxu3 %v9257_v39  ;;  %v9221_v49 = vor.u32 %v11710_v54, %v11721_v29  ;;  %v4012_v46 = vadd.f32 %v4011_v31, %v3963_v40 }
 0x289   :  { %v4058_v8 = vpop.f32.mrf.mxu3  ;;  %6289 = vst [vmem:[#allocation2 + $0xa0] sm:$0xf] %v10893_v35 }
 0x28a   :  { %v4212_v13 = vsel %vm4180_vm14, %v4154_v24, %v4196_v7  ;;  %5707 = vmatmul.bf16.gmra.mxu1 %v9237_v16  ;;  %v4059_v26 = vadd.f32 %v4058_v8, %v4010_v25  ;;  %6202 = vst [vmem:[#allocation2 + $0xb8] sm:$0xf] %v10893_v35  ;;  %v10499_v16 = vld [vmem:[#allocation6 + $0x508] sm:$0xff] }
 0x28b   :  { %v4293_v22 = vpack.c.bf16 %v4212_v13, %v4212_v13  ;;  %6364 = vst [vmem:[#allocation2 + $0x88] sm:$0xf] %v10893_v35  ;;  %5837 = vmatpush.bf16.msrb.mxu0 %v10499_v16 }
 0x28c   :  { %v4108_v45 = vadd.f32 %v4107_v19, %v4059_v26  ;;  %v4156_v9 = vpop.f32.mrf.mxu1  ;;  %v10544_v2 = vld [vmem:[#allocation2 + $0x130] sm:$0xf0]  ;;  %6365 = vst [vmem:[#allocation2 + $0xa4] sm:$0xf] %v10893_v35 }
 0x28d   :  { %4309 = vst [vmem:[#allocation2 + $0x150] sm:$0xf] %v4293_v22  ;;  %v9281_v37 = vor.u32 %v10544_v2, %v11683_v1  ;;  %v10541_v19 = vld [vmem:[#allocation2 + $0x11c] sm:$0xf] }
 0x28e   :  { %4408 = vst [vmem:[#allocation2 + $0x138] sm:$0xf] %v4293_v22  ;;  %v4157_v4 = vadd.f32 %v4156_v9, %v4108_v45  ;;  %v10538_v21 = vld [vmem:[#allocation2 + $0x100] sm:$0xf0]  ;;  %v4112_v6 = vpop.f32.mrf.mxu0 }
 0x28f   :  { %4453 = vst [vmem:[#allocation2 + $0x120] sm:$0xf] %v4293_v22  ;;  %5570 = vmatmul.bf16.gmra.mxu2 %v9281_v37  ;;  %v9261_v48 = vor.u32 %v10538_v21, %v11687_v17  ;;  %v3870_v17 = vadd.f32 %v11735_v15, %v11611_v41  ;;  %v10535_v28 = vld [vmem:[#allocation2 + $0xec] sm:$0xf]  ;;  %v10490_v21 = vld [vmem:[#allocation6 + $0x4c0] sm:$0xff]  ;;  %5838 = vmatpush.bf16.msrb.mxu0 %v10498_v47 }
 0x290   :  { %4484 = vst [vmem:[#allocation2 + $0x108] sm:$0xf] %v4293_v22  ;;  %vm4181_vm2 = vcmp.ge.f32.partialorder %v4157_v4, 0.0  ;;  %v4197_v30 = vmul.f32 0.15, %v4157_v4  ;;  %5789 = vmatpush.bf16.msrb.mxu3 %v10490_v21 }
 0x291   :  { %4529 = vst [vmem:[#allocation2 + $0xf0] sm:$0xf] %v4293_v22  ;;  %5663 = vmatmul.bf16.gmra.mxu0 %v9261_v48  ;;  %v4060_v57 = vpop.f32.mrf.mxu3  ;;  %v3919_v43 = vadd.f32 %v11599_v0, %v3870_v17 }
 0x292   :  { %v4213_v55 = vsel %vm4181_vm2, %v4157_v4, %v4197_v30  ;;  %5999 = vst [vmem:[#allocation2 + $0x134] sm:$0xf] %v10893_v35  ;;  %v4061_v1 = vadd.f32 %v4060_v57, %v4012_v46  ;;  %v4019_v30 = vpop.f32.mrf.mxu2 }
 0x293   :  { %v4294_v18 = vpack.c.bf16 %v4213_v55, %v4213_v55  ;;  %6129 = vst [vmem:[#allocation2 + $0x104] sm:$0xf] %v10893_v35  ;;  %v3968_v0 = vadd.f32 %v11615_v50, %v3919_v43  ;;  %v10482_v50 = vld [vmem:[#allocation6 + $0x480] sm:$0xff]  ;;  %v3875_v55 = vadd.f32 %v11735_v15, %v11627_v52 }
 0x294   :  { %v4110_v38 = vadd.f32 %v4109_v62, %v4061_v1  ;;  %v4158_v63 = vpop.f32.mrf.mxu1  ;;  %6086 = vst [vmem:[#allocation2 + $0x11c] sm:$0xf] %v10893_v35  ;;  %v9308_v5 = vld [vmem:[#allocation2 + $0x150] sm:$0xf]  ;;  %5740 = vmatpush.bf16.msra.mxu2 %v10482_v50 }
 0x295   :  { %4310 = vst [vmem:[#allocation2 + $0x16c] sm:$0xf] %v4294_v18  ;;  %v9282_v36 = vld [vmem:[#allocation2 + $0x134] sm:$0xf0]  ;;  %v4017_v2 = vadd.f32 %v4016_v10, %v3968_v0 }
 0x296   :  { %4409 = vst [vmem:[#allocation2 + $0x154] sm:$0xf] %v4294_v18  ;;  %v4159_v23 = vadd.f32 %v4158_v63, %v4110_v38  ;;  %v9285_v32 = vor.u32 %v10541_v19, %v9282_v36  ;;  %v9288_v34 = vld [vmem:[#allocation2 + $0x120] sm:$0xf]  ;;  %v4114_v45 = vpop.f32.mrf.mxu0  ;;  %v4020_v38 = vadd.f32 %v4019_v30, %v11625_v12  ;;  %v3924_v36 = vadd.f32 %v11620_v61, %v3875_v55  ;;  %v11750_v12 = vld [vmem:[#allocation2 + $0x1b0] sm:$0xf0] }
 0x297   :  { %4454 = vst [vmem:[#allocation2 + $0x13c] sm:$0xf] %v4294_v18  ;;  %v9262_v39 = vld [vmem:[#allocation2 + $0x104] sm:$0xf0]  ;;  %v10577_v55 = vld [vmem:[#allocation6 + $0x5b8] sm:$0xff] }
 0x298   :  { %4485 = vst [vmem:[#allocation2 + $0x124] sm:$0xf] %v4294_v18  ;;  %vm4182_vm3 = vcmp.ge.f32.partialorder %v4159_v23, 0.0  ;;  %v4198_v41 = vmul.f32 0.15, %v4159_v23  ;;  %5619 = vmatmul.bf16.gmra.mxu3 %v9285_v32  ;;  %v9265_v31 = vor.u32 %v10535_v28, %v9262_v39  ;;  %v3973_v43 = vadd.f32 %v11629_v27, %v3924_v36  ;;  %7231 = vmatpush.bf16.msrb.mxu2 %v10577_v55  ;;  %v10583_v55 = vld [vmem:[#allocation6 + $0x5e8] sm:$0xff] }
 0x299   :  { %4530 = vst [vmem:[#allocation2 + $0x10c] sm:$0xf] %v4294_v18  ;;  %v4063_v24 = vpop.f32.mrf.mxu3 }
 0x29a   :  { %4629 = vst [vmem:[#allocation2 + $0xf4] sm:$0xf] %v4294_v18  ;;  %v4214_v25 = vsel %vm4182_vm3, %v4159_v23, %v4198_v41  ;;  %5712 = vmatmul.bf16.gmra.mxu1 %v9265_v31  ;;  %v4064_v51 = vadd.f32 %v4063_v24, %v4015_v42  ;;  %v4021_v24 = vpop.f32.mrf.mxu2 }
 0x29b   :  { %v4295_v7 = vpack.c.bf16 %v4214_v25, %v4214_v25  ;;  %6087 = vst [vmem:[#allocation2 + $0x138] sm:$0xf] %v10893_v35  ;;  %v4022_v0 = vadd.f32 %v4021_v24, %v3973_v43 }
 0x29c   :  { %v4113_v8 = vadd.f32 %v4112_v6, %v4064_v51  ;;  %v4161_v13 = vpop.f32.mrf.mxu1  ;;  %v10551_v26 = vld [vmem:[#allocation2 + $0x168] sm:$0xf0]  ;;  %6000 = vst [vmem:[#allocation2 + $0x150] sm:$0xf] %v10893_v35 }
 0x29d   :  { %4311 = vst [vmem:[#allocation2 + $0x188] sm:$0xf] %v4295_v7  ;;  %v9309_v22 = vor.u32 %v10551_v26, %v9308_v5  ;;  %v10548_v20 = vld [vmem:[#allocation2 + $0x154] sm:$0xf] }
 0x29e   :  { %4410 = vst [vmem:[#allocation2 + $0x170] sm:$0xf] %v4295_v7  ;;  %v4162_v62 = vadd.f32 %v4161_v13, %v4113_v8  ;;  %v10545_v40 = vld [vmem:[#allocation2 + $0x138] sm:$0xf0]  ;;  %v4117_v23 = vpop.f32.mrf.mxu0 }
 0x29f   :  { %4455 = vst [vmem:[#allocation2 + $0x158] sm:$0xf] %v4295_v7  ;;  %5575 = vmatmul.bf16.gmra.mxu2 %v9309_v22  ;;  %v9289_v9 = vor.u32 %v10545_v40, %v9288_v34  ;;  %v10542_v63 = vld [vmem:[#allocation2 + $0x124] sm:$0xf]  ;;  %v11754_v22 = vld [vmem:[#allocation8 + $0x2] ss:$0 sm:$0xff] }
 0x2a0   :  { %4486 = vst [vmem:[#allocation2 + $0x140] sm:$0xf] %v4295_v7  ;;  %vm4183_vm4 = vcmp.ge.f32.partialorder %v4162_v62, 0.0  ;;  %v4199_v37 = vmul.f32 0.15, %v4162_v62 }
 0x2a1   :  { %4531 = vst [vmem:[#allocation2 + $0x128] sm:$0xf] %v4295_v7  ;;  %5668 = vmatmul.bf16.gmra.mxu0 %v9289_v9  ;;  %v4065_v4 = vpop.f32.mrf.mxu3 }
 0x2a2   :  { %4630 = vst [vmem:[#allocation2 + $0x110] sm:$0xf] %v4295_v7  ;;  %v4215_v48 = vsel %vm4183_vm4, %v4162_v62, %v4199_v37  ;;  %v4066_v46 = vadd.f32 %v4065_v4, %v4017_v2  ;;  %v11756_v62 = vld [vmem:[#allocation2 + $0x180] sm:$0xf0]  ;;  %v5546_v4 = vpop.f32.mrf.mxu2 }
 0x2a3   :  { %4723 = vst [vmem:[#allocation2 + $0xf8] sm:$0xf] %v4295_v7  ;;  %v4296_v57 = vpack.c.bf16 %v4215_v48, %v4215_v48 }
 0x2a4   :  { %6001 = vst [vmem:[#allocation2 + $0x16c] sm:$0xf] %v10893_v35  ;;  %v4115_v1 = vadd.f32 %v4114_v45, %v4066_v46  ;;  %v4163_v58 = vpop.f32.mrf.mxu1  ;;  %v9336_v31 = vld [vmem:[#allocation2 + $0x188] sm:$0xf]  ;;  %v5547_v46 = vadd.f32 %v11754_v22, %v5546_v4 }
 0x2a5   :  { %4312 = vst [vmem:[#allocation2 + $0x1a4] sm:$0xf] %v4296_v57  ;;  %v9310_v18 = vld [vmem:[#allocation2 + $0x16c] sm:$0xf0] }
 0x2a6   :  { %4411 = vst [vmem:[#allocation2 + $0x18c] sm:$0xf] %v4296_v57  ;;  %v4164_v19 = vadd.f32 %v4163_v58, %v4115_v1  ;;  %v9313_v17 = vor.u32 %v10548_v20, %v9310_v18  ;;  %v9316_v51 = vld [vmem:[#allocation2 + $0x158] sm:$0xf]  ;;  %v4119_v34 = vpop.f32.mrf.mxu0 }
 0x2a7   :  { %4456 = vst [vmem:[#allocation2 + $0x174] sm:$0xf] %v4296_v57  ;;  %v9290_v6 = vld [vmem:[#allocation2 + $0x13c] sm:$0xf0]  ;;  %v10585_v58 = vld [vmem:[#allocation6 + $0x5f8] sm:$0xff] }
 0x2a8   :  { %4487 = vst [vmem:[#allocation2 + $0x15c] sm:$0xf] %v4296_v57  ;;  %vm4184_vm5 = vcmp.ge.f32.partialorder %v4164_v19, 0.0  ;;  %v4200_v52 = vmul.f32 0.15, %v4164_v19  ;;  %5624 = vmatmul.bf16.gmra.mxu3 %v9313_v17  ;;  %v9293_v15 = vor.u32 %v10542_v63, %v9290_v6  ;;  %v10569_v20 = vld [vmem:[#allocation6 + $0x578] sm:$0xff] }
 0x2a9   :  { %4532 = vst [vmem:[#allocation2 + $0x144] sm:$0xf] %v4296_v57  ;;  %v4068_v32 = vpop.f32.mrf.mxu3  ;;  %7280 = vmatpush.bf16.msra.mxu3 %v10585_v58  ;;  %7182 = vmatpush.bf16.msrb.mxu1 %v10569_v20  ;;  %v9242_v58 = vld [vmem:[#allocation2 + $0xd4] sm:$0xf0]  ;;  %v10567_v20 = vld [vmem:[#allocation6 + $0x568] sm:$0xff] }
 0x2aa   :  { %4631 = vst [vmem:[#allocation2 + $0x12c] sm:$0xf] %v4296_v57  ;;  %v4216_v42 = vsel %vm4184_vm5, %v4164_v19, %v4200_v52  ;;  %5717 = vmatmul.bf16.gmra.mxu1 %v9293_v15  ;;  %v4069_v28 = vadd.f32 %v4068_v32, %v4020_v38  ;;  %v10511_v19 = vld [vmem:[#allocation2 + $0x28] sm:$0xf0]  ;;  %v9156_v52 = vld [vmem:[#allocation2 + $0x10] sm:$0xf] }
 0x2ab   :  { %4724 = vst [vmem:[#allocation2 + $0x114] sm:$0xf] %v4296_v57  ;;  %v4396_v39 = vpack.c.bf16 %v4216_v42, %v4216_v42 }
 0x2ac   :  { %v4118_v41 = vadd.f32 %v4117_v23, %v4069_v28  ;;  %v4166_v61 = vpop.f32.mrf.mxu1  ;;  %v10558_v10 = vld [vmem:[#allocation2 + $0x1a0] sm:$0xf0]  ;;  %6211 = vst [vmem:[#allocation2 + $0x1b4] sm:$0xf] %v10893_v35  ;;  %v9157_v23 = vor.u32 %v10511_v19, %v9156_v52 }
 0x2ad   :  { %4412 = vst [vmem:[#allocation2 + $0x1a8] sm:$0xf] %v4396_v39  ;;  %v9337_v16 = vor.u32 %v10558_v10, %v9336_v31  ;;  %v10555_v9 = vld [vmem:[#allocation2 + $0x18c] sm:$0xf] }
 0x2ae   :  { %4457 = vst [vmem:[#allocation2 + $0x190] sm:$0xf] %v4396_v39  ;;  %v4167_v25 = vadd.f32 %v4166_v61, %v4118_v41  ;;  %v10552_v7 = vld [vmem:[#allocation2 + $0x170] sm:$0xf0] }
 0x2af   :  { %4488 = vst [vmem:[#allocation2 + $0x178] sm:$0xf] %v4396_v39  ;;  %5580 = vmatmul.bf16.gmra.mxu2 %v9337_v16  ;;  %v9317_v5 = vor.u32 %v10552_v7, %v9316_v51  ;;  %v10549_v47 = vld [vmem:[#allocation2 + $0x15c] sm:$0xf]  ;;  %v10508_v61 = vld [vmem:[#allocation2 + $0x14] sm:$0xf] }
 0x2b0   :  { %4533 = vst [vmem:[#allocation2 + $0x160] sm:$0xf] %v4396_v39  ;;  %vm4185_vm6 = vcmp.ge.f32.partialorder %v4167_v25, 0.0  ;;  %v4201_v27 = vmul.f32 0.15, %v4167_v25 }
 0x2b1   :  { %4632 = vst [vmem:[#allocation2 + $0x148] sm:$0xf] %v4396_v39  ;;  %5673 = vmatmul.bf16.gmra.mxu0 %v9317_v5  ;;  %v4070_v8 = vpop.f32.mrf.mxu3  ;;  %v10576_v5 = vld [vmem:[#allocation6 + $0x5b0] sm:$0xff] }
 0x2b2   :  { %4725 = vst [vmem:[#allocation2 + $0x130] sm:$0xf] %v4396_v39  ;;  %v4217_v13 = vsel %vm4185_vm6, %v4167_v25, %v4201_v27  ;;  %v4071_v26 = vadd.f32 %v4070_v8, %v4022_v0  ;;  %v9158_v39 = vld [vmem:[#allocation2 + $0x2c] sm:$0xf0]  ;;  %7232 = vmatpush.bf16.msrb.mxu2 %v10576_v5 }
 0x2b3   :  { %v4442_v40 = vpack.c.bf16 %v4217_v13, %v4217_v13  ;;  %6373 = vst [vmem:[#allocation2 + $0x184] sm:$0xf] %v10893_v35  ;;  %v9161_v24 = vor.u32 %v10508_v61, %v9158_v39  ;;  %v10584_v0 = vld [vmem:[#allocation6 + $0x5f0] sm:$0xff]  ;;  %v11786_v13 = vpop.f32.mrf.mxu2  ;;  %v9248_v39 = vld [vmem:[#allocation2 + $0xc0] sm:$0xf] }
 0x2b4   :  { %v4120_v45 = vadd.f32 %v4119_v34, %v4071_v26  ;;  %v9338_v2 = vld [vmem:[#allocation2 + $0x1a4] sm:$0xf0]  ;;  %v4168_v37 = vpop.f32.mrf.mxu1  ;;  %v10568_v27 = vld [vmem:[#allocation6 + $0x570] sm:$0xff]  ;;  %v10518_v26 = vld [vmem:[#allocation2 + $0x60] sm:$0xf0]  ;;  %7281 = vmatpush.bf16.msra.mxu3 %v10584_v0 }
 0x2b5   :  { %4458 = vst [vmem:[#allocation2 + $0x1ac] sm:$0xf] %v4442_v40  ;;  %v9341_v50 = vor.u32 %v10555_v9, %v9338_v2  ;;  %v9344_v6 = vld [vmem:[#allocation2 + $0x190] sm:$0xf]  ;;  %7183 = vmatpush.bf16.msrb.mxu1 %v10568_v27  ;;  %v9184_v34 = vld [vmem:[#allocation2 + $0x48] sm:$0xf] }
 0x2b6   :  { %4489 = vst [vmem:[#allocation2 + $0x194] sm:$0xf] %v4442_v40  ;;  %v4169_v21 = vadd.f32 %v4168_v37, %v4120_v45  ;;  %v9318_v48 = vld [vmem:[#allocation2 + $0x174] sm:$0xf0]  ;;  %v9185_v45 = vor.u32 %v10518_v26, %v9184_v34  ;;  %v10574_v27 = vld [vmem:[#allocation6 + $0x5a0] sm:$0xff] }
 0x2b7   :  { %4534 = vst [vmem:[#allocation2 + $0x17c] sm:$0xf] %v4442_v40  ;;  %v9321_v30 = vor.u32 %v10549_v47, %v9318_v48  ;;  %v9164_v2 = vld [vmem:[#allocation2 + $0x18] sm:$0xf]  ;;  %v9186_v47 = vld [vmem:[#allocation2 + $0x64] sm:$0xf0] }
 0x2b8   :  { %4633 = vst [vmem:[#allocation2 + $0x164] sm:$0xf] %v4442_v40  ;;  %vm4186_vm8 = vcmp.ge.f32.partialorder %v4169_v21, 0.0  ;;  %v4202_v57 = vmul.f32 0.15, %v4169_v21  ;;  %5629 = vmatmul.bf16.gmra.mxu3 %v9341_v50 }
 0x2b9   :  { %4726 = vst [vmem:[#allocation2 + $0x14c] sm:$0xf] %v4442_v40  ;;  %v5595_v1 = vpop.f32.mrf.mxu3  ;;  %v11760_v38 = vld [vmem:[#allocation2 + $0x130] sm:$0xf]  ;;  %v10512_v40 = vld [vmem:[#allocation2 + $0x30] sm:$0xf0]  ;;  %7282 = vmatpush.bf16.msra.mxu3 %v10583_v55  ;;  %7184 = vmatpush.bf16.msrb.mxu1 %v10567_v20 }
 0x2ba   :  { %v4218_v18 = vsel %vm4186_vm8, %v4169_v21, %v4202_v57  ;;  %5722 = vmatmul.bf16.gmra.mxu1 %v9321_v30  ;;  %v5596_v17 = vadd.f32 %v5595_v1, %v5547_v46  ;;  %6370 = vst [vmem:[#allocation2 + $0x130] sm:$0xf] %v10893_v35  ;;  %v9165_v50 = vor.u32 %v10512_v40, %v9164_v2  ;;  %v10515_v48 = vld [vmem:[#allocation2 + $0x4c] sm:$0xf]  ;;  %v10529_v1 = vld [vmem:[#allocation2 + $0xbc] sm:$0xf] }
 0x2bb   :  { %v4474_v63 = vpack.c.bf16 %v4218_v18, %v4218_v18  ;;  %v9189_v30 = vor.u32 %v10515_v48, %v9186_v47  ;;  %v10575_v57 = vld [vmem:[#allocation6 + $0x5a8] sm:$0xff]  ;;  %6290 = vst [vmem:[#allocation2 + $0xbc] sm:$0xf] %v10893_v35  ;;  %v10573_v48 = vld [vmem:[#allocation6 + $0x598] sm:$0xff] }
 0x2bc   :  { %v10559_v36 = vld [vmem:[#allocation2 + $0x1a8] sm:$0xf0]  ;;  %7233 = vmatpush.bf16.msrb.mxu2 %v10575_v57  ;;  %6291 = vst [vmem:[#allocation2 + $0xd8] sm:$0xf] %v10893_v35  ;;  %v10565_v57 = vld [vmem:[#allocation6 + $0x558] sm:$0xff] }
 0x2bd   :  { %4490 = vst [vmem:[#allocation2 + $0x1b0] sm:$0xf] %v4474_v63  ;;  %v9345_v15 = vor.u32 %v10559_v36, %v9344_v6  ;;  %v10556_v41 = vld [vmem:[#allocation2 + $0x194] sm:$0xf]  ;;  %v9212_v36 = vld [vmem:[#allocation2 + $0x80] sm:$0xf]  ;;  %7283 = vmatpush.bf16.msra.mxu3 %v10582_v11  ;;  %7185 = vmatpush.bf16.msrb.mxu1 %v10566_v53 }
 0x2be   :  { %4535 = vst [vmem:[#allocation2 + $0x198] sm:$0xf] %v4474_v63 }
 0x2bf   :  { %4634 = vst [vmem:[#allocation2 + $0x180] sm:$0xf] %v4474_v63  ;;  %5741 = vmatmul.bf16.vlgmr.msra.gmra.mxu2 %v9157_v23  ;;  %v11768_v28 = vld [vmem:[#allocation2 + $0x164] sm:$0xf] }
 0x2c0   :  { %4727 = vst [vmem:[#allocation2 + $0x168] sm:$0xf] %v4474_v63  ;;  %v11763_v32 = vld [vmem:[#allocation2 + $0x148] sm:$0xf0]  ;;  %7234 = vmatpush.bf16.msrb.mxu2 %v10574_v27 }
 0x2c1   :  { %5678 = vmatmul.bf16.gmra.mxu0 %v9345_v15  ;;  %v9305_v42 = vor.u32 %v11763_v32, %v11760_v38  ;;  %6371 = vst [vmem:[#allocation2 + $0x14c] sm:$0xf] %v10893_v35  ;;  %v11790_v21 = vpop.f32.mrf.mxu3  ;;  %7186 = vmatpush.bf16.msrb.mxu1 %v10565_v57  ;;  %v10562_v57 = vld [vmem:[#allocation6 + $0x540] sm:$0xff] }
 0x2c2   :  { %6296 = vst [vmem:[#allocation2 + $0x164] sm:$0xf] %v10893_v35 }
 0x2c3   :  { %6366 = vst [vmem:[#allocation2 + $0xc0] sm:$0xf] %v10893_v35 }
 0x2c4   :  { %v9346_v43 = vld [vmem:[#allocation2 + $0x1ac] sm:$0xf0]  ;;  %7235 = vmatpush.bf16.msrb.mxu2 %v10573_v48  ;;  %v9298_v48 = vld [vmem:[#allocation2 + $0x144] sm:$0xf0] }
 0x2c5   :  { %v11771_v31 = vld [vmem:[#allocation2 + $0x198] sm:$0xf]  ;;  %v9349_v10 = vor.u32 %v10556_v41, %v9346_v43  ;;  %v10533_v43 = vld [vmem:[#allocation2 + $0xd8] sm:$0xf0] }
 0x2c6   :  { %v11773_v16 = vld [vmem:[#allocation2 + $0x17c] sm:$0xf0]  ;;  %v9353_v25 = vor.u32 %v11750_v12, %v11771_v31  ;;  %6210 = vst [vmem:[#allocation2 + $0x198] sm:$0xf] %v10893_v35  ;;  %v9249_v20 = vor.u32 %v10533_v43, %v9248_v39  ;;  %v10572_v39 = vld [vmem:[#allocation6 + $0x590] sm:$0xff] }
 0x2c7   :  { %v9329_v51 = vor.u32 %v11768_v28, %v11773_v16  ;;  %6297 = vst [vmem:[#allocation2 + $0x180] sm:$0xf] %v10893_v35  ;;  %v11781_v7 = vld [vmem:[#allocation2 + $0x168] sm:$0xf]  ;;  %v10580_v43 = vld [vmem:[#allocation6 + $0x5d0] sm:$0xff]  ;;  %v10590_v12 = vld [vmem:[#allocation6 + $0x620] sm:$0xff] }
 0x2c8   :  { %5790 = vmatmul.bf16.vlgmr.msrb.gmra.mxu3 %v9161_v24  ;;  %v9333_v8 = vor.u32 %v11756_v62, %v11781_v7  ;;  %6372 = vst [vmem:[#allocation2 + $0x168] sm:$0xf] %v10893_v35  ;;  %7236 = vmatpush.bf16.msrb.mxu2 %v10572_v39  ;;  %v10592_v16 = vld [vmem:[#allocation6 + $0x630] sm:$0xff]  ;;  %v10635_v7 = vld [vmem:[#allocation2 + $0x88] sm:$0xf0] }
 0x2c9   :  { %6367 = vst [vmem:[#allocation2 + $0xdc] sm:$0xf] %v10893_v35  ;;  %v9644_v62 = vld [vmem:[#allocation2 + $0x70] sm:$0xf] }
 0x2ca   :  { %5727 = vmatmul.bf16.gmra.mxu1 %v9349_v10 }
 0x2ce   :  { %v5644_v9 = vpop.f32.mrf.mxu0 }
 0x2cf   :  { %v11788_v37 = vadd.f32 %v5644_v9, %v5596_v17  ;;  %5746 = vmatmul.bf16.gmra.mxu2 %v9185_v45  ;;  %v10525_v17 = vld [vmem:[#allocation2 + $0x98] sm:$0xf0] }
 0x2d0   :  { %v9213_v52 = vor.u32 %v10525_v17, %v9212_v36  ;;  %v10536_v36 = vld [vmem:[#allocation2 + $0xf4] sm:$0xf] }
 0x2d1   :  { %5839 = vmatmul.bf16.vlgmr.msrb.gmra.mxu0 %v9165_v50  ;;  %v9245_v50 = vor.u32 %v10529_v1, %v9242_v58 }
 0x2d2   :  { %v5551_v4 = vpop.f32.mrf.mxu2 }
 0x2d3   :  { %v5552_v18 = vadd.f32 %v11754_v22, %v5551_v4 }
 0x2d6   :  { %v11792_v46 = vpop.f32.mrf.mxu0 }
 0x2d7   :  { %v11829_v27 = vpop.f32.mrf.mxu1 }
 0x2d8   :  { %5795 = vmatmul.bf16.gmra.mxu3 %v9189_v30  ;;  %v10581_v30 = vld [vmem:[#allocation6 + $0x5d8] sm:$0xff] }
 0x2d9   :  { %7284 = vmatpush.bf16.msra.mxu3 %v10581_v30 }
 0x2da   :  { %v5553_v19 = vpop.f32.mrf.mxu2 }
 0x2db   :  { %v5600_v63 = vpop.f32.mrf.mxu3  ;;  %v5554_v41 = vadd.f32 %v11754_v22, %v5553_v19 }
 0x2dc   :  { %v5601_v6 = vadd.f32 %v5600_v63, %v5552_v18  ;;  %v9270_v63 = vld [vmem:[#allocation2 + $0x10c] sm:$0xf0] }
 0x2dd   :  { %7285 = vmatpush.bf16.msra.mxu3 %v10580_v43 }
 0x2de   :  { %v5649_v15 = vpop.f32.mrf.mxu0 }
 0x2df   :  { %v11797_v23 = vadd.f32 %v5649_v15, %v5601_v6  ;;  %5751 = vmatmul.bf16.gmra.mxu2 %v9213_v52  ;;  %v9273_v15 = vor.u32 %v10536_v36, %v9270_v63  ;;  %v10557_v63 = vld [vmem:[#allocation2 + $0x19c] sm:$0xf]  ;;  %v9354_v36 = vld [vmem:[#allocation2 + $0x1b4] sm:$0xf0] }
 0x2e0   :  { %6298 = vst [vmem:[#allocation2 + $0x19c] sm:$0xf] %v10893_v35 }
 0x2e1   :  { %5844 = vmatmul.bf16.gmra.mxu0 %v9193_v44  ;;  %6299 = vst [vmem:[#allocation2 + $0x1b8] sm:$0xf] %v10893_v35 }
 0x2e2   :  { %v5556_v61 = vpop.f32.mrf.mxu2 }
 0x2e3   :  { %v5602_v10 = vpop.f32.mrf.mxu3  ;;  %v5557_v44 = vadd.f32 %v11754_v22, %v5556_v61 }
 0x2e4   :  { %v5603_v24 = vadd.f32 %v5602_v10, %v5554_v41  ;;  %v10564_v10 = vld [vmem:[#allocation6 + $0x550] sm:$0xff] }
 0x2e5   :  { %7187 = vmatpush.bf16.msrb.mxu1 %v10564_v10 }
 0x2e6   :  { %v5651_v5 = vpop.f32.mrf.mxu0 }
 0x2e7   :  { %v11805_v0 = vadd.f32 %v5651_v5, %v5603_v24  ;;  %v10546_v5 = vld [vmem:[#allocation2 + $0x140] sm:$0xf0] }
 0x2e8   :  { %5800 = vmatmul.bf16.gmra.mxu3 %v9217_v33 }
 0x2ea   :  { %v5558_v26 = vpop.f32.mrf.mxu2 }
 0x2eb   :  { %v5605_v34 = vpop.f32.mrf.mxu3  ;;  %v5559_v60 = vadd.f32 %v11754_v22, %v5558_v26  ;;  %v10540_v26 = vld [vmem:[#allocation2 + $0x110] sm:$0xf0] }
 0x2ec   :  { %v5606_v40 = vadd.f32 %v5605_v34, %v5557_v44  ;;  %v9296_v44 = vld [vmem:[#allocation2 + $0x128] sm:$0xf] }
 0x2ed   :  { %v9297_v34 = vor.u32 %v10546_v5, %v9296_v44  ;;  %v10561_v5 = vld [vmem:[#allocation2 + $0x1b8] sm:$0xf0]  ;;  %v10570_v44 = vld [vmem:[#allocation6 + $0x580] sm:$0xff] }
 0x2ee   :  { %v5654_v45 = vpop.f32.mrf.mxu0  ;;  %6375 = vst [vmem:[#allocation2 + $0x1bc] sm:$0xf] %v10893_v35 }
 0x2ef   :  { %v11811_v9 = vadd.f32 %v5654_v45, %v5606_v40  ;;  %5756 = vmatmul.bf16.gmra.mxu2 %v9241_v14  ;;  %v10539_v14 = vld [vmem:[#allocation2 + $0x108] sm:$0xf0]  ;;  %v9276_v45 = vld [vmem:[#allocation2 + $0xf8] sm:$0xf] }
 0x2f1   :  { %5849 = vmatmul.bf16.gmra.mxu0 %v9221_v49  ;;  %v9268_v49 = vld [vmem:[#allocation2 + $0xf0] sm:$0xf] }
 0x2f2   :  { %v5561_v59 = vpop.f32.mrf.mxu2  ;;  %v9269_v55 = vor.u32 %v10539_v14, %v9268_v49  ;;  %v9588_v49 = vld [vmem:[#allocation2] sm:$0xf] }
 0x2f3   :  { %v5607_v33 = vpop.f32.mrf.mxu3  ;;  %v5562_v3 = vadd.f32 %v11754_v22, %v5561_v59  ;;  %v9277_v59 = vor.u32 %v10540_v26, %v9276_v45  ;;  %7597 = vst [vmem:[#allocation2] sm:$0xf] %v10893_v35  ;;  %v10593_v45 = vld [vmem:[#allocation6 + $0x638] sm:$0xff] }
 0x2f4   :  { %v5608_v2 = vadd.f32 %v5607_v33, %v5559_v60  ;;  %v10563_v33 = vld [vmem:[#allocation6 + $0x548] sm:$0xff]  ;;  %7329 = vmatpush.bf16.msra.mxu0 %v10593_v45 }
 0x2f5   :  { %7188 = vmatpush.bf16.msrb.mxu1 %v10563_v33 }
 0x2f6   :  { %v5656_v4 = vpop.f32.mrf.mxu0 }
 0x2f7   :  { %v11820_v47 = vadd.f32 %v5656_v4, %v5608_v2 }
 0x2f8   :  { %5805 = vmatmul.bf16.gmra.mxu3 %v9245_v50  ;;  %7330 = vmatpush.bf16.msra.mxu0 %v10592_v16  ;;  %v9618_v16 = vld [vmem:[#allocation2 + $0x54] sm:$0xf0] }
 0x2f9   :  { %7189 = vmatpush.bf16.msrb.mxu1 %v10562_v57 }
 0x2fa   :  { %v5563_v56 = vpop.f32.mrf.mxu2 }
 0x2fb   :  { %v5610_v54 = vpop.f32.mrf.mxu3  ;;  %v5564_v18 = vadd.f32 %v11754_v22, %v5563_v56  ;;  %v10543_v56 = vld [vmem:[#allocation2 + $0x12c] sm:$0xf] }
 0x2fc   :  { %v5611_v29 = vadd.f32 %v5610_v54, %v5562_v3  ;;  %v11836_v3 = vpop.f32.mrf.mxu1  ;;  %v9301_v54 = vor.u32 %v10543_v56, %v9298_v48  ;;  %v9357_v56 = vor.u32 %v10557_v63, %v9354_v36 }
 0x2fe   :  { %v5659_v1 = vpop.f32.mrf.mxu0 }
 0x2ff   :  { %v11823_v58 = vadd.f32 %v5659_v1, %v5611_v29  ;;  %5761 = vmatmul.bf16.gmra.mxu2 %v9269_v55  ;;  %v10571_v29 = vld [vmem:[#allocation6 + $0x588] sm:$0xff]  ;;  %v10621_v55 = vld [vmem:[#allocation2 + $0x18] sm:$0xf0] }
 0x300   :  { %v10579_v1 = vld [vmem:[#allocation6 + $0x5c8] sm:$0xff]  ;;  %7237 = vmatpush.bf16.msrb.mxu2 %v10571_v29  ;;  %7598 = vst [vmem:[#allocation2 + $0x1c] sm:$0xf] %v10893_v35 }
 0x301   :  { %5854 = vmatmul.bf16.gmra.mxu0 %v9249_v20  ;;  %v9589_v20 = vor.u32 %v10621_v55, %v9588_v49  ;;  %7286 = vmatpush.bf16.msra.mxu3 %v10579_v1  ;;  %v10618_v49 = vld [vmem:[#allocation2 + $0x4] sm:$0xf]  ;;  %v9590_v55 = vld [vmem:[#allocation2 + $0x1c] sm:$0xf0]  ;;  %v9645_v1 = vor.u32 %v10635_v7, %v9644_v62 }
 0x302   :  { %v5566_v19 = vpop.f32.mrf.mxu2 }
 0x303   :  { %v5612_v17 = vpop.f32.mrf.mxu3  ;;  %v5567_v61 = vadd.f32 %v11754_v22, %v5566_v19  ;;  %7190 = vmatmul.bf16.vlgmr.msrb.gmra.mxu1 %v9589_v20  ;;  %v9593_v20 = vor.u32 %v10618_v49, %v9590_v55 }
 0x304   :  { %v5613_v6 = vadd.f32 %v5612_v17, %v5564_v18  ;;  %v10553_v17 = vld [vmem:[#allocation2 + $0x178] sm:$0xf0]  ;;  %v11847_v43 = vpop.f32.mrf.mxu1  ;;  %7238 = vmatpush.bf16.msrb.mxu2 %v10570_v44 }
 0x305   :  { %v10617_v44 = vld [vmem:[#allocation6 + $0x6f8] sm:$0xff] }
 0x306   :  { %v5661_v52 = vpop.f32.mrf.mxu0 }
 0x307   :  { %v11826_v41 = vadd.f32 %v5661_v52, %v5613_v6 }
 0x308   :  { %5810 = vmatmul.bf16.gmra.mxu3 %v9273_v15  ;;  %v9324_v15 = vld [vmem:[#allocation2 + $0x160] sm:$0xf] }
 0x30a   :  { %v5568_v24 = vpop.f32.mrf.mxu2 }
 0x30b   :  { %v5615_v11 = vpop.f32.mrf.mxu3  ;;  %v5569_v2 = vadd.f32 %v11754_v22, %v5568_v24  ;;  %v11851_v24 = vld [vmem:[#allocation2 + $0x1a0] sm:$0xf] }
 0x30c   :  { %v5616_v53 = vadd.f32 %v5615_v11, %v5567_v61  ;;  %v9325_v61 = vor.u32 %v10553_v17, %v9324_v15  ;;  %6374 = vst [vmem:[#allocation2 + $0x1a0] sm:$0xf] %v10893_v35  ;;  %v11865_v38 = vpop.f32.mrf.mxu1  ;;  %v10589_v17 = vld [vmem:[#allocation6 + $0x618] sm:$0xff]  ;;  %v9596_v15 = vld [vmem:[#allocation2 + $0x8] sm:$0xf] }
 0x30e   :  { %v5664_v40 = vpop.f32.mrf.mxu0 }
 0x30f   :  { %v11831_v60 = vadd.f32 %v5664_v40, %v5616_v53  ;;  %5766 = vmatmul.bf16.gmra.mxu2 %v9297_v34  ;;  %v9616_v34 = vld [vmem:[#allocation2 + $0x38] sm:$0xf]  ;;  %v10628_v40 = vld [vmem:[#allocation2 + $0x50] sm:$0xf0] }
 0x310   :  { %v9617_v32 = vor.u32 %v10628_v40, %v9616_v34  ;;  %7599 = vst [vmem:[#allocation2 + $0x38] sm:$0xf] %v10893_v35  ;;  %v10601_v34 = vld [vmem:[#allocation6 + $0x678] sm:$0xff] }
 0x311   :  { %5859 = vmatmul.bf16.gmra.mxu0 %v9277_v59  ;;  %7600 = vst [vmem:[#allocation2 + $0x54] sm:$0xf] %v10893_v35  ;;  %7378 = vmatpush.bf16.msra.mxu1 %v10601_v34 }
 0x312   :  { %v5571_v50 = vpop.f32.mrf.mxu2 }
 0x313   :  { %v5617_v4 = vpop.f32.mrf.mxu3  ;;  %v5572_v18 = vadd.f32 %v11754_v22, %v5571_v50  ;;  %7195 = vmatmul.bf16.gmra.mxu1 %v9617_v32 }
 0x314   :  { %v11834_v30 = vadd.f32 %v5617_v4, %v5569_v2  ;;  %v11880_v48 = vpop.f32.mrf.mxu1 }
 0x316   :  { %v11838_v14 = vpop.f32.mrf.mxu0 }
 0x318   :  { %5815 = vmatmul.bf16.gmra.mxu3 %v9301_v54  ;;  %v10591_v54 = vld [vmem:[#allocation6 + $0x628] sm:$0xff] }
 0x319   :  { %7331 = vmatpush.bf16.msra.mxu0 %v10591_v54 }
 0x31a   :  { %v11842_v19 = vpop.f32.mrf.mxu2 }
 0x31b   :  { %v5620_v6 = vpop.f32.mrf.mxu3 }
 0x31c   :  { %v5621_v52 = vadd.f32 %v5620_v6, %v5572_v18  ;;  %v11889_v63 = vpop.f32.mrf.mxu1  ;;  %v9361_v6 = vor.u32 %v10561_v5, %v11851_v24  ;;  %v10587_v5 = vld [vmem:[#allocation6 + $0x608] sm:$0xff] }
 0x31d   :  { %7332 = vmatpush.bf16.msra.mxu0 %v10590_v12 }
 0x31e   :  { %v5669_v39 = vpop.f32.mrf.mxu0 }
 0x31f   :  { %v11849_v10 = vadd.f32 %v5669_v39, %v5621_v52  ;;  %5771 = vmatmul.bf16.gmra.mxu2 %v9325_v61  ;;  %v10622_v61 = vld [vmem:[#allocation2 + $0x20] sm:$0xf0]  ;;  %v10588_v39 = vld [vmem:[#allocation6 + $0x610] sm:$0xff] }
 0x320   :  { %v9597_v24 = vor.u32 %v10622_v61, %v9596_v15  ;;  %v5699_v15 = vadd.f32 %v11847_v43, %v11797_v23 }
 0x321   :  { %5864 = vmatmul.bf16.gmra.mxu0 %v9305_v42  ;;  %v10578_v42 = vld [vmem:[#allocation6 + $0x5c0] sm:$0xff] }
 0x322   :  { %v5576_v11 = vpop.f32.mrf.mxu2  ;;  %7287 = vmatpush.bf16.msra.mxu3 %v10578_v42  ;;  %7333 = vmatpush.bf16.msra.mxu0 %v10589_v17 }
 0x323   :  { %v11858_v53 = vpop.f32.mrf.mxu3  ;;  %v5577_v59 = vadd.f32 %v11754_v22, %v5576_v11  ;;  %7200 = vmatmul.bf16.gmra.mxu1 %v9645_v1  ;;  %v10609_v11 = vld [vmem:[#allocation6 + $0x6b8] sm:$0xff] }
 0x324   :  { %7427 = vmatpush.bf16.msra.mxu2 %v10609_v11  ;;  %v11898_v45 = vpop.f32.mrf.mxu1 }
 0x326   :  { %v11860_v26 = vpop.f32.mrf.mxu0  ;;  %7334 = vmatpush.bf16.msra.mxu0 %v10588_v39  ;;  %7476 = vmatpush.bf16.msrb.mxu3 %v10617_v44  ;;  %v11911_v44 = vld [vmem:[#allocation2 + $0xe0] sm:$0xf] }
 0x327   :  { %7605 = vst [vmem:[#allocation2 + $0xe0] sm:$0xf] %v10893_v35 }
 0x328   :  { %5820 = vmatmul.bf16.gmra.mxu3 %v9329_v51 }
 0x32a   :  { %v11869_v33 = vpop.f32.mrf.mxu2  ;;  %7335 = vmatpush.bf16.msra.mxu0 %v10587_v5  ;;  %v11915_v5 = vld [vmem:[#allocation2 + $0xf8] sm:$0xf0] }
 0x32b   :  { %v5625_v2 = vpop.f32.mrf.mxu3  ;;  %7606 = vst [vmem:[#allocation2 + $0xfc] sm:$0xf] %v10893_v35 }
 0x32c   :  { %v5626_v28 = vadd.f32 %v5625_v2, %v5577_v59  ;;  %v5549_v59 = vadd.f32 %v11754_v22, %v11786_v13  ;;  %v5694_v2 = vadd.f32 %v11829_v27, %v11788_v37  ;;  %v11907_v13 = vpop.f32.mrf.mxu1  ;;  %v10608_v27 = vld [vmem:[#allocation6 + $0x6b0] sm:$0xff] }
 0x32d   :  { %7428 = vmatpush.bf16.msra.mxu2 %v10608_v27 }
 0x32e   :  { %v5674_v51 = vpop.f32.mrf.mxu0  ;;  %v5598_v55 = vadd.f32 %v11790_v21, %v5549_v59 }
 0x32f   :  { %v11872_v50 = vadd.f32 %v5674_v51, %v5626_v28  ;;  %5776 = vmatmul.bf16.gmra.mxu2 %v9353_v25  ;;  %v10625_v28 = vld [vmem:[#allocation2 + $0x3c] sm:$0xf]  ;;  %v10586_v51 = vld [vmem:[#allocation6 + $0x600] sm:$0xff] }
 0x330   :  { %7336 = vmatpush.bf16.msra.mxu0 %v10586_v51  ;;  %v9621_v49 = vor.u32 %v10625_v28, %v9618_v16  ;;  %v5701_v28 = vadd.f32 %v11865_v38, %v11805_v0  ;;  %v10607_v51 = vld [vmem:[#allocation6 + $0x6a8] sm:$0xff] }
 0x331   :  { %5869 = vmatmul.bf16.gmra.mxu0 %v9333_v8  ;;  %7429 = vmatpush.bf16.msra.mxu2 %v10607_v51 }
 0x332   :  { %v5581_v4 = vpop.f32.mrf.mxu2 }
 0x333   :  { %v11882_v57 = vpop.f32.mrf.mxu3  ;;  %v5582_v31 = vadd.f32 %v11754_v22, %v5581_v4 }
 0x334   :  { %v11913_v34 = vpop.f32.mrf.mxu1 }
 0x336   :  { %v11884_v29 = vpop.f32.mrf.mxu0 }
 0x338   :  { %5825 = vmatmul.bf16.gmra.mxu3 %v9357_v56 }
 0x33a   :  { %v11887_v25 = vpop.f32.mrf.mxu2 }
 0x33b   :  { %v5630_v8 = vpop.f32.mrf.mxu3 }
 0x33c   :  { %v5631_v18 = vadd.f32 %v5630_v8, %v5582_v31  ;;  %v5647_v31 = vadd.f32 %v11792_v46, %v5598_v55  ;;  %v10616_v8 = vld [vmem:[#allocation6 + $0x6f0] sm:$0xff] }
 0x33d   :  { %7477 = vmatpush.bf16.msrb.mxu3 %v10616_v8 }
 0x33e   :  { %v5679_v36 = vpop.f32.mrf.mxu0  ;;  %v5696_v22 = vadd.f32 %v11836_v3, %v5647_v31 }
 0x33f   :  { %v11892_v52 = vadd.f32 %v5679_v36, %v5631_v18  ;;  %7239 = vmatmul.bf16.vlgmr.msrb.gmra.mxu2 %v9593_v20  ;;  %v10600_v20 = vld [vmem:[#allocation6 + $0x670] sm:$0xff] }
 0x340   :  { %7379 = vmatpush.bf16.msra.mxu1 %v10600_v20 }
 0x341   :  { %5874 = vmatmul.bf16.gmra.mxu0 %v9361_v6 }
 0x342   :  { %v5742_v40 = vpop.f32.mrf.mxu2 }
 0x343   :  { %v11894_v32 = vpop.f32.mrf.mxu3  ;;  %v5743_v4 = vadd.f32 %v5742_v40, %v5694_v2 }
 0x346   :  { %v11896_v42 = vpop.f32.mrf.mxu0 }
 0x348   :  { %7288 = vmatmul.bf16.vlgmr.msra.gmra.mxu3 %v9597_v24 }
 0x34a   :  { %v5744_v56 = vpop.f32.mrf.mxu2 }
 0x34b   :  { %v5791_v54 = vpop.f32.mrf.mxu3  ;;  %v5745_v1 = vadd.f32 %v5744_v56, %v5696_v22 }
 0x34c   :  { %v5792_v12 = vadd.f32 %v5791_v54, %v5743_v4  ;;  %v10615_v54 = vld [vmem:[#allocation6 + $0x6e8] sm:$0xff] }
 0x34d   :  { %7478 = vmatpush.bf16.msrb.mxu3 %v10615_v54 }
 0x34e   :  { %v5840_v62 = vpop.f32.mrf.mxu0 }
 0x34f   :  { %v5841_v7 = vadd.f32 %v5840_v62, %v5792_v12  ;;  %7244 = vmatmul.bf16.gmra.mxu2 %v9621_v49  ;;  %v10599_v49 = vld [vmem:[#allocation6 + $0x668] sm:$0xff] }
 0x350   :  { %7380 = vmatpush.bf16.msra.mxu1 %v10599_v49  ;;  %v10614_v49 = vld [vmem:[#allocation6 + $0x6e0] sm:$0xff] }
 0x351   :  { %vm5880_vm10 = vcmp.ge.f32.partialorder %v5841_v7, 0.0  ;;  %v5896_v37 = vmul.f32 0.15, %v5841_v7  ;;  %7479 = vmatpush.bf16.msrb.mxu3 %v10614_v49 }
 0x352   :  { %v5747_v18 = vpop.f32.mrf.mxu2 }
 0x353   :  { %v5912_v17 = vsel %vm5880_vm10, %v5841_v7, %v5896_v37  ;;  %v5793_v6 = vpop.f32.mrf.mxu3  ;;  %v5748_v39 = vadd.f32 %v5747_v18, %v5699_v15  ;;  %v11921_v7 = vpop.f32.mrf.mxu1 }
 0x354   :  { %v5978_v21 = vpack.c.bf16 %v5912_v17, %v5912_v17  ;;  %v5794_v46 = vadd.f32 %v5793_v6, %v5745_v1  ;;  %v5704_v6 = vadd.f32 %v11880_v48, %v11811_v9 }
 0x356   :  { %5994 = vst [vmem:[#allocation2 + $0xa8] sm:$0xf] %v5978_v21  ;;  %v5842_v36 = vpop.f32.mrf.mxu0 }
 0x357   :  { %6080 = vst [vmem:[#allocation2 + $0x74] sm:$0xf] %v5978_v21  ;;  %v5843_v3 = vadd.f32 %v5842_v36, %v5794_v46 }
 0x358   :  { %6122 = vst [vmem:[#allocation2 + $0x40] sm:$0xf] %v5978_v21 }
 0x359   :  { %6152 = vst [vmem:[#allocation2 + $0xc] sm:$0xf] %v5978_v21  ;;  %vm5881_vm0 = vcmp.ge.f32.partialorder %v5843_v3, 0.0  ;;  %v5897_v61 = vmul.f32 0.15, %v5843_v3 }
 0x35a   :  { %v5749_v11 = vpop.f32.mrf.mxu2 }
 0x35b   :  { %v5913_v40 = vsel %vm5881_vm0, %v5843_v3, %v5897_v61  ;;  %v5796_v24 = vpop.f32.mrf.mxu3  ;;  %v5750_v4 = vadd.f32 %v5749_v11, %v5701_v28  ;;  %v11925_v11 = vld [vmem:[#allocation2 + $0x118] sm:$0xf]  ;;  %v5706_v28 = vadd.f32 %v11889_v63, %v11820_v47  ;;  %v9701_v47 = vor.u32 %v11915_v5, %v11911_v44 }
 0x35c   :  { %v5979_v59 = vpack.c.bf16 %v5913_v40, %v5913_v40  ;;  %v5797_v2 = vadd.f32 %v5796_v24, %v5748_v39  ;;  %7607 = vst [vmem:[#allocation2 + $0x118] sm:$0xf] %v10893_v35 }
 0x35d   :  { %v9672_v22 = vld [vmem:[#allocation2 + $0xa8] sm:$0xf] }
 0x35e   :  { %5995 = vst [vmem:[#allocation2 + $0xc4] sm:$0xf] %v5979_v59  ;;  %v5845_v23 = vpop.f32.mrf.mxu0  ;;  %v10632_v27 = vld [vmem:[#allocation2 + $0x74] sm:$0xf] }
 0x35f   :  { %6081 = vst [vmem:[#allocation2 + $0x90] sm:$0xf] %v5979_v59  ;;  %v5846_v43 = vadd.f32 %v5845_v23, %v5797_v2  ;;  %v9624_v18 = vld [vmem:[#allocation2 + $0x40] sm:$0xf]  ;;  %v11931_v23 = vpop.f32.mrf.mxu1 }
 0x360   :  { %6123 = vst [vmem:[#allocation2 + $0x5c] sm:$0xf] %v5979_v59  ;;  %v10619_v46 = vld [vmem:[#allocation2 + $0xc] sm:$0xf] }
 0x361   :  { %6153 = vst [vmem:[#allocation2 + $0x28] sm:$0xf] %v5979_v59  ;;  %vm5882_vm9 = vcmp.ge.f32.partialorder %v5846_v43, 0.0  ;;  %v5898_v16 = vmul.f32 0.15, %v5846_v43 }
 0x362   :  { %v5752_v56 = vpop.f32.mrf.mxu2  ;;  %v11927_v59 = vld [vmem:[#allocation2 + $0x130] sm:$0xf0] }
 0x363   :  { %v5914_v55 = vsel %vm5882_vm9, %v5846_v43, %v5898_v16  ;;  %v5798_v12 = vpop.f32.mrf.mxu3  ;;  %v5753_v61 = vadd.f32 %v5752_v56, %v5704_v6  ;;  %7608 = vst [vmem:[#allocation2 + $0x134] sm:$0xf] %v10893_v35  ;;  %v9729_v49 = vor.u32 %v11927_v59, %v11925_v11 }
 0x364   :  { %v6066_v31 = vpack.c.bf16 %v5914_v55, %v5914_v55  ;;  %v5799_v62 = vadd.f32 %v5798_v12, %v5750_v4  ;;  %v10606_v4 = vld [vmem:[#allocation6 + $0x6a0] sm:$0xff] }
 0x365   :  { %v10642_v0 = vld [vmem:[#allocation2 + $0xc0] sm:$0xf0]  ;;  %7430 = vmatpush.bf16.msra.mxu2 %v10606_v4 }
 0x366   :  { %6082 = vst [vmem:[#allocation2 + $0xac] sm:$0xf] %v6066_v31  ;;  %v5847_v38 = vpop.f32.mrf.mxu0  ;;  %v9673_v37 = vor.u32 %v10642_v0, %v9672_v22  ;;  %v9646_v8 = vld [vmem:[#allocation2 + $0x8c] sm:$0xf0]  ;;  %v10598_v55 = vld [vmem:[#allocation6 + $0x660] sm:$0xff] }
 0x367   :  { %6124 = vst [vmem:[#allocation2 + $0x78] sm:$0xf] %v6066_v31  ;;  %v5848_v20 = vadd.f32 %v5847_v38, %v5799_v62  ;;  %v9649_v1 = vor.u32 %v10632_v27, %v9646_v8  ;;  %v10629_v17 = vld [vmem:[#allocation2 + $0x58] sm:$0xf0]  ;;  %7381 = vmatpush.bf16.msra.mxu1 %v10598_v55  ;;  %v11940_v44 = vpop.f32.mrf.mxu1 }
 0x368   :  { %6154 = vst [vmem:[#allocation2 + $0x44] sm:$0xf] %v6066_v31  ;;  %7205 = vmatmul.bf16.gmra.mxu1 %v9673_v37  ;;  %v9625_v21 = vor.u32 %v10629_v17, %v9624_v18  ;;  %v9598_v36 = vld [vmem:[#allocation2 + $0x24] sm:$0xf0]  ;;  %v5709_v17 = vadd.f32 %v11898_v45, %v11823_v58 }
 0x369   :  { %6196 = vst [vmem:[#allocation2 + $0x10] sm:$0xf] %v6066_v31  ;;  %vm5883_vm11 = vcmp.ge.f32.partialorder %v5848_v20, 0.0  ;;  %v5899_v3 = vmul.f32 0.15, %v5848_v20  ;;  %7249 = vmatmul.bf16.gmra.mxu2 %v9649_v1  ;;  %v9601_v15 = vor.u32 %v10619_v46, %v9598_v36 }
 0x36a   :  { %7293 = vmatmul.bf16.gmra.mxu3 %v9625_v21  ;;  %v5754_v39 = vpop.f32.mrf.mxu2 }
 0x36b   :  { %v5915_v40 = vsel %vm5883_vm11, %v5848_v20, %v5899_v3  ;;  %7337 = vmatmul.bf16.vlgmr.msra.gmra.mxu0 %v9601_v15  ;;  %v5801_v24 = vpop.f32.mrf.mxu3  ;;  %v5755_v56 = vadd.f32 %v5754_v39, %v5706_v28  ;;  %v5711_v39 = vadd.f32 %v11907_v13, %v11826_v41  ;;  %v9702_v28 = vld [vmem:[#allocation2 + $0xfc] sm:$0xf0] }
 0x36c   :  { %v6067_v9 = vpack.c.bf16 %v5915_v40, %v5915_v40  ;;  %v5802_v48 = vadd.f32 %v5801_v24, %v5753_v61  ;;  %v10646_v40 = vld [vmem:[#allocation2 + $0xe4] sm:$0xf] }
 0x36d   :  { %v10639_v63 = vld [vmem:[#allocation2 + $0xac] sm:$0xf]  ;;  %v9705_v55 = vor.u32 %v10646_v40, %v9702_v28  ;;  %v9708_v40 = vld [vmem:[#allocation2 + $0xe8] sm:$0xf] }
 0x36e   :  { %6083 = vst [vmem:[#allocation2 + $0xc8] sm:$0xf] %v6067_v9  ;;  %v5850_v2 = vpop.f32.mrf.mxu0  ;;  %v9652_v16 = vld [vmem:[#allocation2 + $0x78] sm:$0xf] }
 0x36f   :  { %6125 = vst [vmem:[#allocation2 + $0x94] sm:$0xf] %v6067_v9  ;;  %v5851_v43 = vadd.f32 %v5850_v2, %v5802_v48  ;;  %v10626_v1 = vld [vmem:[#allocation2 + $0x44] sm:$0xf]  ;;  %v10605_v48 = vld [vmem:[#allocation6 + $0x698] sm:$0xff]  ;;  %v11946_v4 = vpop.f32.mrf.mxu1 }
 0x370   :  { %6155 = vst [vmem:[#allocation2 + $0x60] sm:$0xf] %v6067_v9  ;;  %7431 = vmatpush.bf16.msra.mxu2 %v10605_v48 }
 0x371   :  { %6197 = vst [vmem:[#allocation2 + $0x2c] sm:$0xf] %v6067_v9  ;;  %vm5884_vm12 = vcmp.ge.f32.partialorder %v5851_v43, 0.0  ;;  %v5900_v51 = vmul.f32 0.15, %v5851_v43 }
 0x372   :  { %v5757_v54 = vpop.f32.mrf.mxu2  ;;  %7673 = vst [vmem:[#allocation2 + $0x78] sm:$0xf] %v10893_v35 }
 0x373   :  { %v5916_v12 = vsel %vm5884_vm12, %v5851_v43, %v5900_v51  ;;  %v5803_v31 = vpop.f32.mrf.mxu3  ;;  %v5758_v21 = vadd.f32 %v5757_v54, %v5709_v17  ;;  %v10597_v51 = vld [vmem:[#allocation6 + $0x658] sm:$0xff] }
 0x374   :  { %v6110_v62 = vpack.c.bf16 %v5916_v12, %v5916_v12  ;;  %v5804_v22 = vadd.f32 %v5803_v31, %v5755_v56  ;;  %7382 = vmatpush.bf16.msra.mxu1 %v10597_v51 }
 0x375   :  { %v9674_v0 = vld [vmem:[#allocation2 + $0xc4] sm:$0xf0] }
 0x376   :  { %6126 = vst [vmem:[#allocation2 + $0xb0] sm:$0xf] %v6110_v62  ;;  %v5852_v38 = vpop.f32.mrf.mxu0  ;;  %v9677_v37 = vor.u32 %v10639_v63, %v9674_v0  ;;  %v10636_v27 = vld [vmem:[#allocation2 + $0x90] sm:$0xf0] }
 0x377   :  { %6156 = vst [vmem:[#allocation2 + $0x7c] sm:$0xf] %v6110_v62  ;;  %v5853_v8 = vadd.f32 %v5852_v38, %v5804_v22  ;;  %v9653_v20 = vor.u32 %v10636_v27, %v9652_v16  ;;  %v9626_v18 = vld [vmem:[#allocation2 + $0x5c] sm:$0xf0]  ;;  %v10613_v16 = vld [vmem:[#allocation6 + $0x6d8] sm:$0xff]  ;;  %v5714_v38 = vadd.f32 %v11913_v34, %v11831_v60  ;;  %v5667_v60 = vadd.f32 %v11838_v14, %v11834_v30 }
 0x378   :  { %6198 = vst [vmem:[#allocation2 + $0x48] sm:$0xf] %v6110_v62  ;;  %7210 = vmatmul.bf16.gmra.mxu1 %v9701_v47  ;;  %v9629_v6 = vor.u32 %v10626_v1, %v9626_v18  ;;  %7480 = vmatpush.bf16.msrb.mxu3 %v10613_v16  ;;  %v11953_v18 = vpop.f32.mrf.mxu1 }
 0x379   :  { %6284 = vst [vmem:[#allocation2 + $0x14] sm:$0xf] %v6110_v62  ;;  %vm5885_vm13 = vcmp.ge.f32.partialorder %v5853_v8, 0.0  ;;  %v5901_v5 = vmul.f32 0.15, %v5853_v8  ;;  %7254 = vmatmul.bf16.gmra.mxu2 %v9677_v37 }
 0x37a   :  { %7298 = vmatmul.bf16.gmra.mxu3 %v9653_v20  ;;  %7674 = vst [vmem:[#allocation2 + $0x94] sm:$0xf] %v10893_v35  ;;  %v5759_v46 = vpop.f32.mrf.mxu2 }
 0x37b   :  { %v5917_v36 = vsel %vm5885_vm13, %v5853_v8, %v5901_v5  ;;  %7342 = vmatmul.bf16.gmra.mxu0 %v9629_v6  ;;  %v5806_v3 = vpop.f32.mrf.mxu3  ;;  %v5760_v2 = vadd.f32 %v5759_v46, %v5711_v39  ;;  %v9756_v6 = vld [vmem:[#allocation2 + $0x150] sm:$0xf]  ;;  %v5716_v5 = vadd.f32 %v11921_v7, %v5667_v60  ;;  %v10611_v60 = vld [vmem:[#allocation6 + $0x6c8] sm:$0xff] }
 0x37c   :  { %v6111_v15 = vpack.c.bf16 %v5917_v36, %v5917_v36  ;;  %v5807_v61 = vadd.f32 %v5806_v3, %v5758_v21  ;;  %v10663_v21 = vld [vmem:[#allocation2 + $0x168] sm:$0xf0]  ;;  %v10596_v46 = vld [vmem:[#allocation6 + $0x650] sm:$0xff] }
 0x37d   :  { %v9680_v24 = vld [vmem:[#allocation2 + $0xb0] sm:$0xf]  ;;  %7383 = vmatpush.bf16.msra.mxu1 %v10596_v46  ;;  %v9757_v48 = vor.u32 %v10663_v21, %v9756_v6 }
 0x37e   :  { %6127 = vst [vmem:[#allocation2 + $0xcc] sm:$0xf] %v6111_v15  ;;  %v5855_v58 = vpop.f32.mrf.mxu0  ;;  %v10633_v22 = vld [vmem:[#allocation2 + $0x7c] sm:$0xf]  ;;  %v10604_v3 = vld [vmem:[#allocation6 + $0x690] sm:$0xff] }
 0x37f   :  { %6157 = vst [vmem:[#allocation2 + $0x98] sm:$0xf] %v6111_v15  ;;  %v5856_v45 = vadd.f32 %v5855_v58, %v5807_v61  ;;  %v10653_v58 = vld [vmem:[#allocation2 + $0x11c] sm:$0xf]  ;;  %v10612_v39 = vld [vmem:[#allocation6 + $0x6d0] sm:$0xff]  ;;  %7432 = vmatpush.bf16.msra.mxu2 %v10604_v3 }
 0x380   :  { %6199 = vst [vmem:[#allocation2 + $0x64] sm:$0xf] %v6111_v15  ;;  %7481 = vmatpush.bf16.msrb.mxu3 %v10612_v39 }
 0x381   :  { %6285 = vst [vmem:[#allocation2 + $0x30] sm:$0xf] %v6111_v15  ;;  %vm5886_vm15 = vcmp.ge.f32.partialorder %v5856_v45, 0.0  ;;  %v5902_v9 = vmul.f32 0.15, %v5856_v45 }
 0x382   :  { %v5762_v43 = vpop.f32.mrf.mxu2  ;;  %7675 = vst [vmem:[#allocation2 + $0xb0] sm:$0xf] %v10893_v35 }
 0x383   :  { %v5918_v56 = vsel %vm5886_vm15, %v5856_v45, %v5902_v9  ;;  %v5808_v54 = vpop.f32.mrf.mxu3  ;;  %v5763_v59 = vadd.f32 %v5762_v43, %v5714_v38  ;;  %v9730_v45 = vld [vmem:[#allocation2 + $0x134] sm:$0xf0] }
 0x384   :  { %v6142_v41 = vpack.c.bf16 %v5918_v56, %v5918_v56  ;;  %v5809_v13 = vadd.f32 %v5808_v54, %v5760_v2  ;;  %v10595_v2 = vld [vmem:[#allocation6 + $0x648] sm:$0xff]  ;;  %v9733_v43 = vor.u32 %v10653_v58, %v9730_v45  ;;  %v11958_v54 = vpop.f32.mrf.mxu1  ;;  %7482 = vmatpush.bf16.msrb.mxu3 %v10611_v60 }
 0x385   :  { %v10643_v12 = vld [vmem:[#allocation2 + $0xc8] sm:$0xf0]  ;;  %7384 = vmatpush.bf16.msra.mxu1 %v10595_v2 }
 0x386   :  { %6158 = vst [vmem:[#allocation2 + $0xb4] sm:$0xf] %v6142_v41  ;;  %v5857_v31 = vpop.f32.mrf.mxu0  ;;  %v9681_v62 = vor.u32 %v10643_v12, %v9680_v24  ;;  %v9654_v47 = vld [vmem:[#allocation2 + $0x94] sm:$0xf0]  ;;  %v10650_v24 = vld [vmem:[#allocation2 + $0x100] sm:$0xf0]  ;;  %v5719_v12 = vadd.f32 %v11931_v23, %v11849_v10 }
 0x387   :  { %6200 = vst [vmem:[#allocation2 + $0x80] sm:$0xf] %v6142_v41  ;;  %v5858_v63 = vadd.f32 %v5857_v31, %v5809_v13  ;;  %v9657_v0 = vor.u32 %v10633_v22, %v9654_v47  ;;  %v9709_v51 = vor.u32 %v10650_v24, %v9708_v40  ;;  %v10594_v31 = vld [vmem:[#allocation6 + $0x640] sm:$0xff] }
 0x388   :  { %6286 = vst [vmem:[#allocation2 + $0x4c] sm:$0xf] %v6142_v41  ;;  %7215 = vmatmul.bf16.gmra.mxu1 %v9729_v49  ;;  %v11960_v49 = vld [vmem:[#allocation8 + $0x2] ss:$0 sm:$0xff] }
 0x389   :  { %6360 = vst [vmem:[#allocation2 + $0x18] sm:$0xf] %v6142_v41  ;;  %vm5887_vm1 = vcmp.ge.f32.partialorder %v5858_v63, 0.0  ;;  %v5903_v11 = vmul.f32 0.15, %v5858_v63  ;;  %7259 = vmatmul.bf16.gmra.mxu2 %v9705_v55  ;;  %v5574_v55 = vadd.f32 %v11960_v49, %v11842_v19  ;;  %7385 = vmatpush.bf16.msra.mxu1 %v10594_v31  ;;  %v10610_v31 = vld [vmem:[#allocation6 + $0x6c0] sm:$0xff] }
 0x38a   :  { %7303 = vmatmul.bf16.gmra.mxu3 %v9681_v62  ;;  %7676 = vst [vmem:[#allocation2 + $0xcc] sm:$0xf] %v10893_v35  ;;  %v5764_v37 = vpop.f32.mrf.mxu2 }
 0x38b   :  { %v5919_v27 = vsel %vm5887_vm1, %v5858_v63, %v5903_v11  ;;  %7347 = vmatmul.bf16.gmra.mxu0 %v9657_v0  ;;  %v5811_v8 = vpop.f32.mrf.mxu3  ;;  %v5765_v15 = vadd.f32 %v5764_v37, %v5716_v5  ;;  %v5623_v22 = vadd.f32 %v11858_v53, %v5574_v55  ;;  %7483 = vmatpush.bf16.msrb.mxu3 %v10610_v31 }
 0x38c   :  { %v6143_v20 = vpack.c.bf16 %v5919_v27, %v5919_v27  ;;  %v5812_v1 = vadd.f32 %v5811_v8, %v5763_v59  ;;  %v11969_v27 = vpop.f32.mrf.mxu1  ;;  %v10603_v8 = vld [vmem:[#allocation6 + $0x688] sm:$0xff] }
 0x38d   :  { %v10640_v56 = vld [vmem:[#allocation2 + $0xb4] sm:$0xf]  ;;  %v5672_v10 = vadd.f32 %v11860_v26, %v5623_v22  ;;  %7433 = vmatpush.bf16.msra.mxu2 %v10603_v8 }
 0x38e   :  { %6159 = vst [vmem:[#allocation2 + $0xd0] sm:$0xf] %v6143_v20  ;;  %v5860_v34 = vpop.f32.mrf.mxu0 }
 0x38f   :  { %6201 = vst [vmem:[#allocation2 + $0x9c] sm:$0xf] %v6143_v20  ;;  %v5861_v17 = vadd.f32 %v5860_v34, %v5812_v1  ;;  %v5721_v37 = vadd.f32 %v11940_v44, %v5672_v10  ;;  %v9604_v10 = vld [vmem:[#allocation2 + $0x10] sm:$0xf] }
 0x390   :  { %6287 = vst [vmem:[#allocation2 + $0x68] sm:$0xf] %v6143_v20 }
 0x391   :  { %6361 = vst [vmem:[#allocation2 + $0x34] sm:$0xf] %v6143_v20  ;;  %vm5888_vm7 = vcmp.ge.f32.partialorder %v5861_v17, 0.0  ;;  %v5904_v36 = vmul.f32 0.15, %v5861_v17 }
 0x392   :  { %v5767_v61 = vpop.f32.mrf.mxu2 }
 0x393   :  { %v5920_v30 = vsel %vm5888_vm7, %v5861_v17, %v5904_v36  ;;  %v5813_v14 = vpop.f32.mrf.mxu3  ;;  %v5768_v47 = vadd.f32 %v5767_v61, %v5719_v12 }
 0x394   :  { %v5986_v9 = vpack.c.bf16 %v5920_v30, %v5920_v30  ;;  %v5814_v7 = vadd.f32 %v5813_v14, %v5765_v15  ;;  %v5579_v30 = vadd.f32 %v11960_v49, %v11869_v33  ;;  %v5724_v14 = vadd.f32 %v11946_v4, %v11872_v50  ;;  %v11975_v2 = vpop.f32.mrf.mxu1 }
 0x395   :  { %v9682_v28 = vld [vmem:[#allocation2 + $0xcc] sm:$0xf0] }
 0x396   :  { %6002 = vst [vmem:[#allocation2 + $0x188] sm:$0xf] %v5986_v9  ;;  %v5862_v16 = vpop.f32.mrf.mxu0  ;;  %v9685_v13 = vor.u32 %v10640_v56, %v9682_v28 }
 0x397   :  { %6088 = vst [vmem:[#allocation2 + $0x154] sm:$0xf] %v5986_v9  ;;  %v5863_v41 = vadd.f32 %v5862_v16, %v5814_v7 }
 0x398   :  { %6130 = vst [vmem:[#allocation2 + $0x120] sm:$0xf] %v5986_v9  ;;  %7220 = vmatmul.bf16.gmra.mxu1 %v9757_v48 }
 0x399   :  { %6160 = vst [vmem:[#allocation2 + $0xec] sm:$0xf] %v5986_v9  ;;  %vm5889_vm14 = vcmp.ge.f32.partialorder %v5863_v41, 0.0  ;;  %v5905_v62 = vmul.f32 0.15, %v5863_v41  ;;  %7264 = vmatmul.bf16.gmra.mxu2 %v9733_v43  ;;  %v10602_v9 = vld [vmem:[#allocation6 + $0x680] sm:$0xff]  ;;  %v5628_v43 = vadd.f32 %v11882_v57, %v5579_v30 }
 0x39a   :  { %7308 = vmatmul.bf16.gmra.mxu3 %v9709_v51  ;;  %v5769_v63 = vpop.f32.mrf.mxu2  ;;  %7434 = vmatpush.bf16.msra.mxu2 %v10602_v9 }
 0x39b   :  { %v5921_v0 = vsel %vm5889_vm14, %v5863_v41, %v5905_v62  ;;  %7352 = vmatmul.bf16.gmra.mxu0 %v9685_v13  ;;  %v5816_v38 = vpop.f32.mrf.mxu3  ;;  %v5770_v20 = vadd.f32 %v5769_v63, %v5721_v37  ;;  %v5677_v56 = vadd.f32 %v11884_v29, %v5628_v43 }
 0x39c   :  { %v5987_v19 = vpack.c.bf16 %v5921_v0, %v5921_v0  ;;  %v5817_v11 = vadd.f32 %v5816_v38, %v5768_v47  ;;  %v10623_v0 = vld [vmem:[#allocation2 + $0x28] sm:$0xf0]  ;;  %v11981_v29 = vpop.f32.mrf.mxu1 }
 0x39d   :  { %v9784_v5 = vld [vmem:[#allocation2 + $0x188] sm:$0xf]  ;;  %v5726_v55 = vadd.f32 %v11953_v18, %v5677_v56 }
 0x39e   :  { %6003 = vst [vmem:[#allocation2 + $0x1a4] sm:$0xf] %v5987_v19  ;;  %v5865_v23 = vpop.f32.mrf.mxu0  ;;  %v10660_v46 = vld [vmem:[#allocation2 + $0x154] sm:$0xf] }
 0x39f   :  { %6089 = vst [vmem:[#allocation2 + $0x170] sm:$0xf] %v5987_v19  ;;  %v5866_v59 = vadd.f32 %v5865_v23, %v5817_v11  ;;  %v9736_v15 = vld [vmem:[#allocation2 + $0x120] sm:$0xf] }
 0x3a0   :  { %6131 = vst [vmem:[#allocation2 + $0x13c] sm:$0xf] %v5987_v19  ;;  %v10647_v39 = vld [vmem:[#allocation2 + $0xec] sm:$0xf] }
 0x3a1   :  { %6161 = vst [vmem:[#allocation2 + $0x108] sm:$0xf] %v5987_v19  ;;  %vm5890_vm2 = vcmp.ge.f32.partialorder %v5866_v59, 0.0  ;;  %v5906_v53 = vmul.f32 0.15, %v5866_v59 }
 0x3a2   :  { %v5772_v1 = vpop.f32.mrf.mxu2 }
 0x3a3   :  { %v5922_v34 = vsel %vm5890_vm2, %v5866_v59, %v5906_v53  ;;  %v5818_v17 = vpop.f32.mrf.mxu3  ;;  %v5773_v28 = vadd.f32 %v5772_v1, %v5724_v14  ;;  %v9605_v53 = vor.u32 %v10623_v0, %v9604_v10  ;;  %v9660_v10 = vld [vmem:[#allocation2 + $0x80] sm:$0xf] }
 0x3a4   :  { %v6074_v26 = vpack.c.bf16 %v5922_v34, %v5922_v34  ;;  %v5819_v6 = vadd.f32 %v5818_v17, %v5770_v20  ;;  %v5584_v34 = vadd.f32 %v11960_v49, %v11887_v25  ;;  %v5729_v17 = vadd.f32 %v11958_v54, %v11892_v52 }
 0x3a5   :  { %v10670_v21 = vld [vmem:[#allocation2 + $0x1a0] sm:$0xf0] }
 0x3a6   :  { %6090 = vst [vmem:[#allocation2 + $0x18c] sm:$0xf] %v6074_v26  ;;  %v5867_v44 = vpop.f32.mrf.mxu0  ;;  %v9785_v36 = vor.u32 %v10670_v21, %v9784_v5  ;;  %v9758_v3 = vld [vmem:[#allocation2 + $0x16c] sm:$0xf0]  ;;  %v5633_v5 = vadd.f32 %v11894_v32, %v5584_v34 }
 0x3a7   :  { %6132 = vst [vmem:[#allocation2 + $0x158] sm:$0xf] %v6074_v26  ;;  %v5868_v61 = vadd.f32 %v5867_v44, %v5819_v6  ;;  %v9761_v58 = vor.u32 %v10660_v46, %v9758_v3  ;;  %v10657_v45 = vld [vmem:[#allocation2 + $0x138] sm:$0xf0]  ;;  %v11989_v44 = vld [vmem:[#allocation8 + $0x3] ss:$0 sm:$0xff] }
 0x3a8   :  { %6162 = vst [vmem:[#allocation2 + $0x124] sm:$0xf] %v6074_v26  ;;  %7225 = vmatmul.bf16.gmra.mxu1 %v9785_v36  ;;  %v9737_v40 = vor.u32 %v10657_v45, %v9736_v15  ;;  %v9710_v24 = vld [vmem:[#allocation2 + $0x104] sm:$0xf0]  ;;  %v7196_v36 = vpop.f32.mrf.mxu1  ;;  %v5682_v3 = vadd.f32 %v11896_v42, %v5633_v5  ;;  %v7192_v32 = vadd.f32 %v11989_v44, %v11975_v2  ;;  %v9606_v2 = vld [vmem:[#allocation2 + $0x2c] sm:$0xf0] }
 0x3a9   :  { %6204 = vst [vmem:[#allocation2 + $0xf0] sm:$0xf] %v6074_v26  ;;  %vm5891_vm3 = vcmp.ge.f32.partialorder %v5868_v61, 0.0  ;;  %v5907_v7 = vmul.f32 0.15, %v5868_v61  ;;  %7269 = vmatmul.bf16.gmra.mxu2 %v9761_v58  ;;  %v9713_v48 = vor.u32 %v10647_v39, %v9710_v24 }
 0x3aa   :  { %7313 = vmatmul.bf16.gmra.mxu3 %v9737_v40  ;;  %v5774_v33 = vpop.f32.mrf.mxu2  ;;  %v5731_v58 = vadd.f32 %v11969_v27, %v5682_v3  ;;  %v10630_v24 = vld [vmem:[#allocation2 + $0x60] sm:$0xf0] }
 0x3ab   :  { %v5923_v16 = vsel %vm5891_vm3, %v5868_v61, %v5907_v7  ;;  %7357 = vmatmul.bf16.gmra.mxu0 %v9713_v48  ;;  %v5821_v50 = vpop.f32.mrf.mxu3  ;;  %v5775_v62 = vadd.f32 %v5774_v33, %v5726_v55  ;;  %v10620_v33 = vld [vmem:[#allocation2 + $0x14] sm:$0xf]  ;;  %v10634_v5 = vld [vmem:[#allocation2 + $0x84] sm:$0xf] }
 0x3ac   :  { %v6075_v4 = vpack.c.bf16 %v5923_v16, %v5923_v16  ;;  %v5822_v51 = vadd.f32 %v5821_v50, %v5773_v28  ;;  %v9632_v28 = vld [vmem:[#allocation2 + $0x48] sm:$0xf] }
 0x3ad   :  { %v10667_v11 = vld [vmem:[#allocation2 + $0x18c] sm:$0xf] }
 0x3ae   :  { %6091 = vst [vmem:[#allocation2 + $0x1a8] sm:$0xf] %v6075_v4  ;;  %v5870_v41 = vpop.f32.mrf.mxu0  ;;  %v9764_v12 = vld [vmem:[#allocation2 + $0x158] sm:$0xf] }
 0x3af   :  { %6133 = vst [vmem:[#allocation2 + $0x174] sm:$0xf] %v6075_v4  ;;  %v5871_v13 = vadd.f32 %v5870_v41, %v5822_v51  ;;  %v10654_v1 = vld [vmem:[#allocation2 + $0x124] sm:$0xf]  ;;  %v9633_v51 = vor.u32 %v10630_v24, %v9632_v28  ;;  %v9668_v24 = vld [vmem:[#allocation2 + $0x88] sm:$0xf] }
 0x3b0   :  { %6163 = vst [vmem:[#allocation2 + $0x140] sm:$0xf] %v6075_v4  ;;  %v7198_v55 = vpop.f32.mrf.mxu1  ;;  %v9716_v28 = vld [vmem:[#allocation2 + $0xf0] sm:$0xf] }
 0x3b1   :  { %6205 = vst [vmem:[#allocation2 + $0x10c] sm:$0xf] %v6075_v4  ;;  %vm5892_vm4 = vcmp.ge.f32.partialorder %v5871_v13, 0.0  ;;  %v5908_v57 = vmul.f32 0.15, %v5871_v13 }
 0x3b2   :  { %v5777_v22 = vpop.f32.mrf.mxu2  ;;  %7681 = vst [vmem:[#allocation2 + $0x158] sm:$0xf] %v10893_v35 }
 0x3b3   :  { %v5924_v47 = vsel %vm5892_vm4, %v5871_v13, %v5908_v57  ;;  %v5823_v63 = vpop.f32.mrf.mxu3  ;;  %v5778_v21 = vadd.f32 %v5777_v22, %v5729_v17  ;;  %v9609_v13 = vor.u32 %v10620_v33, %v9606_v2  ;;  %v9688_v17 = vld [vmem:[#allocation2 + $0xb8] sm:$0xf] }
 0x3b4   :  { %v6118_v38 = vpack.c.bf16 %v5924_v47, %v5924_v47  ;;  %v5824_v19 = vadd.f32 %v5823_v63, %v5775_v62  ;;  %v7197_v63 = vadd.f32 %v11989_v44, %v7196_v36 }
 0x3b5   :  { %v9786_v18 = vld [vmem:[#allocation2 + $0x1a4] sm:$0xf0] }
 0x3b6   :  { %6134 = vst [vmem:[#allocation2 + $0x190] sm:$0xf] %v6118_v38  ;;  %v5872_v23 = vpop.f32.mrf.mxu0  ;;  %v9789_v59 = vor.u32 %v10667_v11, %v9786_v18  ;;  %v10664_v37 = vld [vmem:[#allocation2 + $0x170] sm:$0xf0]  ;;  %v9634_v18 = vld [vmem:[#allocation2 + $0x64] sm:$0xf0] }
 0x3b7   :  { %6164 = vst [vmem:[#allocation2 + $0x15c] sm:$0xf] %v6118_v38  ;;  %v5873_v8 = vadd.f32 %v5872_v23, %v5824_v19  ;;  %v9765_v20 = vor.u32 %v10664_v37, %v9764_v12  ;;  %v9738_v60 = vld [vmem:[#allocation2 + $0x13c] sm:$0xf0]  ;;  %v10637_v19 = vld [vmem:[#allocation2 + $0x98] sm:$0xf0] }
 0x3b8   :  { %6206 = vst [vmem:[#allocation2 + $0x128] sm:$0xf] %v6118_v38  ;;  %v9741_v26 = vor.u32 %v10654_v1, %v9738_v60  ;;  %7386 = vmatmul.bf16.vlgmr.msra.gmra.mxu1 %v9605_v53  ;;  %v7201_v0 = vpop.f32.mrf.mxu1  ;;  %v10624_v23 = vld [vmem:[#allocation2 + $0x30] sm:$0xf0]  ;;  %v9661_v37 = vor.u32 %v10637_v19, %v9660_v10  ;;  %v10627_v53 = vld [vmem:[#allocation2 + $0x4c] sm:$0xf] }
 0x3b9   :  { %6292 = vst [vmem:[#allocation2 + $0xf4] sm:$0xf] %v6118_v38  ;;  %vm5893_vm5 = vcmp.ge.f32.partialorder %v5873_v8, 0.0  ;;  %v5909_v6 = vmul.f32 0.15, %v5873_v8  ;;  %7274 = vmatmul.bf16.gmra.mxu2 %v9789_v59 }
 0x3ba   :  { %7318 = vmatmul.bf16.gmra.mxu3 %v9765_v20  ;;  %7682 = vst [vmem:[#allocation2 + $0x174] sm:$0xf] %v10893_v35  ;;  %v5779_v46 = vpop.f32.mrf.mxu2  ;;  %v9637_v20 = vor.u32 %v10627_v53, %v9634_v18  ;;  %v9612_v1 = vld [vmem:[#allocation2 + $0x18] sm:$0xf]  ;;  %v10645_v19 = vld [vmem:[#allocation2 + $0xd8] sm:$0xf0] }
 0x3bb   :  { %v5925_v25 = vsel %vm5893_vm5, %v5873_v8, %v5909_v6  ;;  %7362 = vmatmul.bf16.gmra.mxu0 %v9741_v26  ;;  %v5826_v49 = vpop.f32.mrf.mxu3  ;;  %v5780_v30 = vadd.f32 %v5779_v46, %v5731_v58  ;;  %v9613_v60 = vor.u32 %v10624_v23, %v9612_v1  ;;  %v10644_v26 = vld [vmem:[#allocation2 + $0xd0] sm:$0xf0]  ;;  %v9640_v46 = vld [vmem:[#allocation2 + $0x50] sm:$0xf] }
 0x3bc   :  { %v6119_v52 = vpack.c.bf16 %v5925_v25, %v5925_v25  ;;  %v5827_v54 = vadd.f32 %v5826_v49, %v5778_v21  ;;  %v9662_v21 = vld [vmem:[#allocation2 + $0x9c] sm:$0xf0]  ;;  %v10631_v25 = vld [vmem:[#allocation2 + $0x68] sm:$0xf0]  ;;  %v9689_v49 = vor.u32 %v10644_v26, %v9688_v17  ;;  %v10696_v17 = vld [vmem:[#allocation6 + $0x830] sm:$0xff] }
 0x3bd   :  { %v9792_v45 = vld [vmem:[#allocation2 + $0x190] sm:$0xf]  ;;  %v9665_v36 = vor.u32 %v10634_v5, %v9662_v21  ;;  %v9641_v3 = vor.u32 %v10631_v25, %v9640_v46 }
 0x3be   :  { %6135 = vst [vmem:[#allocation2 + $0x1ac] sm:$0xf] %v6119_v52  ;;  %v5875_v15 = vpop.f32.mrf.mxu0  ;;  %v10661_v50 = vld [vmem:[#allocation2 + $0x15c] sm:$0xf]  ;;  %v10680_v26 = vld [vmem:[#allocation6 + $0x7b0] sm:$0xff] }
 0x3bf   :  { %6165 = vst [vmem:[#allocation2 + $0x178] sm:$0xf] %v6119_v52  ;;  %v5876_v61 = vadd.f32 %v5875_v15, %v5827_v54  ;;  %v7202_v15 = vadd.f32 %v11989_v44, %v7201_v0 }
 0x3c0   :  { %6207 = vst [vmem:[#allocation2 + $0x144] sm:$0xf] %v6119_v52  ;;  %v7203_v34 = vpop.f32.mrf.mxu1 }
 0x3c1   :  { %6293 = vst [vmem:[#allocation2 + $0x110] sm:$0xf] %v6119_v52  ;;  %vm5894_vm6 = vcmp.ge.f32.partialorder %v5876_v61, 0.0  ;;  %v5910_v39 = vmul.f32 0.15, %v5876_v61 }
 0x3c2   :  { %7683 = vst [vmem:[#allocation2 + $0x190] sm:$0xf] %v10893_v35  ;;  %v7240_v14 = vpop.f32.mrf.mxu2 }
 0x3c3   :  { %v5926_v40 = vsel %vm5894_vm6, %v5876_v61, %v5910_v39  ;;  %v5828_v42 = vpop.f32.mrf.mxu3  ;;  %v7241_v9 = vadd.f32 %v7240_v14, %v7192_v32  ;;  %v10641_v14 = vld [vmem:[#allocation2 + $0xbc] sm:$0xf] }
 0x3c4   :  { %v6150_v7 = vpack.c.bf16 %v5926_v40, %v5926_v40  ;;  %v5829_v48 = vadd.f32 %v5828_v42, %v5780_v30  ;;  %v7199_v30 = vadd.f32 %v11989_v44, %v7198_v55  ;;  %v9690_v40 = vld [vmem:[#allocation2 + $0xd4] sm:$0xf0]  ;;  %v10651_v42 = vld [vmem:[#allocation2 + $0x108] sm:$0xf0] }
 0x3c5   :  { %v10671_v43 = vld [vmem:[#allocation2 + $0x1a8] sm:$0xf0]  ;;  %v9693_v33 = vor.u32 %v10641_v14, %v9690_v40 }
 0x3c6   :  { %6166 = vst [vmem:[#allocation2 + $0x194] sm:$0xf] %v6150_v7  ;;  %v5877_v27 = vpop.f32.mrf.mxu0  ;;  %v9793_v16 = vor.u32 %v10671_v43, %v9792_v45  ;;  %v9766_v4 = vld [vmem:[#allocation2 + $0x174] sm:$0xf0] }
 0x3c7   :  { %6208 = vst [vmem:[#allocation2 + $0x160] sm:$0xf] %v6150_v7  ;;  %v5878_v56 = vadd.f32 %v5877_v27, %v5829_v48  ;;  %v9769_v41 = vor.u32 %v10661_v50, %v9766_v4  ;;  %v10697_v4 = vld [vmem:[#allocation6 + $0x838] sm:$0xff]  ;;  %v10658_v0 = vld [vmem:[#allocation2 + $0x140] sm:$0xf0] }
 0x3c8   :  { %6294 = vst [vmem:[#allocation2 + $0x12c] sm:$0xf] %v6150_v7  ;;  %7391 = vmatmul.bf16.gmra.mxu1 %v9633_v51  ;;  %v10681_v51 = vld [vmem:[#allocation6 + $0x7b8] sm:$0xff]  ;;  %8141 = vmatpush.bf16.msrb.mxu2 %v10697_v4 }
 0x3c9   :  { %6368 = vst [vmem:[#allocation2 + $0xf8] sm:$0xf] %v6150_v7  ;;  %vm5895_vm8 = vcmp.ge.f32.partialorder %v5878_v56, 0.0  ;;  %v5911_v12 = vmul.f32 0.15, %v5878_v56  ;;  %7435 = vmatmul.bf16.vlgmr.msra.gmra.mxu2 %v9609_v13  ;;  %8043 = vmatpush.bf16.msrb.mxu0 %v10681_v51 }
 0x3ca   :  { %7323 = vmatmul.bf16.gmra.mxu3 %v9793_v16  ;;  %7684 = vst [vmem:[#allocation2 + $0x1ac] sm:$0xf] %v10893_v35  ;;  %v11997_v57 = vpop.f32.mrf.mxu2  ;;  %v9717_v16 = vor.u32 %v10651_v42, %v9716_v28  ;;  %v9800_v4 = vld [vmem:[#allocation2 + $0x198] sm:$0xf]  ;;  %v10672_v51 = vld [vmem:[#allocation2 + $0x1b0] sm:$0xf0] }
 0x3cb   :  { %v5927_v31 = vsel %vm5895_vm8, %v5878_v56, %v5911_v12  ;;  %7367 = vmatmul.bf16.gmra.mxu0 %v9769_v41  ;;  %v7289_v62 = vpop.f32.mrf.mxu3  ;;  %v10689_v56 = vld [vmem:[#allocation6 + $0x7f8] sm:$0xff] }
 0x3cc   :  { %v6151_v22 = vpack.c.bf16 %v5927_v31, %v5927_v31  ;;  %v11999_v47 = vadd.f32 %v7289_v62, %v7241_v9  ;;  %v10638_v9 = vld [vmem:[#allocation2 + $0xa0] sm:$0xf0]  ;;  %8092 = vmatpush.bf16.msrb.mxu1 %v10689_v56  ;;  %8142 = vmatpush.bf16.msrb.mxu2 %v10696_v17  ;;  %v10669_v17 = vld [vmem:[#allocation2 + $0x19c] sm:$0xf] }
 0x3cd   :  { %v10668_v59 = vld [vmem:[#allocation2 + $0x194] sm:$0xf]  ;;  %v9669_v50 = vor.u32 %v10638_v9, %v9668_v24  ;;  %8044 = vmatpush.bf16.msrb.mxu0 %v10680_v26  ;;  %v10678_v56 = vld [vmem:[#allocation6 + $0x7a0] sm:$0xff]  ;;  %v9802_v26 = vld [vmem:[#allocation2 + $0x1b4] sm:$0xf0] }
 0x3ce   :  { %6167 = vst [vmem:[#allocation2 + $0x1b0] sm:$0xf] %v6151_v22 }
 0x3cf   :  { %6209 = vst [vmem:[#allocation2 + $0x17c] sm:$0xf] %v6151_v22  ;;  %v10655_v14 = vld [vmem:[#allocation2 + $0x12c] sm:$0xf] }
 0x3d0   :  { %6295 = vst [vmem:[#allocation2 + $0x148] sm:$0xf] %v6151_v22  ;;  %v9724_v42 = vld [vmem:[#allocation2 + $0xf8] sm:$0xf] }
 0x3d1   :  { %6369 = vst [vmem:[#allocation2 + $0x114] sm:$0xf] %v6151_v22  ;;  %v7204_v22 = vadd.f32 %v11989_v44, %v7203_v34 }
 0x3d2   :  { %v7245_v38 = vpop.f32.mrf.mxu2 }
 0x3d3   :  { %v7246_v11 = vadd.f32 %v7245_v38, %v7197_v63  ;;  %v12002_v52 = vpop.f32.mrf.mxu3  ;;  %v9696_v38 = vld [vmem:[#allocation2 + $0xc0] sm:$0xf] }
 0x3d4   :  { %v9697_v1 = vor.u32 %v10645_v19, %v9696_v38 }
 0x3d5   :  { %v9794_v35 = vld [vmem:[#allocation2 + $0x1ac] sm:$0xf0] }
 0x3d6   :  { %v9797_v8 = vor.u32 %v10668_v59, %v9794_v35  ;;  %v9718_v35 = vld [vmem:[#allocation2 + $0x10c] sm:$0xf0] }
 0x3d8   :  { %7396 = vmatmul.bf16.gmra.mxu1 %v9661_v37  ;;  %v9744_v37 = vld [vmem:[#allocation2 + $0x128] sm:$0xf] }
 0x3d9   :  { %7440 = vmatmul.bf16.gmra.mxu2 %v9637_v20  ;;  %v10648_v20 = vld [vmem:[#allocation2 + $0xf4] sm:$0xf] }
 0x3da   :  { %7484 = vmatmul.bf16.vlgmr.msrb.gmra.mxu3 %v9613_v60  ;;  %v7247_v6 = vpop.f32.mrf.mxu2  ;;  %v9721_v60 = vor.u32 %v10648_v20, %v9718_v35  ;;  %v10694_v35 = vld [vmem:[#allocation6 + $0x820] sm:$0xff] }
 0x3db   :  { %7372 = vmatmul.bf16.gmra.mxu0 %v9797_v8  ;;  %v7248_v7 = vadd.f32 %v7247_v6, %v7199_v30  ;;  %v9745_v8 = vor.u32 %v10658_v0, %v9744_v37  ;;  %v10688_v6 = vld [vmem:[#allocation6 + $0x7f0] sm:$0xff] }
 0x3dc   :  { %8093 = vmatpush.bf16.msrb.mxu1 %v10688_v6  ;;  %v9780_v6 = vld [vmem:[#allocation2 + $0x168] sm:$0xf] }
 0x3e5   :  { %v7206_v54 = vpop.f32.mrf.mxu1 }
 0x3e6   :  { %v7207_v41 = vadd.f32 %v11989_v44, %v7206_v54  ;;  %v10665_v54 = vld [vmem:[#allocation2 + $0x178] sm:$0xf0] }
 0x3e8   :  { %7401 = vmatmul.bf16.gmra.mxu1 %v9689_v49 }
 0x3e9   :  { %7445 = vmatmul.bf16.gmra.mxu2 %v9665_v36 }
 0x3ea   :  { %7489 = vmatmul.bf16.gmra.mxu3 %v9641_v3  ;;  %v9746_v3 = vld [vmem:[#allocation2 + $0x144] sm:$0xf0] }
 0x3eb   :  { %v9749_v40 = vor.u32 %v10655_v14, %v9746_v3  ;;  %v9805_v3 = vor.u32 %v10669_v17, %v9802_v26 }
 0x3ec   :  { %v7250_v32 = vpop.f32.mrf.mxu2 }
 0x3ed   :  { %v7251_v61 = vadd.f32 %v7250_v32, %v7202_v15  ;;  %v7294_v58 = vpop.f32.mrf.mxu3  ;;  %v7208_v45 = vpop.f32.mrf.mxu1 }
 0x3ee   :  { %v12005_v39 = vadd.f32 %v7294_v58, %v7246_v11  ;;  %v7209_v63 = vadd.f32 %v11989_v44, %v7208_v45  ;;  %v10652_v58 = vld [vmem:[#allocation2 + $0x110] sm:$0xf0] }
 0x3ef   :  { %v9725_v24 = vor.u32 %v10652_v58, %v9724_v42  ;;  %v10699_v58 = vld [vmem:[#allocation2 + $0x18] sm:$0xf0] }
 0x3f0   :  { %v10685_v42 = vld [vmem:[#allocation6 + $0x7d8] sm:$0xff] }
 0x3f4   :  { %v7252_v48 = vpop.f32.mrf.mxu2 }
 0x3f5   :  { %v7296_v2 = vpop.f32.mrf.mxu3  ;;  %v7211_v43 = vpop.f32.mrf.mxu1  ;;  %v7253_v11 = vadd.f32 %v7252_v48, %v7204_v22  ;;  %v10679_v48 = vld [vmem:[#allocation6 + $0x7a8] sm:$0xff] }
 0x3f6   :  { %v12008_v27 = vadd.f32 %v7296_v2, %v7248_v7  ;;  %v7212_v34 = vadd.f32 %v11989_v44, %v7211_v43  ;;  %v10695_v7 = vld [vmem:[#allocation6 + $0x828] sm:$0xff]  ;;  %8045 = vmatpush.bf16.msrb.mxu0 %v10679_v48 }
 0x3f7   :  { %8143 = vmatpush.bf16.msrb.mxu2 %v10695_v7  ;;  %v10687_v2 = vld [vmem:[#allocation6 + $0x7e8] sm:$0xff] }
 0x3f8   :  { %7406 = vmatmul.bf16.gmra.mxu1 %v9717_v16 }
 0x3f9   :  { %7450 = vmatmul.bf16.gmra.mxu2 %v9693_v33  ;;  %8094 = vmatpush.bf16.msrb.mxu1 %v10687_v2 }
 0x3fa   :  { %7494 = vmatmul.bf16.gmra.mxu3 %v9669_v50  ;;  %8046 = vmatpush.bf16.msrb.mxu0 %v10678_v56 }
 0x3fb   :  { %8144 = vmatpush.bf16.msrb.mxu2 %v10694_v35 }
 0x3fc   :  { %v7255_v13 = vpop.f32.mrf.mxu2 }
 0x3fd   :  { %v7256_v55 = vadd.f32 %v7255_v13, %v7207_v41  ;;  %v7299_v12 = vpop.f32.mrf.mxu3  ;;  %v12011_v31 = vpop.f32.mrf.mxu1  ;;  %v10662_v41 = vld [vmem:[#allocation2 + $0x164] sm:$0xf]  ;;  %v9774_v13 = vld [vmem:[#allocation2 + $0x17c] sm:$0xf0] }
 0x3fe   :  { %v12013_v62 = vadd.f32 %v7299_v12, %v7251_v61  ;;  %v9772_v61 = vld [vmem:[#allocation2 + $0x160] sm:$0xf]  ;;  %v10659_v12 = vld [vmem:[#allocation2 + $0x148] sm:$0xf0]  ;;  %v9777_v19 = vor.u32 %v10662_v41, %v9774_v13  ;;  %v10048_v13 = vld [vmem:[#allocation2 + $0x38] sm:$0xf] }
 0x3ff   :  { %v9773_v30 = vor.u32 %v10665_v54, %v9772_v61  ;;  %v10036_v61 = vld [vmem:[#allocation2] sm:$0xf] }
 0x404   :  { %v7257_v18 = vpop.f32.mrf.mxu2 }
 0x405   :  { %v7258_v10 = vadd.f32 %v7257_v18, %v7209_v63  ;;  %v7301_v23 = vpop.f32.mrf.mxu3  ;;  %v7216_v59 = vpop.f32.mrf.mxu1  ;;  %v9801_v63 = vor.u32 %v10672_v51, %v9800_v4  ;;  %v10673_v4 = vld [vmem:[#allocation2 + $0x1b8] sm:$0xf0] }
 0x406   :  { %v12017_v53 = vadd.f32 %v7301_v23, %v7253_v11  ;;  %v7217_v9 = vadd.f32 %v11989_v44, %v7216_v59  ;;  %v10686_v23 = vld [vmem:[#allocation6 + $0x7e0] sm:$0xff]  ;;  %v10676_v59 = vld [vmem:[#allocation6 + $0x790] sm:$0xff] }
 0x407   :  { %8095 = vmatpush.bf16.msrb.mxu1 %v10686_v23  ;;  %v10683_v23 = vld [vmem:[#allocation6 + $0x7c8] sm:$0xff] }
 0x408   :  { %7411 = vmatmul.bf16.gmra.mxu1 %v9745_v8 }
 0x409   :  { %7455 = vmatmul.bf16.gmra.mxu2 %v9721_v60 }
 0x40a   :  { %7499 = vmatmul.bf16.gmra.mxu3 %v9697_v1 }
 0x40b   :  { %8096 = vmatpush.bf16.msrb.mxu1 %v10685_v42 }
 0x40c   :  { %v7260_v5 = vpop.f32.mrf.mxu2 }
 0x40d   :  { %v7261_v21 = vadd.f32 %v7260_v5, %v7212_v34  ;;  %v7304_v46 = vpop.f32.mrf.mxu3  ;;  %v12020_v25 = vpop.f32.mrf.mxu1  ;;  %v10675_v34 = vld [vmem:[#allocation6 + $0x788] sm:$0xff]  ;;  %v10666_v5 = vld [vmem:[#allocation2 + $0x180] sm:$0xf0] }
 0x40e   :  { %v12022_v49 = vadd.f32 %v7304_v46, %v7256_v55  ;;  %v9752_v55 = vld [vmem:[#allocation2 + $0x130] sm:$0xf] }
 0x40f   :  { %v9753_v11 = vor.u32 %v10659_v12, %v9752_v55  ;;  %v10702_v55 = vld [vmem:[#allocation2 + $0x50] sm:$0xf0] }
 0x410   :  { %v10049_v12 = vor.u32 %v10702_v55, %v10048_v13 }
 0x414   :  { %v12024_v36 = vpop.f32.mrf.mxu2 }
 0x415   :  { %v7306_v15 = vpop.f32.mrf.mxu3  ;;  %v7221_v32 = vpop.f32.mrf.mxu1 }
 0x416   :  { %v12026_v45 = vadd.f32 %v7306_v15, %v7258_v10  ;;  %v7222_v18 = vadd.f32 %v11989_v44, %v7221_v32  ;;  %v10677_v10 = vld [vmem:[#allocation6 + $0x798] sm:$0xff]  ;;  %v9781_v15 = vor.u32 %v10666_v5, %v9780_v6  ;;  %v7338_v32 = vpop.f32.mrf.mxu0 }
 0x417   :  { %8047 = vmatpush.bf16.msrb.mxu0 %v10677_v10  ;;  %v10692_v10 = vld [vmem:[#allocation6 + $0x810] sm:$0xff]  ;;  %v7339_v26 = vadd.f32 %v7338_v32, %v11999_v47 }
 0x418   :  { %7416 = vmatmul.bf16.gmra.mxu1 %v9773_v30  ;;  %v10037_v30 = vor.u32 %v10699_v58, %v10036_v61 }
 0x419   :  { %7460 = vmatmul.bf16.gmra.mxu2 %v9749_v40  ;;  %v10693_v40 = vld [vmem:[#allocation6 + $0x818] sm:$0xff] }
 0x41a   :  { %7504 = vmatmul.bf16.gmra.mxu3 %v9725_v24  ;;  %8145 = vmatpush.bf16.msrb.mxu2 %v10693_v40 }
 0x41b   :  { %8048 = vmatpush.bf16.msrb.mxu0 %v10676_v59 }
 0x41c   :  { %v7265_v43 = vpop.f32.mrf.mxu2 }
 0x41d   :  { %v7266_v28 = vadd.f32 %v7265_v43, %v7217_v9  ;;  %v7309_v33 = vpop.f32.mrf.mxu3  ;;  %v12029_v16 = vpop.f32.mrf.mxu1 }
 0x41e   :  { %v12031_v50 = vadd.f32 %v7309_v33, %v7261_v21  ;;  %v10674_v21 = vld [vmem:[#allocation6 + $0x780] sm:$0xff]  ;;  %v7340_v43 = vpop.f32.mrf.mxu0  ;;  %8146 = vmatpush.bf16.msrb.mxu2 %v10692_v10 }
 0x41f   :  { %8049 = vmatpush.bf16.msrb.mxu0 %v10675_v34  ;;  %v9808_v33 = vld [vmem:[#allocation2 + $0x1a0] sm:$0xf]  ;;  %v7194_v34 = vadd.f32 %v11989_v44, %v11981_v29 }
 0x420   :  { %v9809_v41 = vor.u32 %v10673_v4, %v9808_v33 }
 0x421   :  { %v7243_v6 = vadd.f32 %v11997_v57, %v7194_v34 }
 0x423   :  { %8050 = vmatpush.bf16.msrb.mxu0 %v10674_v21  ;;  %v7292_v61 = vadd.f32 %v12002_v52, %v7243_v6 }
 0x424   :  { %v12033_v22 = vpop.f32.mrf.mxu2 }
 0x425   :  { %v12035_v0 = vpop.f32.mrf.mxu3  ;;  %v7226_v38 = vpop.f32.mrf.mxu1  ;;  %v7341_v42 = vadd.f32 %v7340_v43, %v7292_v61 }
 0x426   :  { %8051 = vmatmul.bf16.vlgmr.msrb.gmra.mxu0 %v10037_v30  ;;  %v7227_v24 = vadd.f32 %v11989_v44, %v7226_v38  ;;  %v10691_v30 = vld [vmem:[#allocation6 + $0x808] sm:$0xff] }
 0x427   :  { %8147 = vmatpush.bf16.msrb.mxu2 %v10691_v30 }
 0x428   :  { %7421 = vmatmul.bf16.gmra.mxu1 %v9801_v63  ;;  %v7343_v63 = vpop.f32.mrf.mxu0 }
 0x429   :  { %7465 = vmatmul.bf16.gmra.mxu2 %v9777_v19  ;;  %v7344_v33 = vadd.f32 %v7343_v63, %v12005_v39 }
 0x42a   :  { %7509 = vmatmul.bf16.gmra.mxu3 %v9753_v11 }
 0x42c   :  { %v7270_v37 = vpop.f32.mrf.mxu2 }
 0x42d   :  { %v7271_v8 = vadd.f32 %v7270_v37, %v7222_v18  ;;  %v7314_v20 = vpop.f32.mrf.mxu3  ;;  %v12040_v60 = vpop.f32.mrf.mxu1  ;;  %v10684_v18 = vld [vmem:[#allocation6 + $0x7d0] sm:$0xff] }
 0x42e   :  { %v12038_v1 = vadd.f32 %v7314_v20, %v7266_v28  ;;  %8097 = vmatpush.bf16.msrb.mxu1 %v10684_v18  ;;  %v10682_v20 = vld [vmem:[#allocation6 + $0x7c0] sm:$0xff] }
 0x42f   :  { %v10690_v18 = vld [vmem:[#allocation6 + $0x800] sm:$0xff] }
 0x430   :  { %v7345_v37 = vpop.f32.mrf.mxu0  ;;  %8148 = vmatpush.bf16.msrb.mxu2 %v10690_v18 }
 0x431   :  { %v7346_v10 = vadd.f32 %v7345_v37, %v12008_v27 }
 0x432   :  { %8098 = vmatpush.bf16.msrb.mxu1 %v10683_v23 }
 0x434   :  { %v12042_v46 = vpop.f32.mrf.mxu2 }
 0x435   :  { %v12044_v54 = vpop.f32.mrf.mxu3  ;;  %v7387_v14 = vpop.f32.mrf.mxu1 }
 0x436   :  { %8056 = vmatmul.bf16.gmra.mxu0 %v10049_v12  ;;  %8099 = vmatpush.bf16.msrb.mxu1 %v10682_v20  ;;  %v7388_v5 = vadd.f32 %v7387_v14, %v7339_v26 }
 0x438   :  { %v7348_v40 = vpop.f32.mrf.mxu0 }
 0x439   :  { %7470 = vmatmul.bf16.gmra.mxu2 %v9805_v3  ;;  %v7349_v37 = vadd.f32 %v7348_v40, %v12013_v62 }
 0x43a   :  { %7514 = vmatmul.bf16.gmra.mxu3 %v9781_v15 }
 0x43c   :  { %v7275_v9 = vpop.f32.mrf.mxu2 }
 0x43d   :  { %v7276_v7 = vadd.f32 %v7275_v9, %v7227_v24  ;;  %v7319_v48 = vpop.f32.mrf.mxu3  ;;  %v7389_v28 = vpop.f32.mrf.mxu1 }
 0x43e   :  { %v12047_v2 = vadd.f32 %v7319_v48, %v7271_v8  ;;  %v7390_v9 = vadd.f32 %v7389_v28, %v7341_v42 }
 0x440   :  { %v7350_v4 = vpop.f32.mrf.mxu0 }
 0x444   :  { %v12049_v51 = vpop.f32.mrf.mxu2 }
 0x445   :  { %v12051_v56 = vpop.f32.mrf.mxu3  ;;  %v7392_v19 = vpop.f32.mrf.mxu1 }
 0x44a   :  { %7519 = vmatmul.bf16.gmra.mxu3 %v9809_v41  ;;  %v7393_v41 = vadd.f32 %v7392_v19, %v7344_v33 }
 0x44c   :  { %v7436_v38 = vpop.f32.mrf.mxu2 }
 0x44d   :  { %v7324_v11 = vpop.f32.mrf.mxu3  ;;  %v7394_v17 = vpop.f32.mrf.mxu1  ;;  %v7437_v21 = vadd.f32 %v7436_v38, %v7388_v5 }
 0x44e   :  { %v12053_v35 = vadd.f32 %v7324_v11, %v7276_v7  ;;  %v7395_v39 = vadd.f32 %v7394_v17, %v7346_v10 }
 0x454   :  { %v7438_v59 = vpop.f32.mrf.mxu2 }
 0x455   :  { %v12055_v8 = vpop.f32.mrf.mxu3  ;;  %v7397_v29 = vpop.f32.mrf.mxu1  ;;  %v7439_v47 = vadd.f32 %v7438_v59, %v7390_v9 }
 0x456   :  { %v7353_v59 = vpop.f32.mrf.mxu0  ;;  %v7398_v30 = vadd.f32 %v7397_v29, %v7349_v37 }
 0x45c   :  { %v7441_v3 = vpop.f32.mrf.mxu2 }
 0x45d   :  { %v7485_v15 = vpop.f32.mrf.mxu3  ;;  %v7399_v13 = vpop.f32.mrf.mxu1  ;;  %v7442_v12 = vadd.f32 %v7441_v3, %v7393_v41 }
 0x45e   :  { %v7486_v58 = vadd.f32 %v7485_v15, %v7437_v21 }
 0x460   :  { %vm7525_vm10 = vcmp.ge.f32.partialorder %v7486_v58, 0.0  ;;  %v7541_v24 = vmul.f32 0.15, %v7486_v58 }
 0x462   :  { %v7557_v7 = vsel %vm7525_vm10, %v7486_v58, %v7541_v24 }
 0x463   :  { %v7585_v48 = vpack.c.bf16 %v7557_v7, %v7557_v7 }
 0x464   :  { %v7443_v32 = vpop.f32.mrf.mxu2 }
 0x465   :  { %7601 = vst [vmem:[#allocation2 + $0x70] sm:$0xf] %v7585_v48  ;;  %v7487_v57 = vpop.f32.mrf.mxu3  ;;  %v7444_v19 = vadd.f32 %v7443_v32, %v7395_v39  ;;  %v7402_v5 = vpop.f32.mrf.mxu1 }
 0x466   :  { %7629 = vst [vmem:[#allocation2 + $0x4] sm:$0xf] %v7585_v48  ;;  %v7488_v14 = vadd.f32 %v7487_v57, %v7439_v47  ;;  %v7355_v48 = vpop.f32.mrf.mxu0 }
 0x468   :  { %vm7526_vm0 = vcmp.ge.f32.partialorder %v7488_v14, 0.0  ;;  %v7542_v52 = vmul.f32 0.15, %v7488_v14 }
 0x46a   :  { %v7558_v43 = vsel %vm7526_vm0, %v7488_v14, %v7542_v52  ;;  %v7351_v14 = vadd.f32 %v7350_v4, %v12017_v53  ;;  %v7354_v53 = vadd.f32 %v7353_v59, %v12022_v49 }
 0x46b   :  { %v7586_v55 = vpack.c.bf16 %v7558_v43, %v7558_v43 }
 0x46c   :  { %v7446_v38 = vpop.f32.mrf.mxu2  ;;  %v10060_v26 = vld [vmem:[#allocation2 + $0x70] sm:$0xf]  ;;  %v7400_v52 = vadd.f32 %v7399_v13, %v7351_v14  ;;  %v7403_v39 = vadd.f32 %v7402_v5, %v7354_v53 }
 0x46d   :  { %7602 = vst [vmem:[#allocation2 + $0x8c] sm:$0xf] %v7586_v55  ;;  %v7490_v28 = vpop.f32.mrf.mxu3  ;;  %v10698_v15 = vld [vmem:[#allocation2 + $0x4] sm:$0xf]  ;;  %v7447_v9 = vadd.f32 %v7446_v38, %v7398_v30  ;;  %v7404_v57 = vpop.f32.mrf.mxu1 }
 0x46e   :  { %7630 = vst [vmem:[#allocation2 + $0x20] sm:$0xf] %v7586_v55  ;;  %v7491_v11 = vadd.f32 %v7490_v28, %v7442_v12 }
 0x470   :  { %vm7527_vm9 = vcmp.ge.f32.partialorder %v7491_v11, 0.0  ;;  %v7543_v23 = vmul.f32 0.15, %v7491_v11 }
 0x472   :  { %v7559_v63 = vsel %vm7527_vm9, %v7491_v11, %v7543_v23  ;;  %v7358_v23 = vpop.f32.mrf.mxu0 }
 0x473   :  { %v7587_v20 = vpack.c.bf16 %v7559_v63, %v7559_v63  ;;  %v7359_v14 = vadd.f32 %v7358_v23, %v12031_v50  ;;  %v10096_v50 = vld [vmem:[#allocation2 + $0x118] sm:$0xf] }
 0x474   :  { %v7448_v34 = vpop.f32.mrf.mxu2  ;;  %v10705_v6 = vld [vmem:[#allocation2 + $0x88] sm:$0xf0] }
 0x475   :  { %7603 = vst [vmem:[#allocation2 + $0xa8] sm:$0xf] %v7587_v20  ;;  %v7492_v21 = vpop.f32.mrf.mxu3  ;;  %v10061_v3 = vor.u32 %v10705_v6, %v10060_v26  ;;  %v10038_v61 = vld [vmem:[#allocation2 + $0x1c] sm:$0xf0]  ;;  %v7449_v41 = vadd.f32 %v7448_v34, %v7400_v52  ;;  %v7407_v13 = vpop.f32.mrf.mxu1 }
 0x476   :  { %7631 = vst [vmem:[#allocation2 + $0x3c] sm:$0xf] %v7587_v20  ;;  %v7493_v58 = vadd.f32 %v7492_v21, %v7444_v19  ;;  %v10041_v27 = vor.u32 %v10698_v15, %v10038_v61  ;;  %v10084_v21 = vld [vmem:[#allocation2 + $0xe0] sm:$0xf]  ;;  %v10711_v61 = vld [vmem:[#allocation2 + $0xf8] sm:$0xf0]  ;;  %v7408_v52 = vadd.f32 %v7407_v13, %v7359_v14 }
 0x477   :  { %8061 = vmatmul.bf16.gmra.mxu0 %v10061_v3  ;;  %v7356_v3 = vadd.f32 %v7355_v48, %v12026_v45  ;;  %v10085_v5 = vor.u32 %v10711_v61, %v10084_v21 }
 0x478   :  { %vm7528_vm11 = vcmp.ge.f32.partialorder %v7493_v58, 0.0  ;;  %v7544_v17 = vmul.f32 0.15, %v7493_v58  ;;  %8100 = vmatmul.bf16.vlgmr.msrb.gmra.mxu1 %v10041_v27 }
 0x479   :  { %v7405_v59 = vadd.f32 %v7404_v57, %v7356_v3  ;;  %v7214_v57 = vadd.f32 %v11989_v44, %v12011_v31 }
 0x47a   :  { %v7560_v42 = vsel %vm7528_vm11, %v7493_v58, %v7544_v17  ;;  %v7360_v49 = vpop.f32.mrf.mxu0 }
 0x47b   :  { %v7588_v24 = vpack.c.bf16 %v7560_v42, %v7560_v42 }
 0x47c   :  { %v7451_v7 = vpop.f32.mrf.mxu2  ;;  %v10072_v29 = vld [vmem:[#allocation2 + $0xa8] sm:$0xf] }
 0x47d   :  { %7604 = vst [vmem:[#allocation2 + $0xc4] sm:$0xf] %v7588_v24  ;;  %v7495_v47 = vpop.f32.mrf.mxu3  ;;  %v10701_v28 = vld [vmem:[#allocation2 + $0x3c] sm:$0xf]  ;;  %v7452_v19 = vadd.f32 %v7451_v7, %v7403_v39  ;;  %v7409_v27 = vpop.f32.mrf.mxu1 }
 0x47e   :  { %7632 = vst [vmem:[#allocation2 + $0x58] sm:$0xf] %v7588_v24  ;;  %v7496_v32 = vadd.f32 %v7495_v47, %v7447_v9 }
 0x480   :  { %vm7529_vm12 = vcmp.ge.f32.partialorder %v7496_v32, 0.0  ;;  %v7545_v33 = vmul.f32 0.15, %v7496_v32 }
 0x482   :  { %v7561_v62 = vsel %vm7529_vm12, %v7496_v32, %v7545_v33 }
 0x483   :  { %v7617_v40 = vpack.c.bf16 %v7561_v62, %v7561_v62 }
 0x484   :  { %v7453_v43 = vpop.f32.mrf.mxu2  ;;  %v10708_v55 = vld [vmem:[#allocation2 + $0xc0] sm:$0xf0] }
 0x485   :  { %7633 = vst [vmem:[#allocation2 + $0x74] sm:$0xf] %v7617_v40  ;;  %v7497_v12 = vpop.f32.mrf.mxu3  ;;  %v10073_v38 = vor.u32 %v10708_v55, %v10072_v29  ;;  %v10050_v11 = vld [vmem:[#allocation2 + $0x54] sm:$0xf0]  ;;  %v7454_v17 = vadd.f32 %v7453_v43, %v7405_v59  ;;  %v7263_v43 = vadd.f32 %v12024_v36, %v7214_v57  ;;  %v7412_v55 = vpop.f32.mrf.mxu1 }
 0x486   :  { %7669 = vst [vmem:[#allocation2 + $0x8] sm:$0xf] %v7617_v40  ;;  %v7498_v18 = vadd.f32 %v7497_v12, %v7449_v41  ;;  %v10053_v10 = vor.u32 %v10701_v28, %v10050_v11  ;;  %v7363_v40 = vpop.f32.mrf.mxu0 }
 0x487   :  { %8066 = vmatmul.bf16.gmra.mxu0 %v10073_v38  ;;  %v7312_v38 = vadd.f32 %v12035_v0, %v7263_v43  ;;  %v7364_v61 = vadd.f32 %v7363_v40, %v12038_v1 }
 0x488   :  { %vm7530_vm13 = vcmp.ge.f32.partialorder %v7498_v18, 0.0  ;;  %v7546_v4 = vmul.f32 0.15, %v7498_v18  ;;  %8105 = vmatmul.bf16.gmra.mxu1 %v10053_v10  ;;  %v10714_v10 = vld [vmem:[#allocation2 + $0x130] sm:$0xf0] }
 0x489   :  { %v7361_v11 = vadd.f32 %v7360_v49, %v7312_v38  ;;  %v10097_v13 = vor.u32 %v10714_v10, %v10096_v50 }
 0x48a   :  { %v7562_v63 = vsel %vm7530_vm13, %v7498_v18, %v7546_v4 }
 0x48b   :  { %v7618_v20 = vpack.c.bf16 %v7562_v63, %v7562_v63  ;;  %v7410_v23 = vadd.f32 %v7409_v27, %v7361_v11 }
 0x48c   :  { %v7456_v34 = vpop.f32.mrf.mxu2  ;;  %v10704_v30 = vld [vmem:[#allocation2 + $0x74] sm:$0xf] }
 0x48d   :  { %7634 = vst [vmem:[#allocation2 + $0x90] sm:$0xf] %v7618_v20  ;;  %v7500_v26 = vpop.f32.mrf.mxu3  ;;  %v10044_v47 = vld [vmem:[#allocation2 + $0x8] sm:$0xf]  ;;  %v7457_v29 = vadd.f32 %v7456_v34, %v7408_v52  ;;  %v7414_v3 = vpop.f32.mrf.mxu1 }
 0x48e   :  { %7670 = vst [vmem:[#allocation2 + $0x24] sm:$0xf] %v7618_v20  ;;  %v7501_v6 = vadd.f32 %v7500_v26, %v7452_v19  ;;  %v7365_v20 = vpop.f32.mrf.mxu0 }
 0x490   :  { %vm7531_vm15 = vcmp.ge.f32.partialorder %v7501_v6, 0.0  ;;  %v7547_v15 = vmul.f32 0.15, %v7501_v6 }
 0x492   :  { %v7563_v58 = vsel %vm7531_vm15, %v7501_v6, %v7547_v15  ;;  %v7219_v15 = vadd.f32 %v11989_v44, %v12020_v25 }
 0x493   :  { %v7619_v37 = vpack.c.bf16 %v7563_v58, %v7563_v58  ;;  %v7413_v58 = vadd.f32 %v7412_v55, %v7364_v61 }
 0x494   :  { %v10062_v42 = vld [vmem:[#allocation2 + $0x8c] sm:$0xf0]  ;;  %v7458_v24 = vpop.f32.mrf.mxu2 }
 0x495   :  { %7635 = vst [vmem:[#allocation2 + $0xac] sm:$0xf] %v7619_v37  ;;  %v7502_v9 = vpop.f32.mrf.mxu3  ;;  %v10065_v7 = vor.u32 %v10704_v30, %v10062_v42  ;;  %v10700_v32 = vld [vmem:[#allocation2 + $0x20] sm:$0xf0]  ;;  %v7459_v39 = vadd.f32 %v7458_v24, %v7410_v23 }
 0x496   :  { %7671 = vst [vmem:[#allocation2 + $0x40] sm:$0xf] %v7619_v37  ;;  %v7503_v45 = vadd.f32 %v7502_v9, %v7454_v17  ;;  %v10045_v48 = vor.u32 %v10700_v32, %v10044_v47  ;;  %v7368_v25 = vpop.f32.mrf.mxu0  ;;  %v10068_v47 = vld [vmem:[#allocation2 + $0x78] sm:$0xf]  ;;  %v10706_v32 = vld [vmem:[#allocation2 + $0x90] sm:$0xf0] }
 0x497   :  { %8071 = vmatmul.bf16.gmra.mxu0 %v10085_v5  ;;  %v7268_v5 = vadd.f32 %v12033_v22, %v7219_v15  ;;  %v7369_v38 = vadd.f32 %v7368_v25, %v12047_v2 }
 0x498   :  { %vm7532_vm1 = vcmp.ge.f32.partialorder %v7503_v45, 0.0  ;;  %v7548_v33 = vmul.f32 0.15, %v7503_v45  ;;  %8110 = vmatmul.bf16.gmra.mxu1 %v10065_v7  ;;  %8149 = vmatmul.bf16.vlgmr.msrb.gmra.mxu2 %v10045_v48  ;;  %v7417_v7 = vpop.f32.mrf.mxu1 }
 0x499   :  { %v7317_v42 = vadd.f32 %v12044_v54, %v7268_v5  ;;  %v7418_v50 = vadd.f32 %v7417_v7, %v7369_v38 }
 0x49a   :  { %v7564_v62 = vsel %vm7532_vm1, %v7503_v45, %v7548_v33 }
 0x49b   :  { %v7620_v41 = vpack.c.bf16 %v7564_v62, %v7564_v62  ;;  %v7366_v9 = vadd.f32 %v7365_v20, %v7317_v42  ;;  %v10069_v62 = vor.u32 %v10706_v32, %v10068_v47 }
 0x49c   :  { %v7461_v28 = vpop.f32.mrf.mxu2  ;;  %v10707_v36 = vld [vmem:[#allocation2 + $0xac] sm:$0xf] }
 0x49d   :  { %7636 = vst [vmem:[#allocation2 + $0xc8] sm:$0xf] %v7620_v41  ;;  %v7505_v12 = vpop.f32.mrf.mxu3  ;;  %v10056_v0 = vld [vmem:[#allocation2 + $0x40] sm:$0xf]  ;;  %v7462_v17 = vadd.f32 %v7461_v28, %v7413_v58  ;;  %v7415_v45 = vadd.f32 %v7414_v3, %v7366_v9 }
 0x49e   :  { %7672 = vst [vmem:[#allocation2 + $0x5c] sm:$0xf] %v7620_v41  ;;  %v7506_v31 = vadd.f32 %v7505_v12, %v7457_v29  ;;  %v7224_v12 = vadd.f32 %v11989_v44, %v12029_v16  ;;  %v7370_v28 = vpop.f32.mrf.mxu0 }
 0x4a0   :  { %vm7533_vm7 = vcmp.ge.f32.partialorder %v7506_v31, 0.0  ;;  %v7549_v18 = vmul.f32 0.15, %v7506_v31  ;;  %v7273_v23 = vadd.f32 %v12042_v46, %v7224_v12 }
 0x4a2   :  { %v7565_v53 = vsel %vm7533_vm7, %v7506_v31, %v7549_v18  ;;  %v7419_v18 = vpop.f32.mrf.mxu1 }
 0x4a3   :  { %v7593_v4 = vpack.c.bf16 %v7565_v53, %v7565_v53 }
 0x4a4   :  { %v10074_v63 = vld [vmem:[#allocation2 + $0xc4] sm:$0xf0]  ;;  %v7463_v59 = vpop.f32.mrf.mxu2 }
 0x4a5   :  { %7609 = vst [vmem:[#allocation2 + $0x150] sm:$0xf] %v7593_v4  ;;  %v7507_v19 = vpop.f32.mrf.mxu3  ;;  %v10077_v34 = vor.u32 %v10707_v36, %v10074_v63  ;;  %v10703_v26 = vld [vmem:[#allocation2 + $0x58] sm:$0xf0]  ;;  %v7464_v33 = vadd.f32 %v7463_v59, %v7415_v45  ;;  %v10080_v36 = vld [vmem:[#allocation2 + $0xb0] sm:$0xf] }
 0x4a6   :  { %7637 = vst [vmem:[#allocation2 + $0xe4] sm:$0xf] %v7593_v4  ;;  %v7508_v6 = vadd.f32 %v7507_v19, %v7459_v39  ;;  %v10057_v21 = vor.u32 %v10703_v26, %v10056_v0  ;;  %v7322_v39 = vadd.f32 %v12051_v56, %v7273_v23  ;;  %v10709_v63 = vld [vmem:[#allocation2 + $0xc8] sm:$0xf0]  ;;  %v10116_v23 = vld [vmem:[#allocation2 + $0x158] sm:$0xf] }
 0x4a7   :  { %8076 = vmatmul.bf16.gmra.mxu0 %v10097_v13 }
 0x4a8   :  { %vm7534_vm14 = vcmp.ge.f32.partialorder %v7508_v6, 0.0  ;;  %v7550_v49 = vmul.f32 0.15, %v7508_v6  ;;  %8115 = vmatmul.bf16.gmra.mxu1 %v10077_v34  ;;  %8154 = vmatmul.bf16.gmra.mxu2 %v10057_v21  ;;  %v7371_v16 = vadd.f32 %v7370_v28, %v7322_v39  ;;  %v7373_v34 = vpop.f32.mrf.mxu0  ;;  %v10081_v21 = vor.u32 %v10709_v63, %v10080_v36 }
 0x4aa   :  { %v7566_v27 = vsel %vm7534_vm14, %v7508_v6, %v7550_v49  ;;  %v7420_v20 = vadd.f32 %v7419_v18, %v7371_v16  ;;  %v7422_v3 = vpop.f32.mrf.mxu1  ;;  %v10128_v16 = vld [vmem:[#allocation2 + $0x190] sm:$0xf] }
 0x4ab   :  { %v7594_v37 = vpack.c.bf16 %v7566_v27, %v7566_v27 }
 0x4ac   :  { %v7466_v57 = vpop.f32.mrf.mxu2  ;;  %v10108_v22 = vld [vmem:[#allocation2 + $0x150] sm:$0xf] }
 0x4ad   :  { %7610 = vst [vmem:[#allocation2 + $0x16c] sm:$0xf] %v7594_v37  ;;  %v7510_v30 = vpop.f32.mrf.mxu3  ;;  %v10710_v41 = vld [vmem:[#allocation2 + $0xe4] sm:$0xf]  ;;  %v7467_v53 = vadd.f32 %v7466_v57, %v7418_v50 }
 0x4ae   :  { %7638 = vst [vmem:[#allocation2 + $0x100] sm:$0xf] %v7594_v37  ;;  %v7511_v24 = vadd.f32 %v7510_v30, %v7462_v17  ;;  %v7374_v37 = vadd.f32 %v7373_v34, %v12053_v35  ;;  %v10765_v17 = vld [vmem:[#allocation8 + $0x3] ss:$0 sm:$0xff]  ;;  %v12087_v34 = vld [vmem:[#allocation8 + $0x4] ss:$0 sm:$0xff] }
 0x4af   :  { %v7229_v30 = vadd.f32 %v10765_v17, %v12040_v60  ;;  %v10767_v17 = vld [vmem:[#allocation3 + $0x8] sm:$0xff] }
 0x4b0   :  { %vm7535_vm2 = vcmp.ge.f32.partialorder %v7511_v24, 0.0  ;;  %v7551_v1 = vmul.f32 0.15, %v7511_v24  ;;  %v7423_v42 = vadd.f32 %v7422_v3, %v7374_v37  ;;  %v7375_v7 = vpop.f32.mrf.mxu0 }
 0x4b1   :  { %v7278_v9 = vadd.f32 %v12049_v51, %v7229_v30 }
 0x4b2   :  { %v7567_v48 = vsel %vm7535_vm2, %v7511_v24, %v7551_v1  ;;  %v7424_v45 = vpop.f32.mrf.mxu1 }
 0x4b3   :  { %v7595_v14 = vpack.c.bf16 %v7567_v48, %v7567_v48  ;;  %v7327_v32 = vadd.f32 %v12055_v8, %v7278_v9 }
 0x4b4   :  { %v10717_v52 = vld [vmem:[#allocation2 + $0x168] sm:$0xf0]  ;;  %v7468_v4 = vpop.f32.mrf.mxu2 }
 0x4b5   :  { %7611 = vst [vmem:[#allocation2 + $0x188] sm:$0xf] %v7595_v14  ;;  %v7512_v40 = vpop.f32.mrf.mxu3  ;;  %v10109_v54 = vor.u32 %v10717_v52, %v10108_v22  ;;  %v10086_v43 = vld [vmem:[#allocation2 + $0xfc] sm:$0xf0]  ;;  %v7469_v26 = vadd.f32 %v7468_v4, %v7420_v20  ;;  %v7376_v48 = vadd.f32 %v7375_v7, %v7327_v32 }
 0x4b6   :  { %7639 = vst [vmem:[#allocation2 + $0x11c] sm:$0xf] %v7595_v14  ;;  %v7513_v29 = vadd.f32 %v7512_v40, %v7464_v33  ;;  %v10089_v55 = vor.u32 %v10710_v41, %v10086_v43 }
 0x4b7   :  { %8081 = vmatmul.bf16.gmra.mxu0 %v10109_v54  ;;  %v7425_v33 = vadd.f32 %v7424_v45, %v7376_v48 }
 0x4b8   :  { %vm7536_vm3 = vcmp.ge.f32.partialorder %v7513_v29, 0.0  ;;  %v7552_v31 = vmul.f32 0.15, %v7513_v29  ;;  %8120 = vmatmul.bf16.gmra.mxu1 %v10089_v55  ;;  %8159 = vmatmul.bf16.gmra.mxu2 %v10069_v62 }
 0x4ba   :  { %v7568_v11 = vsel %vm7536_vm3, %v7513_v29, %v7552_v31 }
 0x4bb   :  { %v7596_v10 = vpack.c.bf16 %v7568_v11, %v7568_v11 }
 0x4bc   :  { %v10120_v6 = vld [vmem:[#allocation2 + $0x188] sm:$0xf]  ;;  %v7471_v27 = vpop.f32.mrf.mxu2 }
 0x4bd   :  { %7612 = vst [vmem:[#allocation2 + $0x1a4] sm:$0xf] %v7596_v10  ;;  %v7515_v13 = vpop.f32.mrf.mxu3  ;;  %v10713_v56 = vld [vmem:[#allocation2 + $0x11c] sm:$0xf]  ;;  %v7472_v1 = vadd.f32 %v7471_v27, %v7423_v42 }
 0x4be   :  { %7640 = vst [vmem:[#allocation2 + $0x138] sm:$0xf] %v7596_v10  ;;  %v7516_v44 = vadd.f32 %v7515_v13, %v7467_v53  ;;  %v10718_v53 = vld [vmem:[#allocation2 + $0x170] sm:$0xf0]  ;;  %v8052_v13 = vpop.f32.mrf.mxu0 }
 0x4bf   :  { %v10117_v4 = vor.u32 %v10718_v53, %v10116_v23  ;;  %v10772_v53 = vld [vmem:[#allocation3 + $0x30] sm:$0xff] }
 0x4c0   :  { %vm7537_vm4 = vcmp.ge.f32.partialorder %v7516_v44, 0.0  ;;  %v7553_v2 = vmul.f32 0.15, %v7516_v44 }
 0x4c2   :  { %v7569_v19 = vsel %vm7537_vm4, %v7516_v44, %v7553_v2  ;;  %v10721_v2 = vld [vmem:[#allocation2 + $0x1a8] sm:$0xf0] }
 0x4c3   :  { %v7625_v0 = vpack.c.bf16 %v7569_v19, %v7569_v19  ;;  %v10129_v63 = vor.u32 %v10721_v2, %v10128_v16 }
 0x4c4   :  { %v10720_v46 = vld [vmem:[#allocation2 + $0x1a0] sm:$0xf0]  ;;  %v7473_v14 = vpop.f32.mrf.mxu2 }
 0x4c5   :  { %7641 = vst [vmem:[#allocation2 + $0x154] sm:$0xf] %v7625_v0  ;;  %v7517_v15 = vpop.f32.mrf.mxu3  ;;  %v10121_v61 = vor.u32 %v10720_v46, %v10120_v6  ;;  %v10098_v49 = vld [vmem:[#allocation2 + $0x134] sm:$0xf0]  ;;  %v7474_v52 = vadd.f32 %v7473_v14, %v7425_v33 }
 0x4c6   :  { %7677 = vst [vmem:[#allocation2 + $0xe8] sm:$0xf] %v7625_v0  ;;  %v7518_v59 = vadd.f32 %v7517_v15, %v7469_v26  ;;  %v10101_v58 = vor.u32 %v10713_v56, %v10098_v49  ;;  %v8054_v44 = vpop.f32.mrf.mxu0  ;;  %v8053_v26 = vadd.f32 %v12087_v34, %v8052_v13  ;;  %v10769_v33 = vld [vmem:[#allocation3 + $0x18] sm:$0xff] }
 0x4c7   :  { %8086 = vmatmul.bf16.gmra.mxu0 %v10121_v61  ;;  %v8055_v15 = vadd.f32 %v12087_v34, %v8054_v44  ;;  %v10766_v61 = vld [vmem:[#allocation3] sm:$0xff] }
 0x4c8   :  { %vm7538_vm5 = vcmp.ge.f32.partialorder %v7518_v59, 0.0  ;;  %v7554_v5 = vmul.f32 0.15, %v7518_v59  ;;  %8125 = vmatmul.bf16.gmra.mxu1 %v10101_v58  ;;  %8164 = vmatmul.bf16.gmra.mxu2 %v10081_v21 }
 0x4ca   :  { %v7570_v24 = vsel %vm7538_vm5, %v7518_v59, %v7554_v5 }
 0x4cb   :  { %v7626_v25 = vpack.c.bf16 %v7570_v24, %v7570_v24 }
 0x4cc   :  { %v10716_v62 = vld [vmem:[#allocation2 + $0x154] sm:$0xf] }
 0x4cd   :  { %7642 = vst [vmem:[#allocation2 + $0x170] sm:$0xf] %v7626_v25  ;;  %v7520_v47 = vpop.f32.mrf.mxu3  ;;  %v10092_v41 = vld [vmem:[#allocation2 + $0xe8] sm:$0xf] }
 0x4ce   :  { %7678 = vst [vmem:[#allocation2 + $0x104] sm:$0xf] %v7626_v25  ;;  %v7521_v35 = vadd.f32 %v7520_v47, %v7472_v1  ;;  %v8057_v20 = vpop.f32.mrf.mxu0  ;;  %v10768_v47 = vld [vmem:[#allocation3 + $0x10] sm:$0xff] }
 0x4cf   :  { %v8058_v5 = vadd.f32 %v12087_v34, %v8057_v20  ;;  %v10773_v20 = vld [vmem:[#allocation3 + $0x38] sm:$0xff] }
 0x4d0   :  { %vm7539_vm6 = vcmp.ge.f32.partialorder %v7521_v35, 0.0  ;;  %v7555_v57 = vmul.f32 0.15, %v7521_v35 }
 0x4d2   :  { %v7571_v60 = vsel %vm7539_vm6, %v7521_v35, %v7555_v57 }
 0x4d3   :  { %v7627_v22 = vpack.c.bf16 %v7571_v60, %v7571_v60 }
 0x4d4   :  { %v10110_v40 = vld [vmem:[#allocation2 + $0x16c] sm:$0xf0] }
 0x4d5   :  { %7643 = vst [vmem:[#allocation2 + $0x18c] sm:$0xf] %v7627_v22  ;;  %v7522_v51 = vpop.f32.mrf.mxu3  ;;  %v10113_v54 = vor.u32 %v10716_v62, %v10110_v40  ;;  %v10712_v43 = vld [vmem:[#allocation2 + $0x100] sm:$0xf0] }
 0x4d6   :  { %7679 = vst [vmem:[#allocation2 + $0x120] sm:$0xf] %v7627_v22  ;;  %v7523_v8 = vadd.f32 %v7522_v51, %v7474_v52  ;;  %v10093_v29 = vor.u32 %v10712_v43, %v10092_v41  ;;  %v8059_v0 = vpop.f32.mrf.mxu0 }
 0x4d7   :  { %v8060_v7 = vadd.f32 %v12087_v34, %v8059_v0 }
 0x4d8   :  { %vm7540_vm8 = vcmp.ge.f32.partialorder %v7523_v8, 0.0  ;;  %v7556_v55 = vmul.f32 0.15, %v7523_v8  ;;  %8130 = vmatmul.bf16.gmra.mxu1 %v10113_v54  ;;  %8169 = vmatmul.bf16.gmra.mxu2 %v10093_v29  ;;  %v10770_v54 = vld [vmem:[#allocation3 + $0x20] sm:$0xff] }
 0x4da   :  { %v7572_v12 = vsel %vm7540_vm8, %v7523_v8, %v7556_v55 }
 0x4db   :  { %v7628_v38 = vpack.c.bf16 %v7572_v12, %v7572_v12 }
 0x4dc   :  { %v10719_v31 = vld [vmem:[#allocation2 + $0x18c] sm:$0xf] }
 0x4dd   :  { %7644 = vst [vmem:[#allocation2 + $0x1a8] sm:$0xf] %v7628_v38  ;;  %v10104_v11 = vld [vmem:[#allocation2 + $0x120] sm:$0xf] }
 0x4de   :  { %7680 = vst [vmem:[#allocation2 + $0x13c] sm:$0xf] %v7628_v38  ;;  %v10771_v38 = vld [vmem:[#allocation3 + $0x28] sm:$0xff] }
 0x4e4   :  { %v10122_v28 = vld [vmem:[#allocation2 + $0x1a4] sm:$0xf0] }
 0x4e5   :  { %v10125_v50 = vor.u32 %v10719_v31, %v10122_v28  ;;  %v10715_v18 = vld [vmem:[#allocation2 + $0x138] sm:$0xf0] }
 0x4e6   :  { %v10105_v10 = vor.u32 %v10715_v18, %v10104_v11 }
 0x4e8   :  { %8135 = vmatmul.bf16.gmra.mxu1 %v10125_v50  ;;  %8174 = vmatmul.bf16.gmra.mxu2 %v10105_v10 }
 0x4f4   :  { %v8062_v49 = vpop.f32.mrf.mxu0 }
 0x4f5   :  { %v8101_v39 = vpop.f32.mrf.mxu1  ;;  %v8063_v22 = vadd.f32 %v12087_v34, %v8062_v49 }
 0x4f6   :  { %v8102_v46 = vadd.f32 %v8101_v39, %v8053_v26 }
 0x4f8   :  { %8179 = vmatmul.bf16.gmra.mxu2 %v10117_v4 }
 0x4fc   :  { %v8064_v42 = vpop.f32.mrf.mxu0 }
 0x4fd   :  { %v8103_v36 = vpop.f32.mrf.mxu1  ;;  %v8065_v8 = vadd.f32 %v12087_v34, %v8064_v42 }
 0x4fe   :  { %v8104_v58 = vadd.f32 %v8103_v36, %v8055_v15  ;;  %v10774_v15 = vld [vmem:[#allocation3 + $0x40] sm:$0xff] }
 0x504   :  { %v8067_v45 = vpop.f32.mrf.mxu0 }
 0x505   :  { %v8106_v19 = vpop.f32.mrf.mxu1  ;;  %v8068_v50 = vadd.f32 %v12087_v34, %v8067_v45 }
 0x506   :  { %v8107_v24 = vadd.f32 %v8106_v19, %v8058_v5 }
 0x508   :  { %8184 = vmatmul.bf16.gmra.mxu2 %v10129_v63 }
 0x50c   :  { %v8069_v51 = vpop.f32.mrf.mxu0 }
 0x50d   :  { %v8108_v6 = vpop.f32.mrf.mxu1  ;;  %v8070_v13 = vadd.f32 %v12087_v34, %v8069_v51 }
 0x50e   :  { %v8109_v35 = vadd.f32 %v8108_v6, %v8060_v7 }
 0x514   :  { %v8072_v28 = vpop.f32.mrf.mxu0 }
 0x515   :  { %v8111_v59 = vpop.f32.mrf.mxu1  ;;  %v8073_v63 = vadd.f32 %v12087_v34, %v8072_v28 }
 0x516   :  { %v8112_v52 = vadd.f32 %v8111_v59, %v8063_v22 }
 0x51b   :  { %v8150_v21 = vpop.f32.mrf.mxu2 }
 0x51c   :  { %v8151_v3 = vadd.f32 %v8150_v21, %v8102_v46  ;;  %v8074_v39 = vpop.f32.mrf.mxu0 }
 0x51d   :  { %v8113_v25 = vpop.f32.mrf.mxu1 }
 0x51e   :  { %v8190_v56 = vadd.f32 %v10766_v61, %v8151_v3  ;;  %v8114_v29 = vadd.f32 %v8113_v25, %v8065_v8  ;;  %v8075_v3 = vadd.f32 %v12087_v34, %v8074_v39 }
 0x520   :  { %8206 = vst [vmem:[#allocation9] sm:$0xff] %v8190_v56 }
 0x523   :  { %v8152_v27 = vpop.f32.mrf.mxu2 }
 0x524   :  { %v8153_v37 = vadd.f32 %v8152_v27, %v8104_v58  ;;  %v8077_v26 = vpop.f32.mrf.mxu0 }
 0x525   :  { %v8116_v14 = vpop.f32.mrf.mxu1  ;;  %v8078_v27 = vadd.f32 %v12087_v34, %v8077_v26 }
 0x526   :  { %v8191_v30 = vadd.f32 %v10767_v17, %v8153_v37  ;;  %v8117_v18 = vadd.f32 %v8116_v14, %v8068_v50  ;;  %v10775_v37 = vld [vmem:[#allocation3 + $0x48] sm:$0xff] }
 0x528   :  { %8207 = vst [vmem:[#allocation9 + $0x8] sm:$0xff] %v8191_v30 }
 0x52b   :  { %v8155_v9 = vpop.f32.mrf.mxu2 }
 0x52c   :  { %v8156_v1 = vadd.f32 %v8155_v9, %v8107_v24  ;;  %v8079_v58 = vpop.f32.mrf.mxu0  ;;  %v10776_v9 = vld [vmem:[#allocation3 + $0x50] sm:$0xff] }
 0x52d   :  { %v8118_v43 = vpop.f32.mrf.mxu1  ;;  %v8080_v25 = vadd.f32 %v12087_v34, %v8079_v58 }
 0x52e   :  { %v8192_v32 = vadd.f32 %v10768_v47, %v8156_v1  ;;  %v8119_v44 = vadd.f32 %v8118_v43, %v8070_v13 }
 0x530   :  { %8208 = vst [vmem:[#allocation9 + $0x10] sm:$0xff] %v8192_v32 }
 0x533   :  { %v8157_v48 = vpop.f32.mrf.mxu2 }
 0x534   :  { %v8158_v57 = vadd.f32 %v8157_v48, %v8109_v35  ;;  %v8082_v7 = vpop.f32.mrf.mxu0  ;;  %v10777_v48 = vld [vmem:[#allocation3 + $0x58] sm:$0xff] }
 0x535   :  { %v8121_v11 = vpop.f32.mrf.mxu1  ;;  %v8083_v14 = vadd.f32 %v12087_v34, %v8082_v7 }
 0x536   :  { %v8193_v60 = vadd.f32 %v10769_v33, %v8158_v57  ;;  %v8122_v0 = vadd.f32 %v8121_v11, %v8073_v63 }
 0x538   :  { %8209 = vst [vmem:[#allocation9 + $0x18] sm:$0xff] %v8193_v60 }
 0x53b   :  { %v8160_v62 = vpop.f32.mrf.mxu2 }
 0x53c   :  { %v8161_v40 = vadd.f32 %v8160_v62, %v8112_v52  ;;  %v8084_v33 = vpop.f32.mrf.mxu0 }
 0x53d   :  { %v8123_v16 = vpop.f32.mrf.mxu1 }
 0x53e   :  { %v8194_v41 = vadd.f32 %v10770_v54, %v8161_v40  ;;  %v8124_v56 = vadd.f32 %v8123_v16, %v8075_v3  ;;  %v10778_v40 = vld [vmem:[#allocation3 + $0x60] sm:$0xff]  ;;  %v8085_v54 = vadd.f32 %v12087_v34, %v8084_v33  ;;  %v10781_v16 = vld [vmem:[#allocation3 + $0x78] sm:$0xff] }
 0x540   :  { %8210 = vst [vmem:[#allocation9 + $0x20] sm:$0xff] %v8194_v41 }
 0x543   :  { %v8162_v55 = vpop.f32.mrf.mxu2 }
 0x544   :  { %v8163_v12 = vadd.f32 %v8162_v55, %v8114_v29  ;;  %v8087_v43 = vpop.f32.mrf.mxu0 }
 0x545   :  { %v8126_v21 = vpop.f32.mrf.mxu1 }
 0x546   :  { %v8195_v31 = vadd.f32 %v10771_v38, %v8163_v12  ;;  %v8127_v30 = vadd.f32 %v8126_v21, %v8078_v27  ;;  %v10779_v12 = vld [vmem:[#allocation3 + $0x68] sm:$0xff] }
 0x548   :  { %8211 = vst [vmem:[#allocation9 + $0x28] sm:$0xff] %v8195_v31  ;;  %v8088_v31 = vadd.f32 %v12087_v34, %v8087_v43 }
 0x54b   :  { %v8165_v10 = vpop.f32.mrf.mxu2 }
 0x54c   :  { %v8166_v23 = vadd.f32 %v8165_v10, %v8117_v18  ;;  %v8089_v18 = vpop.f32.mrf.mxu0  ;;  %v10780_v10 = vld [vmem:[#allocation3 + $0x70] sm:$0xff] }
 0x54d   :  { %v8128_v17 = vpop.f32.mrf.mxu1 }
 0x54e   :  { %v8196_v4 = vadd.f32 %v10772_v53, %v8166_v23  ;;  %v8129_v32 = vadd.f32 %v8128_v17, %v8080_v25 }
 0x550   :  { %8212 = vst [vmem:[#allocation9 + $0x30] sm:$0xff] %v8196_v4  ;;  %v8090_v4 = vadd.f32 %v12087_v34, %v8089_v18 }
 0x553   :  { %v8167_v2 = vpop.f32.mrf.mxu2 }
 0x554   :  { %v8168_v36 = vadd.f32 %v8167_v2, %v8119_v44 }
 0x555   :  { %v8131_v47 = vpop.f32.mrf.mxu1 }
 0x556   :  { %v8197_v19 = vadd.f32 %v10773_v20, %v8168_v36  ;;  %v8132_v60 = vadd.f32 %v8131_v47, %v8083_v14 }
 0x558   :  { %8213 = vst [vmem:[#allocation9 + $0x38] sm:$0xff] %v8197_v19 }
 0x55b   :  { %v8170_v6 = vpop.f32.mrf.mxu2 }
 0x55c   :  { %v8171_v46 = vadd.f32 %v8170_v6, %v8122_v0 }
 0x55d   :  { %v8133_v22 = vpop.f32.mrf.mxu1 }
 0x55e   :  { %v8198_v61 = vadd.f32 %v10774_v15, %v8171_v46  ;;  %v8134_v41 = vadd.f32 %v8133_v22, %v8085_v54 }
 0x560   :  { %8214 = vst [vmem:[#allocation9 + $0x40] sm:$0xff] %v8198_v61 }
 0x563   :  { %v8172_v49 = vpop.f32.mrf.mxu2 }
 0x564   :  { %v8173_v59 = vadd.f32 %v8172_v49, %v8124_v56 }
 0x565   :  { %v8136_v55 = vpop.f32.mrf.mxu1 }
 0x566   :  { %v8199_v5 = vadd.f32 %v10775_v37, %v8173_v59  ;;  %v8137_v28 = vadd.f32 %v8136_v55, %v8088_v31 }
 0x568   :  { %8215 = vst [vmem:[#allocation9 + $0x48] sm:$0xff] %v8199_v5 }
 0x56b   :  { %v8175_v42 = vpop.f32.mrf.mxu2 }
 0x56c   :  { %v8176_v24 = vadd.f32 %v8175_v42, %v8127_v30 }
 0x56d   :  { %v8138_v53 = vpop.f32.mrf.mxu1 }
 0x56e   :  { %v8200_v1 = vadd.f32 %v10776_v9, %v8176_v24  ;;  %v8139_v13 = vadd.f32 %v8138_v53, %v8090_v4 }
 0x570   :  { %8216 = vst [vmem:[#allocation9 + $0x50] sm:$0xff] %v8200_v1 }
 0x573   :  { %v8177_v35 = vpop.f32.mrf.mxu2 }
 0x574   :  { %v8178_v45 = vadd.f32 %v8177_v35, %v8129_v32 }
 0x576   :  { %v8201_v57 = vadd.f32 %v10777_v48, %v8178_v45 }
 0x578   :  { %8217 = vst [vmem:[#allocation9 + $0x58] sm:$0xff] %v8201_v57 }
 0x57b   :  { %v8180_v52 = vpop.f32.mrf.mxu2 }
 0x57c   :  { %v8181_v62 = vadd.f32 %v8180_v52, %v8132_v60 }
 0x57e   :  { %v8202_v51 = vadd.f32 %v10778_v40, %v8181_v62 }
 0x580   :  { %8218 = vst [vmem:[#allocation9 + $0x60] sm:$0xff] %v8202_v51 }
 0x583   :  { %v8182_v8 = vpop.f32.mrf.mxu2 }
 0x584   :  { %v8183_v29 = vadd.f32 %v8182_v8, %v8134_v41 }
 0x586   :  { %v8203_v38 = vadd.f32 %v10779_v12, %v8183_v29 }
 0x588   :  { %8219 = vst [vmem:[#allocation9 + $0x68] sm:$0xff] %v8203_v38 }
 0x58b   :  { %v8185_v50 = vpop.f32.mrf.mxu2 }
 0x58c   :  { %v8186_v11 = vadd.f32 %v8185_v50, %v8137_v28 }
 0x58e   :  { %v8204_v23 = vadd.f32 %v10780_v10, %v8186_v11 }
 0x590   :  { %8220 = vst [vmem:[#allocation9 + $0x70] sm:$0xff] %v8204_v23 }
 0x593   :  { %v8187_v39 = vpop.f32.mrf.mxu2 }
 0x594   :  { %v8188_v44 = vadd.f32 %v8187_v39, %v8139_v13 }
 0x596   :  { %v8205_v2 = vadd.f32 %v10781_v16, %v8188_v44 }
 0x598   :  { %8221 = vst [vmem:[#allocation9 + $0x78] sm:$0xff] %v8205_v2 }
 0x599   :  { %8234 = dma.vmem_to_hbm [thread:$0]  %s8227_s4, 2048, %s8229_s7, [#allocation5], %s10888_s24, %s10888_s24, %s10889_s25  }
 0x59a   :  { %10882 = dma.done.wait [#allocation5], 2048  }
 0x59b   :  { %10883 = vsyncadd [#allocation5], 4294965248 }
 0x59c   :  { %8239 = vsyncpa [#allocation4], 1 }
 0x59d   :  { %8240 = vsyncpa [#allocation7], 1 }
 0x59e   :  { %8241 = vsyncpa [#allocation5], 1 }

</bundles_post_ra>
